<compile_context>
chip_gen: v7x
topology: tpu7x:2x2x1
jax: 0.10.0
libtpu: 0.0.40
codegen_flags: <defaults>
</compile_context>

<pallas_src>
import functools
import math

import jax
import jax.numpy as jnp
from jax.experimental import pallas as pl
from jax.experimental.pallas import tpu as pltpu

_LOG_2PI = math.log(2.0 * math.pi)


def _row_tile(n, target=512):
    """Largest row tile <= target that divides n (keeps blocks 8-aligned, fits VMEM
    comfortably on v5e/v6e/v7x: worst case ~4 MB of buffers at tm=512)."""
    for t in (target, 256, 128, 64, 32, 16, 8):
        if t <= n and n % t == 0:
            return t
    return n


# ----------------------------------------------------------------------------
# Pallas kernels
# ----------------------------------------------------------------------------
def _actnorm_stats_kernel(x_ref, mean_ref, std_ref, sum_ref, sq_ref, *, n_rows):
    """Per-channel mean / unbiased std over all rows (ActNorm data-dependent init).
    Row-tiled reduction: accumulate sum / sum-of-squares in VMEM scratch."""
    @pl.when(pl.program_id(0) == 0)
    def _():
        sum_ref[...] = jnp.zeros_like(sum_ref)
        sq_ref[...] = jnp.zeros_like(sq_ref)

    x = x_ref[...]
    sum_ref[...] += jnp.sum(x, axis=0, keepdims=True)
    sq_ref[...] += jnp.sum(x * x, axis=0, keepdims=True)

    @pl.when(pl.program_id(0) == pl.num_programs(0) - 1)
    def _():
        m = sum_ref[...] / n_rows
        var = (sq_ref[...] - n_rows * m * m) / (n_rows - 1)   # unbiased (torch .std)
        mean_ref[...] = m
        std_ref[...] = jnp.sqrt(jnp.maximum(var, 0.0))


def _actnorm_invconv_kernel(x_ref, loc_ref, scale_ref, wt_ref, o_ref):
    """Fused ActNorm apply + invertible 1x1 conv:  ((x + loc) * scale) @ W^T."""
    y = (x_ref[...] + loc_ref[...]) * scale_ref[...]
    o_ref[...] = jnp.dot(y, wt_ref[...], preferred_element_type=jnp.float32)


def _coupling_net_mm_kernel(p1_ref, w1_ref, b1_ref, w2_ref, b2_ref, h2_ref):
    """Fused Conv2d(3x3 via im2col)+ReLU + Conv2d(1x1)+ReLU.
    bf16 MXU operands, f32 accumulation; the (tm, 512) intermediate stays on-chip."""
    h1 = jnp.dot(p1_ref[...], w1_ref[...], preferred_element_type=jnp.float32)
    h1 = jnp.maximum(h1 + b1_ref[...], 0.0)
    h2 = jnp.dot(h1.astype(jnp.bfloat16), w2_ref[...],
                 preferred_element_type=jnp.float32)
    h2 = jnp.maximum(h2 + b2_ref[...], 0.0)
    h2_ref[...] = h2.astype(h2_ref.dtype)


def _zeroconv_coupling_kernel(h2p_ref, wz_ref, bz_ref, zs_ref, ina_ref, inb_ref,
                              out_ref, det_ref, *, H, W):
    """ZeroConv2d 3x3 (input pre-padded with 1.0) as 9 shifted matmuls from a
    haloed VMEM tile, fused with the affine-coupling epilogue and logdet."""
    F = h2p_ref.shape[-1]
    C = bz_ref.shape[-1]
    C2 = C // 2
    x = h2p_ref[...]                                   # (1, H+2, W+2, F) bf16
    acc = jnp.zeros((H * W, C), jnp.float32)
    for kh in range(3):
        for kw in range(3):
            tap = x[0, kh:kh + H, kw:kw + W, :].reshape(H * W, F)
            acc = acc + jnp.dot(tap, wz_ref[kh * 3 + kw],
                                preferred_element_type=jnp.float32)
    net = (acc + bz_ref[...]) * zs_ref[...]            # (HW, C)
    log_s = net[:, :C2]
    t = net[:, C2:]
    s = 1.0 / (1.0 + jnp.exp(-(log_s + 2.0)))
    out_b = (inb_ref[...][0] + t) * s
    out_full = jnp.concatenate([ina_ref[...][0], out_b], axis=-1)  # (HW, C)
    out_ref[...] = out_full[None]
    det_ref[...] = jnp.sum(jnp.log(s), keepdims=True)[None]


def _zeroconv_prior_logp_kernel(xp_ref, wp_ref, bp_ref, ps_ref, z_ref, logp_ref,
                                *, H, W):
    """Prior ZeroConv2d 3x3 (pad value 1) fused with the gaussian log-density sum."""
    Cin = xp_ref.shape[-1]
    C = bp_ref.shape[-1]
    C2 = C // 2
    x = xp_ref[...]                                    # (1, H+2, W+2, Cin)
    acc = jnp.zeros((H * W, C), jnp.float32)
    for kh in range(3):
        for kw in range(3):
            tap = x[0, kh:kh + H, kw:kw + W, :].reshape(H * W, Cin)
            acc = acc + jnp.dot(tap, wp_ref[kh * 3 + kw],
                                preferred_element_type=jnp.float32)
    net = (acc + bp_ref[...]) * ps_ref[...]
    mean = net[:, :C2]
    log_sd = net[:, C2:]
    z = z_ref[...][0]
    lp = -0.5 * _LOG_2PI - log_sd - 0.5 * (z - mean) ** 2 * jnp.exp(-2.0 * log_sd)
    logp_ref[...] = jnp.sum(lp, keepdims=True)[None]


# ----------------------------------------------------------------------------
# Kernel wrappers (row-tiled / per-image grids, weights VMEM-resident)
# ----------------------------------------------------------------------------
def actnorm_stats(x2d, tm):
    N, C = x2d.shape
    return pl.pallas_call(
        functools.partial(_actnorm_stats_kernel, n_rows=N),
        grid=(N // tm,),
        in_specs=[pl.BlockSpec((tm, C), lambda i: (i, 0))],
        out_specs=(pl.BlockSpec((1, C), lambda i: (0, 0)),
                   pl.BlockSpec((1, C), lambda i: (0, 0))),
        out_shape=(jax.ShapeDtypeStruct((1, C), jnp.float32),
                   jax.ShapeDtypeStruct((1, C), jnp.float32)),
        scratch_shapes=[pltpu.VMEM((1, C), jnp.float32),
                        pltpu.VMEM((1, C), jnp.float32)],
        compiler_params=pltpu.CompilerParams(dimension_semantics=("arbitrary",)),
    )(x2d)


def actnorm_invconv(x2d, loc, scale, w, tm):
    N, C = x2d.shape
    wt = jnp.transpose(w)   # out = ((x + loc) * scale) @ W^T
    return pl.pallas_call(
        _actnorm_invconv_kernel,
        grid=(N // tm,),
        in_specs=[pl.BlockSpec((tm, C), lambda i: (i, 0)),
                  pl.BlockSpec((1, C), lambda i: (0, 0)),
                  pl.BlockSpec((1, C), lambda i: (0, 0)),
                  pl.BlockSpec((C, C), lambda i: (0, 0))],
        out_specs=pl.BlockSpec((tm, C), lambda i: (i, 0)),
        out_shape=jax.ShapeDtypeStruct((N, C), jnp.float32),
        compiler_params=pltpu.CompilerParams(dimension_semantics=("parallel",)),
    )(x2d, loc, scale, wt)


def coupling_net_matmuls(p1, w1, b1, w2, b2, tm):
    N, K1 = p1.shape
    F = w1.shape[1]
    return pl.pallas_call(
        _coupling_net_mm_kernel,
        grid=(N // tm,),
        in_specs=[pl.BlockSpec((tm, K1), lambda i: (i, 0)),
                  pl.BlockSpec((K1, F), lambda i: (0, 0)),
                  pl.BlockSpec((1, F), lambda i: (0, 0)),
                  pl.BlockSpec((F, F), lambda i: (0, 0)),
                  pl.BlockSpec((1, F), lambda i: (0, 0))],
        out_specs=pl.BlockSpec((tm, F), lambda i: (i, 0)),
        out_shape=jax.ShapeDtypeStruct((N, F), jnp.bfloat16),
        compiler_params=pltpu.CompilerParams(dimension_semantics=("parallel",)),
    )(p1, w1, b1.reshape(1, F).astype(jnp.float32),
      w2, b2.reshape(1, F).astype(jnp.float32))


def zeroconv_coupling(h2p, wz9, bz, zscale, in_a3, in_b3, H, W):
    # TODO(synk): for very large spatial dims tile rows with manual halo DMA;
    # the (H+2, W+2, 512) per-image slab is assumed to fit VMEM here.
    B = h2p.shape[0]
    F = h2p.shape[-1]
    C = bz.shape[0]
    C2 = C // 2
    HW = H * W
    out3, det = pl.pallas_call(
        functools.partial(_zeroconv_coupling_kernel, H=H, W=W),
        grid=(B,),
        in_specs=[pl.BlockSpec((1, H + 2, W + 2, F), lambda b: (b, 0, 0, 0)),
                  pl.BlockSpec((9, F, C), lambda b: (0, 0, 0)),
                  pl.BlockSpec((1, C), lambda b: (0, 0)),
                  pl.BlockSpec((1, C), lambda b: (0, 0)),
                  pl.BlockSpec((1, HW, C2), lambda b: (b, 0, 0)),
                  pl.BlockSpec((1, HW, C2), lambda b: (b, 0, 0))],
        out_specs=(pl.BlockSpec((1, HW, C), lambda b: (b, 0, 0)),
                   pl.BlockSpec((1, 1, 1), lambda b: (b, 0, 0))),
        out_shape=(jax.ShapeDtypeStruct((B, HW, C), jnp.float32),
                   jax.ShapeDtypeStruct((B, 1, 1), jnp.float32)),
        compiler_params=pltpu.CompilerParams(dimension_semantics=("parallel",)),
    )(h2p, wz9, bz.reshape(1, C).astype(jnp.float32),
      zscale.reshape(1, C).astype(jnp.float32), in_a3, in_b3)
    return out3, det[:, 0, 0]


def prior_logp(xp, wp9, bp, pscale, z3, H, W):
    B = xp.shape[0]
    Cin = xp.shape[-1]
    C = bp.shape[0]
    C2 = C // 2
    HW = H * W
    lp = pl.pallas_call(
        functools.partial(_zeroconv_prior_logp_kernel, H=H, W=W),
        grid=(B,),
        in_specs=[pl.BlockSpec((1, H + 2, W + 2, Cin), lambda b: (b, 0, 0, 0)),
                  pl.BlockSpec((9, Cin, C), lambda b: (0, 0, 0)),
                  pl.BlockSpec((1, C), lambda b: (0, 0)),
                  pl.BlockSpec((1, C), lambda b: (0, 0)),
                  pl.BlockSpec((1, HW, C2), lambda b: (b, 0, 0))],
        out_specs=pl.BlockSpec((1, 1, 1), lambda b: (b, 0, 0)),
        out_shape=jax.ShapeDtypeStruct((B, 1, 1), jnp.float32),
        compiler_params=pltpu.CompilerParams(dimension_semantics=("parallel",)),
    )(xp, wp9, bp.reshape(1, C).astype(jnp.float32),
      pscale.reshape(1, C).astype(jnp.float32), z3)
    return lp[:, 0, 0]


# ----------------------------------------------------------------------------
# JAX glue: squeeze, im2col, parameter setup
# ----------------------------------------------------------------------------
def squeeze_image(x):  # NCHW, exactly as in the PyTorch reference
    b, c, h, w = x.shape
    x = x.reshape(b, c, h // 2, 2, w // 2, 2)
    x = jnp.transpose(x, (0, 1, 3, 5, 2, 4))
    return x.reshape(b, c * 4, h // 2, w // 2)


def im2col_3x3(x_nhwc, pad_value):
    """3x3 patches (stride 1) of an NHWC image padded by 1 with `pad_value`."""
    B, H, W, C = x_nhwc.shape
    xp = jnp.pad(x_nhwc, ((0, 0), (1, 1), (1, 1), (0, 0)), constant_values=pad_value)
    cols = [xp[:, kh:kh + H, kw:kw + W, :] for kh in range(3) for kw in range(3)]
    return jnp.concatenate(cols, axis=-1)  # (B,H,W,9C), order (kh, kw, c)


def conv3x3_to_mat(w):   # torch (O, I, 3, 3) -> (9*I, O), rows ordered (kh, kw, i)
    O, I, KH, KW = w.shape
    return jnp.transpose(w, (2, 3, 1, 0)).reshape(KH * KW * I, O)


def conv3x3_to_taps(w):  # torch (O, I, 3, 3) -> (9, I, O), tap index = kh*3+kw
    O, I, _, _ = w.shape
    return jnp.transpose(w, (2, 3, 1, 0)).reshape(9, I, O)


def init_block_params(key, in_channel, n_flow, filter_size=512):
    C = in_channel * 4
    flows = []
    for _ in range(n_flow):
        key, k_q, k_w1, k_w2 = jax.random.split(key, 4)
        # InvConv2d: orthogonal weight from QR of a random normal matrix
        w_q, _ = jnp.linalg.qr(jax.random.normal(k_q, (C, C), dtype=jnp.float32))
        # AffineCoupling net
        w1 = 0.05 * jax.random.normal(k_w1, (filter_size, C // 2, 3, 3), jnp.float32)
        b1 = jnp.zeros((filter_size,), jnp.float32)
        w2 = 0.05 * jax.random.normal(k_w2, (filter_size, filter_size, 1, 1), jnp.float32)
        b2 = jnp.zeros((filter_size,), jnp.float32)
        wz = jnp.zeros((C, filter_size, 3, 3), jnp.float32)   # ZeroConv2d weight
        bz = jnp.zeros((C,), jnp.float32)
        zscale = jnp.zeros((C,), jnp.float32)                 # ZeroConv2d scale
        flows.append(dict(
            invconv_w=w_q,
            w1m=conv3x3_to_mat(w1).astype(jnp.bfloat16), b1=b1,
            w2m=jnp.transpose(w2[:, :, 0, 0]).astype(jnp.bfloat16), b2=b2,
            wz9=conv3x3_to_taps(wz).astype(jnp.bfloat16), bz=bz,
            z_out_scale=jnp.exp(zscale * 3.0),
        ))
    # prior: ZeroConv2d(in_channel*2, in_channel*4)  (split=True branch)
    wp = jnp.zeros((in_channel * 4, in_channel * 2, 3, 3), jnp.float32)
    bp = jnp.zeros((in_channel * 4,), jnp.float32)
    pscale = jnp.zeros((in_channel * 4,), jnp.float32)
    prior = dict(wp9=conv3x3_to_taps(wp), bp=bp, p_out_scale=jnp.exp(pscale * 3.0))
    return dict(flows=flows, prior=prior)


# ----------------------------------------------------------------------------
# Forward pass: Flow (ActNorm -> InvConv2d -> AffineCoupling) and Block
# ----------------------------------------------------------------------------
def flow_forward(fp, x2d, B, H, W, C, tm):
    N = B * H * W
    HW = H * W
    C2 = C // 2

    # ActNorm: this models the module's first (data-dependent-init) forward call.
    # TODO(synk): after initialization the reference uses learned loc/scale buffers.
    mean, std = actnorm_stats(x2d, tm)
    loc = -mean
    scale = 1.0 / (std + 1e-6)
    logdet_an = HW * jnp.sum(jnp.log(jnp.abs(scale)))

    # InvConv2d logdet.  TODO(synk): torch computes slogdet in float64; f32 here.
    logdet_ic = HW * jnp.linalg.slogdet(fp["invconv_w"])[1]

    # Fused ActNorm apply + invertible 1x1 conv (row-tiled)
    y2d = actnorm_invconv(x2d, loc, scale, fp["invconv_w"], tm)
    in_a = y2d[:, :C2]
    in_b = y2d[:, C2:]

    # Coupling net: Conv3x3(pad 0)+ReLU -> Conv1x1+ReLU, one fused kernel (bf16 MXU)
    a_img = in_a.reshape(B, H, W, C2).astype(jnp.bfloat16)
    p1 = im2col_3x3(a_img, 0.0).reshape(N, 9 * C2)           # narrow (9*C2) im2col
    h2 = coupling_net_matmuls(p1, fp["w1m"], fp["b1"], fp["w2m"], fp["b2"], tm)

    # ZeroConv2d 3x3 (pad value 1) + sigmoid/affine epilogue + logdet, per image
    h2p = jnp.pad(h2.reshape(B, H, W, -1), ((0, 0), (1, 1), (1, 1), (0, 0)),
                  constant_values=1.0)
    out3, det2 = zeroconv_coupling(h2p, fp["wz9"], fp["bz"], fp["z_out_scale"],
                                   in_a.reshape(B, HW, C2), in_b.reshape(B, HW, C2),
                                   H, W)
    out2d = out3.reshape(N, C)
    det = logdet_an + logdet_ic + det2                        # scalar+scalar+(B,)
    return out2d, det


def block_forward(params, x_nchw):
    B = x_nchw.shape[0]
    sq = squeeze_image(x_nchw)                                # (B, 4*C0, H/2, W/2)
    _, C, H, W = sq.shape
    HW = H * W
    N = B * HW
    tm = _row_tile(N, 512)

    out2d = jnp.transpose(sq, (0, 2, 3, 1)).reshape(N, C).astype(jnp.float32)
    logdet = jnp.zeros((B,), jnp.float32)
    for fp in params["flows"]:
        out2d, det = flow_forward(fp, out2d, B, H, W, C, tm)
        logdet = logdet + det

    # split=True branch
    C2 = C // 2
    out_half = out2d[:, :C2]
    z_new = out2d[:, C2:]

    # prior ZeroConv2d + gaussian log_p, fused per image
    xp = jnp.pad(out_half.reshape(B, H, W, C2), ((0, 0), (1, 1), (1, 1), (0, 0)),
                 constant_values=1.0)
    log_p = prior_logp(xp, params["prior"]["wp9"], params["prior"]["bp"],
                       params["prior"]["p_out_scale"], z_new.reshape(B, HW, C2), H, W)

    out_nchw = jnp.transpose(out_half.reshape(B, H, W, C2), (0, 3, 1, 2))
    return out_nchw, logdet, log_p


# ----------------------------------------------------------------------------
if __name__ == "__main__":
    key = jax.random.PRNGKey(0)
    k_x, k_p = jax.random.split(key)

    in_channel, n_flow = 4, 2
    x = jax.random.normal(k_x, (2, in_channel, 16, 16), dtype=jnp.float32)
    params = init_block_params(k_p, in_channel, n_flow, filter_size=512)

    out, logdet, log_p = jax.jit(block_forward)(params, x)
    jax.block_until_ready((out, logdet, log_p))

    assert out.shape == (2, in_channel * 2, 8, 8)
    assert logdet.shape == (2,)
    assert log_p.shape == (2,)
    assert bool(jnp.all(jnp.isfinite(out)))
    assert bool(jnp.all(jnp.isfinite(logdet)))
    assert bool(jnp.all(jnp.isfinite(log_p)))
    print("KERNEL_OK")
</pallas_src>

<mosaic_0001>
module attributes {stable_mosaic.version = 11 : i64} {
  func.func @_actnorm_stats_kernel(%arg0: i32, %arg1: memref<128x16xf32, #tpu.memory_space<vmem>>, %arg2: memref<1x16xf32, #tpu.memory_space<vmem>>, %arg3: memref<1x16xf32, #tpu.memory_space<vmem>>, %arg4: memref<1x16xf32, #tpu.memory_space<vmem>>, %arg5: memref<1x16xf32, #tpu.memory_space<vmem>>) attributes {dimension_semantics = [#tpu.dimension_semantics<arbitrary>], iteration_bounds = array<i64: 1>, scalar_prefetch = 0 : i64, scratch_operands = 2 : i64, tpu.core_type = #tpu.core_type<tc>, window_params = [{transform_indices = @transform_0, window_bounds = array<i64: 128, 16>}, {pipeline_mode = #tpu.pipeline_mode<synchronous>, transform_indices = @transform_1, window_bounds = array<i64: 1, 16>}, {pipeline_mode = #tpu.pipeline_mode<synchronous>, transform_indices = @transform_2, window_bounds = array<i64: 1, 16>}]} {
    %c0_i32 = arith.constant 0 : i32
    %0 = arith.cmpi eq, %arg0, %c0_i32 : i32
    %1 = arith.extui %0 : i1 to i32
    %c0_i32_0 = arith.constant 0 : i32
    %2 = arith.cmpi ne, %1, %c0_i32_0 : i32
    scf.if %2 {
      %cst_13 = arith.constant 0.000000e+00 : f32
      %18 = vector.broadcast %cst_13 : f32 to vector<1x16xf32>
      %c0_14 = arith.constant 0 : index
      %c0_15 = arith.constant 0 : index
      %19 = vector.load %arg4[%c0_14, %c0_15] : memref<1x16xf32, #tpu.memory_space<vmem>>, vector<1x16xf32>
      tpu.vector_store %arg4[%c0_14, %c0_15], %18 {strides = array<i32>} : memref<1x16xf32, #tpu.memory_space<vmem>>, vector<1x16xf32>,
      %cst_16 = arith.constant 0.000000e+00 : f32
      %20 = vector.broadcast %cst_16 : f32 to vector<1x16xf32>
      %c0_17 = arith.constant 0 : index
      %c0_18 = arith.constant 0 : index
      %21 = vector.load %arg5[%c0_17, %c0_18] : memref<1x16xf32, #tpu.memory_space<vmem>>, vector<1x16xf32>
      tpu.vector_store %arg5[%c0_17, %c0_18], %20 {strides = array<i32>} : memref<1x16xf32, #tpu.memory_space<vmem>>, vector<1x16xf32>,
    } else {
    }
    %c0 = arith.constant 0 : index
    %c0_1 = arith.constant 0 : index
    %3 = vector.load %arg1[%c0, %c0_1] : memref<128x16xf32, #tpu.memory_space<vmem>>, vector<128x16xf32>
    %c0_2 = arith.constant 0 : index
    %c0_3 = arith.constant 0 : index
    %4 = vector.load %arg4[%c0_2, %c0_3] : memref<1x16xf32, #tpu.memory_space<vmem>>, vector<1x16xf32>
    %cst = arith.constant dense<0.000000e+00> : vector<16xf32>
    %5 = vector.multi_reduction <add>, %3, %cst [0] : vector<128x16xf32> to vector<16xf32>
    %6 = vector.shape_cast %5 : vector<16xf32> to vector<1x16xf32>
    %7 = arith.addf %4, %6 : vector<1x16xf32>
    %c0_4 = arith.constant 0 : index
    %c0_5 = arith.constant 0 : index
    %8 = vector.load %arg4[%c0_4, %c0_5] : memref<1x16xf32, #tpu.memory_space<vmem>>, vector<1x16xf32>
    tpu.vector_store %arg4[%c0_4, %c0_5], %7 {strides = array<i32>} : memref<1x16xf32, #tpu.memory_space<vmem>>, vector<1x16xf32>,
    %c0_6 = arith.constant 0 : index
    %c0_7 = arith.constant 0 : index
    %9 = vector.load %arg5[%c0_6, %c0_7] : memref<1x16xf32, #tpu.memory_space<vmem>>, vector<1x16xf32>
    %10 = arith.mulf %3, %3 : vector<128x16xf32>
    %cst_8 = arith.constant dense<0.000000e+00> : vector<16xf32>
    %11 = vector.multi_reduction <add>, %10, %cst_8 [0] : vector<128x16xf32> to vector<16xf32>
    %12 = vector.shape_cast %11 : vector<16xf32> to vector<1x16xf32>
    %13 = arith.addf %9, %12 : vector<1x16xf32>
    %c0_9 = arith.constant 0 : index
    %c0_10 = arith.constant 0 : index
    %14 = vector.load %arg5[%c0_9, %c0_10] : memref<1x16xf32, #tpu.memory_space<vmem>>, vector<1x16xf32>
    tpu.vector_store %arg5[%c0_9, %c0_10], %13 {strides = array<i32>} : memref<1x16xf32, #tpu.memory_space<vmem>>, vector<1x16xf32>,
    %c0_i32_11 = arith.constant 0 : i32
    %15 = arith.cmpi eq, %arg0, %c0_i32_11 : i32
    %16 = arith.extui %15 : i1 to i32
    %c0_i32_12 = arith.constant 0 : i32
    %17 = arith.cmpi ne, %16, %c0_i32_12 : i32
    scf.if %17 {
      %c0_13 = arith.constant 0 : index
      %c0_14 = arith.constant 0 : index
      %18 = vector.load %arg4[%c0_13, %c0_14] : memref<1x16xf32, #tpu.memory_space<vmem>>, vector<1x16xf32>
      %cst_15 = arith.constant 1.280000e+02 : f32
      %19 = vector.broadcast %cst_15 : f32 to vector<1x16xf32>
      %20 = arith.divf %18, %19 : vector<1x16xf32>
      %c0_16 = arith.constant 0 : index
      %c0_17 = arith.constant 0 : index
      %21 = vector.load %arg5[%c0_16, %c0_17] : memref<1x16xf32, #tpu.memory_space<vmem>>, vector<1x16xf32>
      %cst_18 = arith.constant 1.280000e+02 : f32
      %22 = vector.broadcast %cst_18 : f32 to vector<1x16xf32>
      %23 = arith.mulf %22, %20 : vector<1x16xf32>
      %24 = arith.mulf %23, %20 : vector<1x16xf32>
      %25 = arith.subf %21, %24 : vector<1x16xf32>
      %cst_19 = arith.constant 1.270000e+02 : f32
      %26 = vector.broadcast %cst_19 : f32 to vector<1x16xf32>
      %27 = arith.divf %25, %26 : vector<1x16xf32>
      %c0_20 = arith.constant 0 : index
      %c0_21 = arith.constant 0 : index
      %28 = vector.load %arg2[%c0_20, %c0_21] : memref<1x16xf32, #tpu.memory_space<vmem>>, vector<1x16xf32>
      tpu.vector_store %arg2[%c0_20, %c0_21], %20 {strides = array<i32>} : memref<1x16xf32, #tpu.memory_space<vmem>>, vector<1x16xf32>,
      %cst_22 = arith.constant 0.000000e+00 : f32
      %29 = vector.broadcast %cst_22 : f32 to vector<1x16xf32>
      %30 = arith.maximumf %27, %29 : vector<1x16xf32>
      %31 = math.sqrt %30 : vector<1x16xf32>
      %c0_23 = arith.constant 0 : index
      %c0_24 = arith.constant 0 : index
      %32 = vector.load %arg3[%c0_23, %c0_24] : memref<1x16xf32, #tpu.memory_space<vmem>>, vector<1x16xf32>
      tpu.vector_store %arg3[%c0_23, %c0_24], %31 {strides = array<i32>} : memref<1x16xf32, #tpu.memory_space<vmem>>, vector<1x16xf32>,
    } else {
    }
    return
  }
  func.func @transform_0(%arg0: i32) -> (i32, i32) {
    %c0_i32 = arith.constant 0 : i32
    %c0_i32_0 = arith.constant 0 : i32
    return %arg0, %c0_i32 : i32, i32
  }
  func.func @transform_1(%arg0: i32) -> (i32, i32) {
    %c0_i32 = arith.constant 0 : i32
    %c0_i32_0 = arith.constant 0 : i32
    %c0_i32_1 = arith.constant 0 : i32
    return %c0_i32, %c0_i32_0 : i32, i32
  }
  func.func @transform_2(%arg0: i32) -> (i32, i32) {
    %c0_i32 = arith.constant 0 : i32
    %c0_i32_0 = arith.constant 0 : i32
    %c0_i32_1 = arith.constant 0 : i32
    return %c0_i32, %c0_i32_0 : i32, i32
  }
}

module attributes {stable_mosaic.version = 11 : i64} {
  func.func @_actnorm_invconv_kernel(%arg0: i32, %arg1: memref<128x16xf32, #tpu.memory_space<vmem>>, %arg2: memref<1x16xf32, #tpu.memory_space<vmem>>, %arg3: memref<1x16xf32, #tpu.memory_space<vmem>>, %arg4: memref<16x16xf32, #tpu.memory_space<vmem>>, %arg5: memref<128x16xf32, #tpu.memory_space<vmem>>) attributes {dimension_semantics = [#tpu.dimension_semantics<parallel>], iteration_bounds = array<i64: 1>, scalar_prefetch = 0 : i64, scratch_operands = 0 : i64, tpu.core_type = #tpu.core_type<tc>, window_params = [{transform_indices = @transform_0, window_bounds = array<i64: 128, 16>}, {pipeline_mode = #tpu.pipeline_mode<synchronous>, transform_indices = @transform_1, window_bounds = array<i64: 1, 16>}, {pipeline_mode = #tpu.pipeline_mode<synchronous>, transform_indices = @transform_2, window_bounds = array<i64: 1, 16>}, {pipeline_mode = #tpu.pipeline_mode<synchronous>, transform_indices = @transform_3, window_bounds = array<i64: 16, 16>}, {transform_indices = @transform_4, window_bounds = array<i64: 128, 16>}]} {
    %c0 = arith.constant 0 : index
    %c0_0 = arith.constant 0 : index
    %0 = vector.load %arg1[%c0, %c0_0] : memref<128x16xf32, #tpu.memory_space<vmem>>, vector<128x16xf32>
    %c0_1 = arith.constant 0 : index
    %c0_2 = arith.constant 0 : index
    %1 = vector.load %arg2[%c0_1, %c0_2] : memref<1x16xf32, #tpu.memory_space<vmem>>, vector<1x16xf32>
    %2 = vector.broadcast %1 : vector<1x16xf32> to vector<128x16xf32>
    %3 = arith.addf %0, %2 : vector<128x16xf32>
    %c0_3 = arith.constant 0 : index
    %c0_4 = arith.constant 0 : index
    %4 = vector.load %arg3[%c0_3, %c0_4] : memref<1x16xf32, #tpu.memory_space<vmem>>, vector<1x16xf32>
    %5 = vector.broadcast %4 : vector<1x16xf32> to vector<128x16xf32>
    %6 = arith.mulf %3, %5 : vector<128x16xf32>
    %c0_5 = arith.constant 0 : index
    %c0_6 = arith.constant 0 : index
    %7 = vector.load %arg4[%c0_5, %c0_6] : memref<16x16xf32, #tpu.memory_space<vmem>>, vector<16x16xf32>
    %cst = arith.constant dense<0.000000e+00> : vector<128x16xf32>
    %8 = tpu.matmul %6, %7, %cst {dimension_numbers = #tpu.dot_dimension_numbers<[1], [0], [0], [1], [0, 0, 1, 1], [], []>} : vector<128x16xf32>, vector<16x16xf32>, vector<128x16xf32> -> vector<128x16xf32>
    %c0_7 = arith.constant 0 : index
    %c0_8 = arith.constant 0 : index
    %9 = vector.load %arg5[%c0_7, %c0_8] : memref<128x16xf32, #tpu.memory_space<vmem>>, vector<128x16xf32>
    tpu.vector_store %arg5[%c0_7, %c0_8], %8 {strides = array<i32>} : memref<128x16xf32, #tpu.memory_space<vmem>>, vector<128x16xf32>,
    return
  }
  func.func @transform_0(%arg0: i32) -> (i32, i32) {
    %c0_i32 = arith.constant 0 : i32
    %c0_i32_0 = arith.constant 0 : i32
    return %arg0, %c0_i32 : i32, i32
  }
  func.func @transform_1(%arg0: i32) -> (i32, i32) {
    %c0_i32 = arith.constant 0 : i32
    %c0_i32_0 = arith.constant 0 : i32
    %c0_i32_1 = arith.constant 0 : i32
    return %c0_i32, %c0_i32_0 : i32, i32
  }
  func.func @transform_2(%arg0: i32) -> (i32, i32) {
    %c0_i32 = arith.constant 0 : i32
    %c0_i32_0 = arith.constant 0 : i32
    %c0_i32_1 = arith.constant 0 : i32
    return %c0_i32, %c0_i32_0 : i32, i32
  }
  func.func @transform_3(%arg0: i32) -> (i32, i32) {
    %c0_i32 = arith.constant 0 : i32
    %c0_i32_0 = arith.constant 0 : i32
    %c0_i32_1 = arith.constant 0 : i32
    return %c0_i32, %c0_i32_0 : i32, i32
  }
  func.func @transform_4(%arg0: i32) -> (i32, i32) {
    %c0_i32 = arith.constant 0 : i32
    %c0_i32_0 = arith.constant 0 : i32
    return %arg0, %c0_i32 : i32, i32
  }
}

module attributes {stable_mosaic.version = 11 : i64} {
  func.func @_coupling_net_mm_kernel(%arg0: i32, %arg1: memref<128x72xbf16, #tpu.memory_space<vmem>>, %arg2: memref<72x512xbf16, #tpu.memory_space<vmem>>, %arg3: memref<1x512xf32, #tpu.memory_space<vmem>>, %arg4: memref<512x512xbf16, #tpu.memory_space<vmem>>, %arg5: memref<1x512xf32, #tpu.memory_space<vmem>>, %arg6: memref<128x512xbf16, #tpu.memory_space<vmem>>) attributes {dimension_semantics = [#tpu.dimension_semantics<parallel>], iteration_bounds = array<i64: 1>, scalar_prefetch = 0 : i64, scratch_operands = 0 : i64, tpu.core_type = #tpu.core_type<tc>, window_params = [{transform_indices = @transform_0, window_bounds = array<i64: 128, 72>}, {pipeline_mode = #tpu.pipeline_mode<synchronous>, transform_indices = @transform_1, window_bounds = array<i64: 72, 512>}, {pipeline_mode = #tpu.pipeline_mode<synchronous>, transform_indices = @transform_2, window_bounds = array<i64: 1, 512>}, {pipeline_mode = #tpu.pipeline_mode<synchronous>, transform_indices = @transform_3, window_bounds = array<i64: 512, 512>}, {pipeline_mode = #tpu.pipeline_mode<synchronous>, transform_indices = @transform_4, window_bounds = array<i64: 1, 512>}, {transform_indices = @transform_5, window_bounds = array<i64: 128, 512>}]} {
    %c0 = arith.constant 0 : index
    %c0_0 = arith.constant 0 : index
    %0 = vector.load %arg1[%c0, %c0_0] : memref<128x72xbf16, #tpu.memory_space<vmem>>, vector<128x72xbf16>
    %c0_1 = arith.constant 0 : index
    %c0_2 = arith.constant 0 : index
    %1 = vector.load %arg2[%c0_1, %c0_2] : memref<72x512xbf16, #tpu.memory_space<vmem>>, vector<72x512xbf16>
    %cst = arith.constant dense<0.000000e+00> : vector<128x512xf32>
    %2 = tpu.matmul %0, %1, %cst {dimension_numbers = #tpu.dot_dimension_numbers<[1], [0], [0], [1], [0, 0, 1, 1], [], []>} : vector<128x72xbf16>, vector<72x512xbf16>, vector<128x512xf32> -> vector<128x512xf32>
    %c0_3 = arith.constant 0 : index
    %c0_4 = arith.constant 0 : index
    %3 = vector.load %arg3[%c0_3, %c0_4] : memref<1x512xf32, #tpu.memory_space<vmem>>, vector<1x512xf32>
    %4 = vector.broadcast %3 : vector<1x512xf32> to vector<128x512xf32>
    %5 = arith.addf %2, %4 : vector<128x512xf32>
    %cst_5 = arith.constant 0.000000e+00 : f32
    %6 = vector.broadcast %cst_5 : f32 to vector<128x512xf32>
    %7 = arith.maximumf %5, %6 : vector<128x512xf32>
    %8 = arith.truncf %7 : vector<128x512xf32> to vector<128x512xbf16>
    %c0_6 = arith.constant 0 : index
    %c0_7 = arith.constant 0 : index
    %9 = vector.load %arg4[%c0_6, %c0_7] : memref<512x512xbf16, #tpu.memory_space<vmem>>, vector<512x512xbf16>
    %cst_8 = arith.constant dense<0.000000e+00> : vector<128x512xf32>
    %10 = tpu.matmul %8, %9, %cst_8 {dimension_numbers = #tpu.dot_dimension_numbers<[1], [0], [0], [1], [0, 0, 1, 1], [], []>} : vector<128x512xbf16>, vector<512x512xbf16>, vector<128x512xf32> -> vector<128x512xf32>
    %c0_9 = arith.constant 0 : index
    %c0_10 = arith.constant 0 : index
    %11 = vector.load %arg5[%c0_9, %c0_10] : memref<1x512xf32, #tpu.memory_space<vmem>>, vector<1x512xf32>
    %12 = vector.broadcast %11 : vector<1x512xf32> to vector<128x512xf32>
    %13 = arith.addf %10, %12 : vector<128x512xf32>
    %cst_11 = arith.constant 0.000000e+00 : f32
    %14 = vector.broadcast %cst_11 : f32 to vector<128x512xf32>
    %15 = arith.maximumf %13, %14 : vector<128x512xf32>
    %16 = arith.truncf %15 : vector<128x512xf32> to vector<128x512xbf16>
    %c0_12 = arith.constant 0 : index
    %c0_13 = arith.constant 0 : index
    %17 = vector.load %arg6[%c0_12, %c0_13] : memref<128x512xbf16, #tpu.memory_space<vmem>>, vector<128x512xbf16>
    tpu.vector_store %arg6[%c0_12, %c0_13], %16 {strides = array<i32>} : memref<128x512xbf16, #tpu.memory_space<vmem>>, vector<128x512xbf16>,
    return
  }
  func.func @transform_0(%arg0: i32) -> (i32, i32) {
    %c0_i32 = arith.constant 0 : i32
    %c0_i32_0 = arith.constant 0 : i32
    return %arg0, %c0_i32 : i32, i32
  }
  func.func @transform_1(%arg0: i32) -> (i32, i32) {
    %c0_i32 = arith.constant 0 : i32
    %c0_i32_0 = arith.constant 0 : i32
    %c0_i32_1 = arith.constant 0 : i32
    return %c0_i32, %c0_i32_0 : i32, i32
  }
  func.func @transform_2(%arg0: i32) -> (i32, i32) {
    %c0_i32 = arith.constant 0 : i32
    %c0_i32_0 = arith.constant 0 : i32
    %c0_i32_1 = arith.constant 0 : i32
    return %c0_i32, %c0_i32_0 : i32, i32
  }
  func.func @transform_3(%arg0: i32) -> (i32, i32) {
    %c0_i32 = arith.constant 0 : i32
    %c0_i32_0 = arith.constant 0 : i32
    %c0_i32_1 = arith.constant 0 : i32
    return %c0_i32, %c0_i32_0 : i32, i32
  }
  func.func @transform_4(%arg0: i32) -> (i32, i32) {
    %c0_i32 = arith.constant 0 : i32
    %c0_i32_0 = arith.constant 0 : i32
    %c0_i32_1 = arith.constant 0 : i32
    return %c0_i32, %c0_i32_0 : i32, i32
  }
  func.func @transform_5(%arg0: i32) -> (i32, i32) {
    %c0_i32 = arith.constant 0 : i32
    %c0_i32_0 = arith.constant 0 : i32
    return %arg0, %c0_i32 : i32, i32
  }
}

module attributes {stable_mosaic.version = 11 : i64} {
  func.func @_zeroconv_coupling_kernel(%arg0: i32, %arg1: memref<1x10x10x512xbf16, #tpu.memory_space<vmem>>, %arg2: memref<9x512x16xbf16, #tpu.memory_space<vmem>>, %arg3: memref<1x16xf32, #tpu.memory_space<vmem>>, %arg4: memref<1x16xf32, #tpu.memory_space<vmem>>, %arg5: memref<1x64x8xf32, #tpu.memory_space<vmem>>, %arg6: memref<1x64x8xf32, #tpu.memory_space<vmem>>, %arg7: memref<1x64x16xf32, #tpu.memory_space<vmem>>, %arg8: memref<1x1x1xf32, #tpu.memory_space<vmem>>) attributes {dimension_semantics = [#tpu.dimension_semantics<parallel>], iteration_bounds = array<i64: 2>, scalar_prefetch = 0 : i64, scratch_operands = 0 : i64, tpu.core_type = #tpu.core_type<tc>, window_params = [{transform_indices = @transform_0, window_bounds = array<i64: 1, 10, 10, 512>}, {pipeline_mode = #tpu.pipeline_mode<synchronous>, transform_indices = @transform_1, window_bounds = array<i64: 9, 512, 16>}, {pipeline_mode = #tpu.pipeline_mode<synchronous>, transform_indices = @transform_2, window_bounds = array<i64: 1, 16>}, {pipeline_mode = #tpu.pipeline_mode<synchronous>, transform_indices = @transform_3, window_bounds = array<i64: 1, 16>}, {transform_indices = @transform_4, window_bounds = array<i64: 1, 64, 8>}, {transform_indices = @transform_5, window_bounds = array<i64: 1, 64, 8>}, {transform_indices = @transform_6, window_bounds = array<i64: 1, 64, 16>}, {transform_indices = @transform_7, window_bounds = array<i64: 1, 1, 1>}]} {
    %c0 = arith.constant 0 : index
    %c0_0 = arith.constant 0 : index
    %c0_1 = arith.constant 0 : index
    %c0_2 = arith.constant 0 : index
    %0 = vector.load %arg1[%c0, %c0_0, %c0_1, %c0_2] : memref<1x10x10x512xbf16, #tpu.memory_space<vmem>>, vector<1x10x10x512xbf16>
    %cst = arith.constant 0.000000e+00 : f32
    %1 = vector.broadcast %cst : f32 to vector<64x16xf32>
    %2 = vector.extract_strided_slice %0 {offsets = [0, 0, 0, 0], sizes = [1, 8, 8, 512], strides = [1, 1, 1, 1]} : vector<1x10x10x512xbf16> to vector<1x8x8x512xbf16>
    %3 = vector.shape_cast %2 : vector<1x8x8x512xbf16> to vector<8x8x512xbf16>
    %4 = vector.shape_cast %3 : vector<8x8x512xbf16> to vector<64x512xbf16>
    %c0_3 = arith.constant 0 : index
    %c0_4 = arith.constant 0 : index
    %c0_5 = arith.constant 0 : index
    %5 = vector.load %arg2[%c0_3, %c0_4, %c0_5] : memref<9x512x16xbf16, #tpu.memory_space<vmem>>, vector<1x512x16xbf16>
    %6 = vector.shape_cast %5 : vector<1x512x16xbf16> to vector<512x16xbf16>
    %cst_6 = arith.constant dense<0.000000e+00> : vector<64x16xf32>
    %7 = tpu.matmul %4, %6, %cst_6 {dimension_numbers = #tpu.dot_dimension_numbers<[1], [0], [0], [1], [0, 0, 1, 1], [], []>} : vector<64x512xbf16>, vector<512x16xbf16>, vector<64x16xf32> -> vector<64x16xf32>
    %8 = arith.addf %1, %7 : vector<64x16xf32>
    %9 = vector.extract_strided_slice %0 {offsets = [0, 0, 1, 0], sizes = [1, 8, 8, 512], strides = [1, 1, 1, 1]} : vector<1x10x10x512xbf16> to vector<1x8x8x512xbf16>
    %10 = vector.shape_cast %9 : vector<1x8x8x512xbf16> to vector<8x8x512xbf16>
    %11 = vector.shape_cast %10 : vector<8x8x512xbf16> to vector<64x512xbf16>
    %c1 = arith.constant 1 : index
    %c0_7 = arith.constant 0 : index
    %c0_8 = arith.constant 0 : index
    %12 = vector.load %arg2[%c1, %c0_7, %c0_8] : memref<9x512x16xbf16, #tpu.memory_space<vmem>>, vector<1x512x16xbf16>
    %13 = vector.shape_cast %12 : vector<1x512x16xbf16> to vector<512x16xbf16>
    %cst_9 = arith.constant dense<0.000000e+00> : vector<64x16xf32>
    %14 = tpu.matmul %11, %13, %cst_9 {dimension_numbers = #tpu.dot_dimension_numbers<[1], [0], [0], [1], [0, 0, 1, 1], [], []>} : vector<64x512xbf16>, vector<512x16xbf16>, vector<64x16xf32> -> vector<64x16xf32>
    %15 = arith.addf %8, %14 : vector<64x16xf32>
    %16 = vector.extract_strided_slice %0 {offsets = [0, 0, 2, 0], sizes = [1, 8, 8, 512], strides = [1, 1, 1, 1]} : vector<1x10x10x512xbf16> to vector<1x8x8x512xbf16>
    %17 = vector.shape_cast %16 : vector<1x8x8x512xbf16> to vector<8x8x512xbf16>
    %18 = vector.shape_cast %17 : vector<8x8x512xbf16> to vector<64x512xbf16>
    %c2 = arith.constant 2 : index
    %c0_10 = arith.constant 0 : index
    %c0_11 = arith.constant 0 : index
    %19 = vector.load %arg2[%c2, %c0_10, %c0_11] : memref<9x512x16xbf16, #tpu.memory_space<vmem>>, vector<1x512x16xbf16>
    %20 = vector.shape_cast %19 : vector<1x512x16xbf16> to vector<512x16xbf16>
    %cst_12 = arith.constant dense<0.000000e+00> : vector<64x16xf32>
    %21 = tpu.matmul %18, %20, %cst_12 {dimension_numbers = #tpu.dot_dimension_numbers<[1], [0], [0], [1], [0, 0, 1, 1], [], []>} : vector<64x512xbf16>, vector<512x16xbf16>, vector<64x16xf32> -> vector<64x16xf32>
    %22 = arith.addf %15, %21 : vector<64x16xf32>
    %23 = vector.extract_strided_slice %0 {offsets = [0, 1, 0, 0], sizes = [1, 8, 8, 512], strides = [1, 1, 1, 1]} : vector<1x10x10x512xbf16> to vector<1x8x8x512xbf16>
    %24 = vector.shape_cast %23 : vector<1x8x8x512xbf16> to vector<8x8x512xbf16>
    %25 = vector.shape_cast %24 : vector<8x8x512xbf16> to vector<64x512xbf16>
    %c3 = arith.constant 3 : index
    %c0_13 = arith.constant 0 : index
    %c0_14 = arith.constant 0 : index
    %26 = vector.load %arg2[%c3, %c0_13, %c0_14] : memref<9x512x16xbf16, #tpu.memory_space<vmem>>, vector<1x512x16xbf16>
    %27 = vector.shape_cast %26 : vector<1x512x16xbf16> to vector<512x16xbf16>
    %cst_15 = arith.constant dense<0.000000e+00> : vector<64x16xf32>
    %28 = tpu.matmul %25, %27, %cst_15 {dimension_numbers = #tpu.dot_dimension_numbers<[1], [0], [0], [1], [0, 0, 1, 1], [], []>} : vector<64x512xbf16>, vector<512x16xbf16>, vector<64x16xf32> -> vector<64x16xf32>
    %29 = arith.addf %22, %28 : vector<64x16xf32>
    %30 = vector.extract_strided_slice %0 {offsets = [0, 1, 1, 0], sizes = [1, 8, 8, 512], strides = [1, 1, 1, 1]} : vector<1x10x10x512xbf16> to vector<1x8x8x512xbf16>
    %31 = vector.shape_cast %30 : vector<1x8x8x512xbf16> to vector<8x8x512xbf16>
    %32 = vector.shape_cast %31 : vector<8x8x512xbf16> to vector<64x512xbf16>
    %c4 = arith.constant 4 : index
    %c0_16 = arith.constant 0 : index
    %c0_17 = arith.constant 0 : index
    %33 = vector.load %arg2[%c4, %c0_16, %c0_17] : memref<9x512x16xbf16, #tpu.memory_space<vmem>>, vector<1x512x16xbf16>
    %34 = vector.shape_cast %33 : vector<1x512x16xbf16> to vector<512x16xbf16>
    %cst_18 = arith.constant dense<0.000000e+00> : vector<64x16xf32>
    %35 = tpu.matmul %32, %34, %cst_18 {dimension_numbers = #tpu.dot_dimension_numbers<[1], [0], [0], [1], [0, 0, 1, 1], [], []>} : vector<64x512xbf16>, vector<512x16xbf16>, vector<64x16xf32> -> vector<64x16xf32>
    %36 = arith.addf %29, %35 : vector<64x16xf32>
    %37 = vector.extract_strided_slice %0 {offsets = [0, 1, 2, 0], sizes = [1, 8, 8, 512], strides = [1, 1, 1, 1]} : vector<1x10x10x512xbf16> to vector<1x8x8x512xbf16>
    %38 = vector.shape_cast %37 : vector<1x8x8x512xbf16> to vector<8x8x512xbf16>
    %39 = vector.shape_cast %38 : vector<8x8x512xbf16> to vector<64x512xbf16>
    %c5 = arith.constant 5 : index
    %c0_19 = arith.constant 0 : index
    %c0_20 = arith.constant 0 : index
    %40 = vector.load %arg2[%c5, %c0_19, %c0_20] : memref<9x512x16xbf16, #tpu.memory_space<vmem>>, vector<1x512x16xbf16>
    %41 = vector.shape_cast %40 : vector<1x512x16xbf16> to vector<512x16xbf16>
    %cst_21 = arith.constant dense<0.000000e+00> : vector<64x16xf32>
    %42 = tpu.matmul %39, %41, %cst_21 {dimension_numbers = #tpu.dot_dimension_numbers<[1], [0], [0], [1], [0, 0, 1, 1], [], []>} : vector<64x512xbf16>, vector<512x16xbf16>, vector<64x16xf32> -> vector<64x16xf32>
    %43 = arith.addf %36, %42 : vector<64x16xf32>
    %44 = vector.extract_strided_slice %0 {offsets = [0, 2, 0, 0], sizes = [1, 8, 8, 512], strides = [1, 1, 1, 1]} : vector<1x10x10x512xbf16> to vector<1x8x8x512xbf16>
    %45 = vector.shape_cast %44 : vector<1x8x8x512xbf16> to vector<8x8x512xbf16>
    %46 = vector.shape_cast %45 : vector<8x8x512xbf16> to vector<64x512xbf16>
    %c6 = arith.constant 6 : index
    %c0_22 = arith.constant 0 : index
    %c0_23 = arith.constant 0 : index
    %47 = vector.load %arg2[%c6, %c0_22, %c0_23] : memref<9x512x16xbf16, #tpu.memory_space<vmem>>, vector<1x512x16xbf16>
    %48 = vector.shape_cast %47 : vector<1x512x16xbf16> to vector<512x16xbf16>
    %cst_24 = arith.constant dense<0.000000e+00> : vector<64x16xf32>
    %49 = tpu.matmul %46, %48, %cst_24 {dimension_numbers = #tpu.dot_dimension_numbers<[1], [0], [0], [1], [0, 0, 1, 1], [], []>} : vector<64x512xbf16>, vector<512x16xbf16>, vector<64x16xf32> -> vector<64x16xf32>
    %50 = arith.addf %43, %49 : vector<64x16xf32>
    %51 = vector.extract_strided_slice %0 {offsets = [0, 2, 1, 0], sizes = [1, 8, 8, 512], strides = [1, 1, 1, 1]} : vector<1x10x10x512xbf16> to vector<1x8x8x512xbf16>
    %52 = vector.shape_cast %51 : vector<1x8x8x512xbf16> to vector<8x8x512xbf16>
    %53 = vector.shape_cast %52 : vector<8x8x512xbf16> to vector<64x512xbf16>
    %c7 = arith.constant 7 : index
    %c0_25 = arith.constant 0 : index
    %c0_26 = arith.constant 0 : index
    %54 = vector.load %arg2[%c7, %c0_25, %c0_26] : memref<9x512x16xbf16, #tpu.memory_space<vmem>>, vector<1x512x16xbf16>
    %55 = vector.shape_cast %54 : vector<1x512x16xbf16> to vector<512x16xbf16>
    %cst_27 = arith.constant dense<0.000000e+00> : vector<64x16xf32>
    %56 = tpu.matmul %53, %55, %cst_27 {dimension_numbers = #tpu.dot_dimension_numbers<[1], [0], [0], [1], [0, 0, 1, 1], [], []>} : vector<64x512xbf16>, vector<512x16xbf16>, vector<64x16xf32> -> vector<64x16xf32>
    %57 = arith.addf %50, %56 : vector<64x16xf32>
    %58 = vector.extract_strided_slice %0 {offsets = [0, 2, 2, 0], sizes = [1, 8, 8, 512], strides = [1, 1, 1, 1]} : vector<1x10x10x512xbf16> to vector<1x8x8x512xbf16>
    %59 = vector.shape_cast %58 : vector<1x8x8x512xbf16> to vector<8x8x512xbf16>
    %60 = vector.shape_cast %59 : vector<8x8x512xbf16> to vector<64x512xbf16>
    %c8 = arith.constant 8 : index
    %c0_28 = arith.constant 0 : index
    %c0_29 = arith.constant 0 : index
    %61 = vector.load %arg2[%c8, %c0_28, %c0_29] : memref<9x512x16xbf16, #tpu.memory_space<vmem>>, vector<1x512x16xbf16>
    %62 = vector.shape_cast %61 : vector<1x512x16xbf16> to vector<512x16xbf16>
    %cst_30 = arith.constant dense<0.000000e+00> : vector<64x16xf32>
    %63 = tpu.matmul %60, %62, %cst_30 {dimension_numbers = #tpu.dot_dimension_numbers<[1], [0], [0], [1], [0, 0, 1, 1], [], []>} : vector<64x512xbf16>, vector<512x16xbf16>, vector<64x16xf32> -> vector<64x16xf32>
    %64 = arith.addf %57, %63 : vector<64x16xf32>
    %c0_31 = arith.constant 0 : index
    %c0_32 = arith.constant 0 : index
    %65 = vector.load %arg3[%c0_31, %c0_32] : memref<1x16xf32, #tpu.memory_space<vmem>>, vector<1x16xf32>
    %66 = vector.broadcast %65 : vector<1x16xf32> to vector<64x16xf32>
    %67 = arith.addf %64, %66 : vector<64x16xf32>
    %c0_33 = arith.constant 0 : index
    %c0_34 = arith.constant 0 : index
    %68 = vector.load %arg4[%c0_33, %c0_34] : memref<1x16xf32, #tpu.memory_space<vmem>>, vector<1x16xf32>
    %69 = vector.broadcast %68 : vector<1x16xf32> to vector<64x16xf32>
    %70 = arith.mulf %67, %69 : vector<64x16xf32>
    %71 = vector.extract_strided_slice %70 {offsets = [0, 0], sizes = [64, 8], strides = [1, 1]} : vector<64x16xf32> to vector<64x8xf32>
    %72 = vector.extract_strided_slice %70 {offsets = [0, 8], sizes = [64, 8], strides = [1, 1]} : vector<64x16xf32> to vector<64x8xf32>
    %cst_35 = arith.constant 2.000000e+00 : f32
    %73 = vector.broadcast %cst_35 : f32 to vector<64x8xf32>
    %74 = arith.addf %71, %73 : vector<64x8xf32>
    %cst_36 = arith.constant 0.000000e+00 : f32
    %75 = vector.broadcast %cst_36 : f32 to vector<64x8xf32>
    %76 = arith.subf %75, %74 : vector<64x8xf32>
    %77 = math.exp %76 : vector<64x8xf32>
    %cst_37 = arith.constant 1.000000e+00 : f32
    %78 = vector.broadcast %cst_37 : f32 to vector<64x8xf32>
    %79 = arith.addf %78, %77 : vector<64x8xf32>
    %cst_38 = arith.constant 1.000000e+00 : f32
    %80 = vector.broadcast %cst_38 : f32 to vector<64x8xf32>
    %81 = arith.divf %80, %79 : vector<64x8xf32>
    %c0_39 = arith.constant 0 : index
    %c0_40 = arith.constant 0 : index
    %c0_41 = arith.constant 0 : index
    %82 = vector.load %arg6[%c0_39, %c0_40, %c0_41] : memref<1x64x8xf32, #tpu.memory_space<vmem>>, vector<1x64x8xf32>
    %83 = vector.shape_cast %82 : vector<1x64x8xf32> to vector<64x8xf32>
    %84 = arith.addf %83, %72 : vector<64x8xf32>
    %85 = arith.mulf %84, %81 : vector<64x8xf32>
    %c0_42 = arith.constant 0 : index
    %c0_43 = arith.constant 0 : index
    %c0_44 = arith.constant 0 : index
    %86 = vector.load %arg5[%c0_42, %c0_43, %c0_44] : memref<1x64x8xf32, #tpu.memory_space<vmem>>, vector<1x64x8xf32>
    %87 = vector.shape_cast %86 : vector<1x64x8xf32> to vector<64x8xf32>
    %88 = tpu.concatenate %87, %85 in 1 : vector<64x8xf32>, vector<64x8xf32> -> vector<64x16xf32>
    %89 = vector.shape_cast %88 : vector<64x16xf32> to vector<1x64x16xf32>
    %c0_45 = arith.constant 0 : index
    %c0_46 = arith.constant 0 : index
    %c0_47 = arith.constant 0 : index
    %90 = vector.load %arg7[%c0_45, %c0_46, %c0_47] : memref<1x64x16xf32, #tpu.memory_space<vmem>>, vector<1x64x16xf32>
    tpu.vector_store %arg7[%c0_45, %c0_46, %c0_47], %89 {strides = array<i32>} : memref<1x64x16xf32, #tpu.memory_space<vmem>>, vector<1x64x16xf32>,
    %91 = math.log %81 : vector<64x8xf32>
    %92 = vector.shape_cast %91 : vector<64x8xf32> to vector<1x64x8xf32>
    %cst_48 = arith.constant dense<0.000000e+00> : vector<1xf32>
    %93 = vector.multi_reduction <add>, %92, %cst_48 [1, 2] : vector<1x64x8xf32> to vector<1xf32>
    %94 = vector.shape_cast %93 : vector<1xf32> to vector<1x1x1xf32>
    %95 = vector.extract %94[0, 0, 0] : f32 from vector<1x1x1xf32>
    %96 = vector.broadcast %95 : f32 to vector<1x1xf32>
    %97 = vector.shape_cast %96 : vector<1x1xf32> to vector<1x1x1xf32>
    %c0_49 = arith.constant 0 : index
    %c0_50 = arith.constant 0 : index
    %c0_51 = arith.constant 0 : index
    %98 = vector.load %arg8[%c0_49, %c0_50, %c0_51] : memref<1x1x1xf32, #tpu.memory_space<vmem>>, vector<1x1x1xf32>
    tpu.vector_store %arg8[%c0_49, %c0_50, %c0_51], %97 {strides = array<i32>} : memref<1x1x1xf32, #tpu.memory_space<vmem>>, vector<1x1x1xf32>,
    return
  }
  func.func @transform_0(%arg0: i32) -> (i32, i32, i32, i32) {
    %c0_i32 = arith.constant 0 : i32
    %c0_i32_0 = arith.constant 0 : i32
    %c0_i32_1 = arith.constant 0 : i32
    %c0_i32_2 = arith.constant 0 : i32
    return %arg0, %c0_i32, %c0_i32_0, %c0_i32_1 : i32, i32, i32, i32
  }
  func.func @transform_1(%arg0: i32) -> (i32, i32, i32) {
    %c0_i32 = arith.constant 0 : i32
    %c0_i32_0 = arith.constant 0 : i32
    %c0_i32_1 = arith.constant 0 : i32
    %c0_i32_2 = arith.constant 0 : i32
    return %c0_i32, %c0_i32_0, %c0_i32_1 : i32, i32, i32
  }
  func.func @transform_2(%arg0: i32) -> (i32, i32) {
    %c0_i32 = arith.constant 0 : i32
    %c0_i32_0 = arith.constant 0 : i32
    %c0_i32_1 = arith.constant 0 : i32
    return %c0_i32, %c0_i32_0 : i32, i32
  }
  func.func @transform_3(%arg0: i32) -> (i32, i32) {
    %c0_i32 = arith.constant 0 : i32
    %c0_i32_0 = arith.constant 0 : i32
    %c0_i32_1 = arith.constant 0 : i32
    return %c0_i32, %c0_i32_0 : i32, i32
  }
  func.func @transform_4(%arg0: i32) -> (i32, i32, i32) {
    %c0_i32 = arith.constant 0 : i32
    %c0_i32_0 = arith.constant 0 : i32
    %c0_i32_1 = arith.constant 0 : i32
    return %arg0, %c0_i32, %c0_i32_0 : i32, i32, i32
  }
  func.func @transform_5(%arg0: i32) -> (i32, i32, i32) {
    %c0_i32 = arith.constant 0 : i32
    %c0_i32_0 = arith.constant 0 : i32
    %c0_i32_1 = arith.constant 0 : i32
    return %arg0, %c0_i32, %c0_i32_0 : i32, i32, i32
  }
  func.func @transform_6(%arg0: i32) -> (i32, i32, i32) {
    %c0_i32 = arith.constant 0 : i32
    %c0_i32_0 = arith.constant 0 : i32
    %c0_i32_1 = arith.constant 0 : i32
    return %arg0, %c0_i32, %c0_i32_0 : i32, i32, i32
  }
  func.func @transform_7(%arg0: i32) -> (i32, i32, i32) {
    %c0_i32 = arith.constant 0 : i32
    %c0_i32_0 = arith.constant 0 : i32
    %c0_i32_1 = arith.constant 0 : i32
    return %arg0, %c0_i32, %c0_i32_0 : i32, i32, i32
  }
}

module attributes {stable_mosaic.version = 11 : i64} {
  func.func @_zeroconv_prior_logp_kernel(%arg0: i32, %arg1: memref<1x10x10x8xf32, #tpu.memory_space<vmem>>, %arg2: memref<9x8x16xf32, #tpu.memory_space<vmem>>, %arg3: memref<1x16xf32, #tpu.memory_space<vmem>>, %arg4: memref<1x16xf32, #tpu.memory_space<vmem>>, %arg5: memref<1x64x8xf32, #tpu.memory_space<vmem>>, %arg6: memref<1x1x1xf32, #tpu.memory_space<vmem>>) attributes {dimension_semantics = [#tpu.dimension_semantics<parallel>], iteration_bounds = array<i64: 2>, scalar_prefetch = 0 : i64, scratch_operands = 0 : i64, tpu.core_type = #tpu.core_type<tc>, window_params = [{transform_indices = @transform_0, window_bounds = array<i64: 1, 10, 10, 8>}, {pipeline_mode = #tpu.pipeline_mode<synchronous>, transform_indices = @transform_1, window_bounds = array<i64: 9, 8, 16>}, {pipeline_mode = #tpu.pipeline_mode<synchronous>, transform_indices = @transform_2, window_bounds = array<i64: 1, 16>}, {pipeline_mode = #tpu.pipeline_mode<synchronous>, transform_indices = @transform_3, window_bounds = array<i64: 1, 16>}, {transform_indices = @transform_4, window_bounds = array<i64: 1, 64, 8>}, {transform_indices = @transform_5, window_bounds = array<i64: 1, 1, 1>}]} {
    %c0 = arith.constant 0 : index
    %c0_0 = arith.constant 0 : index
    %c0_1 = arith.constant 0 : index
    %c0_2 = arith.constant 0 : index
    %0 = vector.load %arg1[%c0, %c0_0, %c0_1, %c0_2] : memref<1x10x10x8xf32, #tpu.memory_space<vmem>>, vector<1x10x10x8xf32>
    %cst = arith.constant 0.000000e+00 : f32
    %1 = vector.broadcast %cst : f32 to vector<64x16xf32>
    %2 = vector.extract_strided_slice %0 {offsets = [0, 0, 0, 0], sizes = [1, 8, 8, 8], strides = [1, 1, 1, 1]} : vector<1x10x10x8xf32> to vector<1x8x8x8xf32>
    %3 = vector.shape_cast %2 : vector<1x8x8x8xf32> to vector<8x8x8xf32>
    %4 = vector.shape_cast %3 : vector<8x8x8xf32> to vector<64x8xf32>
    %c0_3 = arith.constant 0 : index
    %c0_4 = arith.constant 0 : index
    %c0_5 = arith.constant 0 : index
    %5 = vector.load %arg2[%c0_3, %c0_4, %c0_5] : memref<9x8x16xf32, #tpu.memory_space<vmem>>, vector<1x8x16xf32>
    %6 = vector.shape_cast %5 : vector<1x8x16xf32> to vector<8x16xf32>
    %cst_6 = arith.constant dense<0.000000e+00> : vector<64x16xf32>
    %7 = tpu.matmul %4, %6, %cst_6 {dimension_numbers = #tpu.dot_dimension_numbers<[1], [0], [0], [1], [0, 0, 1, 1], [], []>} : vector<64x8xf32>, vector<8x16xf32>, vector<64x16xf32> -> vector<64x16xf32>
    %8 = arith.addf %1, %7 : vector<64x16xf32>
    %9 = vector.extract_strided_slice %0 {offsets = [0, 0, 1, 0], sizes = [1, 8, 8, 8], strides = [1, 1, 1, 1]} : vector<1x10x10x8xf32> to vector<1x8x8x8xf32>
    %10 = vector.shape_cast %9 : vector<1x8x8x8xf32> to vector<8x8x8xf32>
    %11 = vector.shape_cast %10 : vector<8x8x8xf32> to vector<64x8xf32>
    %c1 = arith.constant 1 : index
    %c0_7 = arith.constant 0 : index
    %c0_8 = arith.constant 0 : index
    %12 = vector.load %arg2[%c1, %c0_7, %c0_8] : memref<9x8x16xf32, #tpu.memory_space<vmem>>, vector<1x8x16xf32>
    %13 = vector.shape_cast %12 : vector<1x8x16xf32> to vector<8x16xf32>
    %cst_9 = arith.constant dense<0.000000e+00> : vector<64x16xf32>
    %14 = tpu.matmul %11, %13, %cst_9 {dimension_numbers = #tpu.dot_dimension_numbers<[1], [0], [0], [1], [0, 0, 1, 1], [], []>} : vector<64x8xf32>, vector<8x16xf32>, vector<64x16xf32> -> vector<64x16xf32>
    %15 = arith.addf %8, %14 : vector<64x16xf32>
    %16 = vector.extract_strided_slice %0 {offsets = [0, 0, 2, 0], sizes = [1, 8, 8, 8], strides = [1, 1, 1, 1]} : vector<1x10x10x8xf32> to vector<1x8x8x8xf32>
    %17 = vector.shape_cast %16 : vector<1x8x8x8xf32> to vector<8x8x8xf32>
    %18 = vector.shape_cast %17 : vector<8x8x8xf32> to vector<64x8xf32>
    %c2 = arith.constant 2 : index
    %c0_10 = arith.constant 0 : index
    %c0_11 = arith.constant 0 : index
    %19 = vector.load %arg2[%c2, %c0_10, %c0_11] : memref<9x8x16xf32, #tpu.memory_space<vmem>>, vector<1x8x16xf32>
    %20 = vector.shape_cast %19 : vector<1x8x16xf32> to vector<8x16xf32>
    %cst_12 = arith.constant dense<0.000000e+00> : vector<64x16xf32>
    %21 = tpu.matmul %18, %20, %cst_12 {dimension_numbers = #tpu.dot_dimension_numbers<[1], [0], [0], [1], [0, 0, 1, 1], [], []>} : vector<64x8xf32>, vector<8x16xf32>, vector<64x16xf32> -> vector<64x16xf32>
    %22 = arith.addf %15, %21 : vector<64x16xf32>
    %23 = vector.extract_strided_slice %0 {offsets = [0, 1, 0, 0], sizes = [1, 8, 8, 8], strides = [1, 1, 1, 1]} : vector<1x10x10x8xf32> to vector<1x8x8x8xf32>
    %24 = vector.shape_cast %23 : vector<1x8x8x8xf32> to vector<8x8x8xf32>
    %25 = vector.shape_cast %24 : vector<8x8x8xf32> to vector<64x8xf32>
    %c3 = arith.constant 3 : index
    %c0_13 = arith.constant 0 : index
    %c0_14 = arith.constant 0 : index
    %26 = vector.load %arg2[%c3, %c0_13, %c0_14] : memref<9x8x16xf32, #tpu.memory_space<vmem>>, vector<1x8x16xf32>
    %27 = vector.shape_cast %26 : vector<1x8x16xf32> to vector<8x16xf32>
    %cst_15 = arith.constant dense<0.000000e+00> : vector<64x16xf32>
    %28 = tpu.matmul %25, %27, %cst_15 {dimension_numbers = #tpu.dot_dimension_numbers<[1], [0], [0], [1], [0, 0, 1, 1], [], []>} : vector<64x8xf32>, vector<8x16xf32>, vector<64x16xf32> -> vector<64x16xf32>
    %29 = arith.addf %22, %28 : vector<64x16xf32>
    %30 = vector.extract_strided_slice %0 {offsets = [0, 1, 1, 0], sizes = [1, 8, 8, 8], strides = [1, 1, 1, 1]} : vector<1x10x10x8xf32> to vector<1x8x8x8xf32>
    %31 = vector.shape_cast %30 : vector<1x8x8x8xf32> to vector<8x8x8xf32>
    %32 = vector.shape_cast %31 : vector<8x8x8xf32> to vector<64x8xf32>
    %c4 = arith.constant 4 : index
    %c0_16 = arith.constant 0 : index
    %c0_17 = arith.constant 0 : index
    %33 = vector.load %arg2[%c4, %c0_16, %c0_17] : memref<9x8x16xf32, #tpu.memory_space<vmem>>, vector<1x8x16xf32>
    %34 = vector.shape_cast %33 : vector<1x8x16xf32> to vector<8x16xf32>
    %cst_18 = arith.constant dense<0.000000e+00> : vector<64x16xf32>
    %35 = tpu.matmul %32, %34, %cst_18 {dimension_numbers = #tpu.dot_dimension_numbers<[1], [0], [0], [1], [0, 0, 1, 1], [], []>} : vector<64x8xf32>, vector<8x16xf32>, vector<64x16xf32> -> vector<64x16xf32>
    %36 = arith.addf %29, %35 : vector<64x16xf32>
    %37 = vector.extract_strided_slice %0 {offsets = [0, 1, 2, 0], sizes = [1, 8, 8, 8], strides = [1, 1, 1, 1]} : vector<1x10x10x8xf32> to vector<1x8x8x8xf32>
    %38 = vector.shape_cast %37 : vector<1x8x8x8xf32> to vector<8x8x8xf32>
    %39 = vector.shape_cast %38 : vector<8x8x8xf32> to vector<64x8xf32>
    %c5 = arith.constant 5 : index
    %c0_19 = arith.constant 0 : index
    %c0_20 = arith.constant 0 : index
    %40 = vector.load %arg2[%c5, %c0_19, %c0_20] : memref<9x8x16xf32, #tpu.memory_space<vmem>>, vector<1x8x16xf32>
    %41 = vector.shape_cast %40 : vector<1x8x16xf32> to vector<8x16xf32>
    %cst_21 = arith.constant dense<0.000000e+00> : vector<64x16xf32>
    %42 = tpu.matmul %39, %41, %cst_21 {dimension_numbers = #tpu.dot_dimension_numbers<[1], [0], [0], [1], [0, 0, 1, 1], [], []>} : vector<64x8xf32>, vector<8x16xf32>, vector<64x16xf32> -> vector<64x16xf32>
    %43 = arith.addf %36, %42 : vector<64x16xf32>
    %44 = vector.extract_strided_slice %0 {offsets = [0, 2, 0, 0], sizes = [1, 8, 8, 8], strides = [1, 1, 1, 1]} : vector<1x10x10x8xf32> to vector<1x8x8x8xf32>
    %45 = vector.shape_cast %44 : vector<1x8x8x8xf32> to vector<8x8x8xf32>
    %46 = vector.shape_cast %45 : vector<8x8x8xf32> to vector<64x8xf32>
    %c6 = arith.constant 6 : index
    %c0_22 = arith.constant 0 : index
    %c0_23 = arith.constant 0 : index
    %47 = vector.load %arg2[%c6, %c0_22, %c0_23] : memref<9x8x16xf32, #tpu.memory_space<vmem>>, vector<1x8x16xf32>
    %48 = vector.shape_cast %47 : vector<1x8x16xf32> to vector<8x16xf32>
    %cst_24 = arith.constant dense<0.000000e+00> : vector<64x16xf32>
    %49 = tpu.matmul %46, %48, %cst_24 {dimension_numbers = #tpu.dot_dimension_numbers<[1], [0], [0], [1], [0, 0, 1, 1], [], []>} : vector<64x8xf32>, vector<8x16xf32>, vector<64x16xf32> -> vector<64x16xf32>
    %50 = arith.addf %43, %49 : vector<64x16xf32>
    %51 = vector.extract_strided_slice %0 {offsets = [0, 2, 1, 0], sizes = [1, 8, 8, 8], strides = [1, 1, 1, 1]} : vector<1x10x10x8xf32> to vector<1x8x8x8xf32>
    %52 = vector.shape_cast %51 : vector<1x8x8x8xf32> to vector<8x8x8xf32>
    %53 = vector.shape_cast %52 : vector<8x8x8xf32> to vector<64x8xf32>
    %c7 = arith.constant 7 : index
    %c0_25 = arith.constant 0 : index
    %c0_26 = arith.constant 0 : index
    %54 = vector.load %arg2[%c7, %c0_25, %c0_26] : memref<9x8x16xf32, #tpu.memory_space<vmem>>, vector<1x8x16xf32>
    %55 = vector.shape_cast %54 : vector<1x8x16xf32> to vector<8x16xf32>
    %cst_27 = arith.constant dense<0.000000e+00> : vector<64x16xf32>
    %56 = tpu.matmul %53, %55, %cst_27 {dimension_numbers = #tpu.dot_dimension_numbers<[1], [0], [0], [1], [0, 0, 1, 1], [], []>} : vector<64x8xf32>, vector<8x16xf32>, vector<64x16xf32> -> vector<64x16xf32>
    %57 = arith.addf %50, %56 : vector<64x16xf32>
    %58 = vector.extract_strided_slice %0 {offsets = [0, 2, 2, 0], sizes = [1, 8, 8, 8], strides = [1, 1, 1, 1]} : vector<1x10x10x8xf32> to vector<1x8x8x8xf32>
    %59 = vector.shape_cast %58 : vector<1x8x8x8xf32> to vector<8x8x8xf32>
    %60 = vector.shape_cast %59 : vector<8x8x8xf32> to vector<64x8xf32>
    %c8 = arith.constant 8 : index
    %c0_28 = arith.constant 0 : index
    %c0_29 = arith.constant 0 : index
    %61 = vector.load %arg2[%c8, %c0_28, %c0_29] : memref<9x8x16xf32, #tpu.memory_space<vmem>>, vector<1x8x16xf32>
    %62 = vector.shape_cast %61 : vector<1x8x16xf32> to vector<8x16xf32>
    %cst_30 = arith.constant dense<0.000000e+00> : vector<64x16xf32>
    %63 = tpu.matmul %60, %62, %cst_30 {dimension_numbers = #tpu.dot_dimension_numbers<[1], [0], [0], [1], [0, 0, 1, 1], [], []>} : vector<64x8xf32>, vector<8x16xf32>, vector<64x16xf32> -> vector<64x16xf32>
    %64 = arith.addf %57, %63 : vector<64x16xf32>
    %c0_31 = arith.constant 0 : index
    %c0_32 = arith.constant 0 : index
    %65 = vector.load %arg3[%c0_31, %c0_32] : memref<1x16xf32, #tpu.memory_space<vmem>>, vector<1x16xf32>
    %66 = vector.broadcast %65 : vector<1x16xf32> to vector<64x16xf32>
    %67 = arith.addf %64, %66 : vector<64x16xf32>
    %c0_33 = arith.constant 0 : index
    %c0_34 = arith.constant 0 : index
    %68 = vector.load %arg4[%c0_33, %c0_34] : memref<1x16xf32, #tpu.memory_space<vmem>>, vector<1x16xf32>
    %69 = vector.broadcast %68 : vector<1x16xf32> to vector<64x16xf32>
    %70 = arith.mulf %67, %69 : vector<64x16xf32>
    %71 = vector.extract_strided_slice %70 {offsets = [0, 0], sizes = [64, 8], strides = [1, 1]} : vector<64x16xf32> to vector<64x8xf32>
    %72 = vector.extract_strided_slice %70 {offsets = [0, 8], sizes = [64, 8], strides = [1, 1]} : vector<64x16xf32> to vector<64x8xf32>
    %c0_35 = arith.constant 0 : index
    %c0_36 = arith.constant 0 : index
    %c0_37 = arith.constant 0 : index
    %73 = vector.load %arg5[%c0_35, %c0_36, %c0_37] : memref<1x64x8xf32, #tpu.memory_space<vmem>>, vector<1x64x8xf32>
    %74 = vector.shape_cast %73 : vector<1x64x8xf32> to vector<64x8xf32>
    %cst_38 = arith.constant -0.918938517 : f32
    %75 = vector.broadcast %cst_38 : f32 to vector<64x8xf32>
    %76 = arith.subf %75, %72 : vector<64x8xf32>
    %77 = arith.subf %74, %71 : vector<64x8xf32>
    %78 = arith.mulf %77, %77 : vector<64x8xf32>
    %cst_39 = arith.constant 5.000000e-01 : f32
    %79 = vector.broadcast %cst_39 : f32 to vector<64x8xf32>
    %80 = arith.mulf %79, %78 : vector<64x8xf32>
    %cst_40 = arith.constant -2.000000e+00 : f32
    %81 = vector.broadcast %cst_40 : f32 to vector<64x8xf32>
    %82 = arith.mulf %81, %72 : vector<64x8xf32>
    %83 = math.exp %82 : vector<64x8xf32>
    %84 = arith.mulf %80, %83 : vector<64x8xf32>
    %85 = arith.subf %76, %84 : vector<64x8xf32>
    %86 = vector.shape_cast %85 : vector<64x8xf32> to vector<1x64x8xf32>
    %cst_41 = arith.constant dense<0.000000e+00> : vector<1xf32>
    %87 = vector.multi_reduction <add>, %86, %cst_41 [1, 2] : vector<1x64x8xf32> to vector<1xf32>
    %88 = vector.shape_cast %87 : vector<1xf32> to vector<1x1x1xf32>
    %89 = vector.extract %88[0, 0, 0] : f32 from vector<1x1x1xf32>
    %90 = vector.broadcast %89 : f32 to vector<1x1xf32>
    %91 = vector.shape_cast %90 : vector<1x1xf32> to vector<1x1x1xf32>
    %c0_42 = arith.constant 0 : index
    %c0_43 = arith.constant 0 : index
    %c0_44 = arith.constant 0 : index
    %92 = vector.load %arg6[%c0_42, %c0_43, %c0_44] : memref<1x1x1xf32, #tpu.memory_space<vmem>>, vector<1x1x1xf32>
    tpu.vector_store %arg6[%c0_42, %c0_43, %c0_44], %91 {strides = array<i32>} : memref<1x1x1xf32, #tpu.memory_space<vmem>>, vector<1x1x1xf32>,
    return
  }
  func.func @transform_0(%arg0: i32) -> (i32, i32, i32, i32) {
    %c0_i32 = arith.constant 0 : i32
    %c0_i32_0 = arith.constant 0 : i32
    %c0_i32_1 = arith.constant 0 : i32
    %c0_i32_2 = arith.constant 0 : i32
    return %arg0, %c0_i32, %c0_i32_0, %c0_i32_1 : i32, i32, i32, i32
  }
  func.func @transform_1(%arg0: i32) -> (i32, i32, i32) {
    %c0_i32 = arith.constant 0 : i32
    %c0_i32_0 = arith.constant 0 : i32
    %c0_i32_1 = arith.constant 0 : i32
    %c0_i32_2 = arith.constant 0 : i32
    return %c0_i32, %c0_i32_0, %c0_i32_1 : i32, i32, i32
  }
  func.func @transform_2(%arg0: i32) -> (i32, i32) {
    %c0_i32 = arith.constant 0 : i32
    %c0_i32_0 = arith.constant 0 : i32
    %c0_i32_1 = arith.constant 0 : i32
    return %c0_i32, %c0_i32_0 : i32, i32
  }
  func.func @transform_3(%arg0: i32) -> (i32, i32) {
    %c0_i32 = arith.constant 0 : i32
    %c0_i32_0 = arith.constant 0 : i32
    %c0_i32_1 = arith.constant 0 : i32
    return %c0_i32, %c0_i32_0 : i32, i32
  }
  func.func @transform_4(%arg0: i32) -> (i32, i32, i32) {
    %c0_i32 = arith.constant 0 : i32
    %c0_i32_0 = arith.constant 0 : i32
    %c0_i32_1 = arith.constant 0 : i32
    return %arg0, %c0_i32, %c0_i32_0 : i32, i32, i32
  }
  func.func @transform_5(%arg0: i32) -> (i32, i32, i32) {
    %c0_i32 = arith.constant 0 : i32
    %c0_i32_0 = arith.constant 0 : i32
    %c0_i32_1 = arith.constant 0 : i32
    return %arg0, %c0_i32, %c0_i32_0 : i32, i32, i32
  }
}

</mosaic_0001>

<bundles_post_ra>
// kernel: neg.2
= control target key start
LH: loop header
LB: loop body
LE: loop exit
PB: predicated region body
PF: predicated region fallthrough
CT: control target
= control target key end

     0   :  { %s24_s0 = inlined_call_operand.vmem [shape: f32[1,16], index: 0, kind: input, shape index: {}]   ;;  %s25_s1 = inlined_call_operand.vmem [shape: f32[1,16], index: 1, kind: output, shape index: {}]  }
   0x1   :  { %v2_v0 = vld [vmem:[%s24_s0] sm:$0x1] }
   0x2   :  { %v5_v1 = vxor.u32 2147483648, %v2_v0 }
   0x4   :  { %7 = vst [vmem:[%s25_s1] sm:$0x1] %v5_v1 }

// kernel: block_forward.9
= control target key start
LH: loop header
LB: loop body
LE: loop exit
PB: predicated region body
PF: predicated region fallthrough
CT: control target
= control target key end

     0   :  { %vm14_vm0 = vcmask 122880   ;;  %vm34_vm1 = vcmask 130048   ;;  %v164_v0 = vmov 0.0   ;;  %s272_s0 = inlined_call_operand.vmem [shape: f32[128,16], index: 0, kind: input, shape index: {}]   ;;  %s273_s1 = inlined_call_operand.vmem [shape: f32[1,16], index: 1, kind: output, shape index: {0}]   ;;  %s274_s2 = inlined_call_operand.vmem [shape: f32[1,16], index: 2, kind: output, shape index: {1}]  }
   0x1   :  { %15 = vst.msk [vmem:[#allocation2] sm:$0x1] %vm14_vm0, %v164_v0  ;;  %16 = vst.msk [vmem:[#allocation3] sm:$0x1] %vm14_vm0, %v164_v0  ;;  %v17_v1 = vld [vmem:[%s272_s0] sm:$0xff]  ;;  %v18_v2 = vld [vmem:[%s272_s0 + $0x8] sm:$0xff] }
   0x2   :  { %v19_v3 = vld [vmem:[%s272_s0 + $0x10] sm:$0xff]  ;;  %v20_v4 = vld [vmem:[%s272_s0 + $0x18] sm:$0xff]  ;;  %v35_v5 = vsel %vm34_vm1, %v17_v1, 0.0  ;;  %v36_v6 = vsel %vm34_vm1, %v18_v2, 0.0  ;;  %v21_v8 = vld [vmem:[%s272_s0 + $0x20] sm:$0xff]  ;;  %v76_v16 = vmul.f32 %v17_v1, %v17_v1  ;;  %v77_v17 = vmul.f32 %v18_v2, %v18_v2 }
   0x3   :  { %v38_v7 = vsel %vm34_vm1, %v19_v3, 0.0  ;;  %v37_v9 = vadd.f32 %v36_v6, %v35_v5  ;;  %v40_v10 = vsel %vm34_vm1, %v20_v4, 0.0  ;;  %v22_v11 = vld [vmem:[%s272_s0 + $0x28] sm:$0xff]  ;;  %v42_v13 = vsel %vm34_vm1, %v21_v8, 0.0  ;;  %v23_v14 = vld [vmem:[%s272_s0 + $0x30] sm:$0xff]  ;;  %v24_v20 = vld [vmem:[%s272_s0 + $0x38] sm:$0xff] }
   0x4   :  { %v78_v18 = vmul.f32 %v19_v3, %v19_v3  ;;  %v44_v19 = vsel %vm34_vm1, %v22_v11, 0.0  ;;  %v79_v22 = vmul.f32 %v20_v4, %v20_v4  ;;  %v46_v23 = vsel %vm34_vm1, %v23_v14, 0.0  ;;  %v25_v25 = vld [vmem:[%s272_s0 + $0x40] sm:$0xff]  ;;  %v26_v32 = vld [vmem:[%s272_s0 + $0x48] sm:$0xff]  ;;  %v27_v38 = vld [vmem:[%s272_s0 + $0x50] sm:$0xff] }
   0x5   :  { %v39_v12 = vadd.f32 %v38_v7, %v37_v9  ;;  %v80_v24 = vmul.f32 %v21_v8, %v21_v8  ;;  %v92_v27 = vsel %vm34_vm1, %v76_v16, 0.0  ;;  %v93_v28 = vsel %vm34_vm1, %v77_v17, 0.0  ;;  %v28_v44 = vld [vmem:[%s272_s0 + $0x58] sm:$0xff]  ;;  %v29_v50 = vld [vmem:[%s272_s0 + $0x60] sm:$0xff]  ;;  %v30_v56 = vld [vmem:[%s272_s0 + $0x68] sm:$0xff] }
   0x6   :  { %v95_v29 = vsel %vm34_vm1, %v78_v18, 0.0  ;;  %v48_v30 = vsel %vm34_vm1, %v24_v20, 0.0  ;;  %v94_v31 = vadd.f32 %v93_v28, %v92_v27  ;;  %v81_v34 = vmul.f32 %v22_v11, %v22_v11  ;;  %v31_v62 = vld [vmem:[%s272_s0 + $0x70] sm:$0xff]  ;;  %v32_v4 = vld [vmem:[%s272_s0 + $0x78] sm:$0xff] }
   0x7   :  { %v41_v15 = vadd.f32 %v40_v10, %v39_v12  ;;  %v97_v35 = vsel %vm34_vm1, %v79_v22, 0.0  ;;  %v50_v36 = vsel %vm34_vm1, %v25_v25, 0.0  ;;  %v82_v40 = vmul.f32 %v23_v14, %v23_v14 }
   0x8   :  { %v96_v37 = vadd.f32 %v95_v29, %v94_v31  ;;  %v99_v41 = vsel %vm34_vm1, %v80_v24, 0.0  ;;  %v52_v42 = vsel %vm34_vm1, %v26_v32, 0.0  ;;  %v83_v46 = vmul.f32 %v24_v20, %v24_v20 }
   0x9   :  { %v43_v21 = vadd.f32 %v42_v13, %v41_v15  ;;  %v101_v47 = vsel %vm34_vm1, %v81_v34, 0.0  ;;  %v54_v48 = vsel %vm34_vm1, %v27_v38, 0.0  ;;  %v84_v52 = vmul.f32 %v25_v25, %v25_v25 }
   0xa   :  { %v98_v43 = vadd.f32 %v97_v35, %v96_v37  ;;  %v103_v53 = vsel %vm34_vm1, %v82_v40, 0.0  ;;  %v56_v54 = vsel %vm34_vm1, %v28_v44, 0.0  ;;  %v85_v58 = vmul.f32 %v26_v32, %v26_v32 }
   0xb   :  { %v45_v26 = vadd.f32 %v44_v19, %v43_v21  ;;  %v105_v59 = vsel %vm34_vm1, %v83_v46, 0.0  ;;  %v58_v60 = vsel %vm34_vm1, %v29_v50, 0.0  ;;  %v86_v0 = vmul.f32 %v27_v38, %v27_v38 }
   0xc   :  { %v100_v49 = vadd.f32 %v99_v41, %v98_v43  ;;  %v107_v1 = vsel %vm34_vm1, %v84_v52, 0.0  ;;  %v60_v2 = vsel %vm34_vm1, %v30_v56, 0.0  ;;  %v87_v6 = vmul.f32 %v28_v44, %v28_v44  ;;  %v75_v44 = vld [vmem:[#allocation3] sm:$0x1] }
   0xd   :  { %v47_v33 = vadd.f32 %v46_v23, %v45_v26  ;;  %v109_v7 = vsel %vm34_vm1, %v85_v58, 0.0  ;;  %v62_v8 = vsel %vm34_vm1, %v31_v62, 0.0  ;;  %v88_v11 = vmul.f32 %v29_v50, %v29_v50 }
   0xe   :  { %v102_v55 = vadd.f32 %v101_v47, %v100_v49  ;;  %v111_v12 = vsel %vm34_vm1, %v86_v0, 0.0  ;;  %v64_v13 = vsel %vm34_vm1, %v32_v4, 0.0  ;;  %v89_v16 = vmul.f32 %v30_v56, %v30_v56 }
   0xf   :  { %v49_v39 = vadd.f32 %v48_v30, %v47_v33  ;;  %v113_v17 = vsel %vm34_vm1, %v87_v6, 0.0  ;;  %v90_v20 = vmul.f32 %v31_v62, %v31_v62  ;;  %v115_v21 = vsel %vm34_vm1, %v88_v11, 0.0 }
  0x10   :  { %v104_v61 = vadd.f32 %v103_v53, %v102_v55  ;;  %v91_v24 = vmul.f32 %v32_v4, %v32_v4  ;;  %v117_v25 = vsel %vm34_vm1, %v89_v16, 0.0 }
  0x11   :  { %v51_v45 = vadd.f32 %v50_v36, %v49_v39  ;;  %v119_v28 = vsel %vm34_vm1, %v90_v20, 0.0  ;;  %v33_v36 = vld [vmem:[#allocation2] sm:$0x1] }
  0x12   :  { %v106_v3 = vadd.f32 %v105_v59, %v104_v61  ;;  %v121_v31 = vsel %vm34_vm1, %v91_v24, 0.0 }
  0x13   :  { %v53_v51 = vadd.f32 %v52_v42, %v51_v45 }
  0x14   :  { %v108_v9 = vadd.f32 %v107_v1, %v106_v3 }
  0x15   :  { %v55_v57 = vadd.f32 %v54_v48, %v53_v51 }
  0x16   :  { %v110_v14 = vadd.f32 %v109_v7, %v108_v9 }
  0x17   :  { %v57_v63 = vadd.f32 %v56_v54, %v55_v57 }
  0x18   :  { %v112_v18 = vadd.f32 %v111_v12, %v110_v14 }
  0x19   :  { %v59_v5 = vadd.f32 %v58_v60, %v57_v63 }
  0x1a   :  { %v114_v22 = vadd.f32 %v113_v17, %v112_v18 }
  0x1b   :  { %v61_v10 = vadd.f32 %v60_v2, %v59_v5 }
  0x1c   :  { %v116_v26 = vadd.f32 %v115_v21, %v114_v22 }
  0x1d   :  { %v63_v15 = vadd.f32 %v62_v8, %v61_v10 }
  0x1e   :  { %v118_v29 = vadd.f32 %v117_v25, %v116_v26 }
  0x1f   :  { %v65_v19 = vadd.f32 %v64_v13, %v63_v15 }
  0x20   :  { %v120_v32 = vadd.f32 %v119_v28, %v118_v29 }
  0x21   :  { %v66_v23 = vrot.slane %v65_v19, 4 }
  0x22   :  { %v122_v34 = vadd.f32 %v121_v31, %v120_v32 }
  0x23   :  { %v67_v27 = vadd.f32 %v66_v23, %v65_v19 }
  0x24   :  { %v123_v37 = vrot.slane %v122_v34, 4 }
  0x25   :  { %v68_v30 = vrot.slane %v67_v27, 2 }
  0x26   :  { %v124_v39 = vadd.f32 %v123_v37, %v122_v34 }
  0x27   :  { %v69_v33 = vadd.f32 %v68_v30, %v67_v27 }
  0x28   :  { %v125_v41 = vrot.slane %v124_v39, 2 }
  0x29   :  { %v70_v35 = vrot.slane %v69_v33, 1 }
  0x2a   :  { %v126_v42 = vadd.f32 %v125_v41, %v124_v39 }
  0x2b   :  { %v71_v38 = vadd.f32 %v70_v35, %v69_v33 }
  0x2c   :  { %v127_v43 = vrot.slane %v126_v42, 1 }
  0x2d   :  { %v72_v40 = vadd.f32 %v71_v38, %v33_v36 }
  0x2e   :  { %v128_v45 = vadd.f32 %v127_v43, %v126_v42 }
  0x2f   :  { %74 = vst.msk [vmem:[#allocation2] sm:$0x1] %vm14_vm0, %v72_v40 }
  0x30   :  { %v129_v46 = vadd.f32 %v128_v45, %v75_v44 }
  0x32   :  { %130 = vst.msk [vmem:[#allocation3] sm:$0x1] %vm14_vm0, %v129_v46 }
  0x36   :  { %v134_v47 = vld [vmem:[#allocation2] sm:$0x1] }
  0x37   :  { %v136_v48 = vmul.f32 0.0078125, %v134_v47 }
  0x39   :  { %v138_v49 = vmul.f32 128.0, %v136_v48  ;;  %143 = vst.msk [vmem:[%s273_s1] sm:$0x1] %vm14_vm0, %v136_v48  ;;  %v137_v51 = vld [vmem:[#allocation3] sm:$0x1] }
  0x3b   :  { %v139_v50 = vmul.f32 %v138_v49, %v136_v48 }
  0x3d   :  { %v140_v52 = vsub.f32 %v137_v51, %v139_v50 }
  0x3f   :  { %v142_v53 = vmul.f32 0.007874016, %v140_v52 }
  0x41   :  { %v144_v54 = vmax.f32 %v142_v53, 0.0 }
  0x43   :  { %162 = vrsqrt.f32 %v144_v54  ;;  %vm147_vm2 = vcmp.eq.f32.partialorder %v144_v54, inf  ;;  %v150_v57 = vand.u32 2147483648, %v144_v54  ;;  %vm149_vm3 = vcmp.eq.f32.partialorder %v144_v54, 0.0 }
  0x4d   :  { %v163_v55 = vpop.eup %162 }
  0x4e   :  { %v146_v56 = vmul.f32 %v163_v55, %v144_v54 }
  0x50   :  { %v148_v58 = vsel %vm147_vm2, %v144_v54, %v146_v56 }
  0x51   :  { %v151_v59 = vsel %vm149_vm3, %v150_v57, %v148_v58 }
  0x52   :  { %152 = vst.msk [vmem:[%s274_s2] sm:$0x1] %vm14_vm0, %v151_v59 }

// kernel: block_forward.10
= control target key start
LH: loop header
LB: loop body
LE: loop exit
PB: predicated region body
PF: predicated region fallthrough
CT: control target
= control target key end

     0   :  { %vm81_vm0 = vcmask 130048   ;;  %s548_s3 = inlined_call_operand.vmem [shape: f32[16,16], index: 3, kind: input, shape index: {}]   ;;  %s549_s0 = inlined_call_operand.vmem [shape: f32[128,16], index: 0, kind: input, shape index: {}]   ;;  %s550_s1 = inlined_call_operand.vmem [shape: f32[1,16], index: 1, kind: input, shape index: {}]   ;;  %s551_s2 = inlined_call_operand.vmem [shape: f32[1,16], index: 2, kind: input, shape index: {}]   ;;  %s552_s4 = inlined_call_operand.vmem [shape: f32[128,16], index: 4, kind: output, shape index: {}]  }
   0x1   :  { %v79_v0 = vld [vmem:[%s548_s3] sm:$0xff]  ;;  %v80_v1 = vld [vmem:[%s548_s3 + $0x8] sm:$0xff]  ;;  %v19_v11 = vld [vmem:[%s549_s0 + $0x10] sm:$0xff] }
   0x2   :  { %v17_v2 = vld [vmem:[%s549_s0] sm:$0xff]  ;;  %v359_v3 = vpack.c.bf16 %v80_v1, %v79_v0  ;;  %v18_v9 = vld [vmem:[%s549_s0 + $0x8] sm:$0xff]  ;;  %v27_v15 = vld [vmem:[%s549_s0 + $0x50] sm:$0xff] }
   0x3   :  { %v295_v4 = vld [vmem:[%s550_s1] ss:$0 sm:$0xff]  ;;  %v26_v10 = vld [vmem:[%s549_s0 + $0x48] sm:$0xff]  ;;  %v20_v16 = vld [vmem:[%s549_s0 + $0x18] sm:$0xff] }
   0x4   :  { %v405_v5 = vld [vmem:[%s551_s2] ss:$0 sm:$0xff]  ;;  %v40_v7 = vadd.f32 %v295_v4, %v17_v2  ;;  %360 = vmatprep.subr.bf16.mxu0 %v359_v3  ;;  %363 = vmatprep.subr.bf16.mxu1 %v359_v3  ;;  %v41_v12 = vadd.f32 %v295_v4, %v18_v9  ;;  %v49_v13 = vadd.f32 %v295_v4, %v26_v10  ;;  %v28_v17 = vld [vmem:[%s549_s0 + $0x58] sm:$0xff]  ;;  %v22_v23 = vld [vmem:[%s549_s0 + $0x28] sm:$0xff] }
   0x5   :  { %v25_v6 = vld [vmem:[%s549_s0 + $0x40] sm:$0xff]  ;;  %v42_v14 = vadd.f32 %v295_v4, %v19_v11  ;;  %362 = vmatpush3.bf16.msra.mxu0 %v359_v3  ;;  %364 = vmatpush3.bf16.msra.mxu1 %v359_v3  ;;  %v50_v20 = vadd.f32 %v295_v4, %v27_v15  ;;  %v43_v27 = vadd.f32 %v295_v4, %v20_v16  ;;  %v30_v28 = vld [vmem:[%s549_s0 + $0x68] sm:$0xff]  ;;  %v23_v32 = vld [vmem:[%s549_s0 + $0x30] sm:$0xff] }
   0x6   :  { %v48_v8 = vadd.f32 %v295_v4, %v25_v6  ;;  %v63_v18 = vmul.f32 %v405_v5, %v40_v7  ;;  %v21_v21 = vld [vmem:[%s549_s0 + $0x20] sm:$0xff]  ;;  %v64_v24 = vmul.f32 %v405_v5, %v41_v12  ;;  %v72_v25 = vmul.f32 %v405_v5, %v49_v13  ;;  %v31_v33 = vld [vmem:[%s549_s0 + $0x70] sm:$0xff]  ;;  %v24_v40 = vld [vmem:[%s549_s0 + $0x38] sm:$0xff] }
   0x7   :  { %v29_v22 = vld [vmem:[%s549_s0 + $0x60] sm:$0xff]  ;;  %v65_v26 = vmul.f32 %v405_v5, %v42_v14  ;;  %v73_v29 = vmul.f32 %v405_v5, %v50_v20  ;;  %v51_v30 = vadd.f32 %v295_v4, %v28_v17  ;;  %v44_v31 = vadd.f32 %v295_v4, %v21_v21  ;;  %v32_v41 = vld [vmem:[%s549_s0 + $0x78] sm:$0xff] }
   0x8   :  { %v71_v19 = vmul.f32 %v405_v5, %v48_v8  ;;  %335 = vmatprep.mubr.msk.f32.mxu0 %vm81_vm0, %v63_v18  ;;  %v66_v34 = vmul.f32 %v405_v5, %v43_v27  ;;  %v52_v35 = vadd.f32 %v295_v4, %v29_v22  ;;  %v45_v36 = vadd.f32 %v295_v4, %v22_v23 }
   0x9   :  { %336 = vmatmul.mubr.msk.f32.vlgmr.msra.gmra.mrb[0].mxu0 %vm81_vm0, %v64_v24  ;;  %v74_v37 = vmul.f32 %v405_v5, %v51_v30  ;;  %v67_v38 = vmul.f32 %v405_v5, %v44_v31  ;;  %v53_v39 = vadd.f32 %v295_v4, %v30_v28  ;;  %v46_v43 = vadd.f32 %v295_v4, %v23_v32 }
   0xa   :  { %347 = vmatprep.mubr.msk.f32.mxu1 %vm81_vm0, %v71_v19  ;;  %338 = vmatprep.mubr.msk.f32.mxu0 %vm81_vm0, %v65_v26  ;;  %v75_v42 = vmul.f32 %v405_v5, %v52_v35  ;;  %v54_v44 = vadd.f32 %v295_v4, %v31_v33  ;;  %v68_v45 = vmul.f32 %v405_v5, %v45_v36 }
   0xb   :  { %348 = vmatmul.mubr.msk.f32.vlgmr.msra.gmra.mrb[0].mxu1 %vm81_vm0, %v72_v25  ;;  %v76_v46 = vmul.f32 %v405_v5, %v53_v39  ;;  %v47_v47 = vadd.f32 %v295_v4, %v24_v40  ;;  %v55_v48 = vadd.f32 %v295_v4, %v32_v41  ;;  %v69_v49 = vmul.f32 %v405_v5, %v46_v43 }
   0xc   :  { %350 = vmatprep.mubr.msk.f32.mxu1 %vm81_vm0, %v73_v29  ;;  %v77_v50 = vmul.f32 %v405_v5, %v54_v44 }
   0xd   :  { %339 = vmatmul.mubr.msk.f32.gmra.mrb[2].mxu0 %vm81_vm0, %v66_v34  ;;  %v70_v51 = vmul.f32 %v405_v5, %v47_v47  ;;  %v78_v52 = vmul.f32 %v405_v5, %v55_v48 }
   0xe   :  { %341 = vmatprep.mubr.msk.f32.mxu0 %vm81_vm0, %v67_v38 }
   0xf   :  { %351 = vmatmul.mubr.msk.f32.gmra.mrb[2].mxu1 %vm81_vm0, %v74_v37 }
  0x10   :  { %353 = vmatprep.mubr.msk.f32.mxu1 %vm81_vm0, %v75_v42 }
  0x11   :  { %342 = vmatmul.mubr.msk.f32.gmra.mrb[4].mxu0 %vm81_vm0, %v68_v45 }
  0x12   :  { %344 = vmatprep.mubr.msk.f32.mxu0 %vm81_vm0, %v69_v49 }
  0x13   :  { %354 = vmatmul.mubr.msk.f32.gmra.mrb[4].mxu1 %vm81_vm0, %v76_v46 }
  0x14   :  { %356 = vmatprep.mubr.msk.f32.mxu1 %vm81_vm0, %v77_v50 }
  0x15   :  { %345 = vmatmul.mubr.msk.f32.gmra.mrb[6].mxu0 %vm81_vm0, %v70_v51 }
  0x17   :  { %357 = vmatmul.mubr.msk.f32.gmra.mrb[6].mxu1 %vm81_vm0, %v78_v52 }
  0xdc   :  { %v337_v53 = vpop.f32.mrb[0].mxu0 }
  0xdd   :  { %276 = vst.msk [vmem:[%s552_s4 + $0x8] sm:$0xff] %vm81_vm0, %v337_v53  ;;  %v196_v55 = vpop.f32.mrb[1].mxu0 }
  0xde   :  { %v349_v54 = vpop.f32.mrb[0].mxu1  ;;  %275 = vst.msk [vmem:[%s552_s4] sm:$0xff] %vm81_vm0, %v196_v55 }
  0xdf   :  { %284 = vst.msk [vmem:[%s552_s4 + $0x48] sm:$0xff] %vm81_vm0, %v349_v54  ;;  %v236_v56 = vpop.f32.mrb[1].mxu1 }
  0xe0   :  { %283 = vst.msk [vmem:[%s552_s4 + $0x40] sm:$0xff] %vm81_vm0, %v236_v56  ;;  %v340_v57 = vpop.f32.mrb[2].mxu0 }
  0xe1   :  { %278 = vst.msk [vmem:[%s552_s4 + $0x18] sm:$0xff] %vm81_vm0, %v340_v57  ;;  %v206_v59 = vpop.f32.mrb[3].mxu0 }
  0xe2   :  { %v352_v58 = vpop.f32.mrb[2].mxu1  ;;  %277 = vst.msk [vmem:[%s552_s4 + $0x10] sm:$0xff] %vm81_vm0, %v206_v59 }
  0xe3   :  { %286 = vst.msk [vmem:[%s552_s4 + $0x58] sm:$0xff] %vm81_vm0, %v352_v58  ;;  %v246_v60 = vpop.f32.mrb[3].mxu1 }
  0xe4   :  { %285 = vst.msk [vmem:[%s552_s4 + $0x50] sm:$0xff] %vm81_vm0, %v246_v60  ;;  %v343_v61 = vpop.f32.mrb[4].mxu0 }
  0xe5   :  { %280 = vst.msk [vmem:[%s552_s4 + $0x28] sm:$0xff] %vm81_vm0, %v343_v61  ;;  %v216_v63 = vpop.f32.mrb[5].mxu0 }
  0xe6   :  { %v355_v62 = vpop.f32.mrb[4].mxu1  ;;  %279 = vst.msk [vmem:[%s552_s4 + $0x20] sm:$0xff] %vm81_vm0, %v216_v63 }
  0xe7   :  { %288 = vst.msk [vmem:[%s552_s4 + $0x68] sm:$0xff] %vm81_vm0, %v355_v62  ;;  %v256_v0 = vpop.f32.mrb[5].mxu1 }
  0xe8   :  { %287 = vst.msk [vmem:[%s552_s4 + $0x60] sm:$0xff] %vm81_vm0, %v256_v0  ;;  %v346_v1 = vpop.f32.mrb[6].mxu0 }
  0xe9   :  { %282 = vst.msk [vmem:[%s552_s4 + $0x38] sm:$0xff] %vm81_vm0, %v346_v1  ;;  %v226_v3 = vpop.f32.mrb[7].mxu0 }
  0xea   :  { %v358_v2 = vpop.f32.mrb[6].mxu1  ;;  %281 = vst.msk [vmem:[%s552_s4 + $0x30] sm:$0xff] %vm81_vm0, %v226_v3 }
  0xeb   :  { %290 = vst.msk [vmem:[%s552_s4 + $0x78] sm:$0xff] %vm81_vm0, %v358_v2  ;;  %v266_v4 = vpop.f32.mrb[7].mxu1 }
  0xec   :  { %289 = vst.msk [vmem:[%s552_s4 + $0x70] sm:$0xff] %vm81_vm0, %v266_v4 }

// kernel: block_forward.11
= control target key start
LH: loop header
LB: loop body
LE: loop exit
PB: predicated region body
PF: predicated region fallthrough
CT: control target
= control target key end

     0   :  { %v2696_v1 = vmov 0   ;;  %vm232_vm0 = vcmask 1043456   ;;  %vm207_vm1 = vcmask 588800   ;;  %s3541_s1 = inlined_call_operand.vmem [shape: bf16[72,512], index: 1, kind: input, shape index: {}]   ;;  %s3542_s0 = inlined_call_operand.vmem [shape: bf16[128,72], index: 0, kind: input, shape index: {}]   ;;  %s3543_s3 = inlined_call_operand.vmem [shape: bf16[512,512], index: 3, kind: input, shape index: {}]   ;;  %s3544_s2 = inlined_call_operand.vmem [shape: f32[1,512], index: 2, kind: input, shape index: {}]   ;;  %s3545_s4 = inlined_call_operand.vmem [shape: f32[1,512], index: 4, kind: input, shape index: {}]   ;;  %s3546_s5 = inlined_call_operand.vmem [shape: bf16[128,512], index: 5, kind: output, shape index: {}]  }
   0x1   :  { %v2468_v0 = vld [vmem:[%s3541_s1 + $0x4] ss:$16 sps:$4 sm:$0xff]   ;;  %277 = vmatprep.mubr.bf16.mxu0 %v2696_v1  ;;  %390 = vmatprep.mubr.bf16.mxu1 %v2696_v1  ;;  %v2470_v2 = vld [vmem:[%s3541_s1] ss:$16 sps:$4 sm:$0xff]   ;;  %v2488_v12 = vld [vmem:[%s3541_s1 + $0xc] ss:$16 sps:$4 sm:$0xff]  }
   0x2   :  { %245 = vmatprep.subr.bf16.mxu0 %v2468_v0  ;;  %v2471_v3 = vld [vmem:[%s3541_s1 + $0x24] ss:$16 sps:$4 sm:$0xff]   ;;  %v2473_v4 = vld [vmem:[%s3541_s1 + $0x20] ss:$16 sps:$4 sm:$0xff]   ;;  %v2490_v13 = vld [vmem:[%s3541_s1 + $0x8] ss:$16 sps:$4 sm:$0xff]   ;;  %358 = vmatprep.subr.bf16.mxu1 %v2488_v12 }
   0x3   :  { %246 = vmatpush1.bf16.msra.mxu0 %v2470_v2  ;;  %v2474_v5 = vld [vmem:[%s3541_s1 + $0x44] ss:$16 sps:$4 sm:$0xff]   ;;  %v2476_v6 = vld [vmem:[%s3541_s1 + $0x40] ss:$16 sps:$4 sm:$0xff]   ;;  %v2491_v14 = vld [vmem:[%s3541_s1 + $0x2c] ss:$16 sps:$4 sm:$0xff]   ;;  %359 = vmatpush1.bf16.msra.mxu1 %v2490_v13 }
   0x4   :  { %247 = vmatprep.subr.bf16.mxu0 %v2471_v3  ;;  %v2477_v7 = vld [vmem:[%s3541_s1 + $0x64] ss:$16 sps:$4 sm:$0xff]   ;;  %v2479_v9 = vld [vmem:[%s3541_s1 + $0x60] ss:$16 sps:$4 sm:$0xff]   ;;  %v2493_v15 = vld [vmem:[%s3541_s1 + $0x28] ss:$16 sps:$4 sm:$0xff]   ;;  %360 = vmatprep.subr.bf16.mxu1 %v2491_v14 }
   0x5   :  { %v53_v8 = vld [vmem:[%s3541_s1 + $0x80] sm:$0xff]  ;;  %v2495_v17 = vld [vmem:[%s3541_s1 + $0x4c] ss:$16 sps:$4 sm:$0xff]   ;;  %v2497_v19 = vld [vmem:[%s3541_s1 + $0x48] ss:$16 sps:$4 sm:$0xff]  }
   0x6   :  { %v2126_v10 = vcombine.high %v53_v8, %v53_v8  ;;  %v2125_v11 = vcombine.low %v53_v8, %v53_v8  ;;  %v2482_v18 = vld [vmem:[%s3542_s0] sm:$0xff]   ;;  %v2498_v20 = vld [vmem:[%s3541_s1 + $0x6c] ss:$16 sps:$4 sm:$0xff]   ;;  %v2500_v24 = vld [vmem:[%s3541_s1 + $0x68] ss:$16 sps:$4 sm:$0xff]  }
   0x7   :  { %248 = vmatpush1.bf16.msra.mxu0 %v2473_v4  ;;  %361 = vmatpush1.bf16.msra.mxu1 %v2493_v15  ;;  %v2504_v21 = vld [vmem:[%s3543_s3] ss:$16 sps:$4 sm:$0xff]   ;;  %v2506_v22 = vld [vmem:[%s3543_s3 + $0x4] ss:$16 sps:$4 sm:$0xff]   ;;  %v54_v23 = vld [vmem:[%s3541_s1 + $0x88] sm:$0xff] }
   0x8   :  { %249 = vmatprep.subr.bf16.mxu0 %v2474_v5  ;;  %v234_v16 = vsel %vm232_vm0, %v2125_v11, 0  ;;  %362 = vmatprep.subr.bf16.mxu1 %v2495_v17  ;;  %v2512_v25 = vld [vmem:[%s3543_s3 + $0x24] ss:$16 sps:$4 sm:$0xff]   ;;  %v2128_v26 = vcombine.high %v54_v23, %v54_v23  ;;  %v2127_v27 = vcombine.low %v54_v23, %v54_v23  ;;  %v2510_v28 = vld [vmem:[%s3543_s3 + $0x20] ss:$16 sps:$4 sm:$0xff]   ;;  %v2483_v30 = vld [vmem:[%s3542_s0 + $0x8] sm:$0xff]  }
   0x9   :  { %v2518_v29 = vld [vmem:[%s3543_s3 + $0x44] ss:$16 sps:$4 sm:$0xff]   ;;  %v2509_v32 = vld [vmem:[%s3543_s3 + $0xc] ss:$16 sps:$4 sm:$0xff]   ;;  %v2516_v33 = vld [vmem:[%s3543_s3 + $0x40] ss:$16 sps:$4 sm:$0xff]  }
   0xa   :  { %v240_v31 = vsel %vm232_vm0, %v2127_v27, 0  ;;  %v2524_v34 = vld [vmem:[%s3543_s3 + $0x64] ss:$16 sps:$4 sm:$0xff]   ;;  %v2507_v35 = vld [vmem:[%s3543_s3 + $0x8] ss:$16 sps:$4 sm:$0xff]  }
   0xb   :  { %250 = vmatpush1.bf16.msra.mxu0 %v2476_v6  ;;  %363 = vmatpush1.bf16.msra.mxu1 %v2497_v19  ;;  %v2515_v36 = vld [vmem:[%s3543_s3 + $0x2c] ss:$16 sps:$4 sm:$0xff]   ;;  %v2522_v37 = vld [vmem:[%s3543_s3 + $0x60] ss:$16 sps:$4 sm:$0xff]   ;;  %v2530_v38 = vld [vmem:[%s3543_s3 + $0x84] ss:$16 sps:$4 sm:$0xff]  }
   0xc   :  { %251 = vmatprep.subr.bf16.mxu0 %v2477_v7  ;;  %364 = vmatprep.subr.bf16.mxu1 %v2498_v20  ;;  %v2484_v39 = vld [vmem:[%s3542_s0 + $0x10] sm:$0xff]   ;;  %v2513_v40 = vld [vmem:[%s3543_s3 + $0x28] ss:$16 sps:$4 sm:$0xff]   ;;  %v2521_v41 = vld [vmem:[%s3543_s3 + $0x4c] ss:$16 sps:$4 sm:$0xff]  }
   0xd   :  { %v2528_v42 = vld [vmem:[%s3543_s3 + $0x80] ss:$16 sps:$4 sm:$0xff]   ;;  %v2536_v43 = vld [vmem:[%s3543_s3 + $0xa4] ss:$16 sps:$4 sm:$0xff]   ;;  %v2519_v44 = vld [vmem:[%s3543_s3 + $0x48] ss:$16 sps:$4 sm:$0xff]  }
   0xe   :  { %v2527_v45 = vld [vmem:[%s3543_s3 + $0x6c] ss:$16 sps:$4 sm:$0xff]   ;;  %v2534_v46 = vld [vmem:[%s3543_s3 + $0xa0] ss:$16 sps:$4 sm:$0xff]   ;;  %v2542_v47 = vld [vmem:[%s3543_s3 + $0xc4] ss:$16 sps:$4 sm:$0xff]  }
   0xf   :  { %252 = vmatpush1.bf16.msra.mxu0 %v2479_v9  ;;  %365 = vmatpush1.bf16.msra.mxu1 %v2500_v24  ;;  %v2485_v48 = vld [vmem:[%s3542_s0 + $0x18] sm:$0xff]   ;;  %v2540_v51 = vld [vmem:[%s3543_s3 + $0xc0] ss:$16 sps:$4 sm:$0xff]   ;;  %v2548_v52 = vld [vmem:[%s3543_s3 + $0xe4] ss:$16 sps:$4 sm:$0xff]  }
  0x10   :  { %2129 = vmatprep.subr.msk.bf16.mxu0 %vm232_vm0, %v2126_v10  ;;  %2138 = vmatprep.subr.msk.bf16.mxu1 %vm232_vm0, %v2128_v26  ;;  %v2525_v49 = vld [vmem:[%s3543_s3 + $0x68] ss:$16 sps:$4 sm:$0xff]   ;;  %v2533_v50 = vld [vmem:[%s3543_s3 + $0x8c] ss:$16 sps:$4 sm:$0xff]   ;;  %v2546_v55 = vld [vmem:[%s3543_s3 + $0xe0] ss:$16 sps:$4 sm:$0xff]  }
  0x11   :  { %v2531_v53 = vld [vmem:[%s3543_s3 + $0x88] ss:$16 sps:$4 sm:$0xff]   ;;  %v2539_v54 = vld [vmem:[%s3543_s3 + $0xac] ss:$16 sps:$4 sm:$0xff]   ;;  %v2554_v56 = vld [vmem:[%s3543_s3 + $0x104] ss:$16 sps:$4 sm:$0xff]  }
  0x12   :  { %v2486_v57 = vld [vmem:[%s3542_s0 + $0x20] sm:$0xff]   ;;  %v2537_v58 = vld [vmem:[%s3543_s3 + $0xa8] ss:$16 sps:$4 sm:$0xff]   ;;  %v2545_v59 = vld [vmem:[%s3543_s3 + $0xcc] ss:$16 sps:$4 sm:$0xff]  }
  0x13   :  { %254 = vmatpush1.bf16.msra.mxu0 %v234_v16  ;;  %367 = vmatpush1.bf16.msra.mxu1 %v240_v31  ;;  %v2552_v60 = vld [vmem:[%s3543_s3 + $0x100] ss:$16 sps:$4 sm:$0xff]   ;;  %v2560_v61 = vld [vmem:[%s3543_s3 + $0x124] ss:$16 sps:$4 sm:$0xff]   ;;  %v2543_v62 = vld [vmem:[%s3543_s3 + $0xc8] ss:$16 sps:$4 sm:$0xff]  }
  0x14   :  { %1357 = vmatprep.subr.bf16.mxu0 %v2506_v22  ;;  %1583 = vmatprep.subr.bf16.mxu1 %v2509_v32  ;;  %v2487_v63 = vld [vmem:[%s3542_s0 + $0x28] sm:$0xff]   ;;  %v2558_v2 = vld [vmem:[%s3543_s3 + $0x120] ss:$16 sps:$4 sm:$0xff]   ;;  %v2566_v3 = vld [vmem:[%s3543_s3 + $0x144] ss:$16 sps:$4 sm:$0xff]  }
  0x15   :  { %v2551_v0 = vld [vmem:[%s3543_s3 + $0xec] ss:$16 sps:$4 sm:$0xff]   ;;  %v2549_v4 = vld [vmem:[%s3543_s3 + $0xe8] ss:$16 sps:$4 sm:$0xff]   ;;  %v2564_v6 = vld [vmem:[%s3543_s3 + $0x140] ss:$16 sps:$4 sm:$0xff]  }
  0x16   :  { %2130 = vmatmul.mubr.msk.bf16.vlgmr.msra.gmra.mrb[0].mxu0 %vm207_vm1, %v2482_v18  ;;  %2139 = vmatmul.mubr.msk.bf16.vlgmr.msra.gmra.mrb[0].mxu1 %vm207_vm1, %v2482_v18  ;;  %v2557_v5 = vld [vmem:[%s3543_s3 + $0x10c] ss:$16 sps:$4 sm:$0xff]   ;;  %v2572_v7 = vld [vmem:[%s3543_s3 + $0x164] ss:$16 sps:$4 sm:$0xff]   ;;  %v2555_v8 = vld [vmem:[%s3543_s3 + $0x108] ss:$16 sps:$4 sm:$0xff]  }
  0x17   :  { %287 = vmatprep.mubr.bf16.mxu0 %v2696_v1  ;;  %1358 = vmatpush1.bf16.msra.mxu0 %v2504_v21  ;;  %v2563_v9 = vld [vmem:[%s3543_s3 + $0x12c] ss:$16 sps:$4 sm:$0xff]   ;;  %v2570_v10 = vld [vmem:[%s3543_s3 + $0x160] ss:$16 sps:$4 sm:$0xff]   ;;  %v2578_v11 = vld [vmem:[%s3543_s3 + $0x184] ss:$16 sps:$4 sm:$0xff]  }
  0x18   :  { %1359 = vmatprep.subr.bf16.mxu0 %v2512_v25  ;;  %400 = vmatprep.mubr.bf16.mxu1 %v2696_v1  ;;  %v2494_v12 = vld [vmem:[%s3542_s0 + $0x30] sm:$0xff]   ;;  %v2561_v13 = vld [vmem:[%s3543_s3 + $0x128] ss:$16 sps:$4 sm:$0xff]   ;;  %v2569_v14 = vld [vmem:[%s3543_s3 + $0x14c] ss:$16 sps:$4 sm:$0xff]  }
  0x19   :  { %1584 = vmatpush1.bf16.msra.mxu1 %v2507_v35  ;;  %v2576_v15 = vld [vmem:[%s3543_s3 + $0x180] ss:$16 sps:$4 sm:$0xff]   ;;  %v2584_v16 = vld [vmem:[%s3543_s3 + $0x1a4] ss:$16 sps:$4 sm:$0xff]   ;;  %v2567_v17 = vld [vmem:[%s3543_s3 + $0x148] ss:$16 sps:$4 sm:$0xff]   ;;  %v57_v35 = vlaneseq }
  0x1a   :  { %1585 = vmatprep.subr.bf16.mxu1 %v2515_v36  ;;  %v2575_v18 = vld [vmem:[%s3543_s3 + $0x16c] ss:$16 sps:$4 sm:$0xff]   ;;  %v2582_v19 = vld [vmem:[%s3543_s3 + $0x1a0] ss:$16 sps:$4 sm:$0xff]   ;;  %v2573_v21 = vld [vmem:[%s3543_s3 + $0x168] ss:$16 sps:$4 sm:$0xff]  }
  0x1b   :  { %1360 = vmatpush1.bf16.msra.mxu0 %v2510_v28  ;;  %v2501_v20 = vld [vmem:[%s3542_s0 + $0x38] sm:$0xff]   ;;  %v2590_v26 = vld [vmem:[%s3543_s3 + $0x1c4] ss:$16 sps:$4 sm:$0xff]   ;;  %v2594_v31 = vld [vmem:[%s3543_s3 + $0x1e0] ss:$16 sps:$4 sm:$0xff]   ;;  %v3039_v36 = vshrl.u32 %v57_v35, 7 }
  0x1c   :  { %1361 = vmatprep.subr.bf16.mxu0 %v2518_v29  ;;  %v2581_v22 = vld [vmem:[%s3543_s3 + $0x18c] ss:$16 sps:$4 sm:$0xff]   ;;  %v2579_v23 = vld [vmem:[%s3543_s3 + $0x188] ss:$16 sps:$4 sm:$0xff]   ;;  %v2596_v29 = vld [vmem:[%s3543_s3 + $0x1e4] ss:$16 sps:$4 sm:$0xff]  }
  0x1d   :  { %1586 = vmatpush1.bf16.msra.mxu1 %v2513_v40  ;;  %v2587_v24 = vld [vmem:[%s3543_s3 + $0x1ac] ss:$16 sps:$4 sm:$0xff]   ;;  %v2585_v25 = vld [vmem:[%s3543_s3 + $0x1a8] ss:$16 sps:$4 sm:$0xff]  }
  0x1e   :  { %2131 = vmatmul.mubr.msk.bf16.gmra.mrb[4].mxu0 %vm207_vm1, %v2483_v30  ;;  %1587 = vmatprep.subr.bf16.mxu1 %v2521_v41  ;;  %v2593_v27 = vld [vmem:[%s3543_s3 + $0x1cc] ss:$16 sps:$4 sm:$0xff]   ;;  %v2591_v28 = vld [vmem:[%s3543_s3 + $0x1c8] ss:$16 sps:$4 sm:$0xff]  }
  0x1f   :  { %297 = vmatprep.mubr.bf16.mxu0 %v2696_v1  ;;  %1362 = vmatpush1.bf16.msra.mxu0 %v2516_v33  ;;  %v2597_v32 = vld [vmem:[%s3543_s3 + $0x1e8] ss:$16 sps:$4 sm:$0xff]   ;;  %v2602_v33 = vld [vmem:[%s3543_s3 + $0x204] ss:$16 sps:$4 sm:$0xff]  }
  0x20   :  { %1363 = vmatprep.subr.bf16.mxu0 %v2524_v34  ;;  %2140 = vmatmul.mubr.msk.bf16.gmra.mrb[4].mxu1 %vm207_vm1, %v2483_v30  ;;  %v2599_v30 = vld [vmem:[%s3543_s3 + $0x1ec] ss:$16 sps:$4 sm:$0xff]  }
  0x21   :  { %410 = vmatprep.mubr.bf16.mxu1 %v2696_v1  ;;  %1588 = vmatpush1.bf16.msra.mxu1 %v2519_v44  ;;  %v2605_v34 = vld [vmem:[%s3543_s3 + $0x20c] ss:$16 sps:$4 sm:$0xff]  }
  0x22   :  { %1589 = vmatprep.subr.bf16.mxu1 %v2527_v45 }
  0x23   :  { %1364 = vmatpush1.bf16.msra.mxu0 %v2522_v37  ;;  %v59_v37 = vsub.s32 0, %v3039_v36 }
  0x24   :  { %1365 = vmatprep.subr.bf16.mxu0 %v2530_v38  ;;  %v55_v38 = vld [vmem:[%s3544_s2] sm:$0xf] }
  0x25   :  { %1590 = vmatpush1.bf16.msra.mxu1 %v2525_v49  ;;  %v3048_v40 = vrot.slane %v55_v38, %v59_v37 }
  0x26   :  { %2132 = vmatmul.mubr.msk.bf16.gmra.mrb[8].mxu0 %vm207_vm1, %v2484_v39  ;;  %1591 = vmatprep.subr.bf16.mxu1 %v2533_v50 }
  0x27   :  { %307 = vmatprep.mubr.bf16.mxu0 %v2696_v1  ;;  %1366 = vmatpush1.bf16.msra.mxu0 %v2528_v42 }
  0x28   :  { %1367 = vmatprep.subr.bf16.mxu0 %v2536_v43  ;;  %2141 = vmatmul.mubr.msk.bf16.gmra.mrb[8].mxu1 %vm207_vm1, %v2484_v39  ;;  %v63_v39 = vsub.s32 1, %v3039_v36 }
  0x29   :  { %420 = vmatprep.mubr.bf16.mxu1 %v2696_v1  ;;  %1592 = vmatpush1.bf16.msra.mxu1 %v2531_v53 }
  0x2a   :  { %1593 = vmatprep.subr.bf16.mxu1 %v2539_v54  ;;  %v3052_v41 = vrot.slane %v55_v38, %v63_v39 }
  0x2b   :  { %1368 = vmatpush1.bf16.msra.mxu0 %v2534_v46 }
  0x2c   :  { %1369 = vmatprep.subr.bf16.mxu0 %v2542_v47 }
  0x2d   :  { %1594 = vmatpush1.bf16.msra.mxu1 %v2537_v58 }
  0x2e   :  { %2133 = vmatmul.mubr.msk.bf16.gmra.mrb[12].mxu0 %vm207_vm1, %v2485_v48  ;;  %1595 = vmatprep.subr.bf16.mxu1 %v2545_v59  ;;  %v2600_v59 = vld [vmem:[%s3543_s3 + $0x200] ss:$16 sps:$4 sm:$0xff]  }
  0x2f   :  { %317 = vmatprep.mubr.bf16.mxu0 %v2696_v1  ;;  %1370 = vmatpush1.bf16.msra.mxu0 %v2540_v51 }
  0x30   :  { %1371 = vmatprep.subr.bf16.mxu0 %v2548_v52  ;;  %2142 = vmatmul.mubr.msk.bf16.gmra.mrb[12].mxu1 %vm207_vm1, %v2485_v48  ;;  %v67_v52 = vsub.s32 2, %v3039_v36 }
  0x31   :  { %430 = vmatprep.mubr.bf16.mxu1 %v2696_v1  ;;  %1596 = vmatpush1.bf16.msra.mxu1 %v2543_v62 }
  0x32   :  { %1597 = vmatprep.subr.bf16.mxu1 %v2551_v0  ;;  %v2611_v0 = vld [vmem:[%s3543_s3 + $0x22c] ss:$16 sps:$4 sm:$0xff]  }
  0x33   :  { %1372 = vmatpush1.bf16.msra.mxu0 %v2546_v55  ;;  %v71_v55 = vsub.s32 3, %v3039_v36 }
  0x34   :  { %1373 = vmatprep.subr.bf16.mxu0 %v2554_v56 }
  0x35   :  { %1598 = vmatpush1.bf16.msra.mxu1 %v2549_v4 }
  0x36   :  { %2134 = vmatmul.mubr.msk.bf16.gmra.mrb[16].mxu0 %vm207_vm1, %v2486_v57  ;;  %1599 = vmatprep.subr.bf16.mxu1 %v2557_v5  ;;  %v3080_v5 = vrot.slane %v55_v38, %v71_v55 }
  0x37   :  { %327 = vmatprep.mubr.bf16.mxu0 %v2696_v1  ;;  %1374 = vmatpush1.bf16.msra.mxu0 %v2552_v60  ;;  %v2603_v60 = vld [vmem:[%s3543_s3 + $0x208] ss:$16 sps:$4 sm:$0xff]  }
  0x38   :  { %1375 = vmatprep.subr.bf16.mxu0 %v2560_v61  ;;  %2143 = vmatmul.mubr.msk.bf16.gmra.mrb[16].mxu1 %vm207_vm1, %v2486_v57 }
  0x39   :  { %440 = vmatprep.mubr.bf16.mxu1 %v2696_v1  ;;  %1600 = vmatpush1.bf16.msra.mxu1 %v2555_v8  ;;  %v2606_v8 = vld [vmem:[%s3543_s3 + $0x220] ss:$16 sps:$4 sm:$0xff]  }
  0x3a   :  { %1601 = vmatprep.subr.bf16.mxu1 %v2563_v9 }
  0x3b   :  { %1376 = vmatpush1.bf16.msra.mxu0 %v2558_v2  ;;  %v3075_v2 = vrot.slane %v55_v38, %v67_v52 }
  0x3c   :  { %1377 = vmatprep.subr.bf16.mxu0 %v2566_v3 }
  0x3d   :  { %1602 = vmatpush1.bf16.msra.mxu1 %v2561_v13 }
  0x3e   :  { %2135 = vmatmul.mubr.msk.bf16.gmra.mrb[20].mxu0 %vm207_vm1, %v2487_v63  ;;  %1603 = vmatprep.subr.bf16.mxu1 %v2569_v14 }
  0x3f   :  { %337 = vmatprep.mubr.bf16.mxu0 %v2696_v1  ;;  %1378 = vmatpush1.bf16.msra.mxu0 %v2564_v6 }
  0x40   :  { %1379 = vmatprep.subr.bf16.mxu0 %v2572_v7  ;;  %2144 = vmatmul.mubr.msk.bf16.gmra.mrb[20].mxu1 %vm207_vm1, %v2487_v63  ;;  %v2608_v63 = vld [vmem:[%s3543_s3 + $0x224] ss:$16 sps:$4 sm:$0xff]  }
  0x41   :  { %450 = vmatprep.mubr.bf16.mxu1 %v2696_v1  ;;  %1604 = vmatpush1.bf16.msra.mxu1 %v2567_v17 }
  0x42   :  { %1605 = vmatprep.subr.bf16.mxu1 %v2575_v18 }
  0x43   :  { %1380 = vmatpush1.bf16.msra.mxu0 %v2570_v10  ;;  %v2609_v10 = vld [vmem:[%s3543_s3 + $0x228] ss:$16 sps:$4 sm:$0xff]  }
  0x44   :  { %1381 = vmatprep.subr.bf16.mxu0 %v2578_v11  ;;  %v2614_v11 = vld [vmem:[%s3543_s3 + $0x244] ss:$16 sps:$4 sm:$0xff]  }
  0x45   :  { %1606 = vmatpush1.bf16.msra.mxu1 %v2573_v21 }
  0x46   :  { %2136 = vmatmul.mubr.msk.bf16.gmra.mrb[24].mxu0 %vm207_vm1, %v2494_v12  ;;  %1607 = vmatprep.subr.bf16.mxu1 %v2581_v22 }
  0x47   :  { %347 = vmatprep.mubr.bf16.mxu0 %v2696_v1  ;;  %1382 = vmatpush1.bf16.msra.mxu0 %v2576_v15  ;;  %v2617_v15 = vld [vmem:[%s3543_s3 + $0x24c] ss:$16 sps:$4 sm:$0xff]  }
  0x48   :  { %1383 = vmatprep.subr.bf16.mxu0 %v2584_v16  ;;  %2145 = vmatmul.mubr.msk.bf16.gmra.mrb[24].mxu1 %vm207_vm1, %v2494_v12 }
  0x49   :  { %460 = vmatprep.mubr.bf16.mxu1 %v2696_v1  ;;  %1608 = vmatpush1.bf16.msra.mxu1 %v2579_v23  ;;  %v2588_v1 = vld [vmem:[%s3543_s3 + $0x1c0] ss:$16 sps:$4 sm:$0xff]  }
  0x4a   :  { %1609 = vmatprep.subr.bf16.mxu1 %v2587_v24 }
  0x4b   :  { %1384 = vmatpush1.bf16.msra.mxu0 %v2582_v19 }
  0x4c   :  { %1385 = vmatprep.subr.bf16.mxu0 %v2590_v26 }
  0x4d   :  { %1610 = vmatpush1.bf16.msra.mxu1 %v2585_v25 }
  0x4e   :  { %2137 = vmatmul.mubr.msk.bf16.gmra.mrb[28].mxu0 %vm207_vm1, %v2501_v20  ;;  %1611 = vmatprep.subr.bf16.mxu1 %v2593_v27 }
  0x4f   :  { %1386 = vmatpush1.bf16.msra.mxu0 %v2588_v1  ;;  %v2612_v1 = vld [vmem:[%s3543_s3 + $0x240] ss:$16 sps:$4 sm:$0xff]  }
  0x50   :  { %2146 = vmatmul.mubr.msk.bf16.gmra.mrb[28].mxu1 %vm207_vm1, %v2501_v20  ;;  %1387 = vmatprep.subr.bf16.mxu0 %v2596_v29 }
  0x51   :  { %1612 = vmatpush1.bf16.msra.mxu1 %v2591_v28  ;;  %v2615_v28 = vld [vmem:[%s3543_s3 + $0x248] ss:$16 sps:$4 sm:$0xff]  }
  0x52   :  { %1613 = vmatprep.subr.bf16.mxu1 %v2599_v30 }
  0x53   :  { %1388 = vmatpush1.bf16.msra.mxu0 %v2594_v31 }
  0x54   :  { %1470 = vmatprep.subr.bf16.mxu0 %v2602_v33  ;;  %v2620_v33 = vld [vmem:[%s3543_s3 + $0x264] ss:$16 sps:$4 sm:$0xff]  }
  0x55   :  { %1614 = vmatpush1.bf16.msra.mxu1 %v2597_v32 }
  0x56   :  { %1696 = vmatprep.subr.bf16.mxu1 %v2605_v34  ;;  %v2623_v34 = vld [vmem:[%s3543_s3 + $0x26c] ss:$16 sps:$4 sm:$0xff]  }
  0xe9   :  { %v279_v42 = vpop.f32.mrb[0].mxu0  ;;  %v392_v12 = vpop.f32.mrb[0].mxu1 }
  0xea   :  { %v280_v43 = vadd.f32 %v279_v42, %v3048_v40  ;;  %v281_v44 = vpop.f32.mrb[1].mxu0  ;;  %v393_v16 = vadd.f32 %v392_v12, %v3075_v2  ;;  %v394_v17 = vpop.f32.mrb[1].mxu1 }
  0xeb   :  { %v282_v45 = vadd.f32 %v281_v44, %v3052_v41  ;;  %v283_v46 = vpop.f32.mrb[2].mxu0  ;;  %v395_v20 = vadd.f32 %v394_v17, %v3080_v5  ;;  %v396_v21 = vpop.f32.mrb[2].mxu1 }
  0xec   :  { %v284_v47 = vadd.f32 %v283_v46, %v3048_v40  ;;  %v285_v48 = vpop.f32.mrb[3].mxu0  ;;  %v471_v50 = vmax.f32 %v280_v43, 0.0  ;;  %v473_v23 = vmax.f32 %v393_v16, 0.0  ;;  %v397_v24 = vadd.f32 %v396_v21, %v3075_v2  ;;  %v398_v25 = vpop.f32.mrb[3].mxu1  ;;  %v2618_v46 = vld [vmem:[%s3543_s3 + $0x260] ss:$16 sps:$4 sm:$0xff]  }
  0xed   :  { %v286_v49 = vadd.f32 %v285_v48, %v3052_v41  ;;  %v472_v53 = vmax.f32 %v282_v45, 0.0  ;;  %v474_v29 = vmax.f32 %v395_v20, 0.0  ;;  %v399_v30 = vadd.f32 %v398_v25, %v3080_v5  ;;  %v2635_v16 = vld [vmem:[%s3543_s3 + $0x2ac] ss:$16 sps:$4 sm:$0xff]  }
  0xee   :  { %v475_v51 = vmax.f32 %v284_v47, 0.0  ;;  %v477_v35 = vmax.f32 %v397_v24, 0.0 }
  0xef   :  { %v476_v54 = vmax.f32 %v286_v49, 0.0  ;;  %v478_v43 = vmax.f32 %v399_v30, 0.0  ;;  %v2621_v49 = vld [vmem:[%s3543_s3 + $0x268] ss:$16 sps:$4 sm:$0xff]  }
  0xf0   :  { %v535_v56 = vpack.c.bf16 %v475_v51, %v471_v50  ;;  %v3118_v47 = vpack.c.bf16 %v477_v35, %v473_v23  ;;  %v2626_v50 = vld [vmem:[%s3543_s3 + $0x284] ss:$16 sps:$4 sm:$0xff]   ;;  %v2630_v23 = vld [vmem:[%s3543_s3 + $0x2a0] ss:$16 sps:$4 sm:$0xff]  }
  0xf1   :  { %v536_v57 = vpack.c.bf16 %v476_v54, %v472_v53  ;;  %v289_v58 = vpop.f32.mrb[4].mxu0  ;;  %v3127_v51 = vpack.c.bf16 %v478_v43, %v474_v29 }
  0xf2   :  { %v290_v61 = vadd.f32 %v289_v58, %v3048_v40  ;;  %v291_v62 = vpop.f32.mrb[5].mxu0 }
  0xf3   :  { %v292_v3 = vadd.f32 %v291_v62, %v3052_v41  ;;  %v293_v4 = vpop.f32.mrb[6].mxu0  ;;  %1389 = vmatprep.mubr.bf16.mxu0 %v536_v57  ;;  %1615 = vmatprep.mubr.bf16.mxu1 %v536_v57  ;;  %v402_v53 = vpop.f32.mrb[4].mxu1  ;;  %v2629_v57 = vld [vmem:[%s3543_s3 + $0x28c] ss:$16 sps:$4 sm:$0xff]  }
  0xf4   :  { %v294_v6 = vadd.f32 %v293_v4, %v3048_v40  ;;  %v295_v7 = vpop.f32.mrb[7].mxu0  ;;  %1390 = vmatmul.mubr.bf16.vlgmr.msra.gmra.mrb[32].mxu0 %v535_v56  ;;  %1616 = vmatmul.mubr.bf16.vlgmr.msra.gmra.mrb[32].mxu1 %v535_v56  ;;  %v479_v13 = vmax.f32 %v290_v61, 0.0  ;;  %v403_v58 = vadd.f32 %v402_v53, %v3075_v2  ;;  %v2639_v53 = vld [vmem:[%s3543_s3 + $0x2c8] ss:$16 sps:$4 sm:$0xff]  }
  0xf5   :  { %v296_v9 = vadd.f32 %v295_v7, %v3052_v41  ;;  %1471 = vmatpush1.bf16.msra.mxu0 %v2600_v59  ;;  %1697 = vmatpush1.bf16.msra.mxu1 %v2603_v60  ;;  %v480_v18 = vmax.f32 %v292_v3, 0.0  ;;  %v404_v59 = vpop.f32.mrb[5].mxu1 }
  0xf6   :  { %v483_v14 = vmax.f32 %v294_v6, 0.0  ;;  %1472 = vmatprep.subr.bf16.mxu0 %v2608_v63  ;;  %1698 = vmatprep.subr.bf16.mxu1 %v2611_v0  ;;  %v405_v62 = vadd.f32 %v404_v59, %v3080_v5  ;;  %v406_v63 = vpop.f32.mrb[6].mxu1  ;;  %v481_v3 = vmax.f32 %v403_v58, 0.0  ;;  %v2644_v59 = vld [vmem:[%s3543_s3 + $0x2e4] ss:$16 sps:$4 sm:$0xff]  }
  0xf7   :  { %v484_v19 = vmax.f32 %v296_v9, 0.0  ;;  %v407_v4 = vadd.f32 %v406_v63, %v3075_v2  ;;  %v408_v6 = vpop.f32.mrb[7].mxu1  ;;  %v2624_v9 = vld [vmem:[%s3543_s3 + $0x280] ss:$16 sps:$4 sm:$0xff]  }
  0xf8   :  { %v539_v22 = vpack.c.bf16 %v483_v14, %v479_v13  ;;  %v409_v12 = vadd.f32 %v408_v6, %v3080_v5  ;;  %v2642_v6 = vld [vmem:[%s3543_s3 + $0x2e0] ss:$16 sps:$4 sm:$0xff]  }
  0xf9   :  { %v540_v26 = vpack.c.bf16 %v484_v19, %v480_v18  ;;  %1473 = vmatpush1.bf16.msra.mxu0 %v2606_v8  ;;  %1699 = vmatpush1.bf16.msra.mxu1 %v2609_v10  ;;  %v299_v27 = vpop.f32.mrb[8].mxu0  ;;  %v2627_v10 = vld [vmem:[%s3543_s3 + $0x288] ss:$16 sps:$4 sm:$0xff]   ;;  %v485_v17 = vmax.f32 %v407_v4, 0.0 }
  0xfa   :  { %v300_v31 = vadd.f32 %v299_v27, %v3048_v40  ;;  %v301_v32 = vpop.f32.mrb[9].mxu0  ;;  %1474 = vmatprep.subr.bf16.mxu0 %v2614_v11  ;;  %1700 = vmatprep.subr.bf16.mxu1 %v2617_v15  ;;  %v482_v11 = vmax.f32 %v405_v62, 0.0  ;;  %v2632_v15 = vld [vmem:[%s3543_s3 + $0x2a4] ss:$16 sps:$4 sm:$0xff]   ;;  %v486_v20 = vmax.f32 %v409_v12, 0.0 }
  0xfb   :  { %v302_v38 = vadd.f32 %v301_v32, %v3052_v41  ;;  %v303_v42 = vpop.f32.mrb[10].mxu0  ;;  %1399 = vmatprep.mubr.bf16.mxu0 %v540_v26  ;;  %1625 = vmatprep.mubr.bf16.mxu1 %v540_v26  ;;  %v3154_v24 = vpack.c.bf16 %v485_v17, %v481_v3  ;;  %v2633_v26 = vld [vmem:[%s3543_s3 + $0x2a8] ss:$16 sps:$4 sm:$0xff]   ;;  %v2638_v27 = vld [vmem:[%s3543_s3 + $0x2c4] ss:$16 sps:$4 sm:$0xff]  }
  0xfc   :  { %v304_v44 = vadd.f32 %v303_v42, %v3048_v40  ;;  %v305_v45 = vpop.f32.mrb[11].mxu0  ;;  %1400 = vmatmul.mubr.bf16.gmra.mrb[36].mxu0 %v539_v22  ;;  %1626 = vmatmul.mubr.bf16.gmra.mrb[36].mxu1 %v539_v22  ;;  %v487_v54 = vmax.f32 %v300_v31, 0.0  ;;  %v2641_v31 = vld [vmem:[%s3543_s3 + $0x2cc] ss:$16 sps:$4 sm:$0xff]  }
  0xfd   :  { %v306_v48 = vadd.f32 %v305_v45, %v3052_v41  ;;  %1475 = vmatpush1.bf16.msra.mxu0 %v2612_v1  ;;  %1701 = vmatpush1.bf16.msra.mxu1 %v2615_v28  ;;  %v488_v60 = vmax.f32 %v302_v38, 0.0  ;;  %v3163_v1 = vpack.c.bf16 %v486_v20, %v482_v11  ;;  %v412_v28 = vpop.f32.mrb[8].mxu1 }
  0xfe   :  { %v491_v56 = vmax.f32 %v304_v44, 0.0  ;;  %1476 = vmatprep.subr.bf16.mxu0 %v2620_v33  ;;  %1702 = vmatprep.subr.bf16.mxu1 %v2623_v34  ;;  %v413_v32 = vadd.f32 %v412_v28, %v3075_v2  ;;  %v414_v33 = vpop.f32.mrb[9].mxu1 }
  0xff   :  { %v492_v61 = vmax.f32 %v306_v48, 0.0  ;;  %v415_v38 = vadd.f32 %v414_v33, %v3080_v5  ;;  %v416_v42 = vpop.f32.mrb[10].mxu1 }
 0x100   :  { %v543_v0 = vpack.c.bf16 %v491_v56, %v487_v54  ;;  %v489_v44 = vmax.f32 %v413_v32, 0.0  ;;  %v417_v45 = vadd.f32 %v416_v42, %v3075_v2 }
 0x101   :  { %v544_v7 = vpack.c.bf16 %v492_v61, %v488_v60  ;;  %1477 = vmatpush1.bf16.msra.mxu0 %v2618_v46  ;;  %1703 = vmatpush1.bf16.msra.mxu1 %v2621_v49  ;;  %v309_v8 = vpop.f32.mrb[12].mxu0  ;;  %v418_v46 = vpop.f32.mrb[11].mxu1  ;;  %v490_v54 = vmax.f32 %v415_v38, 0.0  ;;  %v2647_v60 = vld [vmem:[%s3543_s3 + $0x2ec] ss:$16 sps:$4 sm:$0xff]  }
 0x102   :  { %v310_v13 = vadd.f32 %v309_v8, %v3048_v40  ;;  %v311_v14 = vpop.f32.mrb[13].mxu0  ;;  %1478 = vmatprep.subr.bf16.mxu0 %v2626_v50  ;;  %1704 = vmatprep.subr.bf16.mxu1 %v2629_v57  ;;  %v2636_v50 = vld [vmem:[%s3543_s3 + $0x2c0] ss:$16 sps:$4 sm:$0xff]   ;;  %v419_v56 = vadd.f32 %v418_v46, %v3080_v5  ;;  %v493_v61 = vmax.f32 %v417_v45, 0.0  ;;  %v2659_v38 = vld [vmem:[%s3543_s3 + $0x32c] ss:$16 sps:$4 sm:$0xff]  }
 0x103   :  { %v312_v18 = vadd.f32 %v311_v14, %v3052_v41  ;;  %v313_v19 = vpop.f32.mrb[14].mxu0  ;;  %1409 = vmatprep.mubr.bf16.mxu0 %v544_v7  ;;  %1635 = vmatprep.mubr.bf16.mxu1 %v544_v7  ;;  %v422_v12 = vpop.f32.mrb[12].mxu1 }
 0x104   :  { %v314_v21 = vadd.f32 %v313_v19, %v3048_v40  ;;  %v315_v22 = vpop.f32.mrb[15].mxu0  ;;  %1410 = vmatmul.mubr.bf16.gmra.mrb[40].mxu0 %v543_v0  ;;  %1636 = vmatmul.mubr.bf16.gmra.mrb[40].mxu1 %v543_v0  ;;  %v495_v29 = vmax.f32 %v310_v13, 0.0  ;;  %v494_v0 = vmax.f32 %v419_v56, 0.0  ;;  %v3190_v7 = vpack.c.bf16 %v493_v61, %v489_v44  ;;  %v424_v17 = vpop.f32.mrb[13].mxu1  ;;  %v2662_v56 = vld [vmem:[%s3543_s3 + $0x344] ss:$16 sps:$4 sm:$0xff]  }
 0x105   :  { %v316_v25 = vadd.f32 %v315_v22, %v3052_v41  ;;  %1479 = vmatpush1.bf16.msra.mxu0 %v2624_v9  ;;  %1705 = vmatpush1.bf16.msra.mxu1 %v2627_v10  ;;  %v496_v34 = vmax.f32 %v312_v18, 0.0  ;;  %v2645_v9 = vld [vmem:[%s3543_s3 + $0x2e8] ss:$16 sps:$4 sm:$0xff]   ;;  %v2650_v10 = vld [vmem:[%s3543_s3 + $0x304] ss:$16 sps:$4 sm:$0xff]   ;;  %v425_v20 = vadd.f32 %v424_v17, %v3080_v5 }
 0x106   :  { %v499_v30 = vmax.f32 %v314_v21, 0.0  ;;  %1480 = vmatprep.subr.bf16.mxu0 %v2632_v15  ;;  %1706 = vmatprep.subr.bf16.mxu1 %v2635_v16  ;;  %v3199_v11 = vpack.c.bf16 %v494_v0, %v490_v54  ;;  %v2653_v15 = vld [vmem:[%s3543_s3 + $0x30c] ss:$16 sps:$4 sm:$0xff]   ;;  %v423_v16 = vadd.f32 %v422_v12, %v3075_v2  ;;  %v426_v21 = vpop.f32.mrb[14].mxu1  ;;  %v2657_v54 = vld [vmem:[%s3543_s3 + $0x328] ss:$16 sps:$4 sm:$0xff]  }
 0x107   :  { %v500_v35 = vmax.f32 %v316_v25, 0.0  ;;  %v427_v25 = vadd.f32 %v426_v21, %v3075_v2  ;;  %v2665_v61 = vld [vmem:[%s3543_s3 + $0x34c] ss:$16 sps:$4 sm:$0xff]   ;;  %v2668_v21 = vld [vmem:[%s3543_s3 + $0x364] ss:$16 sps:$4 sm:$0xff]  }
 0x108   :  { %v547_v43 = vpack.c.bf16 %v499_v30, %v495_v29  ;;  %v2648_v29 = vld [vmem:[%s3543_s3 + $0x300] ss:$16 sps:$4 sm:$0xff]   ;;  %v2651_v30 = vld [vmem:[%s3543_s3 + $0x308] ss:$16 sps:$4 sm:$0xff]  }
 0x109   :  { %v548_v48 = vpack.c.bf16 %v500_v35, %v496_v34  ;;  %1481 = vmatpush1.bf16.msra.mxu0 %v2630_v23  ;;  %1707 = vmatpush1.bf16.msra.mxu1 %v2633_v26  ;;  %v319_v49 = vpop.f32.mrb[16].mxu0  ;;  %v497_v23 = vmax.f32 %v423_v16, 0.0  ;;  %v428_v26 = vpop.f32.mrb[15].mxu1  ;;  %v2656_v35 = vld [vmem:[%s3543_s3 + $0x324] ss:$16 sps:$4 sm:$0xff]   ;;  %v501_v42 = vmax.f32 %v427_v25, 0.0 }
 0x10a   :  { %v320_v57 = vadd.f32 %v319_v49, %v3048_v40  ;;  %v321_v58 = vpop.f32.mrb[17].mxu0  ;;  %1482 = vmatprep.subr.bf16.mxu0 %v2638_v27  ;;  %1708 = vmatprep.subr.bf16.mxu1 %v2641_v31  ;;  %v498_v31 = vmax.f32 %v425_v20, 0.0  ;;  %v429_v32 = vadd.f32 %v428_v26, %v3080_v5  ;;  %v2654_v49 = vld [vmem:[%s3543_s3 + $0x320] ss:$16 sps:$4 sm:$0xff]   ;;  %v2663_v16 = vld [vmem:[%s3543_s3 + $0x348] ss:$16 sps:$4 sm:$0xff]  }
 0x10b   :  { %v322_v62 = vadd.f32 %v321_v58, %v3052_v41  ;;  %v323_v63 = vpop.f32.mrb[18].mxu0  ;;  %1419 = vmatprep.mubr.bf16.mxu0 %v548_v48  ;;  %1645 = vmatprep.mubr.bf16.mxu1 %v548_v48  ;;  %v432_v58 = vpop.f32.mrb[16].mxu1 }
 0x10c   :  { %v324_v3 = vadd.f32 %v323_v63, %v3048_v40  ;;  %v325_v4 = vpop.f32.mrb[19].mxu0  ;;  %1420 = vmatmul.mubr.bf16.gmra.mrb[44].mxu0 %v547_v43  ;;  %1646 = vmatmul.mubr.bf16.gmra.mrb[44].mxu1 %v547_v43  ;;  %v503_v13 = vmax.f32 %v320_v57, 0.0  ;;  %v502_v45 = vmax.f32 %v429_v32, 0.0  ;;  %v434_v63 = vpop.f32.mrb[17].mxu1 }
 0x10d   :  { %v326_v8 = vadd.f32 %v325_v4, %v3052_v41  ;;  %1483 = vmatpush1.bf16.msra.mxu0 %v2636_v50  ;;  %1709 = vmatpush1.bf16.msra.mxu1 %v2639_v53  ;;  %v504_v18 = vmax.f32 %v322_v62, 0.0  ;;  %v3226_v50 = vpack.c.bf16 %v501_v42, %v497_v23  ;;  %v433_v62 = vadd.f32 %v432_v58, %v3075_v2 }
 0x10e   :  { %v507_v14 = vmax.f32 %v324_v3, 0.0  ;;  %1484 = vmatprep.subr.bf16.mxu0 %v2644_v59  ;;  %1710 = vmatprep.subr.bf16.mxu1 %v2647_v60  ;;  %v3235_v57 = vpack.c.bf16 %v502_v45, %v498_v31  ;;  %v435_v4 = vadd.f32 %v434_v63, %v3080_v5  ;;  %v2672_v63 = vld [vmem:[%s3543_s3 + $0x380] ss:$16 sps:$4 sm:$0xff]  }
 0x10f   :  { %v508_v19 = vmax.f32 %v326_v8, 0.0 }
 0x110   :  { %v551_v22 = vpack.c.bf16 %v507_v14, %v503_v13  ;;  %v506_v17 = vmax.f32 %v435_v4, 0.0 }
 0x111   :  { %v552_v27 = vpack.c.bf16 %v508_v19, %v504_v18  ;;  %1485 = vmatpush1.bf16.msra.mxu0 %v2642_v6  ;;  %1711 = vmatpush1.bf16.msra.mxu1 %v2645_v9  ;;  %v329_v28 = vpop.f32.mrb[20].mxu0  ;;  %v436_v6 = vpop.f32.mrb[18].mxu1  ;;  %v505_v9 = vmax.f32 %v433_v62, 0.0 }
 0x112   :  { %v330_v33 = vadd.f32 %v329_v28, %v3048_v40  ;;  %v331_v34 = vpop.f32.mrb[21].mxu0  ;;  %1486 = vmatprep.subr.bf16.mxu0 %v2650_v10  ;;  %1712 = vmatprep.subr.bf16.mxu1 %v2653_v15  ;;  %v437_v10 = vadd.f32 %v436_v6, %v3075_v2  ;;  %v438_v12 = vpop.f32.mrb[19].mxu1  ;;  %v2660_v15 = vld [vmem:[%s3543_s3 + $0x340] ss:$16 sps:$4 sm:$0xff]  }
 0x113   :  { %v332_v43 = vadd.f32 %v331_v34, %v3052_v41  ;;  %v333_v44 = vpop.f32.mrb[22].mxu0  ;;  %1429 = vmatprep.mubr.bf16.mxu0 %v552_v27  ;;  %1655 = vmatprep.mubr.bf16.mxu1 %v552_v27  ;;  %v439_v18 = vadd.f32 %v438_v12, %v3080_v5  ;;  %v2674_v34 = vld [vmem:[%s3543_s3 + $0x384] ss:$16 sps:$4 sm:$0xff]  }
 0x114   :  { %v334_v46 = vadd.f32 %v333_v44, %v3048_v40  ;;  %v335_v48 = vpop.f32.mrb[23].mxu0  ;;  %1430 = vmatmul.mubr.bf16.gmra.mrb[48].mxu0 %v551_v22  ;;  %1656 = vmatmul.mubr.bf16.gmra.mrb[48].mxu1 %v551_v22  ;;  %v511_v59 = vmax.f32 %v330_v33, 0.0  ;;  %v2671_v22 = vld [vmem:[%s3543_s3 + $0x36c] ss:$16 sps:$4 sm:$0xff]   ;;  %v509_v23 = vmax.f32 %v437_v10, 0.0 }
 0x115   :  { %v336_v53 = vadd.f32 %v335_v48, %v3052_v41  ;;  %1487 = vmatpush1.bf16.msra.mxu0 %v2648_v29  ;;  %1713 = vmatpush1.bf16.msra.mxu1 %v2651_v30  ;;  %v512_v0 = vmax.f32 %v332_v43, 0.0  ;;  %v510_v27 = vmax.f32 %v439_v18, 0.0  ;;  %v2666_v30 = vld [vmem:[%s3543_s3 + $0x360] ss:$16 sps:$4 sm:$0xff]   ;;  %v2669_v33 = vld [vmem:[%s3543_s3 + $0x368] ss:$16 sps:$4 sm:$0xff]  }
 0x116   :  { %v515_v60 = vmax.f32 %v334_v46, 0.0  ;;  %1488 = vmatprep.subr.bf16.mxu0 %v2656_v35  ;;  %1714 = vmatprep.subr.bf16.mxu1 %v2659_v38  ;;  %v3262_v31 = vpack.c.bf16 %v509_v23, %v505_v9  ;;  %v442_v38 = vpop.f32.mrb[20].mxu1  ;;  %v2677_v44 = vld [vmem:[%s3543_s3 + $0x38c] ss:$16 sps:$4 sm:$0xff]   ;;  %v2680_v9 = vld [vmem:[%s3543_s3 + $0x3a4] ss:$16 sps:$4 sm:$0xff]  }
 0x117   :  { %v516_v3 = vmax.f32 %v336_v53, 0.0  ;;  %v3271_v35 = vpack.c.bf16 %v510_v27, %v506_v17  ;;  %v443_v45 = vadd.f32 %v442_v38, %v3075_v2  ;;  %v444_v46 = vpop.f32.mrb[21].mxu1  ;;  %v2683_v10 = vld [vmem:[%s3543_s3 + $0x3ac] ss:$16 sps:$4 sm:$0xff]   ;;  %v2678_v18 = vld [vmem:[%s3543_s3 + $0x3a0] ss:$16 sps:$4 sm:$0xff]  }
 0x118   :  { %v555_v8 = vpack.c.bf16 %v515_v60, %v511_v59  ;;  %v445_v53 = vadd.f32 %v444_v46, %v3080_v5  ;;  %v2687_v46 = vld [vmem:[%s3543_s3 + $0x3c8] ss:$16 sps:$4 sm:$0xff]  }
 0x119   :  { %v556_v13 = vpack.c.bf16 %v516_v3, %v512_v0  ;;  %1489 = vmatpush1.bf16.msra.mxu0 %v2654_v49  ;;  %1715 = vmatpush1.bf16.msra.mxu1 %v2657_v54  ;;  %v339_v14 = vpop.f32.mrb[24].mxu0  ;;  %v446_v54 = vpop.f32.mrb[22].mxu1  ;;  %v513_v58 = vmax.f32 %v443_v45, 0.0  ;;  %v2675_v0 = vld [vmem:[%s3543_s3 + $0x388] ss:$16 sps:$4 sm:$0xff]  }
 0x11a   :  { %v340_v19 = vadd.f32 %v339_v14, %v3048_v40  ;;  %v341_v20 = vpop.f32.mrb[25].mxu0  ;;  %1490 = vmatprep.subr.bf16.mxu0 %v2662_v56  ;;  %1716 = vmatprep.subr.bf16.mxu1 %v2665_v61  ;;  %v447_v59 = vadd.f32 %v446_v54, %v3075_v2  ;;  %v448_v60 = vpop.f32.mrb[23].mxu1  ;;  %v514_v3 = vmax.f32 %v445_v53, 0.0  ;;  %v2684_v45 = vld [vmem:[%s3543_s3 + $0x3c0] ss:$16 sps:$4 sm:$0xff]  }
 0x11b   :  { %v342_v25 = vadd.f32 %v341_v20, %v3052_v41  ;;  %v343_v26 = vpop.f32.mrb[26].mxu0  ;;  %1439 = vmatprep.mubr.bf16.mxu0 %v556_v13  ;;  %1665 = vmatprep.mubr.bf16.mxu1 %v556_v13  ;;  %v449_v4 = vadd.f32 %v448_v60, %v3080_v5  ;;  %v452_v23 = vpop.f32.mrb[24].mxu1  ;;  %v2692_v53 = vld [vmem:[%s3543_s3 + $0x3e4] ss:$16 sps:$4 sm:$0xff]   ;;  %v2695_v54 = vld [vmem:[%s3543_s3 + $0x3ec] ss:$16 sps:$4 sm:$0xff]  }
 0x11c   :  { %v344_v28 = vadd.f32 %v343_v26, %v3048_v40  ;;  %v345_v29 = vpop.f32.mrb[27].mxu0  ;;  %1440 = vmatmul.mubr.bf16.gmra.mrb[52].mxu0 %v555_v8  ;;  %1666 = vmatmul.mubr.bf16.gmra.mrb[52].mxu1 %v555_v8  ;;  %v519_v42 = vmax.f32 %v340_v19, 0.0  ;;  %v517_v12 = vmax.f32 %v447_v59, 0.0  ;;  %v453_v27 = vadd.f32 %v452_v23, %v3075_v2  ;;  %v2690_v60 = vld [vmem:[%s3543_s3 + $0x3e0] ss:$16 sps:$4 sm:$0xff]  }
 0x11d   :  { %v346_v32 = vadd.f32 %v345_v29, %v3052_v41  ;;  %1491 = vmatpush1.bf16.msra.mxu0 %v2660_v15  ;;  %1717 = vmatpush1.bf16.msra.mxu1 %v2663_v16  ;;  %v520_v48 = vmax.f32 %v342_v25, 0.0  ;;  %v518_v15 = vmax.f32 %v449_v4, 0.0 }
 0x11e   :  { %v523_v43 = vmax.f32 %v344_v28, 0.0  ;;  %1492 = vmatprep.subr.bf16.mxu0 %v2668_v21  ;;  %1718 = vmatprep.subr.bf16.mxu1 %v2671_v22  ;;  %v3298_v19 = vpack.c.bf16 %v517_v12, %v513_v58  ;;  %v2681_v21 = vld [vmem:[%s3543_s3 + $0x3a8] ss:$16 sps:$4 sm:$0xff]   ;;  %v454_v28 = vpop.f32.mrb[25].mxu1  ;;  %v521_v38 = vmax.f32 %v453_v27, 0.0 }
 0x11f   :  { %v524_v49 = vmax.f32 %v346_v32, 0.0  ;;  %v3307_v22 = vpack.c.bf16 %v518_v15, %v514_v3  ;;  %v455_v32 = vadd.f32 %v454_v28, %v3080_v5 }
 0x120   :  { %v559_v56 = vpack.c.bf16 %v523_v43, %v519_v42 }
 0x121   :  { %v560_v61 = vpack.c.bf16 %v524_v49, %v520_v48  ;;  %1493 = vmatpush1.bf16.msra.mxu0 %v2666_v30  ;;  %1719 = vmatpush1.bf16.msra.mxu1 %v2669_v33  ;;  %v349_v62 = vpop.f32.mrb[28].mxu0  ;;  %v456_v33 = vpop.f32.mrb[26].mxu1  ;;  %v522_v48 = vmax.f32 %v455_v32, 0.0 }
 0x122   :  { %v350_v6 = vadd.f32 %v349_v62, %v3048_v40  ;;  %v351_v8 = vpop.f32.mrb[29].mxu0  ;;  %1494 = vmatprep.subr.bf16.mxu0 %v2674_v34  ;;  %1720 = vmatprep.subr.bf16.mxu1 %v2677_v44  ;;  %v457_v42 = vadd.f32 %v456_v33, %v3075_v2  ;;  %v458_v43 = vpop.f32.mrb[27].mxu1 }
 0x123   :  { %v352_v13 = vadd.f32 %v351_v8, %v3052_v41  ;;  %v353_v14 = vpop.f32.mrb[30].mxu0  ;;  %1449 = vmatprep.mubr.bf16.mxu0 %v560_v61  ;;  %1675 = vmatprep.mubr.bf16.mxu1 %v560_v61  ;;  %v459_v49 = vadd.f32 %v458_v43, %v3080_v5  ;;  %v2693_v61 = vld [vmem:[%s3543_s3 + $0x3e8] ss:$16 sps:$4 sm:$0xff]  }
 0x124   :  { %v354_v16 = vadd.f32 %v353_v14, %v3048_v40  ;;  %v355_v17 = vpop.f32.mrb[31].mxu0  ;;  %1450 = vmatmul.mubr.bf16.gmra.mrb[56].mxu0 %v559_v56  ;;  %1676 = vmatmul.mubr.bf16.gmra.mrb[56].mxu1 %v559_v56  ;;  %v2686_v40 = vld [vmem:[%s3543_s3 + $0x3c4] ss:$16 sps:$4 sm:$0xff]   ;;  %v527_v25 = vmax.f32 %v350_v6, 0.0  ;;  %v525_v56 = vmax.f32 %v457_v42, 0.0 }
 0x125   :  { %v356_v20 = vadd.f32 %v355_v17, %v3052_v41  ;;  %1495 = vmatpush1.bf16.msra.mxu0 %v2672_v63  ;;  %1721 = vmatpush1.bf16.msra.mxu1 %v2675_v0  ;;  %v2689_v41 = vld [vmem:[%s3543_s3 + $0x3cc] ss:$16 sps:$4 sm:$0xff]   ;;  %v528_v29 = vmax.f32 %v352_v13, 0.0  ;;  %v526_v58 = vmax.f32 %v459_v49, 0.0  ;;  %v462_v63 = vpop.f32.mrb[28].mxu1 }
 0x126   :  { %v531_v26 = vmax.f32 %v354_v16, 0.0  ;;  %1496 = vmatprep.subr.bf16.mxu0 %v2680_v9  ;;  %1722 = vmatprep.subr.bf16.mxu1 %v2683_v10  ;;  %v561_v59 = vpack.c.bf16 %v525_v56, %v521_v38  ;;  %v463_v0 = vadd.f32 %v462_v63, %v3075_v2  ;;  %v464_v3 = vpop.f32.mrb[29].mxu1 }
 0x127   :  { %v532_v30 = vmax.f32 %v356_v20, 0.0  ;;  %v562_v62 = vpack.c.bf16 %v526_v58, %v522_v48  ;;  %v465_v4 = vadd.f32 %v464_v3, %v3080_v5  ;;  %v466_v6 = vpop.f32.mrb[30].mxu1 }
 0x128   :  { %v563_v34 = vpack.c.bf16 %v531_v26, %v527_v25  ;;  %v529_v8 = vmax.f32 %v463_v0, 0.0  ;;  %v467_v9 = vadd.f32 %v466_v6, %v3075_v2  ;;  %v468_v10 = vpop.f32.mrb[31].mxu1  ;;  %v695_v2 = vld [vmem:[%s3545_s4] sm:$0xf] }
 0x129   :  { %v564_v44 = vpack.c.bf16 %v532_v30, %v528_v29  ;;  %1497 = vmatpush1.bf16.msra.mxu0 %v2678_v18  ;;  %1723 = vmatpush1.bf16.msra.mxu1 %v2681_v21  ;;  %v530_v12 = vmax.f32 %v465_v4, 0.0  ;;  %v469_v13 = vadd.f32 %v468_v10, %v3080_v5  ;;  %v3367_v5 = vrot.slane %v695_v2, %v59_v37 }
 0x12a   :  { %1498 = vmatprep.subr.bf16.mxu0 %v2686_v40  ;;  %1724 = vmatprep.subr.bf16.mxu1 %v2689_v41  ;;  %v533_v14 = vmax.f32 %v467_v9, 0.0 }
 0x12b   :  { %1459 = vmatprep.mubr.bf16.mxu0 %v564_v44  ;;  %1685 = vmatprep.mubr.bf16.mxu1 %v564_v44  ;;  %v534_v15 = vmax.f32 %v469_v13, 0.0 }
 0x12c   :  { %1460 = vmatmul.mubr.bf16.gmra.mrb[60].mxu0 %v563_v34  ;;  %1686 = vmatmul.mubr.bf16.gmra.mrb[60].mxu1 %v563_v34  ;;  %v565_v16 = vpack.c.bf16 %v533_v14, %v529_v8 }
 0x12d   :  { %1499 = vmatpush1.bf16.msra.mxu0 %v2684_v45  ;;  %1725 = vmatpush1.bf16.msra.mxu1 %v2687_v46 }
 0x12e   :  { %1500 = vmatprep.subr.bf16.mxu0 %v2692_v53  ;;  %1726 = vmatprep.subr.bf16.mxu1 %v2695_v54 }
 0x12f   :  { %1502 = vmatprep.mubr.bf16.mxu0 %v3127_v51  ;;  %1728 = vmatprep.mubr.bf16.mxu1 %v3127_v51  ;;  %v566_v51 = vpack.c.bf16 %v534_v15, %v530_v12 }
 0x131   :  { %1501 = vmatpush1.bf16.msra.mxu0 %v2690_v60  ;;  %1727 = vmatpush1.bf16.msra.mxu1 %v2693_v61 }
 0x134   :  { %1503 = vmatmul.mubr.bf16.vlgmr.msra.gmra.mrb[32].mxu0 %v3118_v47  ;;  %1729 = vmatmul.mubr.bf16.vlgmr.msra.gmra.mrb[32].mxu1 %v3118_v47  ;;  %v3371_v47 = vrot.slane %v695_v2, %v67_v52 }
 0x135   :  { %1512 = vmatprep.mubr.bf16.mxu0 %v3163_v1  ;;  %1738 = vmatprep.mubr.bf16.mxu1 %v3163_v1  ;;  %v3379_v1 = vrot.slane %v695_v2, %v71_v55 }
 0x13c   :  { %1513 = vmatmul.mubr.bf16.gmra.mrb[36].mxu0 %v3154_v24  ;;  %1739 = vmatmul.mubr.bf16.gmra.mrb[36].mxu1 %v3154_v24  ;;  %v3375_v24 = vrot.slane %v695_v2, %v63_v39 }
 0x13d   :  { %1522 = vmatprep.mubr.bf16.mxu0 %v3199_v11  ;;  %1748 = vmatprep.mubr.bf16.mxu1 %v3199_v11 }
 0x144   :  { %1523 = vmatmul.mubr.bf16.gmra.mrb[40].mxu0 %v3190_v7  ;;  %1749 = vmatmul.mubr.bf16.gmra.mrb[40].mxu1 %v3190_v7 }
 0x145   :  { %1532 = vmatprep.mubr.bf16.mxu0 %v3235_v57  ;;  %1758 = vmatprep.mubr.bf16.mxu1 %v3235_v57 }
 0x14c   :  { %1533 = vmatmul.mubr.bf16.gmra.mrb[44].mxu0 %v3226_v50  ;;  %1759 = vmatmul.mubr.bf16.gmra.mrb[44].mxu1 %v3226_v50 }
 0x14d   :  { %1542 = vmatprep.mubr.bf16.mxu0 %v3271_v35  ;;  %1768 = vmatprep.mubr.bf16.mxu1 %v3271_v35 }
 0x154   :  { %1543 = vmatmul.mubr.bf16.gmra.mrb[48].mxu0 %v3262_v31  ;;  %1769 = vmatmul.mubr.bf16.gmra.mrb[48].mxu1 %v3262_v31 }
 0x155   :  { %1552 = vmatprep.mubr.bf16.mxu0 %v3307_v22  ;;  %1778 = vmatprep.mubr.bf16.mxu1 %v3307_v22 }
 0x15c   :  { %1553 = vmatmul.mubr.bf16.gmra.mrb[52].mxu0 %v3298_v19  ;;  %1779 = vmatmul.mubr.bf16.gmra.mrb[52].mxu1 %v3298_v19 }
 0x15d   :  { %1562 = vmatprep.mubr.bf16.mxu0 %v562_v62  ;;  %1788 = vmatprep.mubr.bf16.mxu1 %v562_v62 }
 0x164   :  { %1563 = vmatmul.mubr.bf16.gmra.mrb[56].mxu0 %v561_v59  ;;  %1789 = vmatmul.mubr.bf16.gmra.mrb[56].mxu1 %v561_v59 }
 0x165   :  { %1572 = vmatprep.mubr.bf16.mxu0 %v566_v51  ;;  %1798 = vmatprep.mubr.bf16.mxu1 %v566_v51 }
 0x16c   :  { %1573 = vmatmul.mubr.bf16.gmra.mrb[60].mxu0 %v565_v16  ;;  %1799 = vmatmul.mubr.bf16.gmra.mrb[60].mxu1 %v565_v16 }
 0x207   :  { %v1504_v7 = vpop.f32.mrb[32].mxu0  ;;  %v1730_v11 = vpop.f32.mrb[32].mxu1 }
 0x208   :  { %v2339_v50 = vadd.f32 %v1504_v7, %v3367_v5  ;;  %v2371_v57 = vadd.f32 %v1730_v11, %v3371_v47  ;;  %v1506_v37 = vpop.f32.mrb[33].mxu0  ;;  %v1732_v31 = vpop.f32.mrb[33].mxu1 }
 0x209   :  { %v2340_v35 = vadd.f32 %v1506_v37, %v3375_v24  ;;  %v2372_v52 = vadd.f32 %v1732_v31, %v3379_v1  ;;  %v1508_v17 = vpop.f32.mrb[34].mxu0  ;;  %v1734_v18 = vpop.f32.mrb[34].mxu1 }
 0x20a   :  { %v1809_v39 = vmax.f32 %v2339_v50, 0.0  ;;  %v1811_v19 = vmax.f32 %v2371_v57, 0.0  ;;  %v2341_v36 = vadd.f32 %v1508_v17, %v3367_v5  ;;  %v2373_v55 = vadd.f32 %v1734_v18, %v3371_v47  ;;  %v1510_v20 = vpop.f32.mrb[35].mxu0  ;;  %v1736_v21 = vpop.f32.mrb[35].mxu1 }
 0x20b   :  { %v1810_v40 = vmax.f32 %v2340_v35, 0.0  ;;  %v1812_v22 = vmax.f32 %v2372_v52, 0.0  ;;  %v2342_v23 = vadd.f32 %v1510_v20, %v3375_v24  ;;  %v2374_v25 = vadd.f32 %v1736_v21, %v3379_v1 }
 0x20c   :  { %v1813_v26 = vmax.f32 %v2341_v36, 0.0  ;;  %v1815_v41 = vmax.f32 %v2373_v55, 0.0 }
 0x20d   :  { %v2307_v27 = vpack.c.bf16 %v1810_v40, %v1809_v39  ;;  %v2308_v28 = vpack.c.bf16 %v1812_v22, %v1811_v19  ;;  %v1814_v29 = vmax.f32 %v2342_v23, 0.0  ;;  %v1816_v30 = vmax.f32 %v2374_v25, 0.0 }
 0x20f   :  { %2065 = vst [vmem:[%s3546_s5] sm:$0xff] %v2307_v27  ;;  %2066 = vst [vmem:[%s3546_s5 + $0x8] sm:$0xff] %v2308_v28  ;;  %v2309_v32 = vpack.c.bf16 %v1814_v29, %v1813_v26  ;;  %v2310_v33 = vpack.c.bf16 %v1816_v30, %v1815_v41  ;;  %v1514_v34 = vpop.f32.mrb[36].mxu0  ;;  %v1740_v38 = vpop.f32.mrb[36].mxu1 }
 0x210   :  { %v2343_v42 = vadd.f32 %v1514_v34, %v3367_v5  ;;  %v2375_v43 = vadd.f32 %v1740_v38, %v3371_v47  ;;  %v1516_v44 = vpop.f32.mrb[37].mxu0  ;;  %v1742_v45 = vpop.f32.mrb[37].mxu1 }
 0x211   :  { %2067 = vst [vmem:[%s3546_s5 + $0x10] sm:$0xff] %v2309_v32  ;;  %2068 = vst [vmem:[%s3546_s5 + $0x18] sm:$0xff] %v2310_v33  ;;  %v2344_v46 = vadd.f32 %v1516_v44, %v3375_v24  ;;  %v2376_v48 = vadd.f32 %v1742_v45, %v3379_v1  ;;  %v1518_v49 = vpop.f32.mrb[38].mxu0  ;;  %v1744_v53 = vpop.f32.mrb[38].mxu1 }
 0x212   :  { %v1817_v54 = vmax.f32 %v2343_v42, 0.0  ;;  %v1819_v56 = vmax.f32 %v2375_v43, 0.0  ;;  %v2345_v58 = vadd.f32 %v1518_v49, %v3367_v5  ;;  %v2377_v59 = vadd.f32 %v1744_v53, %v3371_v47  ;;  %v1520_v60 = vpop.f32.mrb[39].mxu0  ;;  %v1746_v61 = vpop.f32.mrb[39].mxu1 }
 0x213   :  { %v1818_v62 = vmax.f32 %v2344_v46, 0.0  ;;  %v1820_v63 = vmax.f32 %v2376_v48, 0.0  ;;  %v2346_v0 = vadd.f32 %v1520_v60, %v3375_v24  ;;  %v2378_v3 = vadd.f32 %v1746_v61, %v3379_v1 }
 0x214   :  { %v1821_v4 = vmax.f32 %v2345_v58, 0.0  ;;  %v1823_v6 = vmax.f32 %v2377_v59, 0.0 }
 0x215   :  { %v2311_v8 = vpack.c.bf16 %v1818_v62, %v1817_v54  ;;  %v2312_v9 = vpack.c.bf16 %v1820_v63, %v1819_v56  ;;  %v1822_v10 = vmax.f32 %v2346_v0, 0.0  ;;  %v1824_v12 = vmax.f32 %v2378_v3, 0.0 }
 0x217   :  { %2069 = vst [vmem:[%s3546_s5 + $0x20] sm:$0xff] %v2311_v8  ;;  %2070 = vst [vmem:[%s3546_s5 + $0x28] sm:$0xff] %v2312_v9  ;;  %v2313_v13 = vpack.c.bf16 %v1822_v10, %v1821_v4  ;;  %v2314_v14 = vpack.c.bf16 %v1824_v12, %v1823_v6  ;;  %v1524_v15 = vpop.f32.mrb[40].mxu0  ;;  %v1750_v16 = vpop.f32.mrb[40].mxu1 }
 0x218   :  { %v2347_v51 = vadd.f32 %v1524_v15, %v3367_v5  ;;  %v2379_v2 = vadd.f32 %v1750_v16, %v3371_v47  ;;  %v1526_v7 = vpop.f32.mrb[41].mxu0  ;;  %v1752_v11 = vpop.f32.mrb[41].mxu1 }
 0x219   :  { %2071 = vst [vmem:[%s3546_s5 + $0x30] sm:$0xff] %v2313_v13  ;;  %2072 = vst [vmem:[%s3546_s5 + $0x38] sm:$0xff] %v2314_v14  ;;  %v2348_v50 = vadd.f32 %v1526_v7, %v3375_v24  ;;  %v2380_v57 = vadd.f32 %v1752_v11, %v3379_v1  ;;  %v1528_v37 = vpop.f32.mrb[42].mxu0  ;;  %v1754_v31 = vpop.f32.mrb[42].mxu1 }
 0x21a   :  { %v1825_v35 = vmax.f32 %v2347_v51, 0.0  ;;  %v1827_v52 = vmax.f32 %v2379_v2, 0.0  ;;  %v2349_v17 = vadd.f32 %v1528_v37, %v3367_v5  ;;  %v2381_v18 = vadd.f32 %v1754_v31, %v3371_v47  ;;  %v1530_v39 = vpop.f32.mrb[43].mxu0  ;;  %v1756_v19 = vpop.f32.mrb[43].mxu1 }
 0x21b   :  { %v1826_v36 = vmax.f32 %v2348_v50, 0.0  ;;  %v1828_v55 = vmax.f32 %v2380_v57, 0.0  ;;  %v2350_v20 = vadd.f32 %v1530_v39, %v3375_v24  ;;  %v2382_v21 = vadd.f32 %v1756_v19, %v3379_v1 }
 0x21c   :  { %v1829_v40 = vmax.f32 %v2349_v17, 0.0  ;;  %v1831_v22 = vmax.f32 %v2381_v18, 0.0 }
 0x21d   :  { %v2315_v23 = vpack.c.bf16 %v1826_v36, %v1825_v35  ;;  %v2316_v25 = vpack.c.bf16 %v1828_v55, %v1827_v52  ;;  %v1830_v26 = vmax.f32 %v2350_v20, 0.0  ;;  %v1832_v41 = vmax.f32 %v2382_v21, 0.0 }
 0x21f   :  { %2073 = vst [vmem:[%s3546_s5 + $0x40] sm:$0xff] %v2315_v23  ;;  %2074 = vst [vmem:[%s3546_s5 + $0x48] sm:$0xff] %v2316_v25  ;;  %v2317_v27 = vpack.c.bf16 %v1830_v26, %v1829_v40  ;;  %v2318_v28 = vpack.c.bf16 %v1832_v41, %v1831_v22  ;;  %v1534_v29 = vpop.f32.mrb[44].mxu0  ;;  %v1760_v30 = vpop.f32.mrb[44].mxu1 }
 0x220   :  { %v2351_v32 = vadd.f32 %v1534_v29, %v3367_v5  ;;  %v2383_v33 = vadd.f32 %v1760_v30, %v3371_v47  ;;  %v1536_v34 = vpop.f32.mrb[45].mxu0  ;;  %v1762_v38 = vpop.f32.mrb[45].mxu1 }
 0x221   :  { %2075 = vst [vmem:[%s3546_s5 + $0x50] sm:$0xff] %v2317_v27  ;;  %2076 = vst [vmem:[%s3546_s5 + $0x58] sm:$0xff] %v2318_v28  ;;  %v2352_v42 = vadd.f32 %v1536_v34, %v3375_v24  ;;  %v2384_v43 = vadd.f32 %v1762_v38, %v3379_v1  ;;  %v1538_v44 = vpop.f32.mrb[46].mxu0  ;;  %v1764_v45 = vpop.f32.mrb[46].mxu1 }
 0x222   :  { %v1833_v46 = vmax.f32 %v2351_v32, 0.0  ;;  %v1835_v48 = vmax.f32 %v2383_v33, 0.0  ;;  %v2353_v49 = vadd.f32 %v1538_v44, %v3367_v5  ;;  %v2385_v53 = vadd.f32 %v1764_v45, %v3371_v47  ;;  %v1540_v54 = vpop.f32.mrb[47].mxu0  ;;  %v1766_v56 = vpop.f32.mrb[47].mxu1 }
 0x223   :  { %v1834_v58 = vmax.f32 %v2352_v42, 0.0  ;;  %v1836_v59 = vmax.f32 %v2384_v43, 0.0  ;;  %v2354_v60 = vadd.f32 %v1540_v54, %v3375_v24  ;;  %v2386_v61 = vadd.f32 %v1766_v56, %v3379_v1 }
 0x224   :  { %v1837_v62 = vmax.f32 %v2353_v49, 0.0  ;;  %v1839_v63 = vmax.f32 %v2385_v53, 0.0 }
 0x225   :  { %v2319_v0 = vpack.c.bf16 %v1834_v58, %v1833_v46  ;;  %v2320_v3 = vpack.c.bf16 %v1836_v59, %v1835_v48  ;;  %v1838_v4 = vmax.f32 %v2354_v60, 0.0  ;;  %v1840_v6 = vmax.f32 %v2386_v61, 0.0 }
 0x227   :  { %2077 = vst [vmem:[%s3546_s5 + $0x60] sm:$0xff] %v2319_v0  ;;  %2078 = vst [vmem:[%s3546_s5 + $0x68] sm:$0xff] %v2320_v3  ;;  %v2321_v8 = vpack.c.bf16 %v1838_v4, %v1837_v62  ;;  %v2322_v9 = vpack.c.bf16 %v1840_v6, %v1839_v63  ;;  %v1544_v10 = vpop.f32.mrb[48].mxu0  ;;  %v1770_v12 = vpop.f32.mrb[48].mxu1 }
 0x228   :  { %v2355_v13 = vadd.f32 %v1544_v10, %v3367_v5  ;;  %v2387_v14 = vadd.f32 %v1770_v12, %v3371_v47  ;;  %v1546_v15 = vpop.f32.mrb[49].mxu0  ;;  %v1772_v16 = vpop.f32.mrb[49].mxu1 }
 0x229   :  { %2079 = vst [vmem:[%s3546_s5 + $0x70] sm:$0xff] %v2321_v8  ;;  %2080 = vst [vmem:[%s3546_s5 + $0x78] sm:$0xff] %v2322_v9  ;;  %v2356_v51 = vadd.f32 %v1546_v15, %v3375_v24  ;;  %v2388_v2 = vadd.f32 %v1772_v16, %v3379_v1  ;;  %v1548_v7 = vpop.f32.mrb[50].mxu0  ;;  %v1774_v11 = vpop.f32.mrb[50].mxu1 }
 0x22a   :  { %v1841_v50 = vmax.f32 %v2355_v13, 0.0  ;;  %v1843_v57 = vmax.f32 %v2387_v14, 0.0  ;;  %v2357_v37 = vadd.f32 %v1548_v7, %v3367_v5  ;;  %v2389_v31 = vadd.f32 %v1774_v11, %v3371_v47  ;;  %v1550_v35 = vpop.f32.mrb[51].mxu0  ;;  %v1776_v52 = vpop.f32.mrb[51].mxu1 }
 0x22b   :  { %v1842_v17 = vmax.f32 %v2356_v51, 0.0  ;;  %v1844_v18 = vmax.f32 %v2388_v2, 0.0  ;;  %v2358_v39 = vadd.f32 %v1550_v35, %v3375_v24  ;;  %v2390_v19 = vadd.f32 %v1776_v52, %v3379_v1 }
 0x22c   :  { %v1845_v36 = vmax.f32 %v2357_v37, 0.0  ;;  %v1847_v55 = vmax.f32 %v2389_v31, 0.0 }
 0x22d   :  { %v2323_v20 = vpack.c.bf16 %v1842_v17, %v1841_v50  ;;  %v2324_v21 = vpack.c.bf16 %v1844_v18, %v1843_v57  ;;  %v1846_v40 = vmax.f32 %v2358_v39, 0.0  ;;  %v1848_v22 = vmax.f32 %v2390_v19, 0.0 }
 0x22f   :  { %2081 = vst [vmem:[%s3546_s5 + $0x80] sm:$0xff] %v2323_v20  ;;  %2082 = vst [vmem:[%s3546_s5 + $0x88] sm:$0xff] %v2324_v21  ;;  %v2325_v23 = vpack.c.bf16 %v1846_v40, %v1845_v36  ;;  %v2326_v25 = vpack.c.bf16 %v1848_v22, %v1847_v55  ;;  %v1554_v26 = vpop.f32.mrb[52].mxu0  ;;  %v1780_v41 = vpop.f32.mrb[52].mxu1 }
 0x230   :  { %v2359_v27 = vadd.f32 %v1554_v26, %v3367_v5  ;;  %v2391_v28 = vadd.f32 %v1780_v41, %v3371_v47  ;;  %v1556_v29 = vpop.f32.mrb[53].mxu0  ;;  %v1782_v30 = vpop.f32.mrb[53].mxu1 }
 0x231   :  { %2083 = vst [vmem:[%s3546_s5 + $0x90] sm:$0xff] %v2325_v23  ;;  %2084 = vst [vmem:[%s3546_s5 + $0x98] sm:$0xff] %v2326_v25  ;;  %v2360_v32 = vadd.f32 %v1556_v29, %v3375_v24  ;;  %v2392_v33 = vadd.f32 %v1782_v30, %v3379_v1  ;;  %v1558_v34 = vpop.f32.mrb[54].mxu0  ;;  %v1784_v38 = vpop.f32.mrb[54].mxu1 }
 0x232   :  { %v1849_v42 = vmax.f32 %v2359_v27, 0.0  ;;  %v1851_v43 = vmax.f32 %v2391_v28, 0.0  ;;  %v2361_v44 = vadd.f32 %v1558_v34, %v3367_v5  ;;  %v2393_v45 = vadd.f32 %v1784_v38, %v3371_v47  ;;  %v1560_v46 = vpop.f32.mrb[55].mxu0  ;;  %v1786_v48 = vpop.f32.mrb[55].mxu1 }
 0x233   :  { %v1850_v49 = vmax.f32 %v2360_v32, 0.0  ;;  %v1852_v53 = vmax.f32 %v2392_v33, 0.0  ;;  %v2362_v54 = vadd.f32 %v1560_v46, %v3375_v24  ;;  %v2394_v56 = vadd.f32 %v1786_v48, %v3379_v1 }
 0x234   :  { %v1853_v58 = vmax.f32 %v2361_v44, 0.0  ;;  %v1855_v59 = vmax.f32 %v2393_v45, 0.0 }
 0x235   :  { %v2327_v60 = vpack.c.bf16 %v1850_v49, %v1849_v42  ;;  %v2328_v61 = vpack.c.bf16 %v1852_v53, %v1851_v43  ;;  %v1854_v62 = vmax.f32 %v2362_v54, 0.0  ;;  %v1856_v63 = vmax.f32 %v2394_v56, 0.0 }
 0x237   :  { %2085 = vst [vmem:[%s3546_s5 + $0xa0] sm:$0xff] %v2327_v60  ;;  %2086 = vst [vmem:[%s3546_s5 + $0xa8] sm:$0xff] %v2328_v61  ;;  %v2329_v0 = vpack.c.bf16 %v1854_v62, %v1853_v58  ;;  %v2330_v3 = vpack.c.bf16 %v1856_v63, %v1855_v59  ;;  %v1564_v4 = vpop.f32.mrb[56].mxu0  ;;  %v1790_v6 = vpop.f32.mrb[56].mxu1 }
 0x238   :  { %v2363_v8 = vadd.f32 %v1564_v4, %v3367_v5  ;;  %v2395_v9 = vadd.f32 %v1790_v6, %v3371_v47  ;;  %v1566_v10 = vpop.f32.mrb[57].mxu0  ;;  %v1792_v12 = vpop.f32.mrb[57].mxu1 }
 0x239   :  { %2087 = vst [vmem:[%s3546_s5 + $0xb0] sm:$0xff] %v2329_v0  ;;  %2088 = vst [vmem:[%s3546_s5 + $0xb8] sm:$0xff] %v2330_v3  ;;  %v2364_v13 = vadd.f32 %v1566_v10, %v3375_v24  ;;  %v2396_v14 = vadd.f32 %v1792_v12, %v3379_v1  ;;  %v1568_v15 = vpop.f32.mrb[58].mxu0  ;;  %v1794_v16 = vpop.f32.mrb[58].mxu1 }
 0x23a   :  { %v1857_v51 = vmax.f32 %v2363_v8, 0.0  ;;  %v1859_v2 = vmax.f32 %v2395_v9, 0.0  ;;  %v2365_v7 = vadd.f32 %v1568_v15, %v3367_v5  ;;  %v2397_v11 = vadd.f32 %v1794_v16, %v3371_v47  ;;  %v1570_v50 = vpop.f32.mrb[59].mxu0  ;;  %v1796_v57 = vpop.f32.mrb[59].mxu1 }
 0x23b   :  { %v1858_v37 = vmax.f32 %v2364_v13, 0.0  ;;  %v1860_v31 = vmax.f32 %v2396_v14, 0.0  ;;  %v2366_v35 = vadd.f32 %v1570_v50, %v3375_v24  ;;  %v2398_v52 = vadd.f32 %v1796_v57, %v3379_v1 }
 0x23c   :  { %v1861_v17 = vmax.f32 %v2365_v7, 0.0  ;;  %v1863_v18 = vmax.f32 %v2397_v11, 0.0 }
 0x23d   :  { %v2331_v39 = vpack.c.bf16 %v1858_v37, %v1857_v51  ;;  %v2332_v19 = vpack.c.bf16 %v1860_v31, %v1859_v2  ;;  %v1862_v36 = vmax.f32 %v2366_v35, 0.0  ;;  %v1864_v55 = vmax.f32 %v2398_v52, 0.0 }
 0x23f   :  { %2089 = vst [vmem:[%s3546_s5 + $0xc0] sm:$0xff] %v2331_v39  ;;  %2090 = vst [vmem:[%s3546_s5 + $0xc8] sm:$0xff] %v2332_v19  ;;  %v2333_v20 = vpack.c.bf16 %v1862_v36, %v1861_v17  ;;  %v2334_v21 = vpack.c.bf16 %v1864_v55, %v1863_v18  ;;  %v1574_v40 = vpop.f32.mrb[60].mxu0  ;;  %v1800_v22 = vpop.f32.mrb[60].mxu1 }
 0x240   :  { %v2367_v23 = vadd.f32 %v1574_v40, %v3367_v5  ;;  %v2399_v25 = vadd.f32 %v1800_v22, %v3371_v47  ;;  %v1576_v26 = vpop.f32.mrb[61].mxu0  ;;  %v1802_v41 = vpop.f32.mrb[61].mxu1 }
 0x241   :  { %2091 = vst [vmem:[%s3546_s5 + $0xd0] sm:$0xff] %v2333_v20  ;;  %2092 = vst [vmem:[%s3546_s5 + $0xd8] sm:$0xff] %v2334_v21  ;;  %v2368_v27 = vadd.f32 %v1576_v26, %v3375_v24  ;;  %v2400_v28 = vadd.f32 %v1802_v41, %v3379_v1  ;;  %v1578_v29 = vpop.f32.mrb[62].mxu0  ;;  %v1804_v30 = vpop.f32.mrb[62].mxu1 }
 0x242   :  { %v1865_v32 = vmax.f32 %v2367_v23, 0.0  ;;  %v1867_v33 = vmax.f32 %v2399_v25, 0.0  ;;  %v2369_v34 = vadd.f32 %v1578_v29, %v3367_v5  ;;  %v2401_v38 = vadd.f32 %v1804_v30, %v3371_v47  ;;  %v1580_v42 = vpop.f32.mrb[63].mxu0  ;;  %v1806_v43 = vpop.f32.mrb[63].mxu1 }
 0x243   :  { %v1866_v44 = vmax.f32 %v2368_v27, 0.0  ;;  %v1868_v45 = vmax.f32 %v2400_v28, 0.0  ;;  %v2370_v46 = vadd.f32 %v1580_v42, %v3375_v24  ;;  %v2402_v48 = vadd.f32 %v1806_v43, %v3379_v1 }
 0x244   :  { %v1869_v49 = vmax.f32 %v2369_v34, 0.0  ;;  %v1871_v53 = vmax.f32 %v2401_v38, 0.0 }
 0x245   :  { %v2335_v54 = vpack.c.bf16 %v1866_v44, %v1865_v32  ;;  %v2336_v56 = vpack.c.bf16 %v1868_v45, %v1867_v33  ;;  %v1870_v58 = vmax.f32 %v2370_v46, 0.0  ;;  %v1872_v59 = vmax.f32 %v2402_v48, 0.0 }
 0x247   :  { %2093 = vst [vmem:[%s3546_s5 + $0xe0] sm:$0xff] %v2335_v54  ;;  %2094 = vst [vmem:[%s3546_s5 + $0xe8] sm:$0xff] %v2336_v56  ;;  %v2337_v5 = vpack.c.bf16 %v1870_v58, %v1869_v49  ;;  %v2338_v47 = vpack.c.bf16 %v1872_v59, %v1871_v53 }
 0x249   :  { %2095 = vst [vmem:[%s3546_s5 + $0xf0] sm:$0xff] %v2337_v5  ;;  %2096 = vst [vmem:[%s3546_s5 + $0xf8] sm:$0xff] %v2338_v47 }

// kernel: custom-call.9
= control target key start
LH: loop header
LB: loop body
LE: loop exit
PB: predicated region body
PF: predicated region fallthrough
CT: control target
= control target key end

     0   :  { %5 = vsyncpa [#allocation4], 0  ;;  %s834_s0 = inlined_call_operand.vmem [shape: f32[16,16], index: 0, kind: input, shape index: {}]   ;;  %s835_s1 = inlined_call_operand.vmem [shape: f32[16,16], index: 1, kind: output, shape index: {0}]   ;;  %s836_s2 = inlined_call_operand.hbm [shape: s32[16], index: 2, kind: output, shape index: {1}]   ;;  %s837_s3 = inlined_call_operand.hbm [shape: s32[16], index: 3, kind: output, shape index: {2}]  }
   0x1   :  { %6 = vsyncpa [#allocation7], 0  ;;  %s20_s14 = scalar_lea.vmem %s834_s0, 8 }
   0x2   :  { %p399_p0 = scmp.gt.s32.totalorder %s834_s0, %s20_s14 }
   0x3   :  { %s694_s17 = smov (!%p399_p0), [#allocation0]   ;;  %s698_s20 = smov (!%p399_p0), %s834_s0  }
   0x4   :  { %400 = sbr.rel (%p399_p0) target bundleno = 21 (0x15), region = 128 }
   0xb LB: > { %v54_v0 = vld [vmem:[%s700_s20] sm:$0xff]  ;;  %s56_s20 = scalar_lea.vmem %s700_s20, 8   ;;  %s700_s20 = sphi %s698_s20, %s56_s20   ;;  %s696_s17 = sphi %s694_s17, %s57_s17  }
   0xc   : > { %55 = vst [vmem:[%s696_s17] sm:$0xff] %v54_v0  ;;  %s57_s17 = scalar_lea.vmem %s696_s17, 8   ;;  %p51_p1 = scmp.gt.s32.totalorder %s56_s20, %s20_s14 }
   0xe   :  { %53 = sbr.rel (!%p51_p1) target bundleno = 11 (0xb), region = 134 }
  0x15 PF:  { %v69_v1 = vld [vmem:[#allocation0] sm:$0xff]  ;;  %v73_v2 = vld [vmem:[#allocation0 + $0x8] sm:$0xff]  ;;  %v76_v3 = vlaneseq  ;;  %v718_v4 = vmov 0   ;;  %s702_s0 = smov 0  }
  0x16   :  { %70 = vst [vmem:[#allocation1] sm:$0xff] %v69_v1  ;;  %74 = vst [vmem:[#allocation1 + $0x8] sm:$0xff] %v73_v2 }
  0x17   :  { %75 = vst [vmem:[#allocation2] sm:$0x1] %v718_v4  ;;  %v751_v5 = vshrl.u32 %v76_v3, 7 }
  0x18 LB: > { %s437_s21 = sshll.u32 %s704_s0, 3  ;;  %s84_s0 = sadd.s32 1, %s704_s0   ;;  %s704_s0 = sphi %s702_s0, %s84_s0  }
  0x19   : > { %v88_v6 = vstv %s437_s21  ;;  %s86_s22 = scalar_lea.vmem [#allocation8], %s437_s21  ;;  %p81_p2 = scmp.ge.s32.totalorder %s84_s0, 2  }
  0x1a   : > { %v89_v7 = vadd.s32 %v88_v6, %v751_v5  ;;  %s754_s23 = smov (%p81_p2), 0  }
  0x1b   :  { %83 = sbr.rel (!%p81_p2) target bundleno = 24 (0x18), region = 145 }
  0x1c   : > { %90 = vst [vmem:[%s86_s22] sm:$0xff] %v89_v7 }
  0x22 LB: > { %v101_v8 = vld [vmem:[#allocation1] sm:$0xff]  ;;  %v113_v9 = vld [vmem:[#allocation1 + $0x8] sm:$0xff]  ;;  %v760_v10 = vadd.s32 8, %v751_v5  ;;  %v763_v12 = vstv %s708_s23  ;;  %s159_s24 = ssub.s32 128, %s708_s23  ;;  %v165_v45 = vand.u32 127, %v76_v3  ;;  %s171_s25 = scalar_lea.vmem [#allocation1], %s708_s23  ;;  %s708_s23 = sphi %s754_s23, %s96_s23  }
  0x23   : > { %v102_v11 = vand.u32 2147483647, %v101_v8  ;;  %v114_v13 = vand.u32 2147483647, %v113_v9  ;;  %vm105_vm0 = vcmp.ge.s32.totalorder %v751_v5, %v763_v12  ;;  %v168_v48 = vld [vmem:[#allocation2] ss:$0 sm:$0xff] }
  0x24   : > { %vm117_vm3 = vcmp.ge.s32.totalorder %v760_v10, %v763_v12  ;;  %vm189_vm13 = vcmp.gt.s32.totalorder %v165_v45, %v763_v12  ;;  %vm212_vm14 = vcmp.gt.s32.totalorder %v760_v10, %v763_v12  ;;  %vm166_vm15 = vcmp.eq.s32.totalorder %v165_v45, %v763_v12  ;;  %v173_v49 = vld [vmem:[%s171_s25] ss:$0 sm:$0xff]  ;;  %s177_s27 = scalar_lea.vmem [#allocation8], %s708_s23  ;;  %s96_s23 = sadd.s32 1, %s708_s23  }
  0x25   : > { %vm439_vm1 = vcmp.gt.f32.partialorder %v102_v11, -inf  ;;  %v179_v50 = vld [vmem:[%s177_s27] ss:$0 sm:$0xff]  ;;  %p93_p3 = scmp.ge.s32.totalorder %s96_s23, 16  }
  0x26   : > { %vm109_vm2 = vmand %vm105_vm0, %vm439_vm1  ;;  %s710_s5 = smov (%p93_p3), %s835_s1   ;;  %s714_s6 = smov (%p93_p3), [#allocation1]  }
  0x27   : > { %v110_v14 = vsel %vm109_vm2, %v751_v5, %v763_v12  ;;  %v111_v15 = vsel %vm109_vm2, %v102_v11, -inf  ;;  %vm783_vm0 = vmand %vm212_vm14, %vm166_vm15  ;;  %vm197_vm2 = vcmp.gt.s32.totalorder %v751_v5, %v763_v12 }
  0x28   : > { %vm120_vm4 = vcmp.lt.f32.partialorder %v111_v15, %v114_v13 }
  0x29   : > { %vm121_vm5 = vmand %vm117_vm3, %vm120_vm4 }
  0x2a   : > { %v122_v16 = vsel %vm121_vm5, %v760_v10, %v110_v14  ;;  %v123_v17 = vsel %vm121_vm5, %v114_v13, %v111_v15  ;;  %vm201_vm4 = vmand %vm197_vm2, %vm166_vm15 }
  0x2b   : > { %v124_v18 = vrot.slane %v123_v17, 1  ;;  %v125_v19 = vrot.slane %v122_v16, 1 }
  0x2d   : > { %vm126_vm6 = vcmp.ge.f32.partialorder %v124_v18, %v123_v17  ;;  %v129_v20 = vrot.slane %v124_v18, 1  ;;  %v130_v21 = vrot.slane %v125_v19, 1 }
  0x2e   : > { %v127_v22 = vsel %vm126_vm6, %v124_v18, %v123_v17  ;;  %v128_v23 = vsel %vm126_vm6, %v125_v19, %v122_v16 }
  0x2f   : > { %vm131_vm7 = vcmp.ge.f32.partialorder %v129_v20, %v127_v22  ;;  %v134_v24 = vrot.slane %v129_v20, 1  ;;  %v135_v25 = vrot.slane %v130_v21, 1 }
  0x30   : > { %v132_v26 = vsel %vm131_vm7, %v129_v20, %v127_v22  ;;  %v133_v27 = vsel %vm131_vm7, %v130_v21, %v128_v23 }
  0x31   : > { %vm136_vm8 = vcmp.ge.f32.partialorder %v134_v24, %v132_v26  ;;  %v139_v28 = vrot.slane %v134_v24, 1  ;;  %v140_v29 = vrot.slane %v135_v25, 1 }
  0x32   : > { %v137_v30 = vsel %vm136_vm8, %v134_v24, %v132_v26  ;;  %v138_v31 = vsel %vm136_vm8, %v135_v25, %v133_v27 }
  0x33   : > { %vm141_vm9 = vcmp.ge.f32.partialorder %v139_v28, %v137_v30  ;;  %v144_v32 = vrot.slane %v139_v28, 1  ;;  %v145_v33 = vrot.slane %v140_v29, 1 }
  0x34   : > { %v142_v34 = vsel %vm141_vm9, %v139_v28, %v137_v30  ;;  %v143_v35 = vsel %vm141_vm9, %v140_v29, %v138_v31 }
  0x35   : > { %vm146_vm10 = vcmp.ge.f32.partialorder %v144_v32, %v142_v34  ;;  %v149_v36 = vrot.slane %v144_v32, 1  ;;  %v150_v37 = vrot.slane %v145_v33, 1 }
  0x36   : > { %v147_v38 = vsel %vm146_vm10, %v144_v32, %v142_v34  ;;  %v148_v39 = vsel %vm146_vm10, %v145_v33, %v143_v35 }
  0x37   : > { %vm151_vm11 = vcmp.ge.f32.partialorder %v149_v36, %v147_v38  ;;  %v154_v40 = vrot.slane %v149_v36, 1  ;;  %v155_v41 = vrot.slane %v150_v37, 1 }
  0x38   : > { %v152_v42 = vsel %vm151_vm11, %v149_v36, %v147_v38  ;;  %v153_v43 = vsel %vm151_vm11, %v150_v37, %v148_v39 }
  0x39   : > { %vm156_vm12 = vcmp.ge.f32.partialorder %v154_v40, %v152_v42 }
  0x3a   : > { %v158_v44 = vsel %vm156_vm12, %v155_v41, %v153_v43 }
  0x3b   : > { %160 = vrot.lane.b32.xlu0 %v158_v44, %s159_s24 }
  0xad   : > { %v161_v47 = vpop.permute.xlu0 %160 }
  0xae   : > { %444 = vpush %v161_v47 }
  0xdf   : > { %s445_s26 = spop %444 }
  0xe0   : > { %v167_v51 = vstv %s445_s26  ;;  %s172_s28 = scalar_lea.vmem [#allocation1], %s445_s26  ;;  %s178_s29 = scalar_lea.vmem [#allocation8], %s445_s26 }
  0xe1   : > { %v169_v52 = vsel %vm166_vm15, %v167_v51, %v168_v48  ;;  %v174_v53 = vld [vmem:[%s172_s28] ss:$0 sm:$0xff] }
  0xe2   : > { %v180_v54 = vld [vmem:[%s178_s29] ss:$0 sm:$0xff]  ;;  %170 = vst [vmem:[#allocation2] sm:$0x1] %v169_v52  ;;  %175 = vst [vmem:[%s172_s28] sm:$0x1] %v173_v49  ;;  %vm183_vm1 = vcmp.ne.f32.partialorder %v174_v53, 0.0 }
  0xe3   : > { %181 = vst [vmem:[%s178_s29] sm:$0x1] %v179_v50  ;;  %176 = vst [vmem:[%s171_s25] sm:$0x1] %v174_v53  ;;  %v190_v2 = vsel %vm189_vm13, %v174_v53, 0.0 }
  0xe4   : > { %182 = vst [vmem:[%s177_s27] sm:$0x1] %v180_v54  ;;  %vm184_vm3 = vmand %vm166_vm15, %vm183_vm1 }
  0xe5   : > { %v185_v55 = vsel %vm184_vm3, %v174_v53, 1.0 }
  0xe6   : > { %v213_v56 = vsel %vm212_vm14, %v185_v55, 1.0  ;;  %v198_v57 = vsel %vm197_vm2, %v185_v55, 1.0 }
  0xe7   : > { %578 = vrcp.f32 %v213_v56 }
  0xe8   : > { %580 = vrcp.f32 %v198_v57 }
  0xe9   :  { %v276_v12 = vld [vmem:[#allocation2] sm:$0x1] (%p93_p3) }
  0xea   : > { %v209_v59 = vld [vmem:[#allocation1 + $0x8] sm:$0xff]  ;;  %v194_v62 = vld [vmem:[#allocation1] sm:$0xff]  ;;  %278 = vst [vmem:[#allocation3] sm:$0x1] (%p93_p3), %v276_v12 }
  0xeb   :  { %v223_v11 = vld [vmem:[#allocation8] sm:$0xff] (%p93_p3)  ;;  %v225_v13 = vld [vmem:[#allocation8 + $0x8] sm:$0xff] (%p93_p3) }
  0xf1   : > { %v579_v58 = vpop.eup %578 }
  0xf2   : > { %v581_v60 = vpop.eup %580  ;;  %v215_v61 = vmul.f32 %v579_v58, %v209_v59 }
  0xf3   : > { %v200_v63 = vmul.f32 %v581_v60, %v194_v62 }
  0xf4   : > { %v217_v0 = vsel %vm783_vm0, %v215_v61, 0.0 }
  0xf5   : > { %218 = vadd.xlane.f32.xlu1 %v217_v0  ;;  %v202_v1 = vsel %vm201_vm4, %v200_v63, 0.0 }
  0xf6   : > { %203 = vadd.xlane.f32.xlu0 %v202_v1 }
 0x123   :  { %240 = vxpose.xlu0.b32.start [1/2] (short) (narrow) (%p93_p3), %v223_v11, 8 }
 0x127   :  { %241 = vxpose.xlu0.b32.end [2/2] (short) (narrow) (%p93_p3), %v225_v13, 8 }
 0x182   : > { %v219_v4 = vpop.xlane.xlu1 %218  ;;  %95 = sbr.rel (!%p93_p3) target bundleno = 34 (0x22), region = 156 }
 0x183   : > { %v220_v6 = vmul.f32 %v219_v4, %v190_v2  ;;  %v204_v7 = vpop.xlane.xlu0 %203 }
 0x184   : > { %v205_v8 = vmul.f32 %v204_v7, %v190_v2 }
 0x185   : > { %v221_v9 = vsub.f32 %v215_v61, %v220_v6 }
 0x186   : > { %v206_v10 = vsub.f32 %v200_v63, %v205_v8 }
 0x187   : > { %222 = vst [vmem:[#allocation1 + $0x8] sm:$0xff] %v221_v9 }
 0x188   : > { %207 = vst [vmem:[#allocation1] sm:$0xff] %v206_v10 }
 0x1a3   :  { %v256_v14 = vpop.trf.xlu0 }
 0x1a4   :  { %272 = vst [vmem:[#allocation5] sm:$0x1] %v256_v14 }
 0x1ab   :  { %v282_v15 = vld [vmem:[#allocation5] sm:$0x1] }
 0x1ac   :  { %284 = vst [vmem:[#allocation6] sm:$0x1] %v282_v15 }
 0x1ad LB: > { %v332_v16 = vld [vmem:[%s716_s6] sm:$0xff]  ;;  %s334_s6 = scalar_lea.vmem %s716_s6, 8   ;;  %s716_s6 = sphi %s714_s6, %s334_s6   ;;  %s712_s5 = sphi %s710_s5, %s335_s5  }
 0x1ae   : > { %333 = vst [vmem:[%s712_s5] sm:$0xff] %v332_v16  ;;  %s335_s5 = scalar_lea.vmem %s712_s5, 8   ;;  %p329_p4 = scmp.gt.s32.totalorder %s334_s6, [#allocation1 + $0x8] }
 0x1af   :  { %s719_s7 = smov (%p329_p4), [#allocation3]   ;;  %s720_s9 = smov (%p329_p4), [#allocation6]  }
 0x1b0   :  { %331 = sbr.rel (!%p329_p4) target bundleno = 429 (0x1ad), region = 178  ;;  %s352_s8 = sshll.u32 (%p329_p4), %s719_s7, 4  ;;  %s353_s8 = int_to_ptr.vmem [resolvable:$true] %s352_s8 }
 0x1b1   :  { %s361_s10 = sshll.u32 (%p329_p4), %s720_s9, 4  ;;  %s582_s1 = scalar_lea.vmem (%p329_p4), %s353_s8, 16  ;;  %s362_s10 = int_to_ptr.vmem [resolvable:$true] %s361_s10 }
 0x1b2   :  { %p583_p5 = scmp.ne.s32.totalorder (%p329_p4), %s353_s8, %s582_s1  ;;  %s586_s11 = scalar_lea.vmem (%p329_p4), %s353_s8, 32 }
 0x1b3   :  { %p587_p6 = scmp.lt.s32.totalorder (%p329_p4), %s353_s8, %s353_s8  ;;  %p588_p7 = scmp.lt.s32.totalorder (%p329_p4), %s586_s11, %s582_s1 }
 0x1b5   :  { %p589_p8 = por (%p329_p4), %p588_p7, %p587_p6 }
 0x1b7   :  { %p590_p9 = pnand %p589_p8, %p583_p5 }
 0x1b9   :  { %593 = shalt.err (!%p590_p9)
}
 0x1ba   :  { %s594_s14 = scalar_lea.hbm %s836_s2, 16 }
 0x1bb   :  { %p595_p10 = scmp.ne.s32.totalorder %s836_s2, %s594_s14  ;;  %p598_p11 = scmp.lt.u32.totalorder %s594_s14, %s836_s2 }
 0x1bd   :  { %p600_p12 = pnand %p598_p11, %p595_p10 }
 0x1bf   :  { %603 = shalt.err (!%p600_p12)
}
 0x1c0   :  { %355 = dma.vmem_to_hbm [thread:$0]  %s353_s8, 16, %s836_s2, [#allocation4]  }
 0x1c1   :  { %s604_s0 = scalar_lea.vmem %s362_s10, 16  ;;  %s608_s21 = scalar_lea.vmem %s362_s10, 32 }
 0x1c2   :  { %p605_p13 = scmp.ne.s32.totalorder %s362_s10, %s604_s0  ;;  %p609_p0 = scmp.lt.s32.totalorder %s362_s10, %s362_s10 }
 0x1c3   :  { %p610_p1 = scmp.lt.s32.totalorder %s608_s21, %s604_s0 }
 0x1c5   :  { %p611_p2 = por %p610_p1, %p609_p0 }
 0x1c7   :  { %p612_p3 = pnand %p611_p2, %p605_p13 }
 0x1c9   :  { %615 = shalt.err (!%p612_p3)
}
 0x1ca   :  { %s616_s24 = scalar_lea.hbm %s837_s3, 16 }
 0x1cb   :  { %p617_p4 = scmp.ne.s32.totalorder %s837_s3, %s616_s24  ;;  %p620_p5 = scmp.lt.u32.totalorder %s616_s24, %s837_s3 }
 0x1cd   :  { %p622_p6 = pnand %p620_p5, %p617_p4 }
 0x1cf   :  { %625 = shalt.err (!%p622_p6)
}
 0x1d0   :  { %364 = dma.vmem_to_hbm [thread:$0]  %s362_s10, 16, %s837_s3, [#allocation7]  }
 0x1d1   :  { %690 = dma.done.wait [#allocation4], 16  }
 0x1d2   :  { %691 = vsyncadd [#allocation4], 4294967280 }
 0x1d3   :  { %692 = dma.done.wait [#allocation7], 16  }
 0x1d4   :  { %693 = vsyncadd [#allocation7], 4294967280 }
 0x1d5   :  { %371 = vsyncpa [#allocation4], 1 }
 0x1d6   :  { %372 = vsyncpa [#allocation7], 1 }

// kernel: block_forward.17
= control target key start
LH: loop header
LB: loop body
LE: loop exit
PB: predicated region body
PF: predicated region fallthrough
CT: control target
= control target key end

     0   :  { %s2149_s18 = smov 0   ;;  %s2534_s0 = inlined_call_operand.vmem [shape: f32[2,10,10,8], index: 0, kind: input, shape index: {}]   ;;  %s2535_s1 = inlined_call_operand.vmem [shape: f32[9,8,16], index: 1, kind: input, shape index: {}]   ;;  %s2536_s2 = inlined_call_operand.vmem [shape: f32[1,16], index: 2, kind: input, shape index: {}]   ;;  %s2537_s3 = inlined_call_operand.vmem [shape: f32[1,16], index: 3, kind: input, shape index: {}]   ;;  %s2538_s4 = inlined_call_operand.vmem [shape: f32[2,64,8], index: 4, kind: input, shape index: {}]   ;;  %s2539_s5 = inlined_call_operand.vmem [shape: f32[2,1,1], index: 5, kind: output, shape index: {}]  }
   0x1 LB: > { %s1714_s19 = sadd.s32 4294967295, %s2115_s18   ;;  %p1718_p0 = scmp.ge.s32.totalorder %s2115_s18, 1  ;;  %s2115_s18 = sphi %s2149_s18, %s15_s18  }
   0x2   : > { %p197_p1 = scmp.lt.s32.totalorder %s2115_s18, 3 }
   0x4   : > { %p198_p2 = pnand %p1718_p0, %p197_p1 }
   0x5   : > { %v2160_v0 = vld [vmem:[%s2535_s1 + $0x20] sm:$0xff] (!%p198_p2)  ;;  %v1722_v1 = vld [vmem:[%s2535_s1 + $0x8] sm:$0xff] (!%p198_p2)  ;;  %p228_p3 = scmp.lt.s32.totalorder (!%p198_p2), %s1714_s19, 1  ;;  %vm278_vm0 = vcmask (!%p198_p2), 1046528   ;;  %vm305_vm1 = vcmask (!%p198_p2), 64512   ;;  %vm548_vm2 = vcmask (!%p198_p2), 1045504  }
   0x6   : > { %201 = sbr.rel (%p198_p2) target bundleno = 887 (0x377), region = 40  ;;  %v1766_v2 = vld [vmem:[%s2535_s1 + $0x28] sm:$0xff] (!%p198_p2)  ;;  %1944 = vmatprep.subr.mxu0 (!%p198_p2), %v2160_v0  ;;  %1888 = vmatprep.subr.mxu1 (!%p198_p2), %v1722_v1  ;;  %v261_v3 = vld [vmem:[%s2535_s1] sm:$0xff] (!%p198_p2)  ;;  %v1775_v30 = vld [vmem:[%s2535_s1 + $0x30] sm:$0xff] (!%p198_p2)  ;;  %s2117_s23 = smov (!%p198_p2), 120   ;;  %vm1653_vm3 = vcmask (!%p198_p2), 0  }
   0x7   : > { %1945 = vmatpush3.msra.mxu0 (!%p198_p2), %v2160_v0  ;;  %1889 = vmatpush3.msra.mxu1 (!%p198_p2), %v1722_v1  ;;  %v1739_v38 = vld [vmem:[%s2535_s1 + $0x10] sm:$0xff] (!%p198_p2)  ;;  %v1784_v58 = vld [vmem:[%s2535_s1 + $0x38] sm:$0xff] (!%p198_p2) }
   0x8   : > { %1958 = vmatprep.subr.mxu0 (!%p198_p2), %v1766_v2  ;;  %1902 = vmatprep.subr.mxu1 (!%p198_p2), %v261_v3 }
   0xd   : > { %s2541_s19 = smov (!%p228_p3, %s1714_s19), 1 }
   0xe   : > { %s2080_s28 = smul.u32 160, %s2541_s19  ;;  %s1806_s24 = sshll.u32 %s2541_s19, 6 }
   0xf   : > { %s237_s27 = scalar_lea.vmem %s2538_s4, %s1806_s24 }
  0x10   : > { %s2179_s6 = scalar_lea.vmem %s2534_s0, %s2080_s28  ;;  %s2118_s28 = smov 8  }
  0x11   : > { %v2182_v4 = vld [vmem:[%s2179_s6] sm:$0xff]  ;;  %v2185_v5 = vld [vmem:[%s2179_s6 + $0x8] sm:$0x3]  ;;  %v2188_v6 = vld [vmem:[%s2179_s6 + $0x10] sm:$0xff] }
  0x12   : > { %v279_v7 = vrot.slane %v2182_v4, 1  ;;  %v280_v8 = vrot.slane %v2185_v5, 1  ;;  %v244_v9 = vld [vmem:[%s2179_s6 + $0x18] sm:$0x3]  ;;  %v282_v10 = vrot.slane %v2188_v6, 1  ;;  %v2195_v12 = vld [vmem:[%s2179_s6 + $0x20] sm:$0xff] }
  0x13   : > { %v283_v11 = vrot.slane %v244_v9, 1  ;;  %v246_v13 = vld [vmem:[%s2179_s6 + $0x28] sm:$0x3]  ;;  %v2199_v14 = vld [vmem:[%s2179_s6 + $0x30] sm:$0xff]  ;;  %v553_v16 = vrot.slane %v244_v9, 2  ;;  %v285_v17 = vrot.slane %v2195_v12, 1 }
  0x14   : > { %v281_v15 = vsel %vm278_vm0, %v279_v7, %v280_v8  ;;  %v286_v18 = vrot.slane %v246_v13, 1  ;;  %v248_v19 = vld [vmem:[%s2179_s6 + $0x38] sm:$0x3]  ;;  %v2205_v20 = vld [vmem:[%s2179_s6 + $0x40] sm:$0xff]  ;;  %v288_v22 = vrot.slane %v2199_v14, 1  ;;  %v2213_v26 = vld [vmem:[%s2179_s6 + $0x50] sm:$0xff] }
  0x15   : > { %1890 = vmatprep.mubr.msk.f32.mxu1 %vm305_vm1, %v281_v15  ;;  %v284_v21 = vsel %vm278_vm0, %v282_v10, %v283_v11  ;;  %v289_v23 = vrot.slane %v248_v19, 1  ;;  %v250_v24 = vld [vmem:[%s2179_s6 + $0x48] sm:$0x3]  ;;  %v291_v25 = vrot.slane %v2205_v20, 1  ;;  %v552_v29 = vrot.slane %v2188_v6, 2  ;;  %v2226_v32 = vld [vmem:[%s2179_s6 + $0x60] sm:$0xff] }
  0x16   : > { %1946 = vmatprep.mubr.msk.f32.mxu0 %vm305_vm1, %v284_v21  ;;  %1891 = vmatmul.mubr.msk.f32.vlgmr.msra.gmra.mrb[0].mxu1 %vm305_vm1, %v284_v21  ;;  %v2218_v27 = vsel %vm278_vm0, %v285_v17, %v286_v18  ;;  %v292_v28 = vrot.slane %v250_v24, 1  ;;  %v252_v31 = vld [vmem:[%s2179_s6 + $0x58] sm:$0x3]  ;;  %v556_v33 = vrot.slane %v246_v13, 2  ;;  %v294_v35 = vrot.slane %v2213_v26, 1  ;;  %v2246_v43 = vld [vmem:[%s2179_s6 + $0x70] sm:$0xff] }
  0x17   : > { %1947 = vmatmul.mubr.msk.f32.vlgmr.msra.gmra.mrb[0].mxu0 %vm305_vm1, %v2218_v27  ;;  %1903 = vmatpush3.msra.mxu1 %v261_v3  ;;  %v2231_v34 = vsel %vm278_vm0, %v288_v22, %v289_v23  ;;  %v295_v36 = vrot.slane %v252_v31, 1  ;;  %v254_v37 = vld [vmem:[%s2179_s6 + $0x68] sm:$0x3]  ;;  %v555_v40 = vrot.slane %v2195_v12, 2  ;;  %v297_v41 = vrot.slane %v2226_v32, 1  ;;  %v2301_v3 = vld [vmem:[%s2179_s6 + $0x80] sm:$0xff] }
  0x18   : > { %1959 = vmatpush3.msra.mxu0 %v1766_v2  ;;  %1893 = vmatprep.mubr.msk.f32.mxu1 %vm305_vm1, %v2218_v27  ;;  %v2241_v39 = vsel %vm278_vm0, %v291_v25, %v292_v28  ;;  %v298_v42 = vrot.slane %v254_v37, 1  ;;  %v256_v44 = vld [vmem:[%s2179_s6 + $0x78] sm:$0x3]  ;;  %v2252_v45 = vsel %vm548_vm2, %v552_v29, %v553_v16  ;;  %v558_v46 = vrot.slane %v2199_v14, 2  ;;  %v2304_v7 = vld [vmem:[%s2179_s6 + $0x88] sm:$0x3] }
  0x19   : > { %1949 = vmatprep.mubr.msk.f32.mxu0 %vm305_vm1, %v2231_v34  ;;  %1972 = vmatprep.subr.mxu0 %v1775_v30  ;;  %v559_v47 = vrot.slane %v248_v19, 2  ;;  %v2262_v48 = vsel %vm278_vm0, %v294_v35, %v295_v36  ;;  %v300_v49 = vrot.slane %v2246_v43, 1  ;;  %v301_v50 = vrot.slane %v256_v44, 1  ;;  %v1748_v13 = vld [vmem:[%s2535_s1 + $0x18] sm:$0xff]  ;;  %v1793_v18 = vld [vmem:[%s2535_s1 + $0x40] sm:$0xff] }
  0x1a   : > { %1894 = vmatmul.mubr.msk.f32.gmra.mrb[2].mxu1 %vm305_vm1, %v2231_v34  ;;  %1916 = vmatprep.subr.mxu1 %v1739_v38  ;;  %v2268_v51 = vsel %vm548_vm2, %v555_v40, %v556_v33  ;;  %v2271_v52 = vsel %vm278_vm0, %v297_v41, %v298_v42  ;;  %v561_v53 = vrot.slane %v2205_v20, 2  ;;  %v562_v54 = vrot.slane %v250_v24, 2  ;;  %v260_v22 = vld [vmem:[%s2179_s6 + $0x98] sm:$0x3]  ;;  %v1803_v33 = vld [vmem:[%s2537_s3] ss:$0 sm:$0xff] }
  0x1b   : > { %1950 = vmatmul.mubr.msk.f32.gmra.mrb[2].mxu0 %vm305_vm1, %v2241_v39  ;;  %1896 = vmatprep.mubr.msk.f32.mxu1 %vm305_vm1, %v2241_v39  ;;  %v2275_v55 = vsel %vm548_vm2, %v558_v46, %v559_v47  ;;  %v564_v56 = vrot.slane %v2213_v26, 2  ;;  %v565_v57 = vrot.slane %v252_v31, 2  ;;  %v2288_v59 = vsel %vm278_vm0, %v300_v49, %v301_v50 }
  0x1c   : > { %1960 = vmatprep.mubr.msk.f32.mxu0 %vm305_vm1, %v2252_v45  ;;  %v2293_v60 = vsel %vm548_vm2, %v561_v53, %v562_v54  ;;  %v567_v61 = vrot.slane %v2226_v32, 2  ;;  %v568_v62 = vrot.slane %v254_v37, 2  ;;  %v570_v1 = vrot.slane %v2246_v43, 2 }
  0x1d   : > { %v2297_v63 = vsel %vm548_vm2, %v564_v56, %v565_v57  ;;  %v571_v2 = vrot.slane %v256_v44, 2  ;;  %v943_v9 = vrot.slane %v2301_v3, 2  ;;  %v944_v10 = vrot.slane %v2304_v7, 2 }
  0x1e   : > { %1897 = vmatmul.mubr.msk.f32.gmra.mrb[4].mxu1 %vm305_vm1, %v2262_v48  ;;  %v2315_v8 = vsel %vm548_vm2, %v567_v61, %v568_v62  ;;  %v550_v16 = vrot.slane %v2185_v5, 2  ;;  %v549_v17 = vrot.slane %v2182_v4, 2  ;;  %v259_v5 = vld [vmem:[%s2179_s6 + $0x90] sm:$0xff]  ;;  %v823_v19 = vrot.slane %v2301_v3, 1  ;;  %s240_s6 = scalar_lea.vmem %s2539_s5, %s2541_s19 }
  0x1f   : > { %1961 = vmatmul.mubr.msk.f32.vlgmr.msra.gmra.mrb[0].mxu0 %vm305_vm1, %v2268_v51  ;;  %1899 = vmatprep.mubr.msk.f32.mxu1 %vm305_vm1, %v2271_v52  ;;  %v2320_v11 = vsel %vm548_vm2, %v570_v1, %v571_v2  ;;  %v2334_v15 = vsel %vm548_vm2, %v943_v9, %v944_v10  ;;  %v824_v21 = vrot.slane %v2304_v7, 1  ;;  %v1182_v23 = vrot.slane %v259_v5, 1 }
  0x20   : > { %1973 = vmatpush3.msra.mxu0 %v1775_v30  ;;  %1963 = vmatprep.mubr.msk.f32.mxu0 %vm305_vm1, %v2275_v55  ;;  %v1183_v24 = vrot.slane %v260_v22, 1  ;;  %v1802_v30 = vld [vmem:[%s2536_s2] ss:$0 sm:$0xff] }
  0x21   : > { %1986 = vmatprep.subr.mxu0 %v1784_v58  ;;  %v825_v25 = vsel %vm278_vm0, %v823_v19, %v824_v21 }
  0x22   : > { %1900 = vmatmul.mubr.msk.f32.gmra.mrb[6].mxu1 %vm305_vm1, %v2288_v59 }
  0x23   : > { %1964 = vmatmul.mubr.msk.f32.gmra.mrb[2].mxu0 %vm305_vm1, %v2293_v60  ;;  %1904 = vmatprep.mubr.msk.f32.mxu1 %vm305_vm1, %v2182_v4  ;;  %v551_v4 = vsel %vm548_vm2, %v549_v17, %v550_v16 }
  0x24   : > { %1966 = vmatprep.mubr.msk.f32.mxu0 %vm305_vm1, %v2297_v63 }
  0x26   : > { %1905 = vmatmul.mubr.msk.f32.vlgmr.msra.gmra.mrb[0].mxu1 %vm305_vm1, %v2188_v6 }
  0x27   : > { %1967 = vmatmul.mubr.msk.f32.gmra.mrb[4].mxu0 %vm305_vm1, %v2315_v8  ;;  %1917 = vmatpush3.msra.mxu1 %v1739_v38 }
  0x28   : > { %1907 = vmatprep.mubr.msk.f32.mxu1 %vm305_vm1, %v2195_v12  ;;  %1969 = vmatprep.mubr.msk.f32.mxu0 %vm305_vm1, %v2320_v11 }
  0x29   : > { %1930 = vmatprep.subr.mxu1 %v1748_v13 }
  0x2a   : > { %1908 = vmatmul.mubr.msk.f32.gmra.mrb[2].mxu1 %vm305_vm1, %v2199_v14 }
  0x2b   : > { %1970 = vmatmul.mubr.msk.f32.gmra.mrb[6].mxu0 %vm305_vm1, %v2334_v15  ;;  %1910 = vmatprep.mubr.msk.f32.mxu1 %vm305_vm1, %v2205_v20 }
  0x2c   : > { %1974 = vmatprep.mubr.msk.f32.mxu0 %vm305_vm1, %v2195_v12 }
  0x2e   : > { %1911 = vmatmul.mubr.msk.f32.gmra.mrb[4].mxu1 %vm305_vm1, %v2213_v26 }
  0x2f   : > { %1975 = vmatmul.mubr.msk.f32.vlgmr.msra.gmra.mrb[0].mxu0 %vm305_vm1, %v2199_v14  ;;  %1913 = vmatprep.mubr.msk.f32.mxu1 %vm305_vm1, %v2226_v32 }
  0x30   : > { %1987 = vmatpush3.msra.mxu0 %v1784_v58  ;;  %1977 = vmatprep.mubr.msk.f32.mxu0 %vm305_vm1, %v2205_v20 }
  0x31   : > { %2000 = vmatprep.subr.mxu0 %v1793_v18 }
  0x32   : > { %1914 = vmatmul.mubr.msk.f32.gmra.mrb[6].mxu1 %vm305_vm1, %v2246_v43 }
  0x33   : > { %1978 = vmatmul.mubr.msk.f32.gmra.mrb[2].mxu0 %vm305_vm1, %v2213_v26  ;;  %1918 = vmatprep.mubr.msk.f32.mxu1 %vm305_vm1, %v551_v4 }
  0x34   : > { %1980 = vmatprep.mubr.msk.f32.mxu0 %vm305_vm1, %v2226_v32 }
  0x36   : > { %1919 = vmatmul.mubr.msk.f32.vlgmr.msra.gmra.mrb[0].mxu1 %vm305_vm1, %v2252_v45 }
  0x37   : > { %1981 = vmatmul.mubr.msk.f32.gmra.mrb[4].mxu0 %vm305_vm1, %v2246_v43  ;;  %1931 = vmatpush3.msra.mxu1 %v1748_v13 }
  0x38   : > { %1921 = vmatprep.mubr.msk.f32.mxu1 %vm305_vm1, %v2268_v51  ;;  %1983 = vmatprep.mubr.msk.f32.mxu0 %vm305_vm1, %v2301_v3 }
  0x39   : > { %2014 = vmatprep.subr.mxu1 %v2160_v0 }
  0x3a   : > { %1922 = vmatmul.mubr.msk.f32.gmra.mrb[2].mxu1 %vm305_vm1, %v2275_v55 }
  0x3b   : > { %1984 = vmatmul.mubr.msk.f32.gmra.mrb[6].mxu0 %vm305_vm1, %v259_v5  ;;  %1924 = vmatprep.mubr.msk.f32.mxu1 %vm305_vm1, %v2293_v60 }
  0x3c   : > { %1988 = vmatprep.mubr.msk.f32.mxu0 %vm305_vm1, %v2218_v27 }
  0x3e   : > { %1925 = vmatmul.mubr.msk.f32.gmra.mrb[4].mxu1 %vm305_vm1, %v2297_v63 }
  0x3f   : > { %1989 = vmatmul.mubr.msk.f32.vlgmr.msra.gmra.mrb[0].mxu0 %vm305_vm1, %v2231_v34  ;;  %1927 = vmatprep.mubr.msk.f32.mxu1 %vm305_vm1, %v2315_v8 }
  0x40   : > { %2001 = vmatpush3.msra.mxu0 %v1793_v18  ;;  %1991 = vmatprep.mubr.msk.f32.mxu0 %vm305_vm1, %v2241_v39 }
  0x42   : > { %1928 = vmatmul.mubr.msk.f32.gmra.mrb[6].mxu1 %vm305_vm1, %v2320_v11 }
  0x43   : > { %1992 = vmatmul.mubr.msk.f32.gmra.mrb[2].mxu0 %vm305_vm1, %v2262_v48  ;;  %1932 = vmatprep.mubr.msk.f32.mxu1 %vm305_vm1, %v2188_v6  ;;  %v1184_v6 = vsel %vm278_vm0, %v1182_v23, %v1183_v24 }
  0x44   : > { %1994 = vmatprep.mubr.msk.f32.mxu0 %vm305_vm1, %v2271_v52 }
  0x46   : > { %1933 = vmatmul.mubr.msk.f32.vlgmr.msra.gmra.mrb[0].mxu1 %vm305_vm1, %v2195_v12  ;;  %v1303_v12 = vrot.slane %v260_v22, 2 }
  0x47   : > { %1995 = vmatmul.mubr.msk.f32.gmra.mrb[4].mxu0 %vm305_vm1, %v2288_v59  ;;  %2015 = vmatpush3.msra.mxu1 %v2160_v0  ;;  %v1302_v0 = vrot.slane %v259_v5, 2 }
  0x48   : > { %1935 = vmatprep.mubr.msk.f32.mxu1 %vm305_vm1, %v2199_v14  ;;  %1997 = vmatprep.mubr.msk.f32.mxu0 %vm305_vm1, %v825_v25 }
  0x49   : > { %v1304_v14 = vsel %vm548_vm2, %v1302_v0, %v1303_v12 }
  0x4a   : > { %1936 = vmatmul.mubr.msk.f32.gmra.mrb[2].mxu1 %vm305_vm1, %v2205_v20 }
  0x4b   : > { %1998 = vmatmul.mubr.msk.f32.gmra.mrb[6].mxu0 %vm305_vm1, %v1184_v6  ;;  %1938 = vmatprep.mubr.msk.f32.mxu1 %vm305_vm1, %v2213_v26 }
  0x4c   : > { %2002 = vmatprep.mubr.msk.f32.mxu0 %vm305_vm1, %v2268_v51 }
  0x4e   : > { %1939 = vmatmul.mubr.msk.f32.gmra.mrb[4].mxu1 %vm305_vm1, %v2226_v32 }
  0x4f   : > { %2003 = vmatmul.mubr.msk.f32.vlgmr.msra.gmra.mrb[0].mxu0 %vm305_vm1, %v2275_v55  ;;  %1941 = vmatprep.mubr.msk.f32.mxu1 %vm305_vm1, %v2246_v43 }
  0x50   : > { %2005 = vmatprep.mubr.msk.f32.mxu0 %vm305_vm1, %v2293_v60 }
  0x52   : > { %1942 = vmatmul.mubr.msk.f32.gmra.mrb[6].mxu1 %vm305_vm1, %v2301_v3 }
  0x53   : > { %2006 = vmatmul.mubr.msk.f32.gmra.mrb[2].mxu0 %vm305_vm1, %v2297_v63  ;;  %1952 = vmatprep.mubr.msk.f32.mxu1 %vm305_vm1, %v2262_v48 }
  0x54   : > { %2008 = vmatprep.mubr.msk.f32.mxu0 %vm305_vm1, %v2315_v8 }
  0x56   : > { %1953 = vmatmul.mubr.msk.f32.vlgmr.msra.gmra.mrb[4].mxu1 %vm305_vm1, %v2271_v52 }
  0x57   : > { %2009 = vmatmul.mubr.msk.f32.gmra.mrb[4].mxu0 %vm305_vm1, %v2320_v11  ;;  %1955 = vmatprep.mubr.msk.f32.mxu1 %vm305_vm1, %v2288_v59 }
  0x58   : > { %2011 = vmatprep.mubr.msk.f32.mxu0 %vm305_vm1, %v2334_v15 }
  0x5a   : > { %1956 = vmatmul.mubr.msk.f32.gmra.mrb[6].mxu1 %vm305_vm1, %v825_v25 }
  0x5b   : > { %2012 = vmatmul.mubr.msk.f32.gmra.mrb[6].mxu0 %vm305_vm1, %v1304_v14 }
 0x119   : > { %v1934_v20 = vpop.f32.mrb[0].mxu1 }
 0x11a   : > { %v775_v26 = vpop.f32.mrb[1].mxu1 }
 0x11d   : > { %v1937_v27 = vpop.f32.mrb[2].mxu1 }
 0x11e   : > { %v785_v28 = vpop.f32.mrb[3].mxu1 }
 0x122   : > { %v2004_v29 = vpop.f32.mrb[0].mxu0 }
 0x123   : > { %v2016_v31 = vadd.f32 %v2004_v29, %v1934_v20  ;;  %v1375_v32 = vpop.f32.mrb[1].mxu0  ;;  %v1453_v29 = vld [vmem:[%s237_s27 + $0x8] sm:$0xff] }
 0x124   : > { %v2017_v34 = vadd.f32 %v1375_v32, %v775_v26 }
 0x125   : > { %v1430_v35 = vadd.f32 %v2016_v31, %v1802_v30 }
 0x126   : > { %v1429_v36 = vadd.f32 %v2017_v34, %v1802_v30  ;;  %v2007_v37 = vpop.f32.mrb[2].mxu0  ;;  %v1455_v34 = vld [vmem:[%s237_s27 + $0x18] sm:$0xff] }
 0x127   : > { %v2451_v38 = vmul.f32 %v1803_v33, %v1430_v35  ;;  %v2018_v39 = vadd.f32 %v2007_v37, %v1937_v27  ;;  %v1385_v40 = vpop.f32.mrb[3].mxu0  ;;  %v1452_v27 = vld [vmem:[%s237_s27] sm:$0xff] }
 0x128   : > { %v2453_v41 = vmul.f32 %v1803_v33, %v1429_v36  ;;  %v2019_v42 = vadd.f32 %v1385_v40, %v785_v28  ;;  %v1456_v35 = vld [vmem:[%s237_s27 + $0x20] sm:$0xff] }
 0x129   : > { %v1493_v43 = vmul.f32 -2.0, %v2451_v38  ;;  %v1432_v44 = vadd.f32 %v2018_v39, %v1802_v30  ;;  %v1954_v45 = vpop.f32.mrb[4].mxu1  ;;  %v1469_v31 = vsub.f32 %v1453_v29, %v2451_v38 }
 0x12a   : > { %v1492_v46 = vmul.f32 -2.0, %v2453_v41  ;;  %v1431_v47 = vadd.f32 %v2019_v42, %v1802_v30  ;;  %v2010_v48 = vpop.f32.mrb[4].mxu0  ;;  %v916_v49 = vpop.f32.mrb[5].mxu1  ;;  %v1468_v28 = vsub.f32 %v1452_v27, %v2453_v41 }
 0x12b   : > { %v2457_v50 = vmul.f32 %v1803_v33, %v1432_v44  ;;  %v2020_v51 = vadd.f32 %v2010_v48, %v1954_v45  ;;  %v1395_v52 = vpop.f32.mrb[5].mxu0  ;;  %v1502_v56 = vmul.f32 1.442695, %v1493_v43  ;;  %v1477_v36 = vmul.f32 %v1469_v31, %v1469_v31  ;;  %v1457_v44 = vld [vmem:[%s237_s27 + $0x28] sm:$0xff]  ;;  %v1458_v45 = vld [vmem:[%s237_s27 + $0x30] sm:$0xff] }
 0x12c   : > { %v1500_v53 = vmul.f32 1.442695, %v1492_v46  ;;  %v2459_v54 = vmul.f32 %v1803_v33, %v1431_v47  ;;  %v2021_v55 = vadd.f32 %v1395_v52, %v916_v49  ;;  %v1476_v32 = vmul.f32 %v1468_v28, %v1468_v28 }
 0x12d   : > { %v1495_v57 = vmul.f32 -2.0, %v2457_v50  ;;  %v1434_v58 = vadd.f32 %v2020_v51, %v1802_v30  ;;  %v1957_v59 = vpop.f32.mrb[6].mxu1  ;;  %v1471_v37 = vsub.f32 %v1455_v34, %v2457_v50  ;;  %v1485_v47 = vmul.f32 0.5, %v1477_v36 }
 0x12e   : > { %2093 = vpow2.f32 %v1500_v53  ;;  %v1494_v60 = vmul.f32 -2.0, %v2459_v54  ;;  %v1433_v61 = vadd.f32 %v2021_v55, %v1802_v30  ;;  %v2013_v62 = vpop.f32.mrb[6].mxu0  ;;  %v926_v63 = vpop.f32.mrb[7].mxu1  ;;  %v1484_v39 = vmul.f32 0.5, %v1476_v32 }
 0x12f   : > { %v2463_v1 = vmul.f32 %v1803_v33, %v1434_v58  ;;  %v2022_v2 = vadd.f32 %v2013_v62, %v1957_v59  ;;  %v1405_v3 = vpop.f32.mrb[7].mxu0  ;;  %2095 = vpow2.f32 %v1502_v56  ;;  %v1506_v10 = vmul.f32 1.442695, %v1495_v57  ;;  %v1459_v57 = vld [vmem:[%s237_s27 + $0x38] sm:$0xff] }
 0x130   : > { %v1504_v7 = vmul.f32 1.442695, %v1494_v60  ;;  %v2465_v8 = vmul.f32 %v1803_v33, %v1433_v61  ;;  %v2023_v9 = vadd.f32 %v1405_v3, %v926_v63  ;;  %v1479_v48 = vmul.f32 %v1471_v37, %v1471_v37 }
 0x131   : > { %v1497_v11 = vmul.f32 -2.0, %v2463_v1  ;;  %v1436_v13 = vadd.f32 %v2022_v2, %v1802_v30  ;;  %v1473_v52 = vsub.f32 %v1457_v44, %v2463_v1  ;;  %v1463_v28 = vsub.f32 -0.9189385, %v2457_v50 }
 0x132   : > { %2097 = vpow2.f32 %v1504_v7  ;;  %v1496_v15 = vmul.f32 -2.0, %v2465_v8  ;;  %v1435_v16 = vadd.f32 %v2023_v9, %v1802_v30  ;;  %v1454_v30 = vld [vmem:[%s237_s27 + $0x10] sm:$0xff]  ;;  %v1472_v42 = vsub.f32 %v1456_v35, %v2465_v8 }
 0x133   : > { %v2469_v17 = vmul.f32 %v1803_v33, %v1436_v13  ;;  %2099 = vpow2.f32 %v1506_v10  ;;  %v1510_v5 = vmul.f32 1.442695, %v1497_v11  ;;  %v1487_v60 = vmul.f32 0.5, %v1479_v48 }
 0x134   : > { %v1508_v18 = vmul.f32 1.442695, %v1496_v15  ;;  %v2471_v4 = vmul.f32 %v1803_v33, %v1435_v16  ;;  %v1470_v33 = vsub.f32 %v1454_v30, %v2459_v54  ;;  %v1480_v51 = vmul.f32 %v1472_v42, %v1472_v42 }
 0x135   : > { %v1499_v19 = vmul.f32 -2.0, %v2469_v17  ;;  %v1481_v62 = vmul.f32 %v1473_v52, %v1473_v52  ;;  %v1475_v2 = vsub.f32 %v1459_v57, %v2469_v17  ;;  %v1467_v50 = vsub.f32 -0.9189385, %v2469_v17 }
 0x136   : > { %2101 = vpow2.f32 %v1508_v18  ;;  %v1498_v21 = vmul.f32 -2.0, %v2471_v4  ;;  %v1478_v40 = vmul.f32 %v1470_v33, %v1470_v33  ;;  %v1474_v53 = vsub.f32 %v1458_v45, %v2471_v4 }
 0x137   : > { %2103 = vpow2.f32 %v1510_v5  ;;  %v1514_v24 = vmul.f32 1.442695, %v1499_v19  ;;  %v1488_v61 = vmul.f32 0.5, %v1480_v51  ;;  %v1489_v11 = vmul.f32 0.5, %v1481_v62 }
 0x138   : > { %v2094_v22 = vpop.eup %2093  ;;  %v1512_v23 = vmul.f32 1.442695, %v1498_v21  ;;  %v1486_v49 = vmul.f32 0.5, %v1478_v40  ;;  %v1482_v63 = vmul.f32 %v1474_v53, %v1474_v53  ;;  %v1483_v15 = vmul.f32 %v1475_v2, %v1475_v2 }
 0x139   : > { %1524 = vrot.lane.b32.xlu0 %v2094_v22, %s2117_s23  ;;  %v2096_v25 = vpop.eup %2095 }
 0x13a   : > { %2105 = vpow2.f32 %v1512_v23  ;;  %v1490_v13 = vmul.f32 0.5, %v1482_v63  ;;  %v1491_v21 = vmul.f32 0.5, %v1483_v15 }
 0x13b   : > { %2107 = vpow2.f32 %v1514_v24  ;;  %v1460_v24 = vsub.f32 -0.9189385, %v2453_v41  ;;  %v1464_v41 = vsub.f32 -0.9189385, %v2465_v8 }
 0x13c   : > { %v2098_v6 = vpop.eup %2097 }
 0x13d   : > { %1526 = vrot.lane.b32.xlu0 %v2096_v25, %s2117_s23  ;;  %1528 = vrot.lane.b32.xlu1 %v2098_v6, %s2117_s23  ;;  %v2100_v0 = vpop.eup %2099 }
 0x140   : > { %v2102_v12 = vpop.eup %2101 }
 0x141   : > { %1530 = vrot.lane.b32.xlu1 %v2100_v0, %s2117_s23  ;;  %1532 = vrot.lane.b32.xlu0 %v2102_v12, %s2117_s23  ;;  %v2104_v14 = vpop.eup %2103  ;;  %v1461_v0 = vsub.f32 -0.9189385, %v2451_v38  ;;  %v1462_v12 = vsub.f32 -0.9189385, %v2459_v54  ;;  %v1465_v38 = vsub.f32 -0.9189385, %v2463_v1 }
 0x142   : > { %v1466_v54 = vsub.f32 -0.9189385, %v2471_v4 }
 0x144   : > { %v2106_v20 = vpop.eup %2105 }
 0x145   : > { %1534 = vrot.lane.b32.xlu1 %v2104_v14, %s2117_s23  ;;  %1536 = vrot.lane.b32.xlu0 %v2106_v20, %s2117_s23  ;;  %v2108_v26 = vpop.eup %2107 }
 0x149   : > { %1538 = vrot.lane.b32.xlu1 %v2108_v26, %s2117_s23 }
 0x1ab   : > { %v1525_v43 = vpop.permute.xlu0 %1524 }
 0x1ac   : > { %v1548_v46 = vmul.f32 %v1525_v43, %v1484_v39 }
 0x1ae   : > { %1564 = vrot.lane.b32.xlu0 %v1548_v46, %s2118_s28 }
 0x1af   : > { %v1527_v55 = vpop.permute.xlu0 %1526  ;;  %v1529_v56 = vpop.permute.xlu1 %1528 }
 0x1b0   : > { %v1549_v58 = vmul.f32 %v1527_v55, %v1485_v47  ;;  %v1550_v59 = vmul.f32 %v1529_v56, %v1486_v49 }
 0x1b2   : > { %1566 = vrot.lane.b32.xlu1 %v1549_v58, %s2118_s28  ;;  %1568 = vrot.lane.b32.xlu0 %v1550_v59, %s2118_s28 }
 0x1b3   : > { %v1531_v3 = vpop.permute.xlu1 %1530  ;;  %v1533_v7 = vpop.permute.xlu0 %1532 }
 0x1b4   : > { %v1551_v9 = vmul.f32 %v1531_v3, %v1487_v60  ;;  %v1552_v10 = vmul.f32 %v1533_v7, %v1488_v61 }
 0x1b6   : > { %1570 = vrot.lane.b32.xlu1 %v1551_v9, %s2118_s28  ;;  %1572 = vrot.lane.b32.xlu0 %v1552_v10, %s2118_s28 }
 0x1b7   : > { %v1535_v16 = vpop.permute.xlu1 %1534  ;;  %v1537_v18 = vpop.permute.xlu0 %1536 }
 0x1b8   : > { %v1553_v5 = vmul.f32 %v1535_v16, %v1489_v11  ;;  %v1554_v19 = vmul.f32 %v1537_v18, %v1490_v13 }
 0x1ba   : > { %1574 = vrot.lane.b32.xlu1 %v1553_v5, %s2118_s28  ;;  %1576 = vrot.lane.b32.xlu0 %v1554_v19, %s2118_s28 }
 0x1bb   : > { %v1539_v22 = vpop.permute.xlu1 %1538 }
 0x1bc   : > { %v1555_v23 = vmul.f32 %v1539_v22, %v1491_v21 }
 0x1be   : > { %1578 = vrot.lane.b32.xlu1 %v1555_v23, %s2118_s28 }
 0x220   : > { %v1565_v25 = vpop.permute.xlu0 %1564 }
 0x221   : > { %v1588_v6 = vsub.f32 %v1460_v24, %v1565_v25 }
 0x223   : > { %1604 = vrot.lane.b32.xlu0 %v1588_v6, %s2117_s23 }
 0x224   : > { %v1567_v14 = vpop.permute.xlu1 %1566  ;;  %v1569_v20 = vpop.permute.xlu0 %1568 }
 0x225   : > { %v1589_v26 = vsub.f32 %v1461_v0, %v1567_v14  ;;  %v1590_v27 = vsub.f32 %v1462_v12, %v1569_v20 }
 0x227   : > { %1606 = vrot.lane.b32.xlu1 %v1589_v26, %s2117_s23  ;;  %1608 = vrot.lane.b32.xlu0 %v1590_v27, %s2117_s23 }
 0x228   : > { %v1571_v29 = vpop.permute.xlu1 %1570  ;;  %v1573_v30 = vpop.permute.xlu0 %1572 }
 0x229   : > { %v1591_v31 = vsub.f32 %v1463_v28, %v1571_v29  ;;  %v1592_v32 = vsub.f32 %v1464_v41, %v1573_v30 }
 0x22b   : > { %1610 = vrot.lane.b32.xlu1 %v1591_v31, %s2117_s23  ;;  %1612 = vrot.lane.b32.xlu0 %v1592_v32, %s2117_s23 }
 0x22c   : > { %v1575_v33 = vpop.permute.xlu1 %1574  ;;  %v1577_v34 = vpop.permute.xlu0 %1576 }
 0x22d   : > { %v1593_v35 = vsub.f32 %v1465_v38, %v1575_v33  ;;  %v1594_v36 = vsub.f32 %v1466_v54, %v1577_v34 }
 0x22f   : > { %1614 = vrot.lane.b32.xlu1 %v1593_v35, %s2117_s23  ;;  %1616 = vrot.lane.b32.xlu0 %v1594_v36, %s2117_s23 }
 0x230   : > { %v1579_v8 = vpop.permute.xlu1 %1578 }
 0x231   : > { %v1595_v37 = vsub.f32 %v1467_v50, %v1579_v8 }
 0x233   : > { %1618 = vrot.lane.b32.xlu1 %v1595_v37, %s2117_s23 }
 0x295   : > { %v1605_v39 = vpop.permute.xlu0 %1604 }
 0x296   : > { %v1628_v1 = vsel %vm305_vm1, %v1605_v39, 0.0 }
 0x299   : > { %v1607_v40 = vpop.permute.xlu1 %1606  ;;  %v1609_v42 = vpop.permute.xlu0 %1608 }
 0x29a   : > { %v1629_v4 = vsel %vm305_vm1, %v1607_v40, 0.0  ;;  %v1631_v44 = vsel %vm305_vm1, %v1609_v42, 0.0 }
 0x29b   : > { %v1630_v43 = vadd.f32 %v1629_v4, %v1628_v1 }
 0x29d   : > { %v1632_v45 = vadd.f32 %v1631_v44, %v1630_v43  ;;  %v1611_v46 = vpop.permute.xlu1 %1610  ;;  %v1613_v47 = vpop.permute.xlu0 %1612 }
 0x29e   : > { %v1633_v48 = vsel %vm305_vm1, %v1611_v46, 0.0  ;;  %v1635_v49 = vsel %vm305_vm1, %v1613_v47, 0.0 }
 0x29f   : > { %v1634_v17 = vadd.f32 %v1633_v48, %v1632_v45 }
 0x2a1   : > { %v1636_v51 = vadd.f32 %v1635_v49, %v1634_v17  ;;  %v1615_v52 = vpop.permute.xlu1 %1614  ;;  %v1617_v53 = vpop.permute.xlu0 %1616 }
 0x2a2   : > { %v1637_v55 = vsel %vm305_vm1, %v1615_v52, 0.0  ;;  %v1639_v57 = vsel %vm305_vm1, %v1617_v53, 0.0 }
 0x2a3   : > { %v1638_v56 = vadd.f32 %v1637_v55, %v1636_v51 }
 0x2a5   : > { %v1640_v58 = vadd.f32 %v1639_v57, %v1638_v56  ;;  %v1619_v59 = vpop.permute.xlu1 %1618 }
 0x2a6   : > { %v1641_v60 = vsel %vm305_vm1, %v1619_v59, 0.0 }
 0x2a7   : > { %v1642_v61 = vadd.f32 %v1641_v60, %v1640_v58 }
 0x2a9   : > { %1643 = vadd.xlane.f32.xlu0 %v1642_v61 }
 0x336   : > { %v1644_v62 = vpop.xlane.xlu0 %1643 }
 0x337   : > { %v1645_v63 = vrot.slane %v1644_v62, 4 }
 0x339   : > { %v1646_v2 = vadd.f32 %v1645_v63, %v1644_v62 }
 0x33b   : > { %v1647_v3 = vrot.slane %v1646_v2, 2 }
 0x33d   : > { %v1648_v7 = vadd.f32 %v1647_v3, %v1646_v2 }
 0x33f   : > { %v1649_v9 = vrot.slane %v1648_v7, 1 }
 0x341   : > { %v1650_v10 = vadd.f32 %v1649_v9, %v1648_v7 }
 0x343   : > { %2081 = vpush %v1650_v10 }
 0x374   : > { %s2082_s7 = spop %2081 }
 0x375   : > { %v1652_v11 = vstv %s2082_s7 }
 0x376   : > { %1654 = vst.msk [vmem:[%s240_s6] sm:$0x1] %vm1653_vm3, %v1652_v11 }
 0x377 PF: > { %s15_s18 = sadd.s32 1, %s2115_s18  }
 0x378   : > { %p12_p4 = scmp.ge.s32.totalorder %s15_s18, 4  }
 0x37a   :  { %14 = sbr.rel (!%p12_p4) target bundleno = 1 (0x1), region = 81 }

// kernel: custom-call.7
= control target key start
LH: loop header
LB: loop body
LE: loop exit
PB: predicated region body
PF: predicated region fallthrough
CT: control target
= control target key end

     0   :  { %5 = vsyncpa [#allocation1], 0  ;;  %s694_s0 = inlined_call_operand.hbm [shape: f32[16,16], index: 0, kind: input, shape index: {}]   ;;  %s695_s1 = inlined_call_operand.vmem [shape: f32[16,16], index: 1, kind: output, shape index: {0}]   ;;  %s696_s2 = inlined_call_operand.hbm [shape: s32[16], index: 2, kind: output, shape index: {1}]   ;;  %s697_s3 = inlined_call_operand.hbm [shape: s32[16], index: 3, kind: output, shape index: {2}]  }
   0x1   :  { %6 = vsyncpa [#allocation2], 0 }
   0x2   :  { %7 = vsyncpa [#allocation8], 0  ;;  %s574_s12 = smov [#allocation0]   ;;  %s450_s16 = scalar_lea.hbm %s694_s0, 256 }
   0x3   :  { %s11_s13 = sshll.u32 %s574_s12, 4  ;;  %p451_p0 = scmp.ne.s32.totalorder %s694_s0, %s450_s16  ;;  %s12_s13 = int_to_ptr.vmem [resolvable:$true] %s11_s13 }
   0x4   :  { %p454_p1 = scmp.lt.u32.totalorder %s450_s16, %s694_s0 }
   0x6   :  { %p456_p2 = pnand %p454_p1, %p451_p0 }
   0x8   :  { %459 = shalt.err (!%p456_p2)
}
   0x9   :  { %s460_s21 = scalar_lea.vmem %s12_s13, 256  ;;  %p465_p4 = scmp.lt.s32.totalorder %s12_s13, %s12_s13 }
   0xa   :  { %p461_p3 = scmp.ne.s32.totalorder %s12_s13, %s460_s21  ;;  %p466_p5 = scmp.lt.s32.totalorder %s460_s21, %s460_s21 }
   0xc   :  { %p467_p6 = por %p466_p5, %p465_p4 }
   0xe   :  { %p468_p7 = pnand %p467_p6, %p461_p3 }
  0x10   :  { %471 = shalt.err (!%p468_p7)
}
  0x11   :  { %14 = dma.hbm_to_vmem [thread:$0]  %s694_s0, 256, %s12_s13, [#allocation1]  }
  0x12   :  { %552 = dma.done.wait [#allocation1], 256  }
  0x13   :  { %553 = vsyncadd [#allocation1], 4294967040  ;;  %v23_v0 = vlaneseq  ;;  %v575_v1 = vmov 0   ;;  %v16_v3 = vld [vmem:[#allocation0] sm:$0xff]  ;;  %v20_v4 = vld [vmem:[#allocation0 + $0x8] sm:$0xff]  ;;  %s558_s24 = smov 0  }
  0x14   :  { %22 = vst [vmem:[#allocation4] sm:$0x1] %v575_v1  ;;  %17 = vst [vmem:[#allocation3] sm:$0xff] %v16_v3 }
  0x15   :  { %v611_v2 = vshrl.u32 %v23_v0, 7  ;;  %21 = vst [vmem:[#allocation3 + $0x8] sm:$0xff] %v20_v4 }
  0x16 LB: > { %s360_s25 = sshll.u32 %s560_s24, 3  ;;  %s31_s24 = sadd.s32 1, %s560_s24   ;;  %s560_s24 = sphi %s558_s24, %s31_s24  }
  0x17   : > { %v35_v5 = vstv %s360_s25  ;;  %s33_s0 = scalar_lea.vmem [#allocation9], %s360_s25  ;;  %p28_p8 = scmp.ge.s32.totalorder %s31_s24, 2  }
  0x18   : > { %v36_v6 = vadd.s32 %v35_v5, %v611_v2  ;;  %s614_s26 = smov (%p28_p8), 0  }
  0x19   :  { %30 = sbr.rel (!%p28_p8) target bundleno = 22 (0x16), region = 94 }
  0x1a   : > { %37 = vst [vmem:[%s33_s0] sm:$0xff] %v36_v6 }
  0x20 LB: > { %v48_v7 = vld [vmem:[#allocation3] sm:$0xff]  ;;  %v60_v8 = vld [vmem:[#allocation3 + $0x8] sm:$0xff]  ;;  %v620_v9 = vadd.s32 8, %v611_v2  ;;  %v623_v11 = vstv %s564_s26  ;;  %s106_s27 = ssub.s32 128, %s564_s26  ;;  %v112_v44 = vand.u32 127, %v23_v0  ;;  %s118_s28 = scalar_lea.vmem [#allocation3], %s564_s26  ;;  %s564_s26 = sphi %s614_s26, %s43_s26  }
  0x21   : > { %v49_v10 = vand.u32 2147483647, %v48_v7  ;;  %v61_v12 = vand.u32 2147483647, %v60_v8  ;;  %vm52_vm0 = vcmp.ge.s32.totalorder %v611_v2, %v623_v11  ;;  %v115_v47 = vld [vmem:[#allocation4] ss:$0 sm:$0xff] }
  0x22   : > { %vm64_vm3 = vcmp.ge.s32.totalorder %v620_v9, %v623_v11  ;;  %vm136_vm13 = vcmp.gt.s32.totalorder %v112_v44, %v623_v11  ;;  %vm159_vm14 = vcmp.gt.s32.totalorder %v620_v9, %v623_v11  ;;  %vm113_vm15 = vcmp.eq.s32.totalorder %v112_v44, %v623_v11  ;;  %v120_v48 = vld [vmem:[%s118_s28] ss:$0 sm:$0xff]  ;;  %s124_s30 = scalar_lea.vmem [#allocation9], %s564_s26  ;;  %s43_s26 = sadd.s32 1, %s564_s26  }
  0x23   : > { %vm362_vm1 = vcmp.gt.f32.partialorder %v49_v10, -inf  ;;  %v126_v49 = vld [vmem:[%s124_s30] ss:$0 sm:$0xff]  ;;  %p40_p9 = scmp.ge.s32.totalorder %s43_s26, 16  }
  0x24   : > { %vm56_vm2 = vmand %vm52_vm0, %vm362_vm1  ;;  %s566_s8 = smov (%p40_p9), %s695_s1   ;;  %s570_s9 = smov (%p40_p9), [#allocation3]  }
  0x25   : > { %v57_v13 = vsel %vm56_vm2, %v611_v2, %v623_v11  ;;  %v58_v14 = vsel %vm56_vm2, %v49_v10, -inf  ;;  %vm643_vm0 = vmand %vm159_vm14, %vm113_vm15  ;;  %vm144_vm2 = vcmp.gt.s32.totalorder %v611_v2, %v623_v11 }
  0x26   : > { %vm67_vm4 = vcmp.lt.f32.partialorder %v58_v14, %v61_v12 }
  0x27   : > { %vm68_vm5 = vmand %vm64_vm3, %vm67_vm4 }
  0x28   : > { %v69_v15 = vsel %vm68_vm5, %v620_v9, %v57_v13  ;;  %v70_v16 = vsel %vm68_vm5, %v61_v12, %v58_v14  ;;  %vm148_vm4 = vmand %vm144_vm2, %vm113_vm15 }
  0x29   : > { %v71_v17 = vrot.slane %v70_v16, 1  ;;  %v72_v18 = vrot.slane %v69_v15, 1 }
  0x2b   : > { %vm73_vm6 = vcmp.ge.f32.partialorder %v71_v17, %v70_v16  ;;  %v76_v19 = vrot.slane %v71_v17, 1  ;;  %v77_v20 = vrot.slane %v72_v18, 1 }
  0x2c   : > { %v74_v21 = vsel %vm73_vm6, %v71_v17, %v70_v16  ;;  %v75_v22 = vsel %vm73_vm6, %v72_v18, %v69_v15 }
  0x2d   : > { %vm78_vm7 = vcmp.ge.f32.partialorder %v76_v19, %v74_v21  ;;  %v81_v23 = vrot.slane %v76_v19, 1  ;;  %v82_v24 = vrot.slane %v77_v20, 1 }
  0x2e   : > { %v79_v25 = vsel %vm78_vm7, %v76_v19, %v74_v21  ;;  %v80_v26 = vsel %vm78_vm7, %v77_v20, %v75_v22 }
  0x2f   : > { %vm83_vm8 = vcmp.ge.f32.partialorder %v81_v23, %v79_v25  ;;  %v86_v27 = vrot.slane %v81_v23, 1  ;;  %v87_v28 = vrot.slane %v82_v24, 1 }
  0x30   : > { %v84_v29 = vsel %vm83_vm8, %v81_v23, %v79_v25  ;;  %v85_v30 = vsel %vm83_vm8, %v82_v24, %v80_v26 }
  0x31   : > { %vm88_vm9 = vcmp.ge.f32.partialorder %v86_v27, %v84_v29  ;;  %v91_v31 = vrot.slane %v86_v27, 1  ;;  %v92_v32 = vrot.slane %v87_v28, 1 }
  0x32   : > { %v89_v33 = vsel %vm88_vm9, %v86_v27, %v84_v29  ;;  %v90_v34 = vsel %vm88_vm9, %v87_v28, %v85_v30 }
  0x33   : > { %vm93_vm10 = vcmp.ge.f32.partialorder %v91_v31, %v89_v33  ;;  %v96_v35 = vrot.slane %v91_v31, 1  ;;  %v97_v36 = vrot.slane %v92_v32, 1 }
  0x34   : > { %v94_v37 = vsel %vm93_vm10, %v91_v31, %v89_v33  ;;  %v95_v38 = vsel %vm93_vm10, %v92_v32, %v90_v34 }
  0x35   : > { %vm98_vm11 = vcmp.ge.f32.partialorder %v96_v35, %v94_v37  ;;  %v101_v39 = vrot.slane %v96_v35, 1  ;;  %v102_v40 = vrot.slane %v97_v36, 1 }
  0x36   : > { %v99_v41 = vsel %vm98_vm11, %v96_v35, %v94_v37  ;;  %v100_v42 = vsel %vm98_vm11, %v97_v36, %v95_v38 }
  0x37   : > { %vm103_vm12 = vcmp.ge.f32.partialorder %v101_v39, %v99_v41 }
  0x38   : > { %v105_v43 = vsel %vm103_vm12, %v102_v40, %v100_v42 }
  0x39   : > { %107 = vrot.lane.b32.xlu0 %v105_v43, %s106_s27 }
  0xab   : > { %v108_v46 = vpop.permute.xlu0 %107 }
  0xac   : > { %367 = vpush %v108_v46 }
  0xdd   : > { %s368_s29 = spop %367 }
  0xde   : > { %v114_v50 = vstv %s368_s29  ;;  %s119_s4 = scalar_lea.vmem [#allocation3], %s368_s29  ;;  %s125_s5 = scalar_lea.vmem [#allocation9], %s368_s29 }
  0xdf   : > { %v116_v51 = vsel %vm113_vm15, %v114_v50, %v115_v47  ;;  %v121_v52 = vld [vmem:[%s119_s4] ss:$0 sm:$0xff] }
  0xe0   : > { %v127_v53 = vld [vmem:[%s125_s5] ss:$0 sm:$0xff]  ;;  %117 = vst [vmem:[#allocation4] sm:$0x1] %v116_v51  ;;  %122 = vst [vmem:[%s119_s4] sm:$0x1] %v120_v48  ;;  %vm130_vm1 = vcmp.ne.f32.partialorder %v121_v52, 0.0 }
  0xe1   : > { %128 = vst [vmem:[%s125_s5] sm:$0x1] %v126_v49  ;;  %123 = vst [vmem:[%s118_s28] sm:$0x1] %v121_v52  ;;  %v137_v3 = vsel %vm136_vm13, %v121_v52, 0.0 }
  0xe2   : > { %129 = vst [vmem:[%s124_s30] sm:$0x1] %v127_v53  ;;  %vm131_vm3 = vmand %vm113_vm15, %vm130_vm1 }
  0xe3   : > { %v132_v54 = vsel %vm131_vm3, %v121_v52, 1.0 }
  0xe4   : > { %v160_v55 = vsel %vm159_vm14, %v132_v54, 1.0  ;;  %v145_v56 = vsel %vm144_vm2, %v132_v54, 1.0 }
  0xe5   : > { %446 = vrcp.f32 %v160_v55 }
  0xe6   : > { %448 = vrcp.f32 %v145_v56 }
  0xe7   :  { %v223_v11 = vld [vmem:[#allocation4] sm:$0x1] (%p40_p9) }
  0xe8   : > { %v156_v58 = vld [vmem:[#allocation3 + $0x8] sm:$0xff]  ;;  %v141_v61 = vld [vmem:[#allocation3] sm:$0xff]  ;;  %225 = vst [vmem:[#allocation5] sm:$0x1] (%p40_p9), %v223_v11 }
  0xe9   :  { %v170_v10 = vld [vmem:[#allocation9] sm:$0xff] (%p40_p9)  ;;  %v172_v12 = vld [vmem:[#allocation9 + $0x8] sm:$0xff] (%p40_p9) }
  0xef   : > { %v447_v57 = vpop.eup %446 }
  0xf0   : > { %v449_v59 = vpop.eup %448  ;;  %v162_v60 = vmul.f32 %v447_v57, %v156_v58 }
  0xf1   : > { %v147_v62 = vmul.f32 %v449_v59, %v141_v61 }
  0xf2   : > { %v164_v63 = vsel %vm643_vm0, %v162_v60, 0.0 }
  0xf3   : > { %165 = vadd.xlane.f32.xlu1 %v164_v63  ;;  %v149_v1 = vsel %vm148_vm4, %v147_v62, 0.0 }
  0xf4   : > { %150 = vadd.xlane.f32.xlu0 %v149_v1 }
 0x121   :  { %187 = vxpose.xlu0.b32.start [1/2] (short) (narrow) (%p40_p9), %v170_v10, 8 }
 0x125   :  { %188 = vxpose.xlu0.b32.end [2/2] (short) (narrow) (%p40_p9), %v172_v12, 8 }
 0x180   : > { %v166_v4 = vpop.xlane.xlu1 %165  ;;  %42 = sbr.rel (!%p40_p9) target bundleno = 32 (0x20), region = 105 }
 0x181   : > { %v167_v5 = vmul.f32 %v166_v4, %v137_v3  ;;  %v151_v6 = vpop.xlane.xlu0 %150 }
 0x182   : > { %v152_v7 = vmul.f32 %v151_v6, %v137_v3 }
 0x183   : > { %v168_v8 = vsub.f32 %v162_v60, %v167_v5 }
 0x184   : > { %v153_v9 = vsub.f32 %v147_v62, %v152_v7 }
 0x185   : > { %169 = vst [vmem:[#allocation3 + $0x8] sm:$0xff] %v168_v8 }
 0x186   : > { %154 = vst [vmem:[#allocation3] sm:$0xff] %v153_v9 }
 0x1a1   :  { %v203_v13 = vpop.trf.xlu0 }
 0x1a2   :  { %219 = vst [vmem:[#allocation6] sm:$0x1] %v203_v13 }
 0x1a9   :  { %v229_v14 = vld [vmem:[#allocation6] sm:$0x1] }
 0x1aa   :  { %231 = vst [vmem:[#allocation7] sm:$0x1] %v229_v14 }
 0x1ab LB: > { %v279_v15 = vld [vmem:[%s572_s9] sm:$0xff]  ;;  %s281_s9 = scalar_lea.vmem %s572_s9, 8   ;;  %s572_s9 = sphi %s570_s9, %s281_s9   ;;  %s568_s8 = sphi %s566_s8, %s282_s8  }
 0x1ac   : > { %280 = vst [vmem:[%s568_s8] sm:$0xff] %v279_v15  ;;  %s282_s8 = scalar_lea.vmem %s568_s8, 8   ;;  %p276_p10 = scmp.gt.s32.totalorder %s281_s9, [#allocation3 + $0x8] }
 0x1ad   :  { %s576_s10 = smov (%p276_p10), [#allocation5]   ;;  %s577_s12 = smov (%p276_p10), [#allocation7]  }
 0x1ae   :  { %278 = sbr.rel (!%p276_p10) target bundleno = 427 (0x1ab), region = 127  ;;  %s299_s11 = sshll.u32 (%p276_p10), %s576_s10, 4  ;;  %s300_s11 = int_to_ptr.vmem [resolvable:$true] %s299_s11 }
 0x1af   :  { %s308_s13 = sshll.u32 (%p276_p10), %s577_s12, 4  ;;  %s472_s1 = scalar_lea.vmem (%p276_p10), %s300_s11, 16  ;;  %s309_s13 = int_to_ptr.vmem [resolvable:$true] %s308_s13 }
 0x1b0   :  { %p473_p11 = scmp.ne.s32.totalorder (%p276_p10), %s300_s11, %s472_s1  ;;  %s476_s14 = scalar_lea.vmem (%p276_p10), %s300_s11, 32 }
 0x1b1   :  { %p477_p12 = scmp.lt.s32.totalorder (%p276_p10), %s300_s11, %s300_s11  ;;  %p478_p13 = scmp.lt.s32.totalorder (%p276_p10), %s476_s14, %s472_s1 }
 0x1b3   :  { %p479_p0 = por (%p276_p10), %p478_p13, %p477_p12 }
 0x1b5   :  { %p480_p1 = pnand %p479_p0, %p473_p11 }
 0x1b7   :  { %483 = shalt.err (!%p480_p1)
}
 0x1b8   :  { %s484_s17 = scalar_lea.hbm %s696_s2, 16 }
 0x1b9   :  { %p485_p2 = scmp.ne.s32.totalorder %s696_s2, %s484_s17  ;;  %p488_p3 = scmp.lt.u32.totalorder %s484_s17, %s696_s2 }
 0x1bb   :  { %p490_p4 = pnand %p488_p3, %p485_p2 }
 0x1bd   :  { %493 = shalt.err (!%p490_p4)
}
 0x1be   :  { %302 = dma.vmem_to_hbm [thread:$0]  %s300_s11, 16, %s696_s2, [#allocation2]  }
 0x1bf   :  { %s494_s24 = scalar_lea.vmem %s309_s13, 16  ;;  %s498_s25 = scalar_lea.vmem %s309_s13, 32 }
 0x1c0   :  { %p495_p5 = scmp.ne.s32.totalorder %s309_s13, %s494_s24  ;;  %p499_p6 = scmp.lt.s32.totalorder %s309_s13, %s309_s13 }
 0x1c1   :  { %p500_p7 = scmp.lt.s32.totalorder %s498_s25, %s494_s24 }
 0x1c3   :  { %p501_p8 = por %p500_p7, %p499_p6 }
 0x1c5   :  { %p502_p9 = pnand %p501_p8, %p495_p5 }
 0x1c7   :  { %505 = shalt.err (!%p502_p9)
}
 0x1c8   :  { %s506_s27 = scalar_lea.hbm %s697_s3, 16 }
 0x1c9   :  { %p507_p10 = scmp.ne.s32.totalorder %s697_s3, %s506_s27  ;;  %p510_p11 = scmp.lt.u32.totalorder %s506_s27, %s697_s3 }
 0x1cb   :  { %p512_p12 = pnand %p510_p11, %p507_p10 }
 0x1cd   :  { %515 = shalt.err (!%p512_p12)
}
 0x1ce   :  { %311 = dma.vmem_to_hbm [thread:$0]  %s309_s13, 16, %s697_s3, [#allocation8]  }
 0x1cf   :  { %554 = dma.done.wait [#allocation2], 16  }
 0x1d0   :  { %555 = vsyncadd [#allocation2], 4294967280 }
 0x1d1   :  { %556 = dma.done.wait [#allocation8], 16  }
 0x1d2   :  { %557 = vsyncadd [#allocation8], 4294967280 }
 0x1d3   :  { %318 = vsyncpa [#allocation1], 1 }
 0x1d4   :  { %319 = vsyncpa [#allocation2], 1 }
 0x1d5   :  { %320 = vsyncpa [#allocation8], 1 }

// kernel: block_forward.12
= control target key start
LH: loop header
LB: loop body
LE: loop exit
PB: predicated region body
PF: predicated region fallthrough
CT: control target
= control target key end

     0   :  { %s7066_s24 = smov 0   ;;  %s9121_s0 = inlined_call_operand.vmem [shape: bf16[2,10,10,512], index: 0, kind: input, shape index: {}]   ;;  %s9122_s1 = inlined_call_operand.vmem [shape: bf16[9,512,16], index: 1, kind: input, shape index: {}]   ;;  %s9123_s2 = inlined_call_operand.vmem [shape: f32[1,16], index: 2, kind: input, shape index: {}]   ;;  %s9124_s3 = inlined_call_operand.vmem [shape: f32[1,16], index: 3, kind: input, shape index: {}]   ;;  %s9125_s4 = inlined_call_operand.vmem [shape: f32[2,64,8], index: 4, kind: input, shape index: {}]   ;;  %s9126_s5 = inlined_call_operand.vmem [shape: f32[2,64,8], index: 5, kind: input, shape index: {}]   ;;  %s9127_s6 = inlined_call_operand.vmem [shape: f32[2,64,16], index: 6, kind: output, shape index: {0}]   ;;  %s9128_s7 = inlined_call_operand.vmem [shape: f32[2,1,1], index: 7, kind: output, shape index: {1}]  }
   0x1 LB: > { %s4996_s25 = sadd.s32 4294967295, %s7022_s24   ;;  %p5000_p0 = scmp.ge.s32.totalorder %s7022_s24, 1  ;;  %s7022_s24 = sphi %s7066_s24, %s18_s24  }
   0x2   : > { %p260_p1 = scmp.lt.s32.totalorder %s7022_s24, 3 }
   0x4   : > { %p261_p2 = pnand %p5000_p0, %p260_p1 }
   0x6   : > { %264 = sbr.rel (%p261_p2) target bundleno = 892 (0x37c), region = 44 }
   0xd   : > { %v6676_v0 = vld [vmem:[%s9122_s1 + $0x140] sm:$0xff]   ;;  %v6680_v4 = vld [vmem:[%s9122_s1 + $0x148] sm:$0xff]   ;;  %v6684_v8 = vld [vmem:[%s9122_s1 + $0x150] sm:$0xff]   ;;  %p305_p3 = scmp.lt.s32.totalorder %s4996_s25, 1  ;;  %vm433_vm0 = vsmask.f32 3328 }
   0xe   : > { %v6677_v1 = vld [vmem:[%s9122_s1 + $0x1c0] sm:$0xff]   ;;  %5943 = vmatprep.subr.bf16.mxu0 %v6676_v0  ;;  %v6681_v5 = vld [vmem:[%s9122_s1 + $0x1c8] sm:$0xff]   ;;  %v6685_v9 = vld [vmem:[%s9122_s1 + $0x1d0] sm:$0xff]   ;;  %vm434_vm1 = vsmask.f32 7440  ;;  %vm1529_vm3 = vcmask 1042432  }
   0xf   : > { %v6678_v2 = vld [vmem:[%s9122_s1 + $0x100] sm:$0xff]   ;;  %5983 = vmatprep.subr.bf16.mxu1 %v6677_v1  ;;  %v6682_v6 = vld [vmem:[%s9122_s1 + $0x108] sm:$0xff]   ;;  %v6686_v10 = vld [vmem:[%s9122_s1 + $0x110] sm:$0xff]   ;;  %s9252_s25 = smov (!%p305_p3, %s4996_s25), 1  ;;  %vm1530_vm4 = vcmask 1046532   ;;  %s7024_s23 = smov 120  }
  0x10   : > { %v6679_v3 = vld [vmem:[%s9122_s1 + $0x180] sm:$0xff]   ;;  %5944 = vmatpush3.bf16.msra.mxu0 %v6678_v2  ;;  %v6683_v7 = vld [vmem:[%s9122_s1 + $0x188] sm:$0xff]   ;;  %v6687_v11 = vld [vmem:[%s9122_s1 + $0x190] sm:$0xff]   ;;  %s6663_s13 = smul.u32 320, %s9252_s25  ;;  %vm4831_vm6 = vcmask 64512   ;;  %s7025_s30 = smov 8  }
  0x11   : > { %5984 = vmatpush3.bf16.msra.mxu1 %v6679_v3  ;;  %5945 = vmatprep.subr.bf16.mxu0 %v6680_v4  ;;  %v6688_v12 = vld [vmem:[%s9122_s1 + $0x158] sm:$0xff]   ;;  %v6692_v16 = vld [vmem:[%s9122_s1 + $0x160] sm:$0xff]   ;;  %v6696_v20 = vld [vmem:[%s9122_s1 + $0x168] sm:$0xff]   ;;  %vm4840_vm7 = vcmask 130048   ;;  %s327_s16 = scalar_lea.vmem %s9128_s7, %s9252_s25  ;;  %vm4890_vm8 = vcmask 0  }
  0x12   : > { %5985 = vmatprep.subr.bf16.mxu1 %v6681_v5  ;;  %v6689_v13 = vld [vmem:[%s9122_s1 + $0x1d8] sm:$0xff]   ;;  %v6693_v17 = vld [vmem:[%s9122_s1 + $0x1e0] sm:$0xff]   ;;  %v6697_v21 = vld [vmem:[%s9122_s1 + $0x1e8] sm:$0xff]   ;;  %s7174_s26 = scalar_lea.vmem %s9121_s0, %s6663_s13 }
  0x13   : > { %v6690_v14 = vld [vmem:[%s9122_s1 + $0x118] sm:$0xff]   ;;  %v6694_v18 = vld [vmem:[%s9122_s1 + $0x120] sm:$0xff]   ;;  %v6698_v22 = vld [vmem:[%s9122_s1 + $0x128] sm:$0xff]  }
  0x14   : > { %5946 = vmatpush3.bf16.msra.mxu0 %v6682_v6  ;;  %v6691_v15 = vld [vmem:[%s9122_s1 + $0x198] sm:$0xff]   ;;  %v6695_v19 = vld [vmem:[%s9122_s1 + $0x1a0] sm:$0xff]   ;;  %v6699_v23 = vld [vmem:[%s9122_s1 + $0x1a8] sm:$0xff]  }
  0x15   : > { %5986 = vmatpush3.bf16.msra.mxu1 %v6683_v7  ;;  %5947 = vmatprep.subr.bf16.mxu0 %v6684_v8  ;;  %v6700_v24 = vld [vmem:[%s9122_s1 + $0x170] sm:$0xff]   ;;  %v6704_v28 = vld [vmem:[%s9122_s1 + $0x178] sm:$0xff]   ;;  %v7183_v32 = vld [vmem:[%s7174_s26] sm:$0xff] }
  0x16   : > { %5987 = vmatprep.subr.bf16.mxu1 %v6685_v9  ;;  %v6701_v25 = vld [vmem:[%s9122_s1 + $0x1f0] sm:$0xff]   ;;  %v6705_v29 = vld [vmem:[%s9122_s1 + $0x1f8] sm:$0xff]   ;;  %v7189_v34 = vld [vmem:[%s7174_s26 + $0x20] sm:$0xff]  ;;  %v437_v38 = vshrl.u32 %v7183_v32, 16  ;;  %v440_v39 = vshll.u32 %v7183_v32, 16 }
  0x17   : > { %v6702_v26 = vld [vmem:[%s9122_s1 + $0x130] sm:$0xff]   ;;  %v6706_v30 = vld [vmem:[%s9122_s1 + $0x138] sm:$0xff]   ;;  %v7195_v36 = vld [vmem:[%s7174_s26 + $0x40] sm:$0xff]  ;;  %v465_v41 = vshrl.u32 %v7189_v34, 16  ;;  %v468_v43 = vshll.u32 %v7189_v34, 16 }
  0x18   : > { %5948 = vmatpush3.bf16.msra.mxu0 %v6686_v10  ;;  %v6703_v27 = vld [vmem:[%s9122_s1 + $0x1b0] sm:$0xff]   ;;  %v6707_v31 = vld [vmem:[%s9122_s1 + $0x1b8] sm:$0xff]   ;;  %v439_v42 = vrot.slane %v437_v38, 4  ;;  %v493_v45 = vshrl.u32 %v7195_v36, 16  ;;  %v442_v46 = vrot.slane %v440_v39, 5  ;;  %v496_v48 = vshll.u32 %v7195_v36, 16  ;;  %vm7227_vm2 = vmor %vm433_vm0, %vm434_vm1 }
  0x19   : > { %5988 = vmatpush3.bf16.msra.mxu1 %v6687_v11  ;;  %5949 = vmatprep.subr.bf16.mxu0 %v6688_v12  ;;  %v7186_v33 = vld [vmem:[%s7174_s26 + $0x10] sm:$0x11]  ;;  %v467_v47 = vrot.slane %v465_v41, 4  ;;  %v7209_v49 = vld [vmem:[%s7174_s26 + $0x8] sm:$0xff]  ;;  %v7212_v50 = vld [vmem:[%s7174_s26 + $0x18] sm:$0x11] }
  0x1a   : > { %5989 = vmatprep.subr.bf16.mxu1 %v6689_v13  ;;  %v7192_v35 = vld [vmem:[%s7174_s26 + $0x30] sm:$0x11]  ;;  %v446_v40 = vshll.u32 %v7186_v33, 16  ;;  %v470_v52 = vrot.slane %v468_v43, 5  ;;  %v495_v53 = vrot.slane %v493_v45, 4  ;;  %v7216_v55 = vld [vmem:[%s7174_s26 + $0x28] sm:$0xff]  ;;  %v443_v56 = vor.u32 %v442_v46, %v439_v42  ;;  %vm7323_vm5 = vmor %vm1529_vm3, %vm1530_vm4 }
  0x1b   : > { %v7198_v37 = vld [vmem:[%s7174_s26 + $0x50] sm:$0x11]  ;;  %v474_v44 = vshll.u32 %v7192_v35, 16  ;;  %v498_v58 = vrot.slane %v496_v48, 5  ;;  %v1534_v59 = vrot.slane %v7186_v33, 5  ;;  %v6708_v61 = vld [vmem:[%s9122_s1 + $0x40] sm:$0xff]  }
  0x1c   : > { %5950 = vmatpush3.bf16.msra.mxu0 %v6690_v14  ;;  %v448_v51 = vrot.slane %v446_v40, 5  ;;  %v502_v54 = vshll.u32 %v7198_v37, 16  ;;  %v7220_v60 = vld [vmem:[%s7174_s26 + $0x38] sm:$0x11]  ;;  %v471_v63 = vor.u32 %v470_v52, %v467_v47  ;;  %v451_v1 = vshrl.u32 %v7209_v49, 16  ;;  %v6709_v3 = vld [vmem:[%s9122_s1 + $0xc0] sm:$0xff]  }
  0x1d   : > { %5990 = vmatpush3.bf16.msra.mxu1 %v6691_v15  ;;  %5951 = vmatprep.subr.bf16.mxu0 %v6692_v16  ;;  %v476_v57 = vrot.slane %v474_v44, 5  ;;  %v454_v2 = vshll.u32 %v7209_v49, 16  ;;  %v444_v4 = vrot.slane %v443_v56, 4  ;;  %v499_v5 = vor.u32 %v498_v58, %v495_v53  ;;  %v7237_v6 = vld [vmem:[%s7174_s26 + $0x48] sm:$0xff]  ;;  %v7242_v10 = vld [vmem:[%s7174_s26 + $0x58] sm:$0x11] }
  0x1e   : > { %5991 = vmatprep.subr.bf16.mxu1 %v6693_v17  ;;  %v504_v0 = vrot.slane %v502_v54, 5  ;;  %v460_v7 = vshll.u32 %v7212_v50, 16  ;;  %v479_v8 = vshrl.u32 %v7216_v55, 16  ;;  %v472_v9 = vrot.slane %v471_v63, 4  ;;  %v6714_v46 = vld [vmem:[%s9122_s1 + $0x8] sm:$0xff]   ;;  %v6711_v48 = vld [vmem:[%s9122_s1 + $0x80] sm:$0xff]  }
  0x1f   : > { %v453_v11 = vrot.slane %v451_v1, 4  ;;  %v456_v12 = vrot.slane %v454_v2, 5  ;;  %v482_v13 = vshll.u32 %v7216_v55, 16  ;;  %v449_v14 = vsel %vm7227_vm2, %v444_v4, %v448_v51  ;;  %v6713_v53 = vld [vmem:[%s9122_s1 + $0xc8] sm:$0xff]   ;;  %v7300_v1 = vld [vmem:[%s7174_s26 + $0x70] sm:$0x11] }
  0x20   : > { %5952 = vmatpush3.bf16.msra.mxu0 %v6694_v18  ;;  %v500_v15 = vrot.slane %v499_v5, 4  ;;  %v462_v16 = vrot.slane %v460_v7, 5  ;;  %v481_v17 = vrot.slane %v479_v8, 4  ;;  %v6710_v18 = vld [vmem:[%s9122_s1] sm:$0xff]   ;;  %v1542_v38 = vrot.slane %v7192_v35, 5  ;;  %v7303_v2 = vld [vmem:[%s7174_s26 + $0x68] sm:$0xff] }
  0x21   : > { %5992 = vmatpush3.bf16.msra.mxu1 %v6695_v19  ;;  %5953 = vmatprep.subr.bf16.mxu0 %v6696_v20  ;;  %v7252_v19 = vsel %vm7227_vm2, %v472_v9, %v476_v57  ;;  %v457_v20 = vor.u32 %v456_v12, %v453_v11  ;;  %v510_v40 = vshll.u32 %v7237_v6, 16  ;;  %v516_v41 = vshll.u32 %v7242_v10, 16  ;;  %v7310_v8 = vld [vmem:[%s7174_s26 + $0x78] sm:$0x11] }
  0x22   : > { %5993 = vmatprep.subr.bf16.mxu1 %v6697_v21  ;;  %v484_v21 = vrot.slane %v482_v13, 5  ;;  %v1538_v44 = vrot.slane %v7212_v50, 5  ;;  %v1546_v45 = vrot.slane %v7220_v60, 5  ;;  %v5168_v54 = vrot.slane %v7183_v32, 9  ;;  %v7558_v51 = vld [vmem:[%s7174_s26 + $0xd8] sm:$0x11] }
  0x23   : > { %v512_v35 = vrot.slane %v510_v40, 5  ;;  %v518_v47 = vrot.slane %v516_v41, 5  ;;  %v530_v7 = vshll.u32 %v7300_v1, 16  ;;  %v535_v9 = vshrl.u32 %v7303_v2, 16  ;;  %v7565_v33 = vld [vmem:[%s7174_s26 + $0xf8] sm:$0x11] }
  0x24   : > { %5954 = vmatpush3.bf16.msra.mxu0 %v6698_v22  ;;  %v488_v22 = vshll.u32 %v7220_v60, 16  ;;  %v538_v12 = vshll.u32 %v7303_v2, 16  ;;  %v544_v13 = vshll.u32 %v7310_v8, 16  ;;  %v5169_v41 = vrot.slane %v7209_v49, 9  ;;  %v6960_v62 = vld [vmem:[%s9122_s1 + $0x878] sm:$0xff]  }
  0x25   : > { %5994 = vmatpush3.bf16.msra.mxu1 %v6699_v23  ;;  %5955 = vmatprep.subr.bf16.mxu0 %v6700_v24  ;;  %v7257_v23 = vsel %vm7227_vm2, %v500_v15, %v504_v0  ;;  %v5072_v24 = vcombine.low %v449_v14, %v7252_v19  ;;  %v7297_v0 = vld [vmem:[%s7174_s26 + $0x60] sm:$0xff]  ;;  %v6715_v15 = vld [vmem:[%s9122_s1 + $0x88] sm:$0xff]  }
  0x26   : > { %5995 = vmatprep.subr.bf16.mxu1 %v6701_v25  ;;  %9159 = vst [vmem:[#allocation2_spill] sm:$0xff] %v7257_v23  ;;  %v5073_v25 = vcombine.high %v449_v14, %v7252_v19  ;;  %v521_v4 = vshrl.u32 %v7297_v0, 16  ;;  %v524_v5 = vshll.u32 %v7297_v0, 16  ;;  %v6716_v14 = vld [vmem:[%s9122_s1 + $0x50] sm:$0xff]  }
  0x28   : > { %5956 = vmatpush3.bf16.msra.mxu0 %v6702_v26  ;;  %v507_v26 = vshrl.u32 %v7237_v6, 16  ;;  %1013 = vmatprep.mubr.bf16.mxu0 %v5073_v25 }
  0x29   : > { %5996 = vmatpush3.bf16.msra.mxu1 %v6703_v27  ;;  %5957 = vmatprep.subr.bf16.mxu0 %v6704_v28  ;;  %v6712_v27 = vld [vmem:[%s9122_s1 + $0x48] sm:$0xff]  }
  0x2a   : > { %5997 = vmatprep.subr.bf16.mxu1 %v6705_v29  ;;  %v458_v29 = vrot.slane %v457_v20, 4  ;;  %v509_v39 = vrot.slane %v507_v26, 4 }
  0x2c   : > { %5958 = vmatpush3.bf16.msra.mxu0 %v6706_v30  ;;  %v485_v30 = vor.u32 %v484_v21, %v481_v17  ;;  %v463_v42 = vsel %vm7227_vm2, %v458_v29, %v462_v16  ;;  %v513_v58 = vor.u32 %v512_v35, %v509_v39  ;;  %v523_v16 = vrot.slane %v521_v4, 4  ;;  %v6717_v29 = vld [vmem:[%s9122_s1 + $0xd0] sm:$0xff]  }
  0x2d   : > { %5998 = vmatpush3.bf16.msra.mxu1 %v6707_v31  ;;  %6023 = vmatprep.subr.bf16.mxu0 %v6708_v61  ;;  %v490_v31 = vrot.slane %v488_v22, 5  ;;  %v526_v17 = vrot.slane %v524_v5, 5  ;;  %v532_v22 = vrot.slane %v530_v7, 5  ;;  %v7343_v39 = vsel %vm7323_vm5, %v5168_v54, %v1534_v59  ;;  %v6723_v5 = vld [vmem:[%s9122_s1 + $0x98] sm:$0xff]   ;;  %v7404_v7 = vld [vmem:[%s7174_s26 + $0x80] sm:$0xff] }
  0x2e   : > { %6063 = vmatprep.subr.bf16.mxu1 %v6709_v3  ;;  %v486_v43 = vrot.slane %v485_v30, 4  ;;  %v5170_v3 = vrot.slane %v7189_v34, 9  ;;  %v514_v11 = vrot.slane %v513_v58, 4  ;;  %v5171_v54 = vrot.slane %v7216_v55, 9 }
  0x2f   : > { %1014 = vmatmul.mubr.bf16.vlgmr.msra.gmra.mrb[0].mxu0 %v5072_v24  ;;  %v540_v24 = vrot.slane %v538_v12, 5  ;;  %v527_v26 = vor.u32 %v526_v17, %v523_v16  ;;  %v1550_v12 = vrot.slane %v7198_v37, 5  ;;  %v552_v60 = vshll.u32 %v7404_v7, 16 }
  0x30   : > { %6024 = vmatpush3.bf16.msra.mxu0 %v6710_v18  ;;  %v7284_v52 = vsel %vm7227_vm2, %v486_v43, %v490_v31  ;;  %v537_v18 = vrot.slane %v535_v9, 4  ;;  %v7329_v21 = vsel %vm7227_vm2, %v514_v11, %v518_v47  ;;  %v6718_v31 = vld [vmem:[%s9122_s1 + $0x10] sm:$0xff]   ;;  %v7347_v40 = vsel %vm7323_vm5, %v5170_v3, %v1542_v38  ;;  %v6720_v38 = vld [vmem:[%s9122_s1 + $0x58] sm:$0xff]  }
  0x31   : > { %9160 = vst [vmem:[#allocation3_spill] sm:$0xff] %v7284_v52  ;;  %6025 = vmatprep.subr.bf16.mxu0 %v6712_v27  ;;  %v5074_v61 = vcombine.low %v463_v42, %v7284_v52  ;;  %v5075_v63 = vcombine.high %v463_v42, %v7284_v52  ;;  %9163 = vst [vmem:[#allocation4_spill] sm:$0xff] %v7329_v21  ;;  %v546_v27 = vrot.slane %v544_v13, 5  ;;  %v528_v42 = vrot.slane %v527_v26, 4  ;;  %v6719_v43 = vld [vmem:[%s9122_s1 + $0x90] sm:$0xff]   ;;  %v7418_v13 = vld [vmem:[%s7174_s26 + $0xa0] sm:$0xff] }
  0x32   : > { %v541_v30 = vor.u32 %v540_v24, %v537_v18  ;;  %v7366_v47 = vsel %vm7323_vm5, %v5169_v41, %v1538_v44  ;;  %v7407_v9 = vld [vmem:[%s7174_s26 + $0x90] sm:$0x11]  ;;  %v7413_v11 = vsel %vm7323_vm5, %v5171_v54, %v1546_v45  ;;  %v577_v37 = vshrl.u32 %v7418_v13, 16  ;;  %v7437_v24 = vld [vmem:[%s7174_s26 + $0x98] sm:$0x11] }
  0x33   : > { %1078 = vmatprep.mubr.bf16.mxu1 %v5075_v63  ;;  %v5172_v63 = vrot.slane %v7195_v36, 9  ;;  %v558_v16 = vshll.u32 %v7407_v9, 16  ;;  %v580_v17 = vshll.u32 %v7418_v13, 16  ;;  %v572_v25 = vshll.u32 %v7437_v24, 16 }
  0x34   : > { %6026 = vmatpush3.bf16.msra.mxu0 %v6714_v46  ;;  %1079 = vmatmul.mubr.bf16.vlgmr.msra.gmra.mrb[0].mxu1 %v5074_v61  ;;  %v542_v35 = vrot.slane %v541_v30, 4  ;;  %v6722_v61 = vld [vmem:[%s9122_s1 + $0x18] sm:$0xff]   ;;  %v7441_v30 = vld [vmem:[%s7174_s26 + $0xa8] sm:$0xff]  ;;  %v579_v41 = vrot.slane %v577_v37, 4 }
  0x35   : > { %6064 = vmatpush3.bf16.msra.mxu1 %v6711_v48  ;;  %6027 = vmatprep.subr.bf16.mxu0 %v6716_v14  ;;  %v7370_v48 = vsel %vm7227_vm2, %v528_v42, %v532_v22  ;;  %v7421_v14 = vld [vmem:[%s7174_s26 + $0xb0] sm:$0x11]  ;;  %v7434_v22 = vld [vmem:[%s7174_s26 + $0x88] sm:$0xff]  ;;  %v582_v42 = vrot.slane %v580_v17, 5 }
  0x36   : > { %6065 = vmatprep.subr.bf16.mxu1 %v6713_v53  ;;  %v6721_v53 = vld [vmem:[%s9122_s1 + $0xd8] sm:$0xff]   ;;  %v7378_v50 = vcombine.high %v7257_v23, %v7370_v48  ;;  %v7382_v44 = vsel %vm7227_vm2, %v542_v35, %v546_v27  ;;  %v7386_v58 = vcombine.low %v7257_v23, %v7370_v48  ;;  %v586_v18 = vshll.u32 %v7421_v14, 16 }
  0x37   : > { %v7394_v3 = vcombine.high %v7329_v21, %v7382_v44  ;;  %v7398_v4 = vcombine.low %v7329_v21, %v7382_v44  ;;  %v554_v27 = vrot.slane %v552_v60, 5  ;;  %v563_v35 = vshrl.u32 %v7434_v22, 16 }
  0x38   : > { %6028 = vmatpush3.bf16.msra.mxu0 %v6718_v31  ;;  %9164 = vst [vmem:[#allocation5_spill] sm:$0xff] %v7378_v50  ;;  %9165 = vst [vmem:[#allocation6_spill] sm:$0xff] %v7386_v58  ;;  %1021 = vmatprep.mubr.bf16.mxu0 %v7378_v50  ;;  %v7444_v31 = vld [vmem:[%s7174_s26 + $0xb8] sm:$0x11]  ;;  %v566_v54 = vshll.u32 %v7434_v22, 16  ;;  %v583_v60 = vor.u32 %v582_v42, %v579_v41  ;;  %v6726_v41 = vld [vmem:[%s9122_s1 + $0x20] sm:$0xff]  }
  0x39   : > { %6066 = vmatpush3.bf16.msra.mxu1 %v6715_v15  ;;  %6029 = vmatprep.subr.bf16.mxu0 %v6720_v38  ;;  %9166 = vst [vmem:[#allocation7_spill] sm:$0xff] %v7394_v3  ;;  %9167 = vst [vmem:[#allocation8_spill] sm:$0xff] %v7398_v4  ;;  %v549_v15 = vshrl.u32 %v7404_v7, 16  ;;  %v600_v37 = vshll.u32 %v7444_v31, 16 }
  0x3a   : > { %6067 = vmatprep.subr.bf16.mxu1 %v6717_v29  ;;  %1086 = vmatprep.mubr.bf16.mxu1 %v7394_v3  ;;  %v560_v29 = vrot.slane %v558_v16, 5  ;;  %v565_v16 = vrot.slane %v563_v35, 4  ;;  %v584_v28 = vrot.slane %v583_v60, 4 }
  0x3b   : > { %1022 = vmatmul.mubr.bf16.gmra.mrb[4].mxu0 %v7386_v58  ;;  %v551_v26 = vrot.slane %v549_v15, 4  ;;  %v6724_v15 = vld [vmem:[%s9122_s1 + $0x60] sm:$0xff]   ;;  %v602_v57 = vrot.slane %v600_v37, 5 }
  0x3c   : > { %1087 = vmatmul.mubr.bf16.gmra.mrb[4].mxu1 %v7398_v4  ;;  %6030 = vmatpush3.bf16.msra.mxu0 %v6722_v61  ;;  %v594_v61 = vshll.u32 %v7441_v30, 16 }
  0x3d   : > { %6068 = vmatpush3.bf16.msra.mxu1 %v6719_v43  ;;  %v588_v43 = vrot.slane %v586_v18, 5  ;;  %v555_v38 = vor.u32 %v554_v27, %v551_v26  ;;  %v568_v18 = vrot.slane %v566_v54, 5  ;;  %v574_v26 = vrot.slane %v572_v25, 5  ;;  %6031 = vmatprep.subr.bf16.mxu0 %v6724_v15 }
  0x3e   : > { %6069 = vmatprep.subr.bf16.mxu1 %v6721_v53  ;;  %v591_v53 = vshrl.u32 %v7441_v30, 16  ;;  %v596_v59 = vrot.slane %v594_v61, 5 }
  0x3f   : > { %v556_v17 = vrot.slane %v555_v38, 4  ;;  %v569_v35 = vor.u32 %v568_v18, %v565_v16  ;;  %v7469_v25 = vsel %vm7227_vm2, %v584_v28, %v588_v43  ;;  %v6728_v43 = vld [vmem:[%s9122_s1 + $0x68] sm:$0xff]  }
  0x40   : > { %v593_v27 = vrot.slane %v591_v53, 4  ;;  %6032 = vmatpush3.bf16.msra.mxu0 %v6726_v41  ;;  %v6727_v53 = vld [vmem:[%s9122_s1 + $0xa0] sm:$0xff]   ;;  %v6730_v18 = vld [vmem:[%s9122_s1 + $0x28] sm:$0xff]  }
  0x41   : > { %6070 = vmatpush3.bf16.msra.mxu1 %v6723_v5  ;;  %v6725_v5 = vld [vmem:[%s9122_s1 + $0xe0] sm:$0xff]   ;;  %v7463_v42 = vsel %vm7227_vm2, %v556_v17, %v560_v29  ;;  %v7478_v29 = vsel %vm7323_vm5, %v5172_v63, %v1550_v12  ;;  %v570_v28 = vrot.slane %v569_v35, 4  ;;  %v6729_v12 = vld [vmem:[%s9122_s1 + $0xe8] sm:$0xff]   ;;  %6033 = vmatprep.subr.bf16.mxu0 %v6728_v43  ;;  %v5173_v43 = vrot.slane %v7237_v6, 9 }
  0x42   : > { %6071 = vmatprep.subr.bf16.mxu1 %v6725_v5  ;;  %v597_v54 = vor.u32 %v596_v59, %v593_v27  ;;  %v7483_v60 = vcombine.high %v7463_v42, %v7469_v25  ;;  %v7487_v59 = vcombine.low %v7463_v42, %v7469_v25  ;;  %v1554_v35 = vrot.slane %v7242_v10, 5  ;;  %v7543_v41 = vld [vmem:[%s7174_s26 + $0xe0] sm:$0xff]  ;;  %v7546_v5 = vld [vmem:[%s7174_s26 + $0xf0] sm:$0x11]  ;;  %v7562_v38 = vld [vmem:[%s7174_s26 + $0xe8] sm:$0xff] }
  0x43   : > { %v7506_v17 = vsel %vm7227_vm2, %v570_v28, %v574_v26  ;;  %v6731_v26 = vld [vmem:[%s9122_s1 + $0xa8] sm:$0xff]   ;;  %v7528_v28 = vld [vmem:[%s7174_s26 + $0xd0] sm:$0x11]  ;;  %v633_v16 = vshrl.u32 %v7543_v41, 16  ;;  %v636_v56 = vshll.u32 %v7543_v41, 16  ;;  %v647_v50 = vshrl.u32 %v7562_v38, 16 }
  0x44   : > { %9168 = vst [vmem:[#allocation9_spill] sm:$0xff] %v7483_v60  ;;  %9169 = vst [vmem:[#allocation10_spill] sm:$0xff] %v7487_v59  ;;  %v598_v63 = vrot.slane %v597_v54, 4  ;;  %1029 = vmatprep.mubr.bf16.mxu0 %v7483_v60  ;;  %6034 = vmatpush3.bf16.msra.mxu0 %v6730_v18  ;;  %v614_v61 = vshll.u32 %v7528_v28, 16  ;;  %v642_v18 = vshll.u32 %v7546_v5, 16  ;;  %v650_v21 = vshll.u32 %v7562_v38, 16 }
  0x45   : > { %6072 = vmatpush3.bf16.msra.mxu1 %v6727_v53  ;;  %1030 = vmatmul.mubr.bf16.gmra.mrb[8].mxu0 %v7487_v59  ;;  %v7525_v53 = vld [vmem:[%s7174_s26 + $0xc0] sm:$0xff]  ;;  %v635_v27 = vrot.slane %v633_v16, 4  ;;  %v638_v59 = vrot.slane %v636_v56, 5  ;;  %v6733_v56 = vld [vmem:[%s9122_s1 + $0xf0] sm:$0xff]  }
  0x46   : > { %v7518_v54 = vsel %vm7227_vm2, %v598_v63, %v602_v57  ;;  %6073 = vmatprep.subr.bf16.mxu1 %v6729_v12  ;;  %v605_v10 = vshrl.u32 %v7525_v53, 16  ;;  %v608_v37 = vshll.u32 %v7525_v53, 16  ;;  %v7551_v57 = vld [vmem:[%s7174_s26 + $0xc8] sm:$0xff]  ;;  %v616_v15 = vrot.slane %v614_v61, 5 }
  0x47   : > { %v7536_v63 = vcombine.high %v7506_v17, %v7518_v54  ;;  %v7540_v12 = vcombine.low %v7506_v17, %v7518_v54  ;;  %v644_v4 = vrot.slane %v642_v18, 5  ;;  %v622_v3 = vshll.u32 %v7551_v57, 16  ;;  %v6734_v18 = vld [vmem:[%s9122_s1 + $0x30] sm:$0xff]  }
  0x48   : > { %v607_v45 = vrot.slane %v605_v10, 4  ;;  %v610_v46 = vrot.slane %v608_v37, 5  ;;  %v6732_v37 = vld [vmem:[%s9122_s1 + $0x70] sm:$0xff]   ;;  %v639_v10 = vor.u32 %v638_v59, %v635_v27  ;;  %v656_v61 = vshll.u32 %v7565_v33, 16 }
  0x49   : > { %9170 = vst [vmem:[#allocation11_spill] sm:$0xff] %v7536_v63  ;;  %9171 = vst [vmem:[#allocation12_spill] sm:$0xff] %v7540_v12  ;;  %6074 = vmatpush3.bf16.msra.mxu1 %v6731_v26  ;;  %1094 = vmatprep.mubr.bf16.mxu1 %v7536_v63  ;;  %v619_v26 = vshrl.u32 %v7551_v57, 16  ;;  %v628_v63 = vshll.u32 %v7558_v51, 16  ;;  %v649_v59 = vrot.slane %v647_v50, 4  ;;  %v652_v27 = vrot.slane %v650_v21, 5 }
  0x4a   : > { %1095 = vmatmul.mubr.bf16.gmra.mrb[8].mxu1 %v7540_v12  ;;  %v611_v60 = vor.u32 %v610_v46, %v607_v45  ;;  %v624_v45 = vrot.slane %v622_v3, 5  ;;  %6035 = vmatprep.subr.bf16.mxu0 %v6732_v37  ;;  %v658_v12 = vrot.slane %v656_v61, 5  ;;  %v5121_v3 = vcombine.high %v7183_v32, %v7189_v34  ;;  %v6735_v21 = vld [vmem:[%s9122_s1 + $0xb0] sm:$0xff]  }
  0x4b   : > { %v621_v58 = vrot.slane %v619_v26, 4  ;;  %v630_v16 = vrot.slane %v628_v63, 5  ;;  %v640_v26 = vrot.slane %v639_v10, 4  ;;  %6075 = vmatprep.subr.bf16.mxu1 %v6733_v56  ;;  %6036 = vmatpush3.bf16.msra.mxu0 %v6734_v18  ;;  %v653_v50 = vor.u32 %v652_v27, %v649_v59  ;;  %v6738_v59 = vld [vmem:[%s9122_s1 + $0x38] sm:$0xff]  }
  0x4c   : > { %v612_v46 = vrot.slane %v611_v60, 4  ;;  %v5123_v60 = vcombine.high %v7209_v49, %v7216_v55  ;;  %v7608_v10 = vsel %vm7323_vm5, %v5173_v43, %v1554_v35  ;;  %v6737_v35 = vld [vmem:[%s9122_s1 + $0xf8] sm:$0xff]   ;;  %v5175_v27 = vrot.slane %v7303_v2, 9 }
  0x4d   : > { %v625_v23 = vor.u32 %v624_v45, %v621_v58  ;;  %v7593_v63 = vsel %vm7227_vm2, %v640_v26, %v644_v4  ;;  %v9173_v58 = vrot.slane %v7297_v0, 9  ;;  %v654_v45 = vrot.slane %v653_v50, 4  ;;  %6076 = vmatpush3.bf16.msra.mxu1 %v6735_v21 }
  0x4e   : > { %v7585_v52 = vsel %vm7227_vm2, %v612_v46, %v616_v15  ;;  %v9172_v15 = vrot.slane %v7300_v1, 5  ;;  %v6736_v1 = vld [vmem:[%s9122_s1 + $0x78] sm:$0xff]   ;;  %6077 = vmatprep.subr.bf16.mxu1 %v6737_v35  ;;  %v1574_v50 = vrot.slane %v7421_v14, 5  ;;  %v7715_v18 = vcombine.high %v7195_v36, %v7297_v0 }
  0x4f   : > { %v7612_v4 = vcombine.high %v7585_v52, %v7593_v63  ;;  %v626_v61 = vrot.slane %v625_v23, 4  ;;  %v7616_v56 = vcombine.low %v7585_v52, %v7593_v63  ;;  %6037 = vmatprep.subr.bf16.mxu0 %v6736_v1  ;;  %v6741_v1 = vld [vmem:[%s9122_s1 + $0x2c0] sm:$0xff]   ;;  %v5122_v43 = vcombine.low %v7209_v49, %v7216_v55 }
  0x50   : > { %v7604_v37 = vsel %vm7323_vm5, %v9173_v58, %v9172_v15  ;;  %v7651_v15 = vsel %vm7227_vm2, %v654_v45, %v658_v12  ;;  %v1562_v58 = vrot.slane %v7310_v8, 5  ;;  %6038 = vmatpush3.bf16.msra.mxu0 %v6738_v59  ;;  %v6740_v8 = vld [vmem:[%s9122_s1 + $0x240] sm:$0xff]   ;;  %v5176_v45 = vrot.slane %v7404_v7, 9  ;;  %9178 = vst [vmem:[#allocation17_spill] sm:$0xff] %v7715_v18 }
  0x51   : > { %9174 = vst [vmem:[#allocation13_spill] sm:$0xff] %v7612_v4  ;;  %9175 = vst [vmem:[#allocation14_spill] sm:$0xff] %v7616_v56  ;;  %v7623_v46 = vcombine.high %v7478_v29, %v7604_v37  ;;  %v7630_v23 = vcombine.low %v7478_v29, %v7604_v37  ;;  %1037 = vmatprep.mubr.bf16.mxu0 %v7612_v4  ;;  %v7639_v26 = vsel %vm7227_vm2, %v626_v61, %v630_v16  ;;  %v6739_v16 = vld [vmem:[%s9122_s1 + $0xb8] sm:$0xff]   ;;  %v6757_v4 = vld [vmem:[%s9122_s1 + $0x2e0] sm:$0xff]  }
  0x52   : > { %1038 = vmatmul.mubr.bf16.gmra.mrb[12].mxu0 %v7616_v56  ;;  %v7664_v21 = vcombine.high %v7639_v26, %v7651_v15  ;;  %v7668_v12 = vcombine.low %v7639_v26, %v7651_v15  ;;  %6078 = vmatpush3.bf16.msra.mxu1 %v6739_v16  ;;  %v7681_v61 = vsel %vm7323_vm5, %v5175_v27, %v1562_v58  ;;  %v5178_v27 = vrot.slane %v7418_v13, 9  ;;  %v6747_v56 = vld [vmem:[%s9122_s1 + $0x288] sm:$0xff]  }
  0x53   : > { %1415 = vmatprep.mubr.bf16.mxu0 %v5121_v3  ;;  %v1566_v3 = vrot.slane %v7407_v9, 5  ;;  %6103 = vmatprep.subr.bf16.mxu0 %v6740_v8  ;;  %v7691_v16 = vcombine.high %v7608_v10, %v7681_v61  ;;  %v7695_v35 = vcombine.low %v7608_v10, %v7681_v61  ;;  %v5120_v58 = vcombine.low %v7183_v32, %v7189_v34  ;;  %v6742_v9 = vld [vmem:[%s9122_s1 + $0x200] sm:$0xff]  }
  0x54   : > { %9176 = vst [vmem:[#allocation15_spill] sm:$0xff] %v7664_v21  ;;  %9177 = vst [vmem:[#allocation16_spill] sm:$0xff] %v7668_v12  ;;  %1102 = vmatprep.mubr.bf16.mxu1 %v7664_v21  ;;  %6143 = vmatprep.subr.bf16.mxu1 %v6741_v1  ;;  %v5177_v32 = vrot.slane %v7434_v22, 9  ;;  %v6744_v1 = vld [vmem:[%s9122_s1 + $0x248] sm:$0xff]   ;;  %v7723_v14 = vsel %vm7323_vm5, %v5178_v27, %v1574_v50  ;;  %v6743_v50 = vld [vmem:[%s9122_s1 + $0x280] sm:$0xff]   ;;  %v1578_v27 = vrot.slane %v7444_v31, 5 }
  0x55   : > { %1103 = vmatmul.mubr.bf16.gmra.mrb[12].mxu1 %v7668_v12  ;;  %v7705_v8 = vsel %vm7323_vm5, %v5176_v45, %v1566_v3  ;;  %v5179_v3 = vrot.slane %v7441_v30, 9  ;;  %v6746_v12 = vld [vmem:[%s9122_s1 + $0x208] sm:$0xff]   ;;  %v7798_v21 = vcombine.high %v7404_v7, %v7418_v13 }
  0x56   : > { %1480 = vmatprep.mubr.bf16.mxu1 %v5123_v60  ;;  %v1570_v60 = vrot.slane %v7437_v24, 5  ;;  %v7728_v45 = vcombine.high %v7705_v8, %v7723_v14  ;;  %v7733_v59 = vcombine.low %v7705_v8, %v7723_v14  ;;  %v6745_v31 = vld [vmem:[%s9122_s1 + $0x2c8] sm:$0xff]  }
  0x57   : > { %9182 = vst [vmem:[#allocation21_spill] sm:$0xff] %v7798_v21 }
  0x58   : > { %v7742_v24 = vsel %vm7323_vm5, %v5177_v32, %v1570_v60  ;;  %v7764_v32 = vsel %vm7323_vm5, %v5179_v3, %v1578_v27  ;;  %v7784_v3 = vcombine.low %v7195_v36, %v7297_v0  ;;  %v6749_v27 = vld [vmem:[%s9122_s1 + $0x2d0] sm:$0xff]  }
  0x59   : > { %9179 = vst [vmem:[#allocation18_spill] sm:$0xff] %v7742_v24  ;;  %v7780_v49 = vcombine.low %v7742_v24, %v7764_v32  ;;  %v6750_v60 = vld [vmem:[%s9122_s1 + $0x210] sm:$0xff]  }
  0x5a   : > { %1416 = vmatmul.mubr.bf16.vlgmr.msra.gmra.mrb[16].mxu0 %v5120_v58  ;;  %v7776_v58 = vcombine.high %v7742_v24, %v7764_v32  ;;  %9181 = vst [vmem:[#allocation20_spill] sm:$0xff] %v7784_v3  ;;  %v7854_v24 = vcombine.high %v7525_v53, %v7543_v41 }
  0x5b   : > { %6104 = vmatpush3.bf16.msra.mxu0 %v6742_v9  ;;  %1423 = vmatprep.mubr.bf16.mxu0 %v7715_v18  ;;  %v7760_v9 = vcombine.high %v7237_v6, %v7303_v2  ;;  %v1582_v18 = vrot.slane %v7528_v28, 5  ;;  %v7839_v28 = vcombine.low %v7404_v7, %v7418_v13 }
  0x5c   : > { %6105 = vmatprep.subr.bf16.mxu0 %v6744_v1  ;;  %v6748_v1 = vld [vmem:[%s9122_s1 + $0x250] sm:$0xff]  }
  0x5d   : > { %9180 = vst [vmem:[#allocation19_spill] sm:$0xff] %v7760_v9  ;;  %1481 = vmatmul.mubr.bf16.vlgmr.msra.gmra.mrb[16].mxu1 %v5122_v43  ;;  %v6752_v43 = vld [vmem:[%s9122_s1 + $0x258] sm:$0xff]   ;;  %9185 = vst [vmem:[#allocation24_spill] sm:$0xff] %v7839_v28 }
  0x5e   : > { %6144 = vmatpush3.bf16.msra.mxu1 %v6743_v50  ;;  %1488 = vmatprep.mubr.bf16.mxu1 %v7760_v9  ;;  %v6751_v50 = vld [vmem:[%s9122_s1 + $0x290] sm:$0xff]   ;;  %v1586_v9 = vrot.slane %v7558_v51, 5  ;;  %v7859_v51 = vcombine.low %v7434_v22, %v7441_v30 }
  0x5f   : > { %6106 = vmatpush3.bf16.msra.mxu0 %v6746_v12  ;;  %6145 = vmatprep.subr.bf16.mxu1 %v6745_v31  ;;  %v7803_v12 = vcombine.low %v7237_v6, %v7303_v2  ;;  %v6754_v31 = vld [vmem:[%s9122_s1 + $0x218] sm:$0xff]  }
  0x60   : > { %6107 = vmatprep.subr.bf16.mxu0 %v6748_v1  ;;  %v5180_v1 = vrot.slane %v7525_v53, 9 }
  0x61   : > { %9183 = vst [vmem:[#allocation22_spill] sm:$0xff] %v7803_v12 }
  0x62   : > { %1424 = vmatmul.mubr.bf16.gmra.mrb[20].mxu0 %v7784_v3  ;;  %6146 = vmatpush3.bf16.msra.mxu1 %v6747_v56  ;;  %v6753_v56 = vld [vmem:[%s9122_s1 + $0x2d8] sm:$0xff]  }
  0x63   : > { %6108 = vmatpush3.bf16.msra.mxu0 %v6750_v60  ;;  %6147 = vmatprep.subr.bf16.mxu1 %v6749_v27  ;;  %v7823_v60 = vcombine.high %v7434_v22, %v7441_v30  ;;  %v6755_v3 = vld [vmem:[%s9122_s1 + $0x298] sm:$0xff]   ;;  %v6756_v27 = vld [vmem:[%s9122_s1 + $0x260] sm:$0xff]  }
  0x64   : > { %6109 = vmatprep.subr.bf16.mxu0 %v6752_v43  ;;  %1431 = vmatprep.mubr.bf16.mxu0 %v7798_v21  ;;  %v5181_v43 = vrot.slane %v7551_v57, 9  ;;  %v6758_v21 = vld [vmem:[%s9122_s1 + $0x220] sm:$0xff]  }
  0x65   : > { %9184 = vst [vmem:[#allocation23_spill] sm:$0xff] %v7823_v60  ;;  %1489 = vmatmul.mubr.bf16.gmra.mrb[20].mxu1 %v7803_v12  ;;  %v6760_v12 = vld [vmem:[%s9122_s1 + $0x268] sm:$0xff]  }
  0x66   : > { %6148 = vmatpush3.bf16.msra.mxu1 %v6751_v50  ;;  %1496 = vmatprep.mubr.bf16.mxu1 %v7823_v60  ;;  %v6759_v50 = vld [vmem:[%s9122_s1 + $0x2a0] sm:$0xff]   ;;  %v7915_v60 = vcombine.low %v7551_v57, %v7562_v38 }
  0x67   : > { %6110 = vmatpush3.bf16.msra.mxu0 %v6754_v31  ;;  %6149 = vmatprep.subr.bf16.mxu1 %v6753_v56  ;;  %v7866_v31 = vsel %vm7323_vm5, %v5180_v1, %v1582_v18  ;;  %v7870_v56 = vsel %vm7323_vm5, %v5181_v43, %v1586_v9  ;;  %v6761_v9 = vld [vmem:[%s9122_s1 + $0x2e8] sm:$0xff]   ;;  %v6765_v43 = vld [vmem:[%s9122_s1 + $0x2f0] sm:$0xff]   ;;  %v6768_v18 = vld [vmem:[%s9122_s1 + $0x278] sm:$0xff]  }
  0x68   : > { %6111 = vmatprep.subr.bf16.mxu0 %v6756_v27  ;;  %v6762_v27 = vld [vmem:[%s9122_s1 + $0x228] sm:$0xff]   ;;  %9186 = vst [vmem:[#allocation25_spill] sm:$0xff] %v7915_v60 }
  0x69   : > { %v6763_v1 = vld [vmem:[%s9122_s1 + $0x2a8] sm:$0xff]  }
  0x6a   : > { %1432 = vmatmul.mubr.bf16.gmra.mrb[24].mxu0 %v7839_v28  ;;  %6150 = vmatpush3.bf16.msra.mxu1 %v6755_v3  ;;  %v6766_v3 = vld [vmem:[%s9122_s1 + $0x230] sm:$0xff]   ;;  %v9187_v28 = vcombine.high %v7343_v39, %v7347_v40 }
  0x6b   : > { %6112 = vmatpush3.bf16.msra.mxu0 %v6758_v21  ;;  %6151 = vmatprep.subr.bf16.mxu1 %v6757_v4  ;;  %v7886_v21 = vcombine.high %v7551_v57, %v7562_v38  ;;  %v6764_v4 = vld [vmem:[%s9122_s1 + $0x270] sm:$0xff]  }
  0x6c   : > { %6113 = vmatprep.subr.bf16.mxu0 %v6760_v12  ;;  %1439 = vmatprep.mubr.bf16.mxu0 %v7854_v24  ;;  %v7900_v12 = vcombine.low %v7525_v53, %v7543_v41 }
  0x6d   : > { %1497 = vmatmul.mubr.bf16.gmra.mrb[24].mxu1 %v7859_v51 }
  0x6e   : > { %6152 = vmatpush3.bf16.msra.mxu1 %v6759_v50  ;;  %1504 = vmatprep.mubr.bf16.mxu1 %v7886_v21  ;;  %v6767_v50 = vld [vmem:[%s9122_s1 + $0x2b0] sm:$0xff]  }
  0x6f   : > { %6114 = vmatpush3.bf16.msra.mxu0 %v6762_v27  ;;  %6153 = vmatprep.subr.bf16.mxu1 %v6761_v9  ;;  %v6770_v27 = vld [vmem:[%s9122_s1 + $0x238] sm:$0xff]  }
  0x70   : > { %6115 = vmatprep.subr.bf16.mxu0 %v6764_v4  ;;  %v6769_v9 = vld [vmem:[%s9122_s1 + $0x2f8] sm:$0xff]  }
  0x71   : > { %v6771_v4 = vld [vmem:[%s9122_s1 + $0x2b8] sm:$0xff]  }
  0x72   : > { %1440 = vmatmul.mubr.bf16.gmra.mrb[28].mxu0 %v7900_v12  ;;  %6154 = vmatpush3.bf16.msra.mxu1 %v6763_v1  ;;  %v6774_v1 = vld [vmem:[%s9122_s1 + $0x300] sm:$0xff]  }
  0x73   : > { %6116 = vmatpush3.bf16.msra.mxu0 %v6766_v3  ;;  %6155 = vmatprep.subr.bf16.mxu1 %v6765_v43  ;;  %v6772_v3 = vld [vmem:[%s9122_s1 + $0x340] sm:$0xff]   ;;  %v6776_v43 = vld [vmem:[%s9122_s1 + $0x348] sm:$0xff]  }
  0x74   : > { %6117 = vmatprep.subr.bf16.mxu0 %v6768_v18  ;;  %1949 = vmatprep.mubr.bf16.mxu0 %v9187_v28  ;;  %v6773_v18 = vld [vmem:[%s9122_s1 + $0x3c0] sm:$0xff]   ;;  %v9188_v28 = vcombine.high %v7366_v47, %v7413_v11 }
  0x75   : > { %1505 = vmatmul.mubr.bf16.gmra.mrb[28].mxu1 %v7915_v60  ;;  %v9189_v60 = vcombine.low %v7343_v39, %v7347_v40  ;;  %v6779_v39 = vld [vmem:[%s9122_s1 + $0x388] sm:$0xff]  }
  0x76   : > { %6156 = vmatpush3.bf16.msra.mxu1 %v6767_v50  ;;  %2014 = vmatprep.mubr.bf16.mxu1 %v9188_v28  ;;  %v6775_v50 = vld [vmem:[%s9122_s1 + $0x380] sm:$0xff]   ;;  %v6783_v28 = vld [vmem:[%s9122_s1 + $0x390] sm:$0xff]  }
  0x77   : > { %6118 = vmatpush3.bf16.msra.mxu0 %v6770_v27  ;;  %6157 = vmatprep.subr.bf16.mxu1 %v6769_v9  ;;  %v6778_v27 = vld [vmem:[%s9122_s1 + $0x308] sm:$0xff]  }
  0x78   : > { %6183 = vmatprep.subr.bf16.mxu0 %v6772_v3  ;;  %v6777_v9 = vld [vmem:[%s9122_s1 + $0x3c8] sm:$0xff]   ;;  %v6781_v3 = vld [vmem:[%s9122_s1 + $0x3d0] sm:$0xff]  }
  0x7a   : > { %1950 = vmatmul.mubr.bf16.vlgmr.msra.gmra.mrb[32].mxu0 %v9189_v60  ;;  %6158 = vmatpush3.bf16.msra.mxu1 %v6771_v4  ;;  %v6780_v60 = vld [vmem:[%s9122_s1 + $0x350] sm:$0xff]   ;;  %v9190_v4 = vcombine.low %v7366_v47, %v7413_v11  ;;  %v5182_v47 = vrot.slane %v7543_v41, 9  ;;  %v6785_v41 = vld [vmem:[%s9122_s1 + $0x3d8] sm:$0xff]  }
  0x7b   : > { %6184 = vmatpush3.bf16.msra.mxu0 %v6774_v1  ;;  %6223 = vmatprep.subr.bf16.mxu1 %v6773_v18  ;;  %v6782_v18 = vld [vmem:[%s9122_s1 + $0x310] sm:$0xff]   ;;  %v6784_v1 = vld [vmem:[%s9122_s1 + $0x358] sm:$0xff]  }
  0x7c   : > { %6185 = vmatprep.subr.bf16.mxu0 %v6776_v43  ;;  %1957 = vmatprep.mubr.bf16.mxu0 %v7623_v46  ;;  %v1590_v43 = vrot.slane %v7546_v5, 5  ;;  %v6788_v5 = vld [vmem:[%s9122_s1 + $0x360] sm:$0xff]  }
  0x7d   : > { %2015 = vmatmul.mubr.bf16.vlgmr.msra.gmra.mrb[32].mxu1 %v9190_v4  ;;  %v6790_v4 = vld [vmem:[%s9122_s1 + $0x320] sm:$0xff]  }
  0x7e   : > { %6224 = vmatpush3.bf16.msra.mxu1 %v6775_v50  ;;  %2022 = vmatprep.mubr.bf16.mxu1 %v7691_v16  ;;  %v6786_v50 = vld [vmem:[%s9122_s1 + $0x318] sm:$0xff]  }
  0x7f   : > { %6186 = vmatpush3.bf16.msra.mxu0 %v6778_v27  ;;  %6225 = vmatprep.subr.bf16.mxu1 %v6777_v9  ;;  %v5183_v27 = vrot.slane %v7562_v38, 9  ;;  %v6787_v9 = vld [vmem:[%s9122_s1 + $0x398] sm:$0xff]   ;;  %v8007_v38 = vsel %vm7323_vm5, %v5182_v47, %v1590_v43  ;;  %v6794_v47 = vld [vmem:[%s9122_s1 + $0x328] sm:$0xff]  }
  0x80   : > { %6187 = vmatprep.subr.bf16.mxu0 %v6780_v60  ;;  %v6789_v60 = vld [vmem:[%s9122_s1 + $0x3e0] sm:$0xff]  }
  0x82   : > { %1958 = vmatmul.mubr.bf16.gmra.mrb[36].mxu0 %v7630_v23  ;;  %6226 = vmatpush3.bf16.msra.mxu1 %v6779_v39  ;;  %v1594_v39 = vrot.slane %v7565_v33, 5  ;;  %v6792_v33 = vld [vmem:[%s9122_s1 + $0x368] sm:$0xff]  }
  0x83   : > { %6188 = vmatpush3.bf16.msra.mxu0 %v6782_v18  ;;  %6227 = vmatprep.subr.bf16.mxu1 %v6781_v3  ;;  %v8018_v3 = vcombine.high %v7866_v31, %v8007_v38 }
  0x84   : > { %6189 = vmatprep.subr.bf16.mxu0 %v6784_v1  ;;  %1965 = vmatprep.mubr.bf16.mxu0 %v7728_v45  ;;  %v8022_v18 = vsel %vm7323_vm5, %v5183_v27, %v1594_v39  ;;  %v6791_v1 = vld [vmem:[%s9122_s1 + $0x3a0] sm:$0xff]   ;;  %v8048_v27 = vcombine.low %v7866_v31, %v8007_v38  ;;  %v6800_v39 = vld [vmem:[%s9122_s1 + $0x378] sm:$0xff]  }
  0x85   : > { %2023 = vmatmul.mubr.bf16.gmra.mrb[36].mxu1 %v7695_v35  ;;  %v8036_v43 = vcombine.high %v7870_v56, %v8022_v18 }
  0x86   : > { %6228 = vmatpush3.bf16.msra.mxu1 %v6783_v28  ;;  %2030 = vmatprep.mubr.bf16.mxu1 %v7776_v58  ;;  %v6793_v28 = vld [vmem:[%s9122_s1 + $0x3e8] sm:$0xff]  }
  0x87   : > { %6190 = vmatpush3.bf16.msra.mxu0 %v6786_v50  ;;  %6229 = vmatprep.subr.bf16.mxu1 %v6785_v41  ;;  %v6795_v50 = vld [vmem:[%s9122_s1 + $0x3a8] sm:$0xff]   ;;  %v6796_v41 = vld [vmem:[%s9122_s1 + $0x370] sm:$0xff]  }
  0x88   : > { %6191 = vmatprep.subr.bf16.mxu0 %v6788_v5  ;;  %v6798_v5 = vld [vmem:[%s9122_s1 + $0x330] sm:$0xff]  }
  0x8a   : > { %1966 = vmatmul.mubr.bf16.gmra.mrb[40].mxu0 %v7733_v59  ;;  %6230 = vmatpush3.bf16.msra.mxu1 %v6787_v9  ;;  %v6797_v9 = vld [vmem:[%s9122_s1 + $0x3f0] sm:$0xff]  }
  0x8b   : > { %6192 = vmatpush3.bf16.msra.mxu0 %v6790_v4  ;;  %6231 = vmatprep.subr.bf16.mxu1 %v6789_v60  ;;  %v8063_v60 = vcombine.low %v7870_v56, %v8022_v18  ;;  %v6799_v4 = vld [vmem:[%s9122_s1 + $0x3b0] sm:$0xff]  }
  0x8c   : > { %6193 = vmatprep.subr.bf16.mxu0 %v6792_v33  ;;  %1973 = vmatprep.mubr.bf16.mxu0 %v8018_v3  ;;  %v6802_v33 = vld [vmem:[%s9122_s1 + $0x338] sm:$0xff]  }
  0x8d   : > { %2031 = vmatmul.mubr.bf16.gmra.mrb[40].mxu1 %v7780_v49 }
  0x8e   : > { %6232 = vmatpush3.bf16.msra.mxu1 %v6791_v1  ;;  %2038 = vmatprep.mubr.bf16.mxu1 %v8036_v43  ;;  %v6801_v1 = vld [vmem:[%s9122_s1 + $0x3f8] sm:$0xff]  }
  0x8f   : > { %6194 = vmatpush3.bf16.msra.mxu0 %v6794_v47  ;;  %6233 = vmatprep.subr.bf16.mxu1 %v6793_v28  ;;  %v6803_v47 = vld [vmem:[%s9122_s1 + $0x3b8] sm:$0xff]   ;;  %v9191_v28 = vcombine.high %v7189_v34, %v7195_v36 }
  0x90   : > { %6195 = vmatprep.subr.bf16.mxu0 %v6796_v41  ;;  %v6805_v41 = vld [vmem:[%s9122_s1 + $0x4c0] sm:$0xff]  }
  0x92   : > { %1974 = vmatmul.mubr.bf16.gmra.mrb[44].mxu0 %v8048_v27  ;;  %6234 = vmatpush3.bf16.msra.mxu1 %v6795_v50  ;;  %v6804_v50 = vld [vmem:[%s9122_s1 + $0x440] sm:$0xff]  }
  0x93   : > { %6196 = vmatpush3.bf16.msra.mxu0 %v6798_v5  ;;  %6235 = vmatprep.subr.bf16.mxu1 %v6797_v9  ;;  %v6806_v9 = vld [vmem:[%s9122_s1 + $0x400] sm:$0xff]   ;;  %v9192_v5 = vcombine.high %v7216_v55, %v7237_v6 }
  0x94   : > { %6197 = vmatprep.subr.bf16.mxu0 %v6800_v39  ;;  %2382 = vmatprep.mubr.bf16.mxu0 %v9191_v28  ;;  %v6808_v39 = vld [vmem:[%s9122_s1 + $0x448] sm:$0xff]   ;;  %v9193_v28 = vcombine.low %v7189_v34, %v7195_v36  ;;  %v9194_v36 = vcombine.high %v7297_v0, %v7404_v7 }
  0x95   : > { %2039 = vmatmul.mubr.bf16.gmra.mrb[44].mxu1 %v8063_v60  ;;  %v6811_v34 = vld [vmem:[%s9122_s1 + $0x488] sm:$0xff]  }
  0x96   : > { %6236 = vmatpush3.bf16.msra.mxu1 %v6799_v4  ;;  %2447 = vmatprep.mubr.bf16.mxu1 %v9192_v5  ;;  %v6807_v4 = vld [vmem:[%s9122_s1 + $0x480] sm:$0xff]   ;;  %v9196_v5 = vcombine.high %v7303_v2, %v7434_v22 }
  0x97   : > { %6198 = vmatpush3.bf16.msra.mxu0 %v6802_v33  ;;  %6237 = vmatprep.subr.bf16.mxu1 %v6801_v1  ;;  %v6810_v33 = vld [vmem:[%s9122_s1 + $0x408] sm:$0xff]  }
  0x98   : > { %6263 = vmatprep.subr.bf16.mxu0 %v6804_v50  ;;  %v6809_v1 = vld [vmem:[%s9122_s1 + $0x4c8] sm:$0xff]   ;;  %v9195_v50 = vcombine.low %v7216_v55, %v7237_v6  ;;  %v6816_v55 = vld [vmem:[%s9122_s1 + $0x458] sm:$0xff]   ;;  %v9197_v6 = vcombine.low %v7297_v0, %v7404_v7  ;;  %v9198_v7 = vcombine.high %v7418_v13, %v7525_v53 }
  0x99   : > { %v6819_v0 = vld [vmem:[%s9122_s1 + $0x498] sm:$0xff]  }
  0x9a   : > { %2383 = vmatmul.mubr.bf16.vlgmr.msra.gmra.mrb[48].mxu0 %v9193_v28  ;;  %6238 = vmatpush3.bf16.msra.mxu1 %v6803_v47  ;;  %v6812_v47 = vld [vmem:[%s9122_s1 + $0x450] sm:$0xff]   ;;  %v6818_v28 = vld [vmem:[%s9122_s1 + $0x418] sm:$0xff]  }
  0x9b   : > { %6264 = vmatpush3.bf16.msra.mxu0 %v6806_v9  ;;  %6303 = vmatprep.subr.bf16.mxu1 %v6805_v41  ;;  %v6813_v41 = vld [vmem:[%s9122_s1 + $0x4d0] sm:$0xff]  }
  0x9c   : > { %6265 = vmatprep.subr.bf16.mxu0 %v6808_v39  ;;  %2390 = vmatprep.mubr.bf16.mxu0 %v9194_v36  ;;  %v6814_v9 = vld [vmem:[%s9122_s1 + $0x410] sm:$0xff]   ;;  %v6822_v36 = vld [vmem:[%s9122_s1 + $0x420] sm:$0xff]  }
  0x9d   : > { %2448 = vmatmul.mubr.bf16.vlgmr.msra.gmra.mrb[48].mxu1 %v9195_v50  ;;  %v6815_v39 = vld [vmem:[%s9122_s1 + $0x490] sm:$0xff]   ;;  %v6823_v50 = vld [vmem:[%s9122_s1 + $0x4a0] sm:$0xff]  }
  0x9e   : > { %6304 = vmatpush3.bf16.msra.mxu1 %v6807_v4  ;;  %2455 = vmatprep.mubr.bf16.mxu1 %v9196_v5  ;;  %v6817_v4 = vld [vmem:[%s9122_s1 + $0x4d8] sm:$0xff]   ;;  %v6826_v5 = vld [vmem:[%s9122_s1 + $0x428] sm:$0xff]  }
  0x9f   : > { %6266 = vmatpush3.bf16.msra.mxu0 %v6810_v33  ;;  %6305 = vmatprep.subr.bf16.mxu1 %v6809_v1  ;;  %v6820_v33 = vld [vmem:[%s9122_s1 + $0x460] sm:$0xff]   ;;  %v9199_v1 = vcombine.low %v7303_v2, %v7434_v22  ;;  %v6824_v2 = vld [vmem:[%s9122_s1 + $0x468] sm:$0xff]   ;;  %v9201_v22 = vcombine.low %v7418_v13, %v7525_v53 }
  0xa0   : > { %6267 = vmatprep.subr.bf16.mxu0 %v6812_v47  ;;  %v9200_v47 = vcombine.high %v7441_v30, %v7551_v57  ;;  %v6825_v13 = vld [vmem:[%s9122_s1 + $0x4e8] sm:$0xff]  }
  0xa1   : > { %v7013_v53 = vld [vmem:[%s7174_s26 + $0xe8] sm:$0xff] }
  0xa2   : > { %2391 = vmatmul.mubr.bf16.gmra.mrb[52].mxu0 %v9197_v6  ;;  %6306 = vmatpush3.bf16.msra.mxu1 %v6811_v34  ;;  %v6821_v34 = vld [vmem:[%s9122_s1 + $0x4e0] sm:$0xff]  }
  0xa3   : > { %6268 = vmatpush3.bf16.msra.mxu0 %v6814_v9  ;;  %6307 = vmatprep.subr.bf16.mxu1 %v6813_v41  ;;  %v8175_v41 = vld [vmem:[%s7174_s26 + $0x100] sm:$0xff]  ;;  %v8178_v9 = vld [vmem:[%s7174_s26 + $0x108] sm:$0xff] }
  0xa4   : > { %6269 = vmatprep.subr.bf16.mxu0 %v6816_v55  ;;  %2398 = vmatprep.mubr.bf16.mxu0 %v9198_v7  ;;  %v7012_v55 = vld [vmem:[%s7174_s26 + $0xe0] sm:$0xff] }
  0xa5   : > { %2456 = vmatmul.mubr.bf16.gmra.mrb[52].mxu1 %v9199_v1  ;;  %v5373_v6 = vcombine.high %v7012_v55, %v8175_v41  ;;  %v5372_v7 = vcombine.low %v7012_v55, %v8175_v41  ;;  %v6830_v1 = vld [vmem:[%s9122_s1 + $0x430] sm:$0xff]   ;;  %v6837_v55 = vld [vmem:[%s9122_s1 + $0x5c0] sm:$0xff]  }
  0xa6   : > { %6308 = vmatpush3.bf16.msra.mxu1 %v6815_v39  ;;  %2463 = vmatprep.mubr.bf16.mxu1 %v9200_v47  ;;  %v5375_v39 = vcombine.high %v7013_v53, %v8178_v9  ;;  %v6833_v47 = vld [vmem:[%s9122_s1 + $0x4f8] sm:$0xff]  }
  0xa7   : > { %6270 = vmatpush3.bf16.msra.mxu0 %v6818_v28  ;;  %6309 = vmatprep.subr.bf16.mxu1 %v6817_v4  ;;  %v6827_v28 = vld [vmem:[%s9122_s1 + $0x4a8] sm:$0xff]   ;;  %v6828_v4 = vld [vmem:[%s9122_s1 + $0x470] sm:$0xff]  }
  0xa8   : > { %6271 = vmatprep.subr.bf16.mxu0 %v6820_v33  ;;  %v6829_v33 = vld [vmem:[%s9122_s1 + $0x4f0] sm:$0xff]  }
  0xaa   : > { %2399 = vmatmul.mubr.bf16.gmra.mrb[56].mxu0 %v9201_v22  ;;  %6310 = vmatpush3.bf16.msra.mxu1 %v6819_v0  ;;  %v9202_v0 = vcombine.low %v7441_v30, %v7551_v57  ;;  %v5374_v30 = vcombine.low %v7013_v53, %v8178_v9  ;;  %v6831_v57 = vld [vmem:[%s9122_s1 + $0x4b0] sm:$0xff]   ;;  %v9203_v22 = vld [vmem:[#allocation2_spill] sm:$0xff] }
  0xab   : > { %6272 = vmatpush3.bf16.msra.mxu0 %v6822_v36  ;;  %6311 = vmatprep.subr.bf16.mxu1 %v6821_v34  ;;  %v6832_v34 = vld [vmem:[%s9122_s1 + $0x478] sm:$0xff]   ;;  %v9206_v53 = vld [vmem:[#allocation4_spill] sm:$0xff] }
  0xac   : > { %6273 = vmatprep.subr.bf16.mxu0 %v6824_v2  ;;  %2406 = vmatprep.mubr.bf16.mxu0 %v5373_v6  ;;  %v6834_v36 = vld [vmem:[%s9122_s1 + $0x438] sm:$0xff]   ;;  %v6838_v6 = vld [vmem:[%s9122_s1 + $0x500] sm:$0xff]  }
  0xad   : > { %2464 = vmatmul.mubr.bf16.gmra.mrb[56].mxu1 %v9202_v0  ;;  %v6835_v2 = vld [vmem:[%s9122_s1 + $0x4b8] sm:$0xff]   ;;  %v6839_v0 = vld [vmem:[%s9122_s1 + $0x580] sm:$0xff]  }
  0xae   : > { %6312 = vmatpush3.bf16.msra.mxu1 %v6823_v50  ;;  %2471 = vmatprep.mubr.bf16.mxu1 %v5375_v39  ;;  %v9204_v50 = vcombine.high %v7252_v19, %v9203_v22 }
  0xaf   : > { %6274 = vmatpush3.bf16.msra.mxu0 %v6826_v5  ;;  %6313 = vmatprep.subr.bf16.mxu1 %v6825_v13  ;;  %v6836_v5 = vld [vmem:[%s9122_s1 + $0x540] sm:$0xff]   ;;  %v9205_v13 = vld [vmem:[#allocation3_spill] sm:$0xff] }
  0xb0   : > { %6275 = vmatprep.subr.bf16.mxu0 %v6828_v4  ;;  %v9207_v39 = vcombine.high %v9205_v13, %v9206_v53  ;;  %v9208_v4 = vcombine.low %v7252_v19, %v9203_v22  ;;  %v2492_v19 = vshll.u32 %v8175_v41, 16  ;;  %v2506_v22 = vshll.u32 %v8178_v9, 16 }
  0xb2   : > { %2407 = vmatmul.mubr.bf16.gmra.mrb[60].mxu0 %v5372_v7  ;;  %6314 = vmatpush3.bf16.msra.mxu1 %v6827_v28  ;;  %v6840_v28 = vld [vmem:[%s9122_s1 + $0x548] sm:$0xff]  }
  0xb3   : > { %6276 = vmatpush3.bf16.msra.mxu0 %v6830_v1  ;;  %6315 = vmatprep.subr.bf16.mxu1 %v6829_v33  ;;  %v6842_v7 = vld [vmem:[%s9122_s1 + $0x508] sm:$0xff]   ;;  %v2489_v33 = vshrl.u32 %v8175_v41, 16 }
  0xb4   : > { %6277 = vmatprep.subr.bf16.mxu0 %v6832_v34  ;;  %2841 = vmatprep.mubr.bf16.mxu0 %v9204_v50  ;;  %v6841_v1 = vld [vmem:[%s9122_s1 + $0x5c8] sm:$0xff]   ;;  %v6846_v50 = vld [vmem:[%s9122_s1 + $0x510] sm:$0xff]  }
  0xb5   : > { %2472 = vmatmul.mubr.bf16.gmra.mrb[60].mxu1 %v5374_v30  ;;  %v6843_v34 = vld [vmem:[%s9122_s1 + $0x588] sm:$0xff]   ;;  %v9209_v30 = vcombine.high %v7370_v48, %v7463_v42 }
  0xb6   : > { %6316 = vmatpush3.bf16.msra.mxu1 %v6831_v57  ;;  %2906 = vmatprep.mubr.bf16.mxu1 %v9207_v39  ;;  %v6844_v57 = vld [vmem:[%s9122_s1 + $0x550] sm:$0xff]   ;;  %v9212_v39 = vcombine.low %v7370_v48, %v7463_v42  ;;  %v6851_v48 = vld [vmem:[%s9122_s1 + $0x598] sm:$0xff]   ;;  %v9213_v42 = vcombine.high %v7469_v25, %v7585_v52 }
  0xb7   : > { %6278 = vmatpush3.bf16.msra.mxu0 %v6834_v36  ;;  %6317 = vmatprep.subr.bf16.mxu1 %v6833_v47  ;;  %v2503_v36 = vshrl.u32 %v8178_v9, 16  ;;  %v9210_v47 = vcombine.low %v9205_v13, %v9206_v53  ;;  %v2494_v13 = vrot.slane %v2492_v19, 5  ;;  %v9214_v19 = vcombine.low %v7382_v44, %v7506_v17 }
  0xb8   : > { %6343 = vmatprep.subr.bf16.mxu0 %v6836_v5  ;;  %v9211_v5 = vcombine.high %v7382_v44, %v7506_v17  ;;  %v6856_v44 = vld [vmem:[%s9122_s1 + $0x568] sm:$0xff]   ;;  %v6855_v17 = vld [vmem:[%s9122_s1 + $0x5a0] sm:$0xff]  }
  0xb9   : > { %v2505_v53 = vrot.slane %v2503_v36, 4  ;;  %v9215_v36 = vcombine.high %v7518_v54, %v7639_v26 }
  0xba   : > { %2842 = vmatmul.mubr.bf16.vlgmr.msra.gmra.mrb[64].mxu0 %v9208_v4  ;;  %6318 = vmatpush3.bf16.msra.mxu1 %v6835_v2  ;;  %v6845_v2 = vld [vmem:[%s9122_s1 + $0x5d0] sm:$0xff]   ;;  %v2508_v4 = vrot.slane %v2506_v22, 5  ;;  %v6858_v22 = vld [vmem:[%s9122_s1 + $0x528] sm:$0xff]  }
  0xbb   : > { %6344 = vmatpush3.bf16.msra.mxu0 %v6838_v6  ;;  %6383 = vmatprep.subr.bf16.mxu1 %v6837_v55  ;;  %v6848_v55 = vld [vmem:[%s9122_s1 + $0x558] sm:$0xff]   ;;  %v2491_v6 = vrot.slane %v2489_v33, 4  ;;  %v6852_v33 = vld [vmem:[%s9122_s1 + $0x560] sm:$0xff]  }
  0xbc   : > { %6345 = vmatprep.subr.bf16.mxu0 %v6840_v28  ;;  %2849 = vmatprep.mubr.bf16.mxu0 %v9209_v30  ;;  %v6847_v28 = vld [vmem:[%s9122_s1 + $0x590] sm:$0xff]   ;;  %v2509_v30 = vor.u32 %v2508_v4, %v2505_v53  ;;  %v9217_v53 = vcombine.low %v7518_v54, %v7639_v26 }
  0xbd   : > { %2907 = vmatmul.mubr.bf16.vlgmr.msra.gmra.mrb[64].mxu1 %v9210_v47  ;;  %v6862_v26 = vld [vmem:[%s9122_s1 + $0x530] sm:$0xff]  }
  0xbe   : > { %6384 = vmatpush3.bf16.msra.mxu1 %v6839_v0  ;;  %2914 = vmatprep.mubr.bf16.mxu1 %v9211_v5  ;;  %v6850_v0 = vld [vmem:[%s9122_s1 + $0x518] sm:$0xff]   ;;  %v8326_v5 = vld [vmem:[%s7174_s26 + $0x110] sm:$0x11] }
  0xbf   : > { %6346 = vmatpush3.bf16.msra.mxu0 %v6842_v7  ;;  %6385 = vmatprep.subr.bf16.mxu1 %v6841_v1  ;;  %v6849_v7 = vld [vmem:[%s9122_s1 + $0x5d8] sm:$0xff]   ;;  %v2495_v1 = vor.u32 %v2494_v13, %v2491_v6  ;;  %v6857_v6 = vld [vmem:[%s9122_s1 + $0x5e8] sm:$0xff]   ;;  %v6860_v13 = vld [vmem:[%s9122_s1 + $0x570] sm:$0xff]  }
  0xc0   : > { %6347 = vmatprep.subr.bf16.mxu0 %v6844_v57  ;;  %v6854_v57 = vld [vmem:[%s9122_s1 + $0x520] sm:$0xff]  }
  0xc1   : > { %v2496_v47 = vrot.slane %v2495_v1, 4  ;;  %v6863_v1 = vld [vmem:[%s9122_s1 + $0x5b0] sm:$0xff]  }
  0xc2   : > { %2850 = vmatmul.mubr.bf16.gmra.mrb[68].mxu0 %v9212_v39  ;;  %6386 = vmatpush3.bf16.msra.mxu1 %v6843_v34  ;;  %v6853_v34 = vld [vmem:[%s9122_s1 + $0x5e0] sm:$0xff]   ;;  %v6859_v39 = vld [vmem:[%s9122_s1 + $0x5a8] sm:$0xff]  }
  0xc3   : > { %6348 = vmatpush3.bf16.msra.mxu0 %v6846_v50  ;;  %6387 = vmatprep.subr.bf16.mxu1 %v6845_v2  ;;  %v9216_v2 = vcombine.low %v7469_v25, %v7585_v52  ;;  %v2510_v50 = vrot.slane %v2509_v30, 4  ;;  %v2498_v52 = vshll.u32 %v8326_v5, 16  ;;  %v6865_v30 = vld [vmem:[%s9122_s1 + $0x5f8] sm:$0xff]  }
  0xc4   : > { %6349 = vmatprep.subr.bf16.mxu0 %v6848_v55  ;;  %2857 = vmatprep.mubr.bf16.mxu0 %v9213_v42  ;;  %v8329_v55 = vld [vmem:[%s7174_s26 + $0x118] sm:$0x11] }
  0xc5   : > { %2915 = vmatmul.mubr.bf16.gmra.mrb[68].mxu1 %v9214_v19  ;;  %v2512_v25 = vshll.u32 %v8329_v55, 16 }
  0xc6   : > { %6388 = vmatpush3.bf16.msra.mxu1 %v6847_v28  ;;  %2922 = vmatprep.mubr.bf16.mxu1 %v9215_v36  ;;  %v2500_v28 = vrot.slane %v2498_v52, 5  ;;  %v9218_v36 = vcombine.high %v7347_v40, %v7478_v29  ;;  %v6874_v52 = vld [vmem:[%s9122_s1 + $0x608] sm:$0xff]  }
  0xc7   : > { %6350 = vmatpush3.bf16.msra.mxu0 %v6850_v0  ;;  %6389 = vmatprep.subr.bf16.mxu1 %v6849_v7  ;;  %v2514_v4 = vrot.slane %v2512_v25, 5  ;;  %v6861_v0 = vld [vmem:[%s9122_s1 + $0x5f0] sm:$0xff]   ;;  %v6875_v25 = vld [vmem:[%s9122_s1 + $0x688] sm:$0xff]  }
  0xc8   : > { %6351 = vmatprep.subr.bf16.mxu0 %v6852_v33  ;;  %v8350_v7 = vsel %vm7227_vm2, %v2496_v47, %v2500_v28  ;;  %v6870_v47 = vld [vmem:[%s9122_s1 + $0x600] sm:$0xff]   ;;  %v6877_v28 = vld [vmem:[%s9122_s1 + $0x6d0] sm:$0xff]  }
  0xc9   : > { %v8354_v54 = vsel %vm7227_vm2, %v2510_v50, %v2514_v4  ;;  %v5484_v33 = vcombine.low %v7593_v63, %v8350_v7  ;;  %v6873_v50 = vld [vmem:[%s9122_s1 + $0x6c8] sm:$0xff]   ;;  %v5520_v4 = vrot.slane %v8175_v41, 9 }
  0xca   : > { %2858 = vmatmul.mubr.bf16.gmra.mrb[72].mxu0 %v9216_v2  ;;  %6390 = vmatpush3.bf16.msra.mxu1 %v6851_v48  ;;  %v5485_v48 = vcombine.high %v7593_v63, %v8350_v7  ;;  %v5487_v42 = vcombine.high %v7651_v15, %v8354_v54  ;;  %v5486_v19 = vcombine.low %v7651_v15, %v8354_v54  ;;  %v6866_v63 = vld [vmem:[%s9122_s1 + $0x538] sm:$0xff]   ;;  %v6871_v2 = vld [vmem:[%s9122_s1 + $0x680] sm:$0xff]  }
  0xcb   : > { %6352 = vmatpush3.bf16.msra.mxu0 %v6854_v57  ;;  %6391 = vmatprep.subr.bf16.mxu1 %v6853_v34  ;;  %v6864_v34 = vld [vmem:[%s9122_s1 + $0x578] sm:$0xff]   ;;  %v6868_v57 = vld [vmem:[%s9122_s1 + $0x640] sm:$0xff]  }
  0xcc   : > { %6353 = vmatprep.subr.bf16.mxu0 %v6856_v44  ;;  %2865 = vmatprep.mubr.bf16.mxu0 %v5485_v48  ;;  %v6867_v15 = vld [vmem:[%s9122_s1 + $0x5b8] sm:$0xff]   ;;  %v6869_v44 = vld [vmem:[%s9122_s1 + $0x6c0] sm:$0xff]  }
  0xcd   : > { %2923 = vmatmul.mubr.bf16.gmra.mrb[72].mxu1 %v9217_v53  ;;  %v9222_v53 = vcombine.low %v7413_v11, %v7608_v10  ;;  %v6881_v48 = vld [vmem:[%s9122_s1 + $0x6d8] sm:$0xff]  }
  0xce   : > { %6392 = vmatpush3.bf16.msra.mxu1 %v6855_v17  ;;  %2930 = vmatprep.mubr.bf16.mxu1 %v5487_v42  ;;  %v9219_v17 = vcombine.high %v7413_v11, %v7608_v10  ;;  %v6878_v11 = vld [vmem:[%s9122_s1 + $0x610] sm:$0xff]   ;;  %v5521_v42 = vrot.slane %v8178_v9, 9 }
  0xcf   : > { %6354 = vmatpush3.bf16.msra.mxu0 %v6858_v22  ;;  %6393 = vmatprep.subr.bf16.mxu1 %v6857_v6  ;;  %v6872_v22 = vld [vmem:[%s9122_s1 + $0x648] sm:$0xff]   ;;  %v9220_v6 = vcombine.low %v7347_v40, %v7478_v29  ;;  %v6876_v40 = vld [vmem:[%s9122_s1 + $0x650] sm:$0xff]   ;;  %v9223_v29 = vld [vmem:[#allocation18_spill] sm:$0xff] }
  0xd0   : > { %6355 = vmatprep.subr.bf16.mxu0 %v6860_v13  ;;  %v9221_v13 = vcombine.high %v7604_v37, %v7705_v8  ;;  %v6879_v10 = vld [vmem:[%s9122_s1 + $0x690] sm:$0xff]  }
  0xd2   : > { %6394 = vmatpush3.bf16.msra.mxu1 %v6859_v39  ;;  %2866 = vmatmul.mubr.bf16.gmra.mrb[76].mxu0 %v5484_v33  ;;  %v9224_v39 = vcombine.high %v7681_v61, %v9223_v29  ;;  %v9225_v33 = vcombine.low %v7604_v37, %v7705_v8  ;;  %v9227_v37 = vcombine.low %v7681_v61, %v9223_v29  ;;  %v6884_v8 = vld [vmem:[%s9122_s1 + $0x660] sm:$0xff]  }
  0xd3   : > { %6395 = vmatprep.subr.bf16.mxu1 %v6861_v0  ;;  %6356 = vmatpush3.bf16.msra.mxu0 %v6862_v26  ;;  %v6880_v0 = vld [vmem:[%s9122_s1 + $0x658] sm:$0xff]   ;;  %v2951_v26 = vrot.slane %v8326_v5, 5  ;;  %v6886_v61 = vld [vmem:[%s9122_s1 + $0x620] sm:$0xff]  }
  0xd4   : > { %6357 = vmatprep.subr.bf16.mxu0 %v6864_v34  ;;  %3282 = vmatprep.mubr.bf16.mxu0 %v9218_v36  ;;  %v6883_v5 = vld [vmem:[%s9122_s1 + $0x698] sm:$0xff]   ;;  %v9226_v34 = vcombine.high %v7723_v14, %v7866_v31  ;;  %v6900_v29 = vld [vmem:[%s9122_s1 + $0x740] sm:$0xff]  }
  0xd5   : > { %2931 = vmatmul.mubr.bf16.gmra.mrb[76].mxu1 %v5486_v19  ;;  %v2955_v19 = vrot.slane %v8329_v55, 5  ;;  %v8466_v55 = vsel %vm7323_vm5, %v5520_v4, %v2951_v26  ;;  %v6904_v4 = vld [vmem:[%s9122_s1 + $0x748] sm:$0xff]  }
  0xd6   : > { %6396 = vmatpush3.bf16.msra.mxu1 %v6863_v1  ;;  %3347 = vmatprep.mubr.bf16.mxu1 %v9219_v17  ;;  %v6882_v1 = vld [vmem:[%s9122_s1 + $0x618] sm:$0xff]   ;;  %v5599_v36 = vcombine.high %v8007_v38, %v8466_v55  ;;  %v6889_v17 = vld [vmem:[%s9122_s1 + $0x6e8] sm:$0xff]  }
  0xd7   : > { %6397 = vmatprep.subr.bf16.mxu1 %v6865_v30  ;;  %6358 = vmatpush3.bf16.msra.mxu0 %v6866_v63  ;;  %v9228_v30 = vcombine.high %v7764_v32, %v7870_v56  ;;  %v6885_v63 = vld [vmem:[%s9122_s1 + $0x6e0] sm:$0xff]  }
  0xd8   : > { %6423 = vmatprep.subr.bf16.mxu0 %v6868_v57  ;;  %v6887_v57 = vld [vmem:[%s9122_s1 + $0x6a0] sm:$0xff]  }
  0xda   : > { %6398 = vmatpush3.bf16.msra.mxu1 %v6867_v15  ;;  %3283 = vmatmul.mubr.bf16.vlgmr.msra.gmra.mrb[80].mxu0 %v9220_v6  ;;  %v8479_v15 = vsel %vm7323_vm5, %v5521_v42, %v2955_v19  ;;  %v9230_v6 = vcombine.low %v7764_v32, %v7870_v56  ;;  %v6894_v32 = vld [vmem:[%s9122_s1 + $0x630] sm:$0xff]   ;;  %v6906_v42 = vld [vmem:[%s9122_s1 + $0x708] sm:$0xff]   ;;  %v9234_v19 = vld [vmem:[#allocation21_spill] sm:$0xff] }
  0xdb   : > { %6463 = vmatprep.subr.bf16.mxu1 %v6869_v44  ;;  %6424 = vmatpush3.bf16.msra.mxu0 %v6870_v47  ;;  %v6888_v44 = vld [vmem:[%s9122_s1 + $0x668] sm:$0xff]   ;;  %v5601_v47 = vcombine.high %v8022_v18, %v8479_v15  ;;  %v6895_v56 = vld [vmem:[%s9122_s1 + $0x6b0] sm:$0xff]  }
  0xdc   : > { %3290 = vmatprep.mubr.bf16.mxu0 %v9221_v13  ;;  %6425 = vmatprep.subr.bf16.mxu0 %v6872_v22  ;;  %v6890_v22 = vld [vmem:[%s9122_s1 + $0x628] sm:$0xff]   ;;  %v6896_v13 = vld [vmem:[%s9122_s1 + $0x678] sm:$0xff]  }
  0xdd   : > { %3348 = vmatmul.mubr.bf16.vlgmr.msra.gmra.mrb[80].mxu1 %v9222_v53  ;;  %v6898_v53 = vld [vmem:[%s9122_s1 + $0x638] sm:$0xff]  }
  0xde   : > { %6464 = vmatpush3.bf16.msra.mxu1 %v6871_v2  ;;  %3355 = vmatprep.mubr.bf16.mxu1 %v9224_v39  ;;  %v9229_v2 = vcombine.low %v7723_v14, %v7866_v31  ;;  %v6892_v14 = vld [vmem:[%s9122_s1 + $0x670] sm:$0xff]   ;;  %v9232_v39 = vld [vmem:[#allocation19_spill] sm:$0xff] }
  0xdf   : > { %6465 = vmatprep.subr.bf16.mxu1 %v6873_v50  ;;  %6426 = vmatpush3.bf16.msra.mxu0 %v6874_v52  ;;  %v6891_v50 = vld [vmem:[%s9122_s1 + $0x6a8] sm:$0xff]   ;;  %v6893_v31 = vld [vmem:[%s9122_s1 + $0x6f0] sm:$0xff]   ;;  %v5598_v52 = vcombine.low %v8007_v38, %v8466_v55  ;;  %v6897_v38 = vld [vmem:[%s9122_s1 + $0x6f8] sm:$0xff]  }
  0xe0   : > { %6427 = vmatprep.subr.bf16.mxu0 %v6876_v40  ;;  %v9231_v40 = vld [vmem:[#allocation17_spill] sm:$0xff] }
  0xe2   : > { %6466 = vmatpush3.bf16.msra.mxu1 %v6875_v25  ;;  %3291 = vmatmul.mubr.bf16.gmra.mrb[84].mxu0 %v9225_v33  ;;  %v5600_v25 = vcombine.low %v8022_v18, %v8479_v15  ;;  %v6899_v18 = vld [vmem:[%s9122_s1 + $0x6b8] sm:$0xff]  }
  0xe3   : > { %6467 = vmatprep.subr.bf16.mxu1 %v6877_v28  ;;  %6428 = vmatpush3.bf16.msra.mxu0 %v6878_v11  ;;  %v6901_v28 = vld [vmem:[%s9122_s1 + $0x7c0] sm:$0xff]  }
  0xe4   : > { %3298 = vmatprep.mubr.bf16.mxu0 %v9226_v34  ;;  %6429 = vmatprep.subr.bf16.mxu0 %v6880_v0  ;;  %v6902_v11 = vld [vmem:[%s9122_s1 + $0x700] sm:$0xff]   ;;  %v6905_v0 = vld [vmem:[%s9122_s1 + $0x7c8] sm:$0xff]  }
  0xe5   : > { %3356 = vmatmul.mubr.bf16.gmra.mrb[84].mxu1 %v9227_v37  ;;  %v9235_v37 = vld [vmem:[#allocation22_spill] sm:$0xff] }
  0xe6   : > { %6468 = vmatpush3.bf16.msra.mxu1 %v6879_v10  ;;  %3363 = vmatprep.mubr.bf16.mxu1 %v9228_v30  ;;  %v6903_v10 = vld [vmem:[%s9122_s1 + $0x780] sm:$0xff]  }
  0xe7   : > { %6469 = vmatprep.subr.bf16.mxu1 %v6881_v48  ;;  %6430 = vmatpush3.bf16.msra.mxu0 %v6882_v1  ;;  %v9233_v48 = vld [vmem:[#allocation20_spill] sm:$0xff]  ;;  %v6907_v1 = vld [vmem:[%s9122_s1 + $0x788] sm:$0xff]  }
  0xe8   : > { %6431 = vmatprep.subr.bf16.mxu0 %v6884_v8  ;;  %v6908_v8 = vld [vmem:[%s9122_s1 + $0x750] sm:$0xff]  }
  0xea   : > { %6470 = vmatpush3.bf16.msra.mxu1 %v6883_v5  ;;  %3299 = vmatmul.mubr.bf16.gmra.mrb[88].mxu0 %v9229_v2 }
  0xeb   : > { %6471 = vmatprep.subr.bf16.mxu1 %v6885_v63  ;;  %6432 = vmatpush3.bf16.msra.mxu0 %v6886_v61  ;;  %v9236_v63 = vld [vmem:[#allocation23_spill] sm:$0xff]  ;;  %v6909_v61 = vld [vmem:[%s9122_s1 + $0x7d0] sm:$0xff]  }
  0xec   : > { %3306 = vmatprep.mubr.bf16.mxu0 %v5599_v36  ;;  %6433 = vmatprep.subr.bf16.mxu0 %v6888_v44  ;;  %v6910_v36 = vld [vmem:[%s9122_s1 + $0x710] sm:$0xff]  }
  0xed   : > { %3364 = vmatmul.mubr.bf16.gmra.mrb[88].mxu1 %v9230_v6  ;;  %v6911_v44 = vld [vmem:[%s9122_s1 + $0x790] sm:$0xff]  }
  0xee   : > { %6472 = vmatpush3.bf16.msra.mxu1 %v6887_v57  ;;  %3371 = vmatprep.mubr.bf16.mxu1 %v5601_v47  ;;  %v6912_v47 = vld [vmem:[%s9122_s1 + $0x758] sm:$0xff]  }
  0xef   : > { %6473 = vmatprep.subr.bf16.mxu1 %v6889_v17  ;;  %6434 = vmatpush3.bf16.msra.mxu0 %v6890_v22  ;;  %v6913_v22 = vld [vmem:[%s9122_s1 + $0x7d8] sm:$0xff]  }
  0xf0   : > { %6435 = vmatprep.subr.bf16.mxu0 %v6892_v14  ;;  %v9237_v14 = vld [vmem:[#allocation24_spill] sm:$0xff] }
  0xf2   : > { %6474 = vmatpush3.bf16.msra.mxu1 %v6891_v50  ;;  %3307 = vmatmul.mubr.bf16.gmra.mrb[92].mxu0 %v5598_v52 }
  0xf3   : > { %6475 = vmatprep.subr.bf16.mxu1 %v6893_v31  ;;  %6436 = vmatpush3.bf16.msra.mxu0 %v6894_v32  ;;  %v6914_v31 = vld [vmem:[%s9122_s1 + $0x718] sm:$0xff]  }
  0xf4   : > { %3691 = vmatprep.mubr.bf16.mxu0 %v9231_v40  ;;  %6437 = vmatprep.subr.bf16.mxu0 %v6896_v13  ;;  %v6915_v32 = vld [vmem:[%s9122_s1 + $0x798] sm:$0xff]   ;;  %v6916_v13 = vld [vmem:[%s9122_s1 + $0x760] sm:$0xff]   ;;  %v6922_v40 = vld [vmem:[%s9122_s1 + $0x728] sm:$0xff]  }
  0xf5   : > { %3372 = vmatmul.mubr.bf16.gmra.mrb[92].mxu1 %v5600_v25 }
  0xf6   : > { %6476 = vmatpush3.bf16.msra.mxu1 %v6895_v56  ;;  %3756 = vmatprep.mubr.bf16.mxu1 %v9232_v39 }
  0xf7   : > { %6477 = vmatprep.subr.bf16.mxu1 %v6897_v38  ;;  %6438 = vmatpush3.bf16.msra.mxu0 %v6898_v53  ;;  %v6917_v38 = vld [vmem:[%s9122_s1 + $0x7e0] sm:$0xff]  }
  0xf8   : > { %6503 = vmatprep.subr.bf16.mxu0 %v6900_v29  ;;  %v6919_v53 = vld [vmem:[%s9122_s1 + $0x7a0] sm:$0xff]  }
  0xf9   : > { %v8618_v29 = vld [vmem:[%s7174_s26 + $0x120] sm:$0xff] }
  0xfa   : > { %6478 = vmatpush3.bf16.msra.mxu1 %v6899_v18  ;;  %3692 = vmatmul.mubr.bf16.vlgmr.msra.gmra.mrb[96].mxu0 %v9233_v48  ;;  %v6921_v18 = vld [vmem:[%s9122_s1 + $0x7e8] sm:$0xff]   ;;  %v9238_v48 = vld [vmem:[#allocation25_spill] sm:$0xff] }
  0xfb   : > { %6543 = vmatprep.subr.bf16.mxu1 %v6901_v28  ;;  %6504 = vmatpush3.bf16.msra.mxu0 %v6902_v11  ;;  %v5699_v28 = vcombine.high %v8175_v41, %v8618_v29  ;;  %v8624_v11 = vld [vmem:[%s7174_s26 + $0x128] sm:$0xff] }
  0xfc   : > { %3699 = vmatprep.mubr.bf16.mxu0 %v9234_v19  ;;  %6505 = vmatprep.subr.bf16.mxu0 %v6904_v4  ;;  %v6923_v4 = vld [vmem:[%s9122_s1 + $0x7a8] sm:$0xff]  }
  0xfd   : > { %3757 = vmatmul.mubr.bf16.vlgmr.msra.gmra.mrb[96].mxu1 %v9235_v37 }
  0xfe   : > { %6544 = vmatpush3.bf16.msra.mxu1 %v6903_v10  ;;  %3764 = vmatprep.mubr.bf16.mxu1 %v9236_v63 }
  0xff   : > { %6545 = vmatprep.subr.bf16.mxu1 %v6905_v0  ;;  %6506 = vmatpush3.bf16.msra.mxu0 %v6906_v42  ;;  %v5701_v0 = vcombine.high %v8178_v9, %v8624_v11  ;;  %v7014_v9 = vld [vmem:[%s7174_s26 + $0x100] sm:$0xff] }
 0x100   : > { %6507 = vmatprep.subr.bf16.mxu0 %v6908_v8  ;;  %v6927_v8 = vld [vmem:[%s9122_s1 + $0x7b0] sm:$0xff]  }
 0x102   : > { %v5959_v26 = vpop.f32.mrb[0].mxu0  ;;  %6546 = vmatpush3.bf16.msra.mxu1 %v6907_v1  ;;  %3700 = vmatmul.mubr.bf16.gmra.mrb[100].mxu0 %v9237_v14  ;;  %v6931_v14 = vld [vmem:[%s9122_s1 + $0x7b8] sm:$0xff]  }
 0x103   : > { %v5960_v33 = vpop.f32.mrb[1].mxu0  ;;  %6547 = vmatprep.subr.bf16.mxu1 %v6909_v61  ;;  %6508 = vmatpush3.bf16.msra.mxu0 %v6910_v36  ;;  %v7015_v61 = vld [vmem:[%s7174_s26 + $0x108] sm:$0xff]  ;;  %v6928_v36 = vld [vmem:[%s9122_s1 + $0x778] sm:$0xff]  }
 0x104   : > { %v5961_v5 = vadd.f32 %v5960_v33, %v5959_v26  ;;  %v5962_v34 = vpop.f32.mrb[2].mxu0  ;;  %3707 = vmatprep.mubr.bf16.mxu0 %v7854_v24  ;;  %6509 = vmatprep.subr.bf16.mxu0 %v6912_v47  ;;  %v6925_v33 = vld [vmem:[%s9122_s1 + $0x7f0] sm:$0xff]   ;;  %v6929_v47 = vld [vmem:[%s9122_s1 + $0x7f8] sm:$0xff]  }
 0x105   : > { %v5963_v30 = vpop.f32.mrb[3].mxu0  ;;  %3765 = vmatmul.mubr.bf16.gmra.mrb[100].mxu1 %v7859_v51  ;;  %v6918_v51 = vld [vmem:[%s9122_s1 + $0x720] sm:$0xff]  }
 0x106   : > { %v5964_v57 = vadd.f32 %v5963_v30, %v5962_v34  ;;  %6548 = vmatpush3.bf16.msra.mxu1 %v6911_v44  ;;  %3772 = vmatprep.mubr.bf16.mxu1 %v7886_v21  ;;  %v6920_v21 = vld [vmem:[%s9122_s1 + $0x768] sm:$0xff]   ;;  %v6926_v34 = vld [vmem:[%s9122_s1 + $0x730] sm:$0xff]  }
 0x107   : > { %v5999_v17 = vpop.f32.mrb[0].mxu1  ;;  %6549 = vmatprep.subr.bf16.mxu1 %v6913_v22  ;;  %6510 = vmatpush3.bf16.msra.mxu0 %v6914_v31  ;;  %v3798_v22 = vshrl.u32 %v8618_v29, 16 }
 0x108   : > { %v6000_v2 = vpop.f32.mrb[1].mxu1  ;;  %6511 = vmatprep.subr.bf16.mxu0 %v6916_v13 }
 0x109   : > { %v6001_v50 = vadd.f32 %v6000_v2, %v5999_v17  ;;  %v6002_v6 = vpop.f32.mrb[2].mxu1  ;;  %v3800_v13 = vrot.slane %v3798_v22, 4  ;;  %v3815_v22 = vshll.u32 %v8624_v11, 16 }
 0x10a   : > { %v6003_v52 = vpop.f32.mrb[3].mxu1  ;;  %6550 = vmatpush3.bf16.msra.mxu1 %v6915_v32  ;;  %3708 = vmatmul.mubr.bf16.gmra.mrb[104].mxu0 %v7900_v12  ;;  %v6924_v12 = vld [vmem:[%s9122_s1 + $0x770] sm:$0xff]   ;;  %v6932_v32 = vld [vmem:[%s9122_s1 + $0x840] sm:$0xff]  }
 0x10b   : > { %v8590_v56 = vadd.f32 %v6001_v50, %v5961_v5  ;;  %v6004_v25 = vadd.f32 %v6003_v52, %v6002_v6  ;;  %6551 = vmatprep.subr.bf16.mxu1 %v6917_v38  ;;  %6512 = vmatpush3.bf16.msra.mxu0 %v6918_v51  ;;  %v5698_v5 = vcombine.low %v7014_v9, %v8618_v29  ;;  %v6930_v50 = vld [vmem:[%s9122_s1 + $0x738] sm:$0xff]   ;;  %v3801_v6 = vshll.u32 %v8618_v29, 16  ;;  %v9240_v38 = vld [vmem:[#allocation7_spill] sm:$0xff] }
 0x10c   : > { %6513 = vmatprep.subr.bf16.mxu0 %v6920_v21  ;;  %3715 = vmatprep.mubr.bf16.mxu0 %v5699_v28  ;;  %v9239_v52 = vld [vmem:[#allocation5_spill] sm:$0xff]  ;;  %v6934_v21 = vld [vmem:[%s9122_s1 + $0x800] sm:$0xff]  }
 0x10d   : > { %v8600_v24 = vadd.f32 %v6004_v25, %v5964_v57  ;;  %3773 = vmatmul.mubr.bf16.gmra.mrb[104].mxu1 %v9238_v48  ;;  %v5700_v57 = vcombine.low %v7015_v61, %v8624_v11  ;;  %v6933_v25 = vld [vmem:[%s9122_s1 + $0x8c0] sm:$0xff]   ;;  %v9242_v9 = vld [vmem:[#allocation9_spill] sm:$0xff] }
 0x10e   : > { %v5965_v39 = vpop.f32.mrb[4].mxu0  ;;  %6552 = vmatpush3.bf16.msra.mxu1 %v6919_v53  ;;  %3780 = vmatprep.mubr.bf16.mxu1 %v5701_v0  ;;  %v3803_v53 = vrot.slane %v3801_v6, 5 }
 0x10f   : > { %v6005_v10 = vpop.f32.mrb[4].mxu1  ;;  %v5966_v26 = vpop.f32.mrb[5].mxu0  ;;  %6553 = vmatprep.subr.bf16.mxu1 %v6921_v18  ;;  %6514 = vmatpush3.bf16.msra.mxu0 %v6922_v40  ;;  %v6935_v40 = vld [vmem:[%s9122_s1 + $0x880] sm:$0xff]  }
 0x110   : > { %v5967_v41 = vadd.f32 %v5966_v26, %v5965_v39  ;;  %v6006_v42 = vpop.f32.mrb[5].mxu1  ;;  %v5968_v19 = vpop.f32.mrb[6].mxu0  ;;  %6515 = vmatprep.subr.bf16.mxu0 %v6924_v12  ;;  %v6937_v26 = vld [vmem:[%s9122_s1 + $0x8c8] sm:$0xff]   ;;  %v9241_v12 = vld [vmem:[#allocation6_spill] sm:$0xff] }
 0x111   : > { %v6007_v1 = vadd.f32 %v6006_v42, %v6005_v10  ;;  %v6008_v37 = vpop.f32.mrb[6].mxu1  ;;  %v5969_v63 = vpop.f32.mrb[7].mxu0  ;;  %v6936_v10 = vld [vmem:[%s9122_s1 + $0x848] sm:$0xff]  }
 0x112   : > { %v5970_v44 = vadd.f32 %v5969_v63, %v5968_v19  ;;  %v6009_v17 = vpop.f32.mrb[7].mxu1  ;;  %6554 = vmatpush3.bf16.msra.mxu1 %v6923_v4  ;;  %3716 = vmatmul.mubr.bf16.gmra.mrb[108].mxu0 %v5698_v5  ;;  %v6938_v42 = vld [vmem:[%s9122_s1 + $0x808] sm:$0xff]   ;;  %v9243_v5 = vld [vmem:[#allocation8_spill] sm:$0xff] }
 0x113   : > { %v8646_v30 = vadd.f32 %v6007_v1, %v5967_v41  ;;  %v6010_v2 = vadd.f32 %v6009_v17, %v6008_v37  ;;  %6555 = vmatprep.subr.bf16.mxu1 %v6925_v33  ;;  %6516 = vmatpush3.bf16.msra.mxu0 %v6926_v34  ;;  %v6939_v19 = vld [vmem:[%s9122_s1 + $0x888] sm:$0xff]   ;;  %v6940_v37 = vld [vmem:[%s9122_s1 + $0x850] sm:$0xff]   ;;  %v3812_v17 = vshrl.u32 %v8624_v11, 16 }
 0x114   : > { %4126 = vmatprep.mubr.bf16.mxu0 %v9239_v52  ;;  %6517 = vmatprep.subr.bf16.mxu0 %v6928_v36  ;;  %v6941_v36 = vld [vmem:[%s9122_s1 + $0x8d0] sm:$0xff]  }
 0x115   : > { %v8664_v31 = vadd.f32 %v6010_v2, %v5970_v44  ;;  %3781 = vmatmul.mubr.bf16.gmra.mrb[108].mxu1 %v5700_v57  ;;  %v9244_v57 = vld [vmem:[#allocation11_spill] sm:$0xff]  ;;  %v6942_v44 = vld [vmem:[%s9122_s1 + $0x810] sm:$0xff]   ;;  %v3814_v52 = vrot.slane %v3812_v17, 4 }
 0x116   : > { %6556 = vmatpush3.bf16.msra.mxu1 %v6927_v8  ;;  %4191 = vmatprep.mubr.bf16.mxu1 %v9240_v38  ;;  %v3804_v8 = vor.u32 %v3803_v53, %v3800_v13  ;;  %v6943_v2 = vld [vmem:[%s9122_s1 + $0x890] sm:$0xff]   ;;  %v3817_v13 = vrot.slane %v3815_v22, 5  ;;  %v9246_v53 = vld [vmem:[#allocation13_spill] sm:$0xff] }
 0x117   : > { %6557 = vmatprep.subr.bf16.mxu1 %v6929_v47  ;;  %6518 = vmatpush3.bf16.msra.mxu0 %v6930_v50  ;;  %v6944_v50 = vld [vmem:[%s9122_s1 + $0x858] sm:$0xff]  }
 0x118   : > { %v5971_v51 = vpop.f32.mrb[8].mxu0  ;;  %6583 = vmatprep.subr.bf16.mxu0 %v6932_v32  ;;  %v8717_v6 = vrot.slane %v3804_v8, 4  ;;  %v9245_v32 = vld [vmem:[#allocation10_spill] sm:$0xff]  ;;  %v6954_v8 = vld [vmem:[%s9122_s1 + $0x828] sm:$0xff]  }
 0x119   : > { %v5972_v18 = vpop.f32.mrb[9].mxu0 }
 0x11a   : > { %v5973_v39 = vadd.f32 %v5972_v18, %v5971_v51  ;;  %v5974_v28 = vpop.f32.mrb[10].mxu0  ;;  %6558 = vmatpush3.bf16.msra.mxu1 %v6931_v14  ;;  %4127 = vmatmul.mubr.bf16.vlgmr.msra.gmra.mrb[112].mxu0 %v9241_v12  ;;  %v6945_v14 = vld [vmem:[%s9122_s1 + $0x8d8] sm:$0xff]  }
 0x11b   : > { %v5975_v4 = vpop.f32.mrb[11].mxu0  ;;  %6623 = vmatprep.subr.bf16.mxu1 %v6933_v25  ;;  %6584 = vmatpush3.bf16.msra.mxu0 %v6934_v21  ;;  %v6946_v25 = vld [vmem:[%s9122_s1 + $0x818] sm:$0xff]   ;;  %v9247_v21 = vld [vmem:[#allocation12_spill] sm:$0xff] }
 0x11c   : > { %v5976_v48 = vadd.f32 %v5975_v4, %v5974_v28  ;;  %4134 = vmatprep.mubr.bf16.mxu0 %v9242_v9  ;;  %6585 = vmatprep.subr.bf16.mxu0 %v6936_v10  ;;  %v6947_v51 = vld [vmem:[%s9122_s1 + $0x898] sm:$0xff]   ;;  %v9248_v10 = vld [vmem:[#allocation15_spill] sm:$0xff]  ;;  %v6949_v4 = vld [vmem:[%s9122_s1 + $0x8e0] sm:$0xff]  }
 0x11d   : > { %v6011_v0 = vpop.f32.mrb[8].mxu1  ;;  %4192 = vmatmul.mubr.bf16.vlgmr.msra.gmra.mrb[112].mxu1 %v9243_v5  ;;  %v6953_v5 = vld [vmem:[%s9122_s1 + $0x8e8] sm:$0xff]  }
 0x11e   : > { %v6012_v41 = vpop.f32.mrb[9].mxu1  ;;  %6624 = vmatpush3.bf16.msra.mxu1 %v6935_v40  ;;  %4199 = vmatprep.mubr.bf16.mxu1 %v9244_v57  ;;  %v6948_v40 = vld [vmem:[%s9122_s1 + $0x860] sm:$0xff]   ;;  %v8758_v57 = vld [vmem:[%s7174_s26 + $0x138] sm:$0x11] }
 0x11f   : > { %v6013_v33 = vadd.f32 %v6012_v41, %v6011_v0  ;;  %v6014_v1 = vpop.f32.mrb[10].mxu1  ;;  %6625 = vmatprep.subr.bf16.mxu1 %v6937_v26  ;;  %6586 = vmatpush3.bf16.msra.mxu0 %v6938_v42  ;;  %v6950_v26 = vld [vmem:[%s9122_s1 + $0x820] sm:$0xff]   ;;  %v3818_v42 = vor.u32 %v3817_v13, %v3814_v52 }
 0x120   : > { %v6015_v34 = vpop.f32.mrb[11].mxu1  ;;  %6587 = vmatprep.subr.bf16.mxu0 %v6940_v37  ;;  %v6951_v41 = vld [vmem:[%s9122_s1 + $0x8a0] sm:$0xff]  }
 0x121   : > { %v8698_v63 = vadd.f32 %v6013_v33, %v5973_v39  ;;  %v6016_v61 = vadd.f32 %v6015_v34, %v6014_v1  ;;  %v6952_v1 = vld [vmem:[%s9122_s1 + $0x868] sm:$0xff]   ;;  %v9249_v37 = vld [vmem:[#allocation14_spill] sm:$0xff]  ;;  %v3819_v22 = vrot.slane %v3818_v42, 4 }
 0x122   : > { %6626 = vmatpush3.bf16.msra.mxu1 %v6939_v19  ;;  %4135 = vmatmul.mubr.bf16.gmra.mrb[116].mxu0 %v9245_v32  ;;  %v3821_v32 = vshll.u32 %v8758_v57, 16 }
 0x123   : > { %v8708_v47 = vadd.f32 %v6016_v61, %v5976_v48  ;;  %6627 = vmatprep.subr.bf16.mxu1 %v6941_v36  ;;  %6588 = vmatpush3.bf16.msra.mxu0 %v6942_v44  ;;  %v8755_v61 = vld [vmem:[%s7174_s26 + $0x130] sm:$0x11]  ;;  %s9041_s26 = sshll.u32 %s9252_s25, 6 }
 0x124   : > { %4142 = vmatprep.mubr.bf16.mxu0 %v9246_v53  ;;  %6589 = vmatprep.subr.bf16.mxu0 %v6944_v50  ;;  %v6956_v50 = vld [vmem:[%s9122_s1 + $0x870] sm:$0xff]   ;;  %s9047_s29 = scalar_lea.vmem %s9126_s5, %s9041_s26  ;;  %s9071_s10 = scalar_lea.vmem %s9125_s4, %s9041_s26 }
 0x125   : > { %v5977_v38 = vpop.f32.mrb[12].mxu0  ;;  %4200 = vmatmul.mubr.bf16.gmra.mrb[116].mxu1 %v9247_v21  ;;  %v6957_v21 = vld [vmem:[%s9122_s1 + $0x8f0] sm:$0xff]   ;;  %s9080_s13 = scalar_lea.vmem %s9127_s6, %s9041_s26 }
 0x126   : > { %v5978_v18 = vpop.f32.mrb[13].mxu0  ;;  %6628 = vmatpush3.bf16.msra.mxu1 %v6943_v2  ;;  %4207 = vmatprep.mubr.bf16.mxu1 %v9248_v10  ;;  %v3807_v2 = vshll.u32 %v8755_v61, 16 }
 0x127   : > { %v5979_v39 = vadd.f32 %v5978_v18, %v5977_v38  ;;  %v5980_v28 = vpop.f32.mrb[14].mxu0  ;;  %6629 = vmatprep.subr.bf16.mxu1 %v6945_v14  ;;  %6590 = vmatpush3.bf16.msra.mxu0 %v6946_v25  ;;  %v9250_v14 = vld [vmem:[#allocation16_spill] sm:$0xff] }
 0x128   : > { %v5981_v0 = vpop.f32.mrb[15].mxu0  ;;  %v6017_v48 = vpop.f32.mrb[12].mxu1  ;;  %6591 = vmatprep.subr.bf16.mxu0 %v6948_v40  ;;  %v3809_v53 = vrot.slane %v3807_v2, 5  ;;  %v3823_v40 = vrot.slane %v3821_v32, 5  ;;  %v6963_v2 = vld [vmem:[%s9122_s1 + $0x8b8] sm:$0xff]  }
 0x129   : > { %v5982_v12 = vadd.f32 %v5981_v0, %v5980_v28  ;;  %v6018_v33 = vpop.f32.mrb[13].mxu1  ;;  %v6958_v0 = vld [vmem:[%s9122_s1 + $0x830] sm:$0xff]  }
 0x12a   : > { %v6019_v19 = vadd.f32 %v6018_v33, %v6017_v48  ;;  %v6020_v9 = vpop.f32.mrb[14].mxu1  ;;  %6630 = vmatpush3.bf16.msra.mxu1 %v6947_v51  ;;  %4143 = vmatmul.mubr.bf16.gmra.mrb[120].mxu0 %v9249_v37  ;;  %v6955_v51 = vld [vmem:[%s9122_s1 + $0x8a8] sm:$0xff]   ;;  %v6962_v37 = vld [vmem:[%s9122_s1 + $0x838] sm:$0xff]  }
 0x12b   : > { %v6021_v34 = vpop.f32.mrb[15].mxu1  ;;  %6631 = vmatprep.subr.bf16.mxu1 %v6949_v4  ;;  %6592 = vmatpush3.bf16.msra.mxu0 %v6950_v26  ;;  %v3810_v4 = vsel %vm7227_vm2, %v8717_v6, %v3809_v53 }
 0x12c   : > { %v8760_v36 = vadd.f32 %v6019_v19, %v5979_v39  ;;  %v6022_v44 = vadd.f32 %v6021_v34, %v6020_v9  ;;  %6593 = vmatprep.subr.bf16.mxu0 %v6952_v1  ;;  %v5799_v48 = vcombine.high %v8350_v7, %v3810_v4 }
 0x12d   : > { %v6039_v17 = vpop.f32.mrb[16].mxu0  ;;  %4208 = vmatmul.mubr.bf16.gmra.mrb[120].mxu1 %v9250_v14 }
 0x12e   : > { %v6040_v52 = vpop.f32.mrb[17].mxu0  ;;  %v8768_v25 = vadd.f32 %v6022_v44, %v5982_v12  ;;  %6632 = vmatpush3.bf16.msra.mxu1 %v6951_v41  ;;  %v3824_v12 = vsel %vm7227_vm2, %v3819_v22, %v3823_v40  ;;  %v5798_v41 = vcombine.low %v8350_v7, %v3810_v4  ;;  %4150 = vmatprep.mubr.bf16.mxu0 %v5799_v48  ;;  %v6961_v7 = vld [vmem:[%s9122_s1 + $0x8f8] sm:$0xff]  }
 0x12f   : > { %v6041_v13 = vadd.f32 %v6040_v52, %v6039_v17  ;;  %v6042_v38 = vpop.f32.mrb[18].mxu0  ;;  %6633 = vmatprep.subr.bf16.mxu1 %v6953_v5  ;;  %6594 = vmatpush3.bf16.msra.mxu0 %v6954_v8  ;;  %v5801_v1 = vcombine.high %v8354_v54, %v3824_v12  ;;  %v5800_v19 = vcombine.low %v8354_v54, %v3824_v12 }
 0x130   : > { %v6043_v18 = vpop.f32.mrb[19].mxu0  ;;  %v6079_v39 = vpop.f32.mrb[16].mxu1  ;;  %6595 = vmatprep.subr.bf16.mxu0 %v6956_v50 }
 0x131   : > { %v1418_v28 = vadd.f32 %v6041_v13, %v8590_v56  ;;  %v6044_v10 = vadd.f32 %v6043_v18, %v6042_v38  ;;  %v6080_v26 = vpop.f32.mrb[17].mxu1  ;;  %v6959_v56 = vld [vmem:[%s9122_s1 + $0x8b0] sm:$0xff]   ;;  %4215 = vmatprep.mubr.bf16.mxu1 %v5801_v1 }
 0x132   : > { %v6081_v42 = vadd.f32 %v6080_v26, %v6079_v39  ;;  %v6082_v33 = vpop.f32.mrb[18].mxu1  ;;  %6634 = vmatpush3.bf16.msra.mxu1 %v6955_v51  ;;  %4151 = vmatmul.mubr.bf16.gmra.mrb[124].mxu0 %v5798_v41  ;;  %v5835_v41 = vrot.slane %v8624_v11, 9 }
 0x133   : > { %v1421_v6 = vadd.f32 %v6044_v10, %v8600_v24  ;;  %v6083_v9 = vpop.f32.mrb[19].mxu1  ;;  %6635 = vmatprep.subr.bf16.mxu1 %v6957_v21  ;;  %6596 = vmatpush3.bf16.msra.mxu0 %v6958_v0 }
 0x134   : > { %v8799_v5 = vadd.f32 %v6081_v42, %v1418_v28  ;;  %v6084_v34 = vadd.f32 %v6083_v9, %v6082_v33  ;;  %6597 = vmatprep.subr.bf16.mxu0 %v6960_v62  ;;  %4543 = vmatprep.mubr.bf16.mxu0 %v7623_v46 }
 0x135   : > { %v6045_v24 = vpop.f32.mrb[20].mxu0  ;;  %4216 = vmatmul.mubr.bf16.gmra.mrb[124].mxu1 %v5800_v19 }
 0x136   : > { %v6046_v54 = vpop.f32.mrb[21].mxu0  ;;  %v8804_v8 = vadd.f32 %v6084_v34, %v1421_v6  ;;  %6636 = vmatpush3.bf16.msra.mxu1 %v6959_v56  ;;  %4608 = vmatprep.mubr.bf16.mxu1 %v7691_v16  ;;  %v4240_v56 = vrot.slane %v8758_v57, 5 }
 0x137   : > { %v6047_v44 = vadd.f32 %v6046_v54, %v6045_v24  ;;  %v6048_v17 = vpop.f32.mrb[22].mxu0  ;;  %6637 = vmatprep.subr.bf16.mxu1 %v6961_v7  ;;  %6598 = vmatpush3.bf16.msra.mxu0 %v6962_v37 }
 0x138   : > { %v6049_v22 = vpop.f32.mrb[23].mxu0  ;;  %v6085_v50 = vpop.f32.mrb[20].mxu1  ;;  %v4241_v6 = vsel %vm7323_vm5, %v5835_v41, %v4240_v56 }
 0x139   : > { %v1426_v14 = vadd.f32 %v6047_v44, %v8646_v30  ;;  %v6050_v52 = vadd.f32 %v6049_v22, %v6048_v17  ;;  %v6086_v32 = vpop.f32.mrb[21].mxu1 }
 0x13a   : > { %v6087_v13 = vadd.f32 %v6086_v32, %v6085_v50  ;;  %v6088_v38 = vpop.f32.mrb[22].mxu1  ;;  %6638 = vmatpush3.bf16.msra.mxu1 %v6963_v2  ;;  %4544 = vmatmul.mubr.bf16.vlgmr.msra.gmra.mrb[128].mxu0 %v7630_v23 }
 0x13b   : > { %v1429_v51 = vadd.f32 %v6050_v52, %v8664_v31  ;;  %v6089_v53 = vpop.f32.mrb[23].mxu1  ;;  %4551 = vmatprep.mubr.bf16.mxu0 %v7728_v45  ;;  %v4236_v45 = vrot.slane %v8755_v61, 5  ;;  %v5902_v52 = vcombine.low %v8479_v15, %v4241_v6 }
 0x13c   : > { %v8813_v21 = vadd.f32 %v6087_v13, %v1426_v14  ;;  %v6090_v18 = vadd.f32 %v6089_v53, %v6088_v38 }
 0x13d   : > { %v6051_v46 = vpop.f32.mrb[24].mxu0  ;;  %4609 = vmatmul.mubr.bf16.vlgmr.msra.gmra.mrb[128].mxu1 %v7695_v35  ;;  %v5834_v35 = vrot.slane %v8618_v29, 9 }
 0x13e   : > { %v6052_v30 = vpop.f32.mrb[25].mxu0  ;;  %v8818_v16 = vadd.f32 %v6090_v18, %v1429_v51  ;;  %4616 = vmatprep.mubr.bf16.mxu1 %v7776_v58 }
 0x13f   : > { %v6053_v40 = vadd.f32 %v6052_v30, %v6051_v46  ;;  %v6054_v39 = vpop.f32.mrb[26].mxu0  ;;  %v4237_v11 = vsel %vm7323_vm5, %v5834_v35, %v4236_v45 }
 0x140   : > { %v6055_v28 = vpop.f32.mrb[27].mxu0  ;;  %v6091_v31 = vpop.f32.mrb[24].mxu1  ;;  %v5900_v50 = vcombine.low %v8466_v55, %v4237_v11 }
 0x141   : > { %v1434_v10 = vadd.f32 %v6053_v40, %v8698_v63  ;;  %v6056_v4 = vadd.f32 %v6055_v28, %v6054_v39  ;;  %v6092_v0 = vpop.f32.mrb[25].mxu1 }
 0x142   : > { %v6093_v26 = vadd.f32 %v6092_v0, %v6091_v31  ;;  %v6094_v23 = vpop.f32.mrb[26].mxu1  ;;  %4552 = vmatmul.mubr.bf16.gmra.mrb[132].mxu0 %v7733_v59 }
 0x143   : > { %v1437_v48 = vadd.f32 %v6056_v4, %v8708_v47  ;;  %v6095_v12 = vpop.f32.mrb[27].mxu1  ;;  %4559 = vmatprep.mubr.bf16.mxu0 %v8018_v3  ;;  %v5901_v3 = vcombine.high %v8466_v55, %v4237_v11 }
 0x144   : > { %v8827_v58 = vadd.f32 %v6093_v26, %v1434_v10  ;;  %v6096_v42 = vadd.f32 %v6095_v12, %v6094_v23 }
 0x145   : > { %v6057_v63 = vpop.f32.mrb[28].mxu0  ;;  %4617 = vmatmul.mubr.bf16.gmra.mrb[132].mxu1 %v7780_v49 }
 0x146   : > { %v6058_v33 = vpop.f32.mrb[29].mxu0  ;;  %v8832_v47 = vadd.f32 %v6096_v42, %v1437_v48  ;;  %4624 = vmatprep.mubr.bf16.mxu1 %v8036_v43  ;;  %v5903_v43 = vcombine.high %v8479_v15, %v4241_v6 }
 0x147   : > { %v6059_v29 = vadd.f32 %v6058_v33, %v6057_v63  ;;  %v6060_v61 = vpop.f32.mrb[30].mxu0 }
 0x148   : > { %v6061_v57 = vpop.f32.mrb[31].mxu0  ;;  %v6097_v59 = vpop.f32.mrb[28].mxu1 }
 0x149   : > { %v1442_v1 = vadd.f32 %v6059_v29, %v8760_v36  ;;  %v6062_v49 = vadd.f32 %v6061_v57, %v6060_v61  ;;  %v6098_v19 = vpop.f32.mrb[29].mxu1 }
 0x14a   : > { %v6099_v62 = vadd.f32 %v6098_v19, %v6097_v59  ;;  %v6100_v9 = vpop.f32.mrb[30].mxu1  ;;  %4560 = vmatmul.mubr.bf16.gmra.mrb[136].mxu0 %v8048_v27 }
 0x14b   : > { %v1445_v7 = vadd.f32 %v6062_v49, %v8768_v25  ;;  %v6101_v34 = vpop.f32.mrb[31].mxu1  ;;  %4567 = vmatprep.mubr.bf16.mxu0 %v5901_v3 }
 0x14c   : > { %v8843_v24 = vadd.f32 %v6099_v62, %v1442_v1  ;;  %v6102_v54 = vadd.f32 %v6101_v34, %v6100_v9 }
 0x14d   : > { %v6119_v20 = vpop.f32.mrb[32].mxu0  ;;  %4625 = vmatmul.mubr.bf16.gmra.mrb[136].mxu1 %v8063_v60 }
 0x14e   : > { %v6120_v36 = vpop.f32.mrb[33].mxu0  ;;  %v8847_v37 = vadd.f32 %v6102_v54, %v1445_v7  ;;  %4632 = vmatprep.mubr.bf16.mxu1 %v5903_v43 }
 0x14f   : > { %v6121_v44 = vadd.f32 %v6120_v36, %v6119_v20  ;;  %v6122_v17 = vpop.f32.mrb[34].mxu0 }
 0x150   : > { %v6123_v2 = vpop.f32.mrb[35].mxu0  ;;  %v6159_v25 = vpop.f32.mrb[32].mxu1 }
 0x151   : > { %v6124_v22 = vadd.f32 %v6123_v2, %v6122_v17  ;;  %v6160_v14 = vpop.f32.mrb[33].mxu1 }
 0x152   : > { %v6161_v32 = vadd.f32 %v6160_v14, %v6159_v25  ;;  %v6162_v27 = vpop.f32.mrb[34].mxu1  ;;  %4568 = vmatmul.mubr.bf16.gmra.mrb[140].mxu0 %v5900_v50 }
 0x153   : > { %v6163_v13 = vpop.f32.mrb[35].mxu1 }
 0x154   : > { %v2017_v38 = vadd.f32 %v6161_v32, %v6121_v44  ;;  %v6164_v60 = vadd.f32 %v6163_v13, %v6162_v27 }
 0x155   : > { %v6125_v51 = vpop.f32.mrb[36].mxu0  ;;  %4633 = vmatmul.mubr.bf16.gmra.mrb[140].mxu1 %v5902_v52 }
 0x156   : > { %v6126_v53 = vpop.f32.mrb[37].mxu0  ;;  %v8852_v18 = vadd.f32 %v2017_v38, %v8799_v5  ;;  %v2020_v46 = vadd.f32 %v6164_v60, %v6124_v22 }
 0x157   : > { %v6127_v30 = vadd.f32 %v6126_v53, %v6125_v51  ;;  %v6128_v40 = vpop.f32.mrb[38].mxu0 }
 0x158   : > { %v6129_v39 = vpop.f32.mrb[39].mxu0  ;;  %v8855_v55 = vadd.f32 %v2020_v46, %v8804_v8  ;;  %v6165_v15 = vpop.f32.mrb[36].mxu1 }
 0x159   : > { %v6130_v28 = vadd.f32 %v6129_v39, %v6128_v40  ;;  %v6166_v31 = vpop.f32.mrb[37].mxu1 }
 0x15a   : > { %v6167_v10 = vadd.f32 %v6166_v31, %v6165_v15  ;;  %v6168_v4 = vpop.f32.mrb[38].mxu1 }
 0x15b   : > { %v6169_v0 = vpop.f32.mrb[39].mxu1 }
 0x15c   : > { %v2025_v26 = vadd.f32 %v6167_v10, %v6127_v30  ;;  %v6170_v23 = vadd.f32 %v6169_v0, %v6168_v4 }
 0x15d   : > { %v6131_v48 = vpop.f32.mrb[40].mxu0 }
 0x15e   : > { %v6132_v35 = vpop.f32.mrb[41].mxu0  ;;  %v8858_v5 = vadd.f32 %v2025_v26, %v8813_v21  ;;  %v2028_v45 = vadd.f32 %v6170_v23, %v6130_v28 }
 0x15f   : > { %v6133_v12 = vadd.f32 %v6132_v35, %v6131_v48  ;;  %v6134_v41 = vpop.f32.mrb[42].mxu0 }
 0x160   : > { %v6135_v56 = vpop.f32.mrb[43].mxu0  ;;  %v8861_v8 = vadd.f32 %v2028_v45, %v8818_v16  ;;  %v6171_v42 = vpop.f32.mrb[40].mxu1 }
 0x161   : > { %v6136_v63 = vadd.f32 %v6135_v56, %v6134_v41  ;;  %v6172_v33 = vpop.f32.mrb[41].mxu1 }
 0x162   : > { %v6173_v29 = vadd.f32 %v6172_v33, %v6171_v42  ;;  %v6174_v61 = vpop.f32.mrb[42].mxu1 }
 0x163   : > { %v6175_v11 = vpop.f32.mrb[43].mxu1 }
 0x164   : > { %v2033_v57 = vadd.f32 %v6173_v29, %v6133_v12  ;;  %v6176_v6 = vadd.f32 %v6175_v11, %v6174_v61 }
 0x165   : > { %v6137_v59 = vpop.f32.mrb[44].mxu0 }
 0x166   : > { %v6138_v1 = vpop.f32.mrb[45].mxu0  ;;  %v8864_v21 = vadd.f32 %v2033_v57, %v8827_v58  ;;  %v2036_v49 = vadd.f32 %v6176_v6, %v6136_v63 }
 0x167   : > { %v6139_v19 = vadd.f32 %v6138_v1, %v6137_v59  ;;  %v6140_v3 = vpop.f32.mrb[46].mxu0 }
 0x168   : > { %v6141_v62 = vpop.f32.mrb[47].mxu0  ;;  %v8867_v16 = vadd.f32 %v2036_v49, %v8832_v47  ;;  %v6177_v9 = vpop.f32.mrb[44].mxu1 }
 0x169   : > { %v6142_v7 = vadd.f32 %v6141_v62, %v6140_v3  ;;  %v6178_v43 = vpop.f32.mrb[45].mxu1 }
 0x16a   : > { %v6179_v34 = vadd.f32 %v6178_v43, %v6177_v9  ;;  %v6180_v54 = vpop.f32.mrb[46].mxu1 }
 0x16b   : > { %v6181_v20 = vpop.f32.mrb[47].mxu1 }
 0x16c   : > { %v2041_v36 = vadd.f32 %v6179_v34, %v6139_v19  ;;  %v6182_v44 = vadd.f32 %v6181_v20, %v6180_v54 }
 0x16d   : > { %v6199_v17 = vpop.f32.mrb[48].mxu0 }
 0x16e   : > { %v6200_v2 = vpop.f32.mrb[49].mxu0  ;;  %v8870_v58 = vadd.f32 %v2041_v36, %v8843_v24  ;;  %v2044_v25 = vadd.f32 %v6182_v44, %v6142_v7 }
 0x16f   : > { %v6201_v22 = vadd.f32 %v6200_v2, %v6199_v17  ;;  %v6202_v50 = vpop.f32.mrb[50].mxu0 }
 0x170   : > { %v6203_v14 = vpop.f32.mrb[51].mxu0  ;;  %v8873_v47 = vadd.f32 %v2044_v25, %v8847_v37  ;;  %v6239_v52 = vpop.f32.mrb[48].mxu1 }
 0x171   : > { %v6204_v32 = vadd.f32 %v6203_v14, %v6202_v50  ;;  %v6240_v27 = vpop.f32.mrb[49].mxu1 }
 0x172   : > { %v6241_v13 = vadd.f32 %v6240_v27, %v6239_v52  ;;  %v6242_v38 = vpop.f32.mrb[50].mxu1 }
 0x173   : > { %v6243_v60 = vpop.f32.mrb[51].mxu1 }
 0x174   : > { %v2450_v51 = vadd.f32 %v6241_v13, %v6201_v22  ;;  %v6244_v53 = vadd.f32 %v6243_v60, %v6242_v38 }
 0x175   : > { %v6205_v46 = vpop.f32.mrb[52].mxu0 }
 0x176   : > { %v6206_v30 = vpop.f32.mrb[53].mxu0  ;;  %v8876_v24 = vadd.f32 %v2450_v51, %v8852_v18  ;;  %v2453_v40 = vadd.f32 %v6244_v53, %v6204_v32 }
 0x177   : > { %v6207_v39 = vadd.f32 %v6206_v30, %v6205_v46  ;;  %v6208_v15 = vpop.f32.mrb[54].mxu0 }
 0x178   : > { %v6209_v28 = vpop.f32.mrb[55].mxu0  ;;  %v8879_v37 = vadd.f32 %v2453_v40, %v8855_v55  ;;  %v6245_v31 = vpop.f32.mrb[52].mxu1 }
 0x179   : > { %v6210_v10 = vadd.f32 %v6209_v28, %v6208_v15  ;;  %v6246_v4 = vpop.f32.mrb[53].mxu1 }
 0x17a   : > { %v6247_v0 = vadd.f32 %v6246_v4, %v6245_v31  ;;  %v6248_v26 = vpop.f32.mrb[54].mxu1 }
 0x17b   : > { %v6249_v23 = vpop.f32.mrb[55].mxu1 }
 0x17c   : > { %v2458_v48 = vadd.f32 %v6247_v0, %v6207_v39  ;;  %v6250_v35 = vadd.f32 %v6249_v23, %v6248_v26 }
 0x17d   : > { %v6211_v45 = vpop.f32.mrb[56].mxu0 }
 0x17e   : > { %v6212_v12 = vpop.f32.mrb[57].mxu0  ;;  %v8882_v18 = vadd.f32 %v2458_v48, %v8858_v5  ;;  %v2461_v41 = vadd.f32 %v6250_v35, %v6210_v10 }
 0x17f   : > { %v6213_v56 = vadd.f32 %v6212_v12, %v6211_v45  ;;  %v6214_v42 = vpop.f32.mrb[58].mxu0 }
 0x180   : > { %v6215_v63 = vpop.f32.mrb[59].mxu0  ;;  %v8885_v55 = vadd.f32 %v2461_v41, %v8861_v8  ;;  %v6251_v33 = vpop.f32.mrb[56].mxu1 }
 0x181   : > { %v6216_v29 = vadd.f32 %v6215_v63, %v6214_v42  ;;  %v6252_v61 = vpop.f32.mrb[57].mxu1 }
 0x182   : > { %v6253_v11 = vadd.f32 %v6252_v61, %v6251_v33  ;;  %v6254_v57 = vpop.f32.mrb[58].mxu1 }
 0x183   : > { %v6255_v6 = vpop.f32.mrb[59].mxu1 }
 0x184   : > { %v2466_v59 = vadd.f32 %v6253_v11, %v6213_v56  ;;  %v6256_v1 = vadd.f32 %v6255_v6, %v6254_v57 }
 0x185   : > { %v6217_v49 = vpop.f32.mrb[60].mxu0 }
 0x186   : > { %v6218_v19 = vpop.f32.mrb[61].mxu0  ;;  %v2484_v5 = vadd.f32 %v2466_v59, %v8864_v21  ;;  %v2469_v3 = vadd.f32 %v6256_v1, %v6216_v29 }
 0x187   : > { %v6219_v62 = vadd.f32 %v6218_v19, %v6217_v49  ;;  %v6220_v9 = vpop.f32.mrb[62].mxu0 }
 0x188   : > { %v6221_v7 = vpop.f32.mrb[63].mxu0  ;;  %v2485_v43 = vadd.f32 %v2469_v3, %v8867_v16  ;;  %v6257_v8 = vpop.f32.mrb[60].mxu1 }
 0x189   : > { %v6222_v34 = vadd.f32 %v6221_v7, %v6220_v9  ;;  %v6258_v54 = vpop.f32.mrb[61].mxu1 }
 0x18a   : > { %v6259_v20 = vadd.f32 %v6258_v54, %v6257_v8  ;;  %v6260_v36 = vpop.f32.mrb[62].mxu1 }
 0x18b   : > { %v6261_v44 = vpop.f32.mrb[63].mxu1 }
 0x18c   : > { %v2474_v17 = vadd.f32 %v6259_v20, %v6219_v62  ;;  %v6262_v2 = vadd.f32 %v6261_v44, %v6260_v36 }
 0x18d   : > { %v6279_v25 = vpop.f32.mrb[64].mxu0 }
 0x18e   : > { %v6280_v22 = vpop.f32.mrb[65].mxu0  ;;  %v2486_v50 = vadd.f32 %v2474_v17, %v8870_v58  ;;  %v2477_v14 = vadd.f32 %v6262_v2, %v6222_v34 }
 0x18f   : > { %v6281_v21 = vadd.f32 %v6280_v22, %v6279_v25  ;;  %v6282_v52 = vpop.f32.mrb[66].mxu0 }
 0x190   : > { %v6283_v32 = vpop.f32.mrb[67].mxu0  ;;  %v2487_v27 = vadd.f32 %v2477_v14, %v8873_v47  ;;  %v6319_v13 = vpop.f32.mrb[64].mxu1 }
 0x191   : > { %v6284_v16 = vadd.f32 %v6283_v32, %v6282_v52  ;;  %v6320_v38 = vpop.f32.mrb[65].mxu1 }
 0x192   : > { %v6321_v60 = vadd.f32 %v6320_v38, %v6319_v13  ;;  %v6322_v51 = vpop.f32.mrb[66].mxu1 }
 0x193   : > { %v6323_v53 = vpop.f32.mrb[67].mxu1 }
 0x194   : > { %v2909_v46 = vadd.f32 %v6321_v60, %v6281_v21  ;;  %v6324_v30 = vadd.f32 %v6323_v53, %v6322_v51 }
 0x195   : > { %v6285_v40 = vpop.f32.mrb[68].mxu0 }
 0x196   : > { %v6286_v39 = vpop.f32.mrb[69].mxu0  ;;  %v2939_v15 = vadd.f32 %v2909_v46, %v8876_v24  ;;  %v2912_v28 = vadd.f32 %v6324_v30, %v6284_v16 }
 0x197   : > { %v6287_v58 = vadd.f32 %v6286_v39, %v6285_v40  ;;  %v6288_v31 = vpop.f32.mrb[70].mxu0 }
 0x198   : > { %v6289_v10 = vpop.f32.mrb[71].mxu0  ;;  %v2940_v4 = vadd.f32 %v2912_v28, %v8879_v37  ;;  %v6325_v0 = vpop.f32.mrb[68].mxu1 }
 0x199   : > { %v6290_v47 = vadd.f32 %v6289_v10, %v6288_v31  ;;  %v6326_v26 = vpop.f32.mrb[69].mxu1 }
 0x19a   : > { %v6327_v23 = vadd.f32 %v6326_v26, %v6325_v0  ;;  %v6328_v48 = vpop.f32.mrb[70].mxu1 }
 0x19b   : > { %v6329_v35 = vpop.f32.mrb[71].mxu1 }
 0x19c   : > { %v2917_v45 = vadd.f32 %v6327_v23, %v6287_v58  ;;  %v6330_v12 = vadd.f32 %v6329_v35, %v6328_v48 }
 0x19d   : > { %v6291_v41 = vpop.f32.mrb[72].mxu0 }
 0x19e   : > { %v6292_v56 = vpop.f32.mrb[73].mxu0  ;;  %v2941_v42 = vadd.f32 %v2917_v45, %v8882_v18  ;;  %v2920_v63 = vadd.f32 %v6330_v12, %v6290_v47 }
 0x19f   : > { %v6293_v24 = vadd.f32 %v6292_v56, %v6291_v41  ;;  %v6294_v33 = vpop.f32.mrb[74].mxu0 }
 0x1a0   : > { %v6295_v29 = vpop.f32.mrb[75].mxu0  ;;  %v2942_v61 = vadd.f32 %v2920_v63, %v8885_v55  ;;  %v6331_v11 = vpop.f32.mrb[72].mxu1 }
 0x1a1   : > { %v6296_v37 = vadd.f32 %v6295_v29, %v6294_v33  ;;  %v6332_v57 = vpop.f32.mrb[73].mxu1 }
 0x1a2   : > { %v6333_v6 = vadd.f32 %v6332_v57, %v6331_v11  ;;  %v6334_v59 = vpop.f32.mrb[74].mxu1 }
 0x1a3   : > { %v6335_v1 = vpop.f32.mrb[75].mxu1 }
 0x1a4   : > { %v2925_v49 = vadd.f32 %v6333_v6, %v6293_v24  ;;  %v6336_v19 = vadd.f32 %v6335_v1, %v6334_v59 }
 0x1a5   : > { %v6297_v9 = vpop.f32.mrb[76].mxu0 }
 0x1a6   : > { %v8895_v3 = vadd.f32 %v2925_v49, %v2484_v5  ;;  %v2928_v62 = vadd.f32 %v6336_v19, %v6296_v37  ;;  %v6298_v7 = vpop.f32.mrb[77].mxu0 }
 0x1a7   : > { %v6299_v34 = vadd.f32 %v6298_v7, %v6297_v9  ;;  %v6300_v54 = vpop.f32.mrb[78].mxu0 }
 0x1a8   : > { %v8897_v18 = vadd.f32 %v2928_v62, %v2485_v43  ;;  %v6337_v8 = vpop.f32.mrb[76].mxu1  ;;  %v6301_v55 = vpop.f32.mrb[79].mxu0 }
 0x1a9   : > { %v6338_v20 = vpop.f32.mrb[77].mxu1  ;;  %v6302_v17 = vadd.f32 %v6301_v55, %v6300_v54 }
 0x1aa   : > { %v6339_v36 = vadd.f32 %v6338_v20, %v6337_v8  ;;  %v6340_v44 = vpop.f32.mrb[78].mxu1 }
 0x1ab   : > { %v6341_v2 = vpop.f32.mrb[79].mxu1 }
 0x1ac   : > { %v2933_v25 = vadd.f32 %v6339_v36, %v6299_v34  ;;  %v6342_v22 = vadd.f32 %v6341_v2, %v6340_v44 }
 0x1ad   : > { %v6359_v21 = vpop.f32.mrb[80].mxu0 }
 0x1ae   : > { %v8899_v14 = vadd.f32 %v2933_v25, %v2486_v50  ;;  %v2936_v5 = vadd.f32 %v6342_v22, %v6302_v17  ;;  %v6360_v52 = vpop.f32.mrb[81].mxu0 }
 0x1af   : > { %v6361_v13 = vadd.f32 %v6360_v52, %v6359_v21  ;;  %v6362_v16 = vpop.f32.mrb[82].mxu0 }
 0x1b0   : > { %v8901_v32 = vadd.f32 %v2936_v5, %v2487_v27  ;;  %v6399_v43 = vpop.f32.mrb[80].mxu1  ;;  %v6363_v60 = vpop.f32.mrb[83].mxu0 }
 0x1b1   : > { %v6400_v38 = vpop.f32.mrb[81].mxu1  ;;  %v6364_v46 = vadd.f32 %v6363_v60, %v6362_v16 }
 0x1b2   : > { %v6401_v51 = vadd.f32 %v6400_v38, %v6399_v43  ;;  %v6402_v53 = vpop.f32.mrb[82].mxu1 }
 0x1b3   : > { %v6403_v30 = vpop.f32.mrb[83].mxu1 }
 0x1b4   : > { %v3350_v40 = vadd.f32 %v6401_v51, %v6361_v13  ;;  %v6404_v39 = vadd.f32 %v6403_v30, %v6402_v53 }
 0x1b5   : > { %v6365_v58 = vpop.f32.mrb[84].mxu0 }
 0x1b6   : > { %v8903_v28 = vadd.f32 %v3350_v40, %v2939_v15  ;;  %v3353_v50 = vadd.f32 %v6404_v39, %v6364_v46  ;;  %v6366_v31 = vpop.f32.mrb[85].mxu0 }
 0x1b7   : > { %v6367_v0 = vadd.f32 %v6366_v31, %v6365_v58  ;;  %v6368_v47 = vpop.f32.mrb[86].mxu0 }
 0x1b8   : > { %v8905_v10 = vadd.f32 %v3353_v50, %v2940_v4  ;;  %v6405_v27 = vpop.f32.mrb[84].mxu1  ;;  %v6369_v23 = vpop.f32.mrb[87].mxu0 }
 0x1b9   : > { %v6406_v26 = vpop.f32.mrb[85].mxu1  ;;  %v6370_v45 = vadd.f32 %v6369_v23, %v6368_v47 }
 0x1ba   : > { %v6407_v48 = vadd.f32 %v6406_v26, %v6405_v27  ;;  %v6408_v35 = vpop.f32.mrb[86].mxu1 }
 0x1bb   : > { %v6409_v12 = vpop.f32.mrb[87].mxu1 }
 0x1bc   : > { %v3358_v41 = vadd.f32 %v6407_v48, %v6367_v0  ;;  %v6410_v56 = vadd.f32 %v6409_v12, %v6408_v35 }
 0x1bd   : > { %v6371_v24 = vpop.f32.mrb[88].mxu0 }
 0x1be   : > { %v8907_v63 = vadd.f32 %v3358_v41, %v2941_v42  ;;  %v3361_v15 = vadd.f32 %v6410_v56, %v6370_v45  ;;  %v6372_v33 = vpop.f32.mrb[89].mxu0 }
 0x1bf   : > { %v6373_v11 = vadd.f32 %v6372_v33, %v6371_v24  ;;  %v6374_v37 = vpop.f32.mrb[90].mxu0 }
 0x1c0   : > { %v8909_v29 = vadd.f32 %v3361_v15, %v2942_v61  ;;  %v6411_v4 = vpop.f32.mrb[88].mxu1  ;;  %v6375_v6 = vpop.f32.mrb[91].mxu0 }
 0x1c1   : > { %v6412_v57 = vpop.f32.mrb[89].mxu1  ;;  %v6376_v49 = vadd.f32 %v6375_v6, %v6374_v37 }
 0x1c2   : > { %v6413_v59 = vadd.f32 %v6412_v57, %v6411_v4  ;;  %v6414_v1 = vpop.f32.mrb[90].mxu1 }
 0x1c3   : > { %v6415_v19 = vpop.f32.mrb[91].mxu1 }
 0x1c4   : > { %v3366_v62 = vadd.f32 %v6413_v59, %v6373_v11  ;;  %v6416_v9 = vadd.f32 %v6415_v19, %v6414_v1 }
 0x1c5   : > { %v6377_v8 = vpop.f32.mrb[92].mxu0 }
 0x1c6   : > { %v8912_v7 = vadd.f32 %v3366_v62, %v8895_v3  ;;  %v3369_v42 = vadd.f32 %v6416_v9, %v6376_v49  ;;  %v6378_v34 = vpop.f32.mrb[93].mxu0 }
 0x1c7   : > { %v6379_v20 = vadd.f32 %v6378_v34, %v6377_v8  ;;  %v6380_v55 = vpop.f32.mrb[94].mxu0 }
 0x1c8   : > { %v8915_v61 = vadd.f32 %v3369_v42, %v8897_v18  ;;  %v6417_v54 = vpop.f32.mrb[92].mxu1  ;;  %v6381_v44 = vpop.f32.mrb[95].mxu0 }
 0x1c9   : > { %v6418_v36 = vpop.f32.mrb[93].mxu1  ;;  %v6382_v25 = vadd.f32 %v6381_v44, %v6380_v55 }
 0x1ca   : > { %v6419_v17 = vadd.f32 %v6418_v36, %v6417_v54  ;;  %v6420_v2 = vpop.f32.mrb[94].mxu1 }
 0x1cb   : > { %v6421_v22 = vpop.f32.mrb[95].mxu1 }
 0x1cc   : > { %v3374_v5 = vadd.f32 %v6419_v17, %v6379_v20  ;;  %v6422_v21 = vadd.f32 %v6421_v22, %v6420_v2 }
 0x1cd   : > { %v6439_v43 = vpop.f32.mrb[96].mxu0 }
 0x1ce   : > { %v8918_v3 = vadd.f32 %v3374_v5, %v8899_v14  ;;  %v3377_v52 = vadd.f32 %v6422_v21, %v6382_v25  ;;  %v6440_v13 = vpop.f32.mrb[97].mxu0 }
 0x1cf   : > { %v6441_v38 = vadd.f32 %v6440_v13, %v6439_v43  ;;  %v6442_v60 = vpop.f32.mrb[98].mxu0 }
 0x1d0   : > { %v8921_v18 = vadd.f32 %v3377_v52, %v8901_v32  ;;  %v6479_v16 = vpop.f32.mrb[96].mxu1  ;;  %v6443_v53 = vpop.f32.mrb[99].mxu0 }
 0x1d1   : > { %v6480_v51 = vpop.f32.mrb[97].mxu1  ;;  %v6444_v40 = vadd.f32 %v6443_v53, %v6442_v60 }
 0x1d2   : > { %v6481_v46 = vadd.f32 %v6480_v51, %v6479_v16  ;;  %v6482_v30 = vpop.f32.mrb[98].mxu1 }
 0x1d3   : > { %v6483_v39 = vpop.f32.mrb[99].mxu1 }
 0x1d4   : > { %v3759_v50 = vadd.f32 %v6481_v46, %v6441_v38  ;;  %v6484_v58 = vadd.f32 %v6483_v39, %v6482_v30 }
 0x1d5   : > { %v6445_v27 = vpop.f32.mrb[100].mxu0 }
 0x1d6   : > { %v8924_v14 = vadd.f32 %v3759_v50, %v8903_v28  ;;  %v3762_v31 = vadd.f32 %v6484_v58, %v6444_v40  ;;  %v6446_v0 = vpop.f32.mrb[101].mxu0 }
 0x1d7   : > { %v6447_v26 = vadd.f32 %v6446_v0, %v6445_v27  ;;  %v6448_v23 = vpop.f32.mrb[102].mxu0 }
 0x1d8   : > { %v8927_v32 = vadd.f32 %v3762_v31, %v8905_v10  ;;  %v6485_v47 = vpop.f32.mrb[100].mxu1  ;;  %v6449_v35 = vpop.f32.mrb[103].mxu0 }
 0x1d9   : > { %v6486_v48 = vpop.f32.mrb[101].mxu1  ;;  %v6450_v41 = vadd.f32 %v6449_v35, %v6448_v23 }
 0x1da   : > { %v6487_v45 = vadd.f32 %v6486_v48, %v6485_v47  ;;  %v6488_v12 = vpop.f32.mrb[102].mxu1 }
 0x1db   : > { %v6489_v56 = vpop.f32.mrb[103].mxu1 }
 0x1dc   : > { %v3767_v15 = vadd.f32 %v6487_v45, %v6447_v26  ;;  %v6490_v24 = vadd.f32 %v6489_v56, %v6488_v12 }
 0x1dd   : > { %v6451_v4 = vpop.f32.mrb[104].mxu0 }
 0x1de   : > { %v8930_v28 = vadd.f32 %v3767_v15, %v8907_v63  ;;  %v3770_v33 = vadd.f32 %v6490_v24, %v6450_v41  ;;  %v6452_v11 = vpop.f32.mrb[105].mxu0 }
 0x1df   : > { %v6453_v57 = vadd.f32 %v6452_v11, %v6451_v4  ;;  %v6454_v6 = vpop.f32.mrb[106].mxu0 }
 0x1e0   : > { %v8933_v10 = vadd.f32 %v3770_v33, %v8909_v29  ;;  %v6491_v37 = vpop.f32.mrb[104].mxu1  ;;  %v6455_v1 = vpop.f32.mrb[107].mxu0 }
 0x1e1   : > { %v6492_v59 = vpop.f32.mrb[105].mxu1  ;;  %v6456_v62 = vadd.f32 %v6455_v1, %v6454_v6 }
 0x1e2   : > { %v6493_v49 = vadd.f32 %v6492_v59, %v6491_v37  ;;  %v6494_v19 = vpop.f32.mrb[106].mxu1 }
 0x1e3   : > { %v6495_v9 = vpop.f32.mrb[107].mxu1 }
 0x1e4   : > { %v3775_v42 = vadd.f32 %v6493_v49, %v6453_v57  ;;  %v6496_v8 = vadd.f32 %v6495_v9, %v6494_v19 }
 0x1e5   : > { %v6457_v54 = vpop.f32.mrb[108].mxu0 }
 0x1e6   : > { %v8936_v63 = vadd.f32 %v3775_v42, %v8912_v7  ;;  %v3778_v34 = vadd.f32 %v6496_v8, %v6456_v62  ;;  %v6458_v20 = vpop.f32.mrb[109].mxu0 }
 0x1e7   : > { %v6459_v36 = vadd.f32 %v6458_v20, %v6457_v54  ;;  %v6460_v44 = vpop.f32.mrb[110].mxu0 }
 0x1e8   : > { %v8939_v29 = vadd.f32 %v3778_v34, %v8915_v61  ;;  %v6497_v55 = vpop.f32.mrb[108].mxu1  ;;  %v6461_v2 = vpop.f32.mrb[111].mxu0 }
 0x1e9   : > { %v6498_v17 = vpop.f32.mrb[109].mxu1  ;;  %v6462_v5 = vadd.f32 %v6461_v2, %v6460_v44 }
 0x1ea   : > { %v6499_v25 = vadd.f32 %v6498_v17, %v6497_v55  ;;  %v6500_v22 = vpop.f32.mrb[110].mxu1 }
 0x1eb   : > { %v6501_v21 = vpop.f32.mrb[111].mxu1 }
 0x1ec   : > { %v3783_v52 = vadd.f32 %v6499_v25, %v6459_v36  ;;  %v6502_v43 = vadd.f32 %v6501_v21, %v6500_v22 }
 0x1ed   : > { %v6519_v16 = vpop.f32.mrb[112].mxu0 }
 0x1ee   : > { %v8942_v7 = vadd.f32 %v3783_v52, %v8918_v3  ;;  %v3786_v13 = vadd.f32 %v6502_v43, %v6462_v5  ;;  %v6520_v38 = vpop.f32.mrb[113].mxu0 }
 0x1ef   : > { %v6521_v51 = vadd.f32 %v6520_v38, %v6519_v16  ;;  %v6522_v53 = vpop.f32.mrb[114].mxu0 }
 0x1f0   : > { %v8945_v61 = vadd.f32 %v3786_v13, %v8921_v18  ;;  %v6559_v60 = vpop.f32.mrb[112].mxu1  ;;  %v6523_v30 = vpop.f32.mrb[115].mxu0 }
 0x1f1   : > { %v6560_v46 = vpop.f32.mrb[113].mxu1  ;;  %v6524_v50 = vadd.f32 %v6523_v30, %v6522_v53 }
 0x1f2   : > { %v6561_v40 = vadd.f32 %v6560_v46, %v6559_v60  ;;  %v6562_v39 = vpop.f32.mrb[114].mxu1 }
 0x1f3   : > { %v6563_v58 = vpop.f32.mrb[115].mxu1 }
 0x1f4   : > { %v4194_v31 = vadd.f32 %v6561_v40, %v6521_v51  ;;  %v6564_v27 = vadd.f32 %v6563_v58, %v6562_v39 }
 0x1f5   : > { %v6525_v47 = vpop.f32.mrb[116].mxu0 }
 0x1f6   : > { %v8948_v3 = vadd.f32 %v4194_v31, %v8924_v14  ;;  %v4197_v0 = vadd.f32 %v6564_v27, %v6524_v50  ;;  %v6526_v26 = vpop.f32.mrb[117].mxu0 }
 0x1f7   : > { %v6527_v48 = vadd.f32 %v6526_v26, %v6525_v47  ;;  %v6528_v35 = vpop.f32.mrb[118].mxu0 }
 0x1f8   : > { %v8951_v18 = vadd.f32 %v4197_v0, %v8927_v32  ;;  %v6565_v23 = vpop.f32.mrb[116].mxu1  ;;  %v6529_v12 = vpop.f32.mrb[119].mxu0 }
 0x1f9   : > { %v6566_v45 = vpop.f32.mrb[117].mxu1  ;;  %v6530_v15 = vadd.f32 %v6529_v12, %v6528_v35 }
 0x1fa   : > { %v6567_v41 = vadd.f32 %v6566_v45, %v6565_v23  ;;  %v6568_v56 = vpop.f32.mrb[118].mxu1  ;;  %v8980_v23 = vld [vmem:[%s9124_s3] ss:$0 sm:$0xff] }
 0x1fb   : > { %v6569_v24 = vpop.f32.mrb[119].mxu1 }
 0x1fc   : > { %v4202_v33 = vadd.f32 %v6567_v41, %v6527_v48  ;;  %v6570_v4 = vadd.f32 %v6569_v24, %v6568_v56 }
 0x1fd   : > { %v6531_v37 = vpop.f32.mrb[120].mxu0 }
 0x1fe   : > { %v8954_v14 = vadd.f32 %v4202_v33, %v8930_v28  ;;  %v4205_v11 = vadd.f32 %v6570_v4, %v6530_v15  ;;  %v6532_v57 = vpop.f32.mrb[121].mxu0 }
 0x1ff   : > { %v6533_v59 = vadd.f32 %v6532_v57, %v6531_v37  ;;  %v6534_v1 = vpop.f32.mrb[122].mxu0 }
 0x200   : > { %v8957_v32 = vadd.f32 %v4205_v11, %v8933_v10  ;;  %v6571_v6 = vpop.f32.mrb[120].mxu1  ;;  %v6535_v19 = vpop.f32.mrb[123].mxu0 }
 0x201   : > { %v6572_v49 = vpop.f32.mrb[121].mxu1  ;;  %v6536_v42 = vadd.f32 %v6535_v19, %v6534_v1 }
 0x202   : > { %v6573_v62 = vadd.f32 %v6572_v49, %v6571_v6  ;;  %v6574_v9 = vpop.f32.mrb[122].mxu1 }
 0x203   : > { %v6575_v8 = vpop.f32.mrb[123].mxu1 }
 0x204   : > { %v4210_v34 = vadd.f32 %v6573_v62, %v6533_v59  ;;  %v6576_v54 = vadd.f32 %v6575_v8, %v6574_v9 }
 0x205   : > { %v6537_v55 = vpop.f32.mrb[124].mxu0 }
 0x206   : > { %v8960_v28 = vadd.f32 %v4210_v34, %v8936_v63  ;;  %v4213_v20 = vadd.f32 %v6576_v54, %v6536_v42  ;;  %v6538_v44 = vpop.f32.mrb[125].mxu0 }
 0x207   : > { %v6539_v17 = vadd.f32 %v6538_v44, %v6537_v55  ;;  %v6540_v25 = vpop.f32.mrb[126].mxu0 }
 0x208   : > { %v8963_v36 = vadd.f32 %v4213_v20, %v8939_v29  ;;  %v6577_v10 = vpop.f32.mrb[124].mxu1  ;;  %v6541_v21 = vpop.f32.mrb[127].mxu0 }
 0x209   : > { %v6578_v2 = vpop.f32.mrb[125].mxu1  ;;  %v6542_v52 = vadd.f32 %v6541_v21, %v6540_v25 }
 0x20a   : > { %v6579_v22 = vadd.f32 %v6578_v2, %v6577_v10  ;;  %v6580_v5 = vpop.f32.mrb[126].mxu1 }
 0x20b   : > { %v6581_v43 = vpop.f32.mrb[127].mxu1 }
 0x20c   : > { %v4218_v13 = vadd.f32 %v6579_v22, %v6539_v17  ;;  %v6582_v16 = vadd.f32 %v6581_v43, %v6580_v5 }
 0x20d   : > { %v6599_v60 = vpop.f32.mrb[128].mxu0 }
 0x20e   : > { %v8966_v63 = vadd.f32 %v4218_v13, %v8942_v7  ;;  %v4221_v38 = vadd.f32 %v6582_v16, %v6542_v52  ;;  %v6600_v53 = vpop.f32.mrb[129].mxu0  ;;  %v8974_v7 = vld [vmem:[%s9123_s2] ss:$0 sm:$0xff] }
 0x20f   : > { %v6601_v46 = vadd.f32 %v6600_v53, %v6599_v60  ;;  %v6602_v40 = vpop.f32.mrb[130].mxu0 }
 0x210   : > { %v8969_v29 = vadd.f32 %v4221_v38, %v8945_v61  ;;  %v6639_v51 = vpop.f32.mrb[128].mxu1  ;;  %v6603_v58 = vpop.f32.mrb[131].mxu0 }
 0x211   : > { %v6640_v30 = vpop.f32.mrb[129].mxu1  ;;  %v6604_v31 = vadd.f32 %v6603_v58, %v6602_v40 }
 0x212   : > { %v6641_v39 = vadd.f32 %v6640_v30, %v6639_v51  ;;  %v6642_v50 = vpop.f32.mrb[130].mxu1 }
 0x213   : > { %v6643_v27 = vpop.f32.mrb[131].mxu1 }
 0x214   : > { %v4611_v0 = vadd.f32 %v6641_v39, %v6601_v46  ;;  %v6644_v47 = vadd.f32 %v6643_v27, %v6642_v50 }
 0x215   : > { %v6605_v48 = vpop.f32.mrb[132].mxu0 }
 0x216   : > { %v4641_v61 = vadd.f32 %v4611_v0, %v8948_v3  ;;  %v4614_v26 = vadd.f32 %v6644_v47, %v6604_v31  ;;  %v6606_v41 = vpop.f32.mrb[133].mxu0 }
 0x217   : > { %v6607_v56 = vadd.f32 %v6606_v41, %v6605_v48  ;;  %v6608_v24 = vpop.f32.mrb[134].mxu0 }
 0x218   : > { %v4656_v35 = vadd.f32 %v8974_v7, %v4641_v61  ;;  %v4642_v45 = vadd.f32 %v4614_v26, %v8951_v18  ;;  %v6645_v12 = vpop.f32.mrb[132].mxu1  ;;  %v6609_v11 = vpop.f32.mrb[135].mxu0 }
 0x219   : > { %v6646_v15 = vpop.f32.mrb[133].mxu1  ;;  %v6610_v57 = vadd.f32 %v6609_v11, %v6608_v24 }
 0x21a   : > { %v8985_v33 = vmul.f32 %v8980_v23, %v4656_v35  ;;  %v6647_v3 = vadd.f32 %v6646_v15, %v6645_v12  ;;  %v6648_v4 = vpop.f32.mrb[134].mxu1  ;;  %v4657_v37 = vadd.f32 %v8974_v7, %v4642_v45 }
 0x21b   : > { %v6649_v6 = vpop.f32.mrb[135].mxu1 }
 0x21c   : > { %v4679_v59 = vadd.f32 2.0, %v8985_v33  ;;  %v4619_v1 = vadd.f32 %v6647_v3, %v6607_v56  ;;  %v6650_v49 = vadd.f32 %v6649_v6, %v6648_v4  ;;  %v4672_v18 = vmul.f32 %v8980_v23, %v4657_v37 }
 0x21d   : > { %v6611_v8 = vpop.f32.mrb[136].mxu0 }
 0x21e   : > { %v4687_v19 = vsub.f32 0.0, %v4679_v59  ;;  %v4643_v62 = vadd.f32 %v4619_v1, %v8954_v14  ;;  %v4622_v9 = vadd.f32 %v6650_v49, %v6610_v57  ;;  %4753 = vrot.lane.b32.xlu1 %v4672_v18, %s7024_s23  ;;  %v4680_v42 = vadd.f32 2.0, %v4672_v18  ;;  %v6612_v10 = vpop.f32.mrb[137].mxu0 }
 0x21f   : > { %v6613_v17 = vadd.f32 %v6612_v10, %v6611_v8  ;;  %v6614_v25 = vpop.f32.mrb[138].mxu0 }
 0x220   : > { %v4695_v34 = vmul.f32 1.442695, %v4687_v19  ;;  %v4644_v54 = vadd.f32 %v4622_v9, %v8957_v32  ;;  %v4688_v20 = vsub.f32 0.0, %v4680_v42  ;;  %v6651_v55 = vpop.f32.mrb[136].mxu1  ;;  %v4658_v44 = vadd.f32 %v8974_v7, %v4643_v62  ;;  %v6615_v21 = vpop.f32.mrb[139].mxu0 }
 0x221   : > { %v6652_v2 = vpop.f32.mrb[137].mxu1  ;;  %v6616_v43 = vadd.f32 %v6615_v21, %v6614_v25 }
 0x222   : > { %6964 = vpow2.f32 %v4695_v34  ;;  %v4697_v22 = vmul.f32 1.442695, %v4688_v20  ;;  %v6653_v14 = vadd.f32 %v6652_v2, %v6651_v55  ;;  %v6654_v5 = vpop.f32.mrb[138].mxu1  ;;  %v4673_v52 = vmul.f32 %v8980_v23, %v4658_v44 }
 0x223   : > { %v6655_v13 = vpop.f32.mrb[139].mxu1  ;;  %v4659_v16 = vadd.f32 %v8974_v7, %v4644_v54 }
 0x224   : > { %6966 = vpow2.f32 %v4697_v22  ;;  %v4627_v32 = vadd.f32 %v6653_v14, %v6613_v17  ;;  %v6656_v38 = vadd.f32 %v6655_v13, %v6654_v5  ;;  %v4681_v60 = vadd.f32 2.0, %v4673_v52  ;;  %4755 = vrot.lane.b32.xlu1 %v4673_v52, %s7024_s23 }
 0x225   : > { %v4674_v51 = vmul.f32 %v8980_v23, %v4659_v16  ;;  %v6617_v40 = vpop.f32.mrb[140].mxu0 }
 0x226   : > { %v4645_v53 = vadd.f32 %v4627_v32, %v8960_v28  ;;  %v4630_v46 = vadd.f32 %v6656_v38, %v6616_v43  ;;  %v4689_v30 = vsub.f32 0.0, %v4681_v60  ;;  %v6618_v27 = vpop.f32.mrb[141].mxu0 }
 0x227   : > { %v4682_v39 = vadd.f32 2.0, %v4674_v51  ;;  %v6619_v61 = vadd.f32 %v6618_v27, %v6617_v40  ;;  %v6620_v48 = vpop.f32.mrb[142].mxu0 }
 0x228   : > { %v4646_v50 = vadd.f32 %v4630_v46, %v8963_v36  ;;  %v4699_v58 = vmul.f32 1.442695, %v4689_v30  ;;  %v6657_v31 = vpop.f32.mrb[140].mxu1  ;;  %4757 = vrot.lane.b32.xlu1 %v4674_v51, %s7024_s23  ;;  %v4660_v0 = vadd.f32 %v8974_v7, %v4645_v53  ;;  %v6621_v45 = vpop.f32.mrb[143].mxu0 }
 0x229   : > { %v4690_v47 = vsub.f32 0.0, %v4682_v39  ;;  %v6658_v26 = vpop.f32.mrb[141].mxu1  ;;  %v6622_v56 = vadd.f32 %v6621_v45, %v6620_v48 }
 0x22a   : > { %6968 = vpow2.f32 %v4699_v58  ;;  %v6659_v35 = vadd.f32 %v6658_v26, %v6657_v31  ;;  %v6660_v28 = vpop.f32.mrb[142].mxu1  ;;  %v4675_v12 = vmul.f32 %v8980_v23, %v4660_v0  ;;  %v4661_v41 = vadd.f32 %v8974_v7, %v4646_v50 }
 0x22b   : > { %v4701_v36 = vmul.f32 1.442695, %v4690_v47  ;;  %v6661_v15 = vpop.f32.mrb[143].mxu1 }
 0x22c   : > { %v6965_v24 = vpop.eup %6964  ;;  %v4635_v3 = vadd.f32 %v6659_v35, %v6619_v61  ;;  %v6662_v4 = vadd.f32 %v6661_v15, %v6660_v28  ;;  %v4683_v11 = vadd.f32 2.0, %v4675_v12  ;;  %4759 = vrot.lane.b32.xlu1 %v4675_v12, %s7024_s23  ;;  %v4676_v37 = vmul.f32 %v8980_v23, %v4661_v41 }
 0x22d   : > { %6970 = vpow2.f32 %v4701_v36  ;;  %v4711_v18 = vadd.f32 1.0, %v6965_v24 }
 0x22e   : > { %v6967_v57 = vpop.eup %6966  ;;  %v4647_v6 = vadd.f32 %v4635_v3, %v8966_v63  ;;  %v4638_v59 = vadd.f32 %v6662_v4, %v6622_v56  ;;  %v4691_v1 = vsub.f32 0.0, %v4683_v11  ;;  %v4684_v49 = vadd.f32 2.0, %v4676_v37 }
 0x22f   : > { %v4712_v19 = vadd.f32 1.0, %v6967_v57 }
 0x230   : > { %v4648_v62 = vadd.f32 %v4638_v59, %v8969_v29  ;;  %v4703_v9 = vmul.f32 1.442695, %v4691_v1  ;;  %v4692_v42 = vsub.f32 0.0, %v4684_v49  ;;  %4761 = vrot.lane.b32.xlu1 %v4676_v37, %s7024_s23  ;;  %v4662_v8 = vadd.f32 %v8974_v7, %v4647_v6 }
 0x231   : > { %6972 = vrcp.f32 %v4712_v19 }
 0x232   : > { %6974 = vpow2.f32 %v4703_v9  ;;  %v4705_v34 = vmul.f32 1.442695, %v4692_v42  ;;  %v4677_v54 = vmul.f32 %v8980_v23, %v4662_v8  ;;  %v4663_v63 = vadd.f32 %v8974_v7, %v4648_v62  ;;  %v4736_v42 = vld [vmem:[%s9047_s29 + $0x8] sm:$0xff] }
 0x233   : > { %6976 = vrcp.f32 %v4711_v18 }
 0x234   : > { %v6969_v20 = vpop.eup %6968  ;;  %6978 = vpow2.f32 %v4705_v34  ;;  %v4685_v55 = vadd.f32 2.0, %v4677_v54  ;;  %4763 = vrot.lane.b32.xlu1 %v4677_v54, %s7024_s23  ;;  %v4678_v29 = vmul.f32 %v8980_v23, %v4663_v63  ;;  %v4738_v63 = vld [vmem:[%s9047_s29 + $0x18] sm:$0xff] }
 0x235   : > { %v4713_v10 = vadd.f32 1.0, %v6969_v20 }
 0x236   : > { %v4693_v44 = vsub.f32 0.0, %v4685_v55  ;;  %v4686_v17 = vadd.f32 2.0, %v4678_v29 }
 0x237   : > { %v6971_v2 = vpop.eup %6970  ;;  %6980 = vrcp.f32 %v4713_v10 }
 0x238   : > { %v4714_v25 = vadd.f32 1.0, %v6971_v2  ;;  %v4707_v22 = vmul.f32 1.442695, %v4693_v44  ;;  %v4694_v14 = vsub.f32 0.0, %v4686_v17  ;;  %4765 = vrot.lane.b32.xlu1 %v4678_v29, %s7024_s23  ;;  %v4740_v44 = vld [vmem:[%s9047_s29 + $0x28] sm:$0xff] }
 0x23a   : > { %6982 = vrcp.f32 %v4714_v25  ;;  %v4709_v7 = vmul.f32 1.442695, %v4694_v14  ;;  %v4742_v14 = vld [vmem:[%s9047_s29 + $0x38] sm:$0xff] }
 0x23b   : > { %v9015_v5 = vpop.eup %6972  ;;  %6984 = vpow2.f32 %v4707_v22 }
 0x23c   : > { %v6975_v21 = vpop.eup %6974  ;;  %6986 = vpow2.f32 %v4709_v7 }
 0x23d   : > { %v9017_v52 = vpop.eup %6976  ;;  %v4715_v23 = vadd.f32 1.0, %v6975_v21  ;;  %6988 = vlog2.f32 %v9015_v5 }
 0x23e   : > { %v6979_v43 = vpop.eup %6978 }
 0x23f   : > { %6990 = vrcp.f32 %v4715_v23  ;;  %v4716_v13 = vadd.f32 1.0, %v6979_v43 }
 0x240   : > { %6992 = vlog2.f32 %v9017_v52 }
 0x241   : > { %v9021_v16 = vpop.eup %6980  ;;  %6994 = vrcp.f32 %v4716_v13  ;;  %v4735_v13 = vld [vmem:[%s9047_s29] sm:$0xff] }
 0x242   : > { %6996 = vlog2.f32 %v9021_v16 }
 0x244   : > { %v6983_v32 = vpop.eup %6982 }
 0x245   : > { %v6985_v38 = vpop.eup %6984  ;;  %6998 = vlog2.f32 %v6983_v32 }
 0x246   : > { %v6987_v60 = vpop.eup %6986  ;;  %v4717_v51 = vadd.f32 1.0, %v6985_v38  ;;  %v4737_v38 = vld [vmem:[%s9047_s29 + $0x10] sm:$0xff] }
 0x247   : > { %v4718_v53 = vadd.f32 1.0, %v6987_v60  ;;  %v6989_v46 = vpop.eup %6988 }
 0x248   : > { %7000 = vrcp.f32 %v4717_v51  ;;  %v4852_v58 = vmul.f32 0.6931472, %v6989_v46 }
 0x249   : > { %v9024_v30 = vpop.eup %6990  ;;  %7002 = vrcp.f32 %v4718_v53 }
 0x24a   : > { %v6993_v40 = vpop.eup %6992  ;;  %7004 = vlog2.f32 %v9024_v30  ;;  %v4866_v47 = vsel %vm4831_vm6, %v4852_v58, 0.0 }
 0x24b   : > { %v6995_v39 = vpop.eup %6994  ;;  %v4850_v31 = vmul.f32 0.6931472, %v6993_v40 }
 0x24c   : > { %v6997_v50 = vpop.eup %6996  ;;  %7006 = vlog2.f32 %v6995_v39 }
 0x24d   : > { %v4854_v27 = vmul.f32 0.6931472, %v6997_v50  ;;  %v4865_v48 = vsel %vm4831_vm6, %v4850_v31, 0.0  ;;  %v4739_v50 = vld [vmem:[%s9047_s29 + $0x20] sm:$0xff] }
 0x24e   : > { %v4867_v45 = vadd.f32 %v4866_v47, %v4865_v48  ;;  %v4741_v47 = vld [vmem:[%s9047_s29 + $0x30] sm:$0xff] }
 0x24f   : > { %v6999_v0 = vpop.eup %6998  ;;  %v4868_v35 = vsel %vm4831_vm6, %v4854_v27, 0.0 }
 0x250   : > { %v4856_v26 = vmul.f32 0.6931472, %v6999_v0  ;;  %v4869_v36 = vadd.f32 %v4868_v35, %v4867_v45 }
 0x252   : > { %v9028_v61 = vpop.eup %7000  ;;  %v4870_v15 = vsel %vm4831_vm6, %v4856_v26, 0.0 }
 0x253   : > { %v7003_v28 = vpop.eup %7002  ;;  %7008 = vlog2.f32 %v9028_v61  ;;  %v4871_v4 = vadd.f32 %v4870_v15, %v4869_v36 }
 0x254   : > { %v7005_v12 = vpop.eup %7004  ;;  %7010 = vlog2.f32 %v7003_v28 }
 0x255   : > { %v4858_v41 = vmul.f32 0.6931472, %v7005_v12  ;;  %v4796_v12 = vld [vmem:[%s9071_s10 + $0x28] sm:$0xff] }
 0x256   : > { %v7007_v56 = vpop.eup %7006 }
 0x257   : > { %v4860_v24 = vmul.f32 0.6931472, %v7007_v56  ;;  %v4872_v3 = vsel %vm4831_vm6, %v4858_v41, 0.0  ;;  %v4798_v56 = vld [vmem:[%s9071_s10 + $0x38] sm:$0xff] }
 0x258   : > { %v4873_v11 = vadd.f32 %v4872_v3, %v4871_v4  ;;  %v4791_v4 = vld [vmem:[%s9071_s10] sm:$0xff] }
 0x259   : > { %v4874_v37 = vsel %vm4831_vm6, %v4860_v24, 0.0 }
 0x25a   : > { %v4875_v49 = vadd.f32 %v4874_v37, %v4873_v11 }
 0x25d   : > { %v7009_v57 = vpop.eup %7008 }
 0x25e   : > { %v7011_v6 = vpop.eup %7010  ;;  %v4862_v59 = vmul.f32 0.6931472, %v7009_v57  ;;  %v4793_v57 = vld [vmem:[%s9071_s10 + $0x10] sm:$0xff] }
 0x25f   : > { %v4864_v1 = vmul.f32 0.6931472, %v7011_v6 }
 0x260   : > { %v4876_v18 = vsel %vm4831_vm6, %v4862_v59, 0.0 }
 0x261   : > { %v4877_v19 = vadd.f32 %v4876_v18, %v4875_v49  ;;  %v4878_v62 = vsel %vm4831_vm6, %v4864_v1, 0.0  ;;  %v4795_v1 = vld [vmem:[%s9071_s10 + $0x20] sm:$0xff] }
 0x263   : > { %v4879_v9 = vadd.f32 %v4878_v62, %v4877_v19  ;;  %v4797_v19 = vld [vmem:[%s9071_s10 + $0x30] sm:$0xff] }
 0x265   : > { %4880 = vadd.xlane.f32.xlu0 %v4879_v9 }
 0x27b   : > { %4751 = vrot.lane.b32.xlu0 %v8985_v33, %s7024_s23 }
 0x290   : > { %v4754_v8 = vpop.permute.xlu1 %4753 }
 0x291   : > { %v4776_v34 = vadd.f32 %v4754_v8, %v4736_v42 }
 0x293   : > { %v4784_v54 = vmul.f32 %v9015_v5, %v4776_v34 }
 0x295   : > { %4809 = vrot.lane.b32.xlu1 %v4784_v54, %s7025_s30 }
 0x296   : > { %v4756_v33 = vpop.permute.xlu1 %4755 }
 0x297   : > { %v4777_v46 = vadd.f32 %v4756_v33, %v4737_v38 }
 0x299   : > { %v4785_v31 = vmul.f32 %v9021_v16, %v4777_v46  ;;  %v4792_v16 = vld [vmem:[%s9071_s10 + $0x8] sm:$0xff] }
 0x29a   : > { %v4758_v20 = vpop.permute.xlu1 %4757 }
 0x29b   : > { %v4778_v55 = vadd.f32 %v4758_v20, %v4738_v63 }
 0x29d   : > { %v4786_v29 = vmul.f32 %v6983_v32, %v4778_v55 }
 0x29e   : > { %v4760_v10 = vpop.permute.xlu1 %4759 }
 0x29f   : > { %4813 = vrot.lane.b32.xlu1 %v4786_v29, %s7025_s30  ;;  %v4779_v27 = vadd.f32 %v4760_v10, %v4739_v50 }
 0x2a1   : > { %v4787_v26 = vmul.f32 %v9024_v30, %v4779_v27 }
 0x2a2   : > { %v4762_v17 = vpop.permute.xlu1 %4761 }
 0x2a3   : > { %v4780_v2 = vadd.f32 %v4762_v17, %v4740_v44 }
 0x2a5   : > { %v4788_v25 = vmul.f32 %v6995_v39, %v4780_v2 }
 0x2a6   : > { %v4764_v22 = vpop.permute.xlu1 %4763 }
 0x2a7   : > { %4817 = vrot.lane.b32.xlu1 %v4788_v25, %s7025_s30  ;;  %v4781_v48 = vadd.f32 %v4764_v22, %v4741_v47 }
 0x2aa   : > { %v4766_v7 = vpop.permute.xlu1 %4765 }
 0x2ab   : > { %v4782_v5 = vadd.f32 %v4766_v7, %v4742_v14 }
 0x2ad   : > { %v4790_v21 = vmul.f32 %v7003_v28, %v4782_v5 }
 0x2af   : > { %4821 = vrot.lane.b32.xlu1 %v4790_v21, %s7025_s30 }
 0x2f2   : > { %v4881_v23 = vpop.xlane.xlu0 %4880 }
 0x2f3   : > { %v4882_v43 = vrot.slane %v4881_v23, 4 }
 0x2f5   : > { %v4883_v32 = vadd.f32 %v4882_v43, %v4881_v23 }
 0x2f6   : > { %v4752_v60 = vpop.permute.xlu0 %4751 }
 0x2f7   : > { %v4884_v51 = vrot.slane %v4883_v32, 2  ;;  %v4775_v53 = vadd.f32 %v4752_v60, %v4735_v13 }
 0x2f9   : > { %v4783_v40 = vmul.f32 %v9017_v52, %v4775_v53  ;;  %v4885_v39 = vadd.f32 %v4884_v51, %v4883_v32  ;;  %v4789_v52 = vmul.f32 %v9028_v61, %v4781_v48  ;;  %v4794_v61 = vld [vmem:[%s9071_s10 + $0x18] sm:$0xff] }
 0x2fb   : > { %4807 = vrot.lane.b32.xlu0 %v4783_v40, %s7025_s30  ;;  %v4886_v58 = vrot.slane %v4885_v39, 1 }
 0x2fd   : > { %v4887_v0 = vadd.f32 %v4886_v58, %v4885_v39 }
 0x2ff   : > { %6664 = vpush %v4887_v0  ;;  %4811 = vrot.lane.b32.xlu0 %v4785_v31, %s7025_s30 }
 0x303   : > { %4815 = vrot.lane.b32.xlu0 %v4787_v26, %s7025_s30 }
 0x307   : > { %4819 = vrot.lane.b32.xlu0 %v4789_v52, %s7025_s30  ;;  %v4810_v30 = vpop.permute.xlu1 %4809 }
 0x308   : > { %v4833_v35 = vsel %vm4831_vm6, %v4792_v16, %v4810_v30 }
 0x309   : > { %4842 = vst.msk [vmem:[%s9080_s13 + $0x8] sm:$0xff] %vm4840_vm7, %v4833_v35 }
 0x311   : > { %v4814_v28 = vpop.permute.xlu1 %4813 }
 0x312   : > { %v4835_v45 = vsel %vm4831_vm6, %v4794_v61, %v4814_v28 }
 0x313   : > { %4844 = vst.msk [vmem:[%s9080_s13 + $0x18] sm:$0xff] %vm4840_vm7, %v4835_v45 }
 0x319   : > { %v4818_v41 = vpop.permute.xlu1 %4817 }
 0x31a   : > { %v4837_v36 = vsel %vm4831_vm6, %v4796_v12, %v4818_v41 }
 0x31b   : > { %4846 = vst.msk [vmem:[%s9080_s13 + $0x28] sm:$0xff] %vm4840_vm7, %v4837_v36 }
 0x321   : > { %v4822_v15 = vpop.permute.xlu1 %4821 }
 0x322   : > { %v4839_v24 = vsel %vm4831_vm6, %v4798_v56, %v4822_v15 }
 0x323   : > { %4848 = vst.msk [vmem:[%s9080_s13 + $0x38] sm:$0xff] %vm4840_vm7, %v4839_v24 }
 0x330   : > { %s6665_s17 = spop %6664 }
 0x331   : > { %v4889_v3 = vstv %s6665_s17 }
 0x332   : > { %4891 = vst.msk [vmem:[%s327_s16] sm:$0x1] %vm4890_vm8, %v4889_v3 }
 0x36d   : > { %v4808_v11 = vpop.permute.xlu0 %4807 }
 0x36e   : > { %v4832_v37 = vsel %vm4831_vm6, %v4791_v4, %v4808_v11 }
 0x36f   : > { %4841 = vst.msk [vmem:[%s9080_s13] sm:$0xff] %vm4840_vm7, %v4832_v37 }
 0x371   : > { %v4812_v6 = vpop.permute.xlu0 %4811 }
 0x372   : > { %v4834_v59 = vsel %vm4831_vm6, %v4793_v57, %v4812_v6 }
 0x373   : > { %4843 = vst.msk [vmem:[%s9080_s13 + $0x10] sm:$0xff] %vm4840_vm7, %v4834_v59 }
 0x375   : > { %v4816_v49 = vpop.permute.xlu0 %4815 }
 0x376   : > { %v4836_v18 = vsel %vm4831_vm6, %v4795_v1, %v4816_v49 }
 0x377   : > { %4845 = vst.msk [vmem:[%s9080_s13 + $0x20] sm:$0xff] %vm4840_vm7, %v4836_v18 }
 0x379   : > { %v4820_v62 = vpop.permute.xlu0 %4819 }
 0x37a   : > { %v4838_v9 = vsel %vm4831_vm6, %v4797_v19, %v4820_v62 }
 0x37b   : > { %4847 = vst.msk [vmem:[%s9080_s13 + $0x30] sm:$0xff] %vm4840_vm7, %v4838_v9 }
 0x37c PF: > { %s18_s24 = sadd.s32 1, %s7022_s24  }
 0x37d   : > { %p15_p4 = scmp.ge.s32.totalorder %s18_s24, 4  }
 0x37f   :  { %17 = sbr.rel (!%p15_p4) target bundleno = 1 (0x1), region = 100 }

</bundles_post_ra>
